<compile_context>
chip_gen: v5e
topology: v5e:2x2
jax: 0.10.0
libtpu: 0.0.40
codegen_flags: <defaults>
</compile_context>

<pallas_src>
import functools

import jax
import jax.numpy as jnp
from jax import lax
from jax.experimental import pallas as pl
from jax.experimental.pallas import tpu as pltpu

EPS = 1e-6
MXU_IN_DTYPE = jnp.bfloat16   # MXU-native on v5e/v6e/v7x; accumulation is always f32.


def _mm(a, b, dims):
    """dot_general with bf16 MXU inputs and f32 accumulation."""
    return lax.dot_general(a.astype(MXU_IN_DTYPE), b.astype(MXU_IN_DTYPE),
                           (dims, ((), ())), preferred_element_type=jnp.float32)


def _hamburger_kernel(x_ref, w_in_ref, b_in_ref, w_out_ref, b_out_ref,
                      bases_ref, o_ref, *, S, R, steps, inv_t, ns_iters):
    f32 = jnp.float32
    x = x_ref[0].astype(f32)                                     # (C, N) original input
    C, N = x.shape
    D = C // S

    # ---- ham_in: 1x1 conv (conv + bias, no norm/act) then ReLU ----------------------
    enjoy = jnp.maximum(
        _mm(w_in_ref[...], x, ((1,), (0,))) + b_in_ref[...].astype(f32), 0.0)  # (C, N) f32
    enjoy_bf = enjoy.astype(MXU_IN_DTYPE)                        # hoisted cast, reused per step

    eye = (lax.broadcasted_iota(jnp.int32, (R, R), 0)
           == lax.broadcasted_iota(jnp.int32, (R, R), 1)).astype(f32)          # (R, R)

    def _trace(m):                                               # (R, R) -> (1, 1)
        return jnp.sum(jnp.sum(m * eye, axis=1, keepdims=True), axis=0, keepdims=True)

    def nuclear_norm(coef_t):
        # ||coef||_* = trace(sqrt(coef_t coef_t^T)); RxR Gram + Newton-Schulz sqrt, all f32.
        gram = lax.dot_general(coef_t, coef_t, (((1,), (1,)), ((), ())),
                               preferred_element_type=f32)       # (R, R) PSD
        fro = jnp.sqrt(jnp.sum(jnp.sum(gram * gram, axis=1, keepdims=True),
                               axis=0, keepdims=True)) + 1e-30   # (1, 1) Frobenius norm
        y = gram / fro                                           # eigvals in [0, 1]
        z = eye
        for _ in range(ns_iters):                                # fully unrolled tiny chain
            t = 1.5 * eye - 0.5 * jnp.dot(z, y, preferred_element_type=f32)
            y = jnp.dot(y, t, preferred_element_type=f32)
            z = jnp.dot(t, z, preferred_element_type=f32)
        return jnp.sqrt(fro) * _trace(y)                         # (1, 1)

    def rr_times_rn(m_rr, v_rn):
        # (R,R) @ (R,N) as R rank-1 VPU accumulations (K=R is too small for the MXU).
        out = m_rr[:, 0:1] * v_rn[0:1, :]
        for k in range(1, R):
            out = out + m_rr[:, k:k + 1] * v_rn[k:k + 1, :]
        return out

    def dr_times_rr(m_dr, v_rr):
        # (D,R) @ (R,R) on the VPU.
        out = m_dr[:, 0:1] * v_rr[0:1, :]
        for k in range(1, R):
            out = out + m_dr[:, k:k + 1] * v_rr[k:k + 1, :]
        return out

    w_out = w_out_ref[...].astype(f32)                           # (C, C)
    y_acc = None                                                 # fused ham_out accumulator

    for s in range(S):
        xs_bf = enjoy_bf[s * D:(s + 1) * D, :]                   # (D, N) bf16, loop-invariant
        bases = bases_ref[0, s].astype(f32)                      # (D, R) f32

        def coef_step(bases, coef_t):
            # torch: coef = coef * (x^T bases) / (coef (bases^T bases) + eps); /= ||coef||_*
            numer = _mm(bases, xs_bf, ((0,), (0,)))              # (R, N), K=D on MXU
            btb = lax.dot_general(bases, bases, (((0,), (0,)), ((), ())),
                                  preferred_element_type=f32)    # (R, R) f32 (symmetric)
            denom = rr_times_rn(btb, coef_t)                     # (R, N) on the VPU
            coef_un = coef_t * numer * pl.reciprocal(denom + EPS, approx=True)
            return coef_un * pl.reciprocal(nuclear_norm(coef_un) + EPS, approx=True)

        # coef init: softmax over R of inv_t * bases^T x   (coef stored transposed: (R, N))
        logits = inv_t * _mm(bases, xs_bf, ((0,), (0,)))         # (R, N)
        logits = logits - jnp.max(logits, axis=0, keepdims=True)
        e = jnp.exp(logits)
        coef_t = e / jnp.sum(e, axis=0, keepdims=True)

        # ---- NMF multiplicative updates, fully VMEM-resident ------------------------
        for _ in range(steps):
            coef_t = coef_step(bases, coef_t)
            coef_bf = coef_t.astype(MXU_IN_DTYPE)
            numer_b = _mm(xs_bf, coef_bf, ((1,), (1,)))          # (D, R), K=N on MXU
            ctc = _mm(coef_bf, coef_bf, ((1,), (1,)))            # (R, R), K=N on MXU
            denom_b = dr_times_rr(bases, ctc)                    # (D, R) on the VPU
            bases = bases * numer_b * pl.reciprocal(denom_b + EPS, approx=True)

        coef_t = coef_step(bases, coef_t)                        # compute_coef

        # ---- ham_out folded into bases: w_out_s @ (bases @ coef^T) == (w_out_s@bases)@coef^T
        wob = _mm(w_out[:, s * D:(s + 1) * D], bases, ((1,), (0,)))   # (C, R), K=D on MXU
        contrib = _mm(wob, coef_t, ((1,), (0,)))                      # (C, N)
        y_acc = contrib if y_acc is None else y_acc + contrib

    # ---- residual: relu(x + ham_out(ham(relu(ham_in(x))))) ---------------------------
    o_ref[0] = jnp.maximum(x + y_acc + b_out_ref[...].astype(f32), 0.0).astype(o_ref.dtype)


def hamburger_forward(x_nchw, params, *, S=1, steps=6, inv_t=1.0, ns_iters=12):
    B, C, H, W = x_nchw.shape
    N = H * W
    D = C // S
    R = params["bases0"].shape[-1]

    x_bcn = x_nchw.reshape(B, C, N)                 # keep caller dtype (pass bf16 on v5e)
    bases0 = params["bases0"].reshape(B, S, D, R)

    kernel = functools.partial(_hamburger_kernel, S=S, R=R, steps=steps,
                               inv_t=float(inv_t), ns_iters=ns_iters)

    out = pl.pallas_call(
        kernel,
        out_shape=jax.ShapeDtypeStruct((B, C, N), x_bcn.dtype),
        grid=(B,),
        in_specs=[
            pl.BlockSpec((1, C, N), lambda i: (i, 0, 0)),        # x slab (per batch)
            pl.BlockSpec((C, C), lambda i: (0, 0)),              # w_in
            pl.BlockSpec((C, 1), lambda i: (0, 0)),              # b_in
            pl.BlockSpec((C, C), lambda i: (0, 0)),              # w_out
            pl.BlockSpec((C, 1), lambda i: (0, 0)),              # b_out
            pl.BlockSpec((1, S, D, R), lambda i: (i, 0, 0, 0)),  # bases
        ],
        out_specs=pl.BlockSpec((1, C, N), lambda i: (i, 0, 0)),
        compiler_params=pltpu.CompilerParams(
            dimension_semantics=("parallel",),       # batch slabs across cores
            vmem_limit_bytes=48 * 1024 * 1024,       # <= v7x-safe; raise on v5e/v6e if needed
        ),
    )(x_bcn, params["w_in"], params["b_in"], params["w_out"], params["b_out"], bases0)

    return out.reshape(B, C, H, W)


# --------------------------------------------------------------------------------------
if __name__ == "__main__":
    # Small deterministic config (ham_channels=32, S=1, R=8, train_steps=6, inv_t=1)
    B, C, H, W = 2, 32, 16, 16          # N = 256 -> lane-dense (multiple of 128)
    S, R, steps = 1, 8, 6
    D, N = C // S, H * W

    key = jax.random.PRNGKey(0)
    kx, kb, kw1, kb1, kw2, kb2 = jax.random.split(key, 6)

    x = jax.random.normal(kx, (B, C, H, W), jnp.float32)

    # bases: torch.rand -> uniform[0,1), then F.normalize(dim=1)
    bases0 = jax.random.uniform(kb, (B * S, D, R), jnp.float32)
    bases0 = bases0 / jnp.maximum(
        jnp.linalg.norm(bases0, axis=1, keepdims=True), 1e-12)

    params = {
        "w_in": 0.05 * jax.random.normal(kw1, (C, C), jnp.float32),
        "b_in": 0.05 * jax.random.normal(kb1, (C, 1), jnp.float32),
        "w_out": 0.05 * jax.random.normal(kw2, (C, C), jnp.float32),
        "b_out": 0.05 * jax.random.normal(kb2, (C, 1), jnp.float32),
        "bases0": bases0,
    }

    fwd = jax.jit(functools.partial(hamburger_forward, S=S, steps=steps, inv_t=1.0))
    out = jax.block_until_ready(fwd(x, params))

    assert out.shape == (B, C, H, W)
    assert bool(jnp.all(jnp.isfinite(out)))
    print("KERNEL_OK")
</pallas_src>

<mosaic_0001>
module attributes {stable_mosaic.version = 11 : i64} {
  func.func @_hamburger_kernel(%arg0: i32, %arg1: memref<1x32x256xf32, #tpu.memory_space<vmem>>, %arg2: memref<32x32xf32, #tpu.memory_space<vmem>>, %arg3: memref<32x1xf32, #tpu.memory_space<vmem>>, %arg4: memref<32x32xf32, #tpu.memory_space<vmem>>, %arg5: memref<32x1xf32, #tpu.memory_space<vmem>>, %arg6: memref<1x1x32x8xf32, #tpu.memory_space<vmem>>, %arg7: memref<1x32x256xf32, #tpu.memory_space<vmem>>) attributes {dimension_semantics = [#tpu.dimension_semantics<parallel>], iteration_bounds = array<i64: 2>, scalar_prefetch = 0 : i64, scratch_operands = 0 : i64, tpu.core_type = #tpu.core_type<tc>, window_params = [{transform_indices = @transform_0, window_bounds = array<i64: 1, 32, 256>}, {pipeline_mode = #tpu.pipeline_mode<synchronous>, transform_indices = @transform_1, window_bounds = array<i64: 32, 32>}, {pipeline_mode = #tpu.pipeline_mode<synchronous>, transform_indices = @transform_2, window_bounds = array<i64: 32, 1>}, {pipeline_mode = #tpu.pipeline_mode<synchronous>, transform_indices = @transform_3, window_bounds = array<i64: 32, 32>}, {pipeline_mode = #tpu.pipeline_mode<synchronous>, transform_indices = @transform_4, window_bounds = array<i64: 32, 1>}, {transform_indices = @transform_5, window_bounds = array<i64: 1, 1, 32, 8>}, {transform_indices = @transform_6, window_bounds = array<i64: 1, 32, 256>}]} {
    %c0 = arith.constant 0 : index
    %c0_0 = arith.constant 0 : index
    %c0_1 = arith.constant 0 : index
    %0 = vector.load %arg1[%c0, %c0_0, %c0_1] : memref<1x32x256xf32, #tpu.memory_space<vmem>>, vector<1x32x256xf32>
    %1 = vector.shape_cast %0 : vector<1x32x256xf32> to vector<32x256xf32>
    %c0_2 = arith.constant 0 : index
    %c0_3 = arith.constant 0 : index
    %2 = vector.load %arg2[%c0_2, %c0_3] : memref<32x32xf32, #tpu.memory_space<vmem>>, vector<32x32xf32>
    %3 = arith.truncf %2 : vector<32x32xf32> to vector<32x32xbf16>
    %4 = arith.truncf %1 : vector<32x256xf32> to vector<32x256xbf16>
    %cst = arith.constant dense<0.000000e+00> : vector<32x256xf32>
    %5 = tpu.matmul %3, %4, %cst {dimension_numbers = #tpu.dot_dimension_numbers<[1], [0], [0], [1], [0, 0, 1, 1], [], []>} : vector<32x32xbf16>, vector<32x256xbf16>, vector<32x256xf32> -> vector<32x256xf32>
    %c0_4 = arith.constant 0 : index
    %c0_5 = arith.constant 0 : index
    %6 = vector.load %arg3[%c0_4, %c0_5] : memref<32x1xf32, #tpu.memory_space<vmem>>, vector<32x1xf32>
    %7 = vector.broadcast %6 : vector<32x1xf32> to vector<32x256xf32>
    %8 = arith.addf %5, %7 : vector<32x256xf32>
    %cst_6 = arith.constant 0.000000e+00 : f32
    %9 = vector.broadcast %cst_6 : f32 to vector<32x256xf32>
    %10 = arith.maximumf %8, %9 : vector<32x256xf32>
    %11 = arith.truncf %10 : vector<32x256xf32> to vector<32x256xbf16>
    %12 = tpu.iota {dimensions = array<i32: 0>} : vector<8x8xi32>
    %13 = tpu.iota {dimensions = array<i32: 1>} : vector<8x8xi32>
    %14 = arith.cmpi eq, %12, %13 : vector<8x8xi32>
    %15 = arith.extui %14 : vector<8x8xi1> to vector<8x8xi32>
    %16 = arith.sitofp %15 : vector<8x8xi32> to vector<8x8xf32>
    %c0_7 = arith.constant 0 : index
    %c0_8 = arith.constant 0 : index
    %17 = vector.load %arg4[%c0_7, %c0_8] : memref<32x32xf32, #tpu.memory_space<vmem>>, vector<32x32xf32>
    %c0_9 = arith.constant 0 : index
    %c0_10 = arith.constant 0 : index
    %c0_11 = arith.constant 0 : index
    %c0_12 = arith.constant 0 : index
    %18 = vector.load %arg6[%c0_9, %c0_10, %c0_11, %c0_12] : memref<1x1x32x8xf32, #tpu.memory_space<vmem>>, vector<1x1x32x8xf32>
    %19 = vector.shape_cast %18 : vector<1x1x32x8xf32> to vector<32x8xf32>
    %20 = arith.truncf %19 : vector<32x8xf32> to vector<32x8xbf16>
    %cst_13 = arith.constant dense<0.000000e+00> : vector<8x256xf32>
    %21 = tpu.matmul %20, %11, %cst_13 {dimension_numbers = #tpu.dot_dimension_numbers<[0], [0], [1], [1], [0, 1, 1, 1], [], []>} : vector<32x8xbf16>, vector<32x256xbf16>, vector<8x256xf32> -> vector<8x256xf32>
    %cst_14 = arith.constant 1.000000e+00 : f32
    %22 = vector.broadcast %cst_14 : f32 to vector<8x256xf32>
    %23 = arith.mulf %22, %21 : vector<8x256xf32>
    %cst_15 = arith.constant dense<0xFF800000> : vector<256xf32>
    %24 = vector.multi_reduction <maximumf>, %23, %cst_15 [0] : vector<8x256xf32> to vector<256xf32>
    %25 = vector.shape_cast %24 : vector<256xf32> to vector<1x256xf32>
    %26 = vector.broadcast %25 : vector<1x256xf32> to vector<8x256xf32>
    %27 = arith.subf %23, %26 : vector<8x256xf32>
    %28 = math.exp %27 : vector<8x256xf32>
    %cst_16 = arith.constant dense<0.000000e+00> : vector<256xf32>
    %29 = vector.multi_reduction <add>, %28, %cst_16 [0] : vector<8x256xf32> to vector<256xf32>
    %30 = vector.shape_cast %29 : vector<256xf32> to vector<1x256xf32>
    %31 = vector.broadcast %30 : vector<1x256xf32> to vector<8x256xf32>
    %32 = arith.divf %28, %31 : vector<8x256xf32>
    %33 = arith.truncf %19 : vector<32x8xf32> to vector<32x8xbf16>
    %cst_17 = arith.constant dense<0.000000e+00> : vector<8x256xf32>
    %34 = tpu.matmul %33, %11, %cst_17 {dimension_numbers = #tpu.dot_dimension_numbers<[0], [0], [1], [1], [0, 1, 1, 1], [], []>} : vector<32x8xbf16>, vector<32x256xbf16>, vector<8x256xf32> -> vector<8x256xf32>
    %cst_18 = arith.constant dense<0.000000e+00> : vector<8x8xf32>
    %35 = tpu.matmul %19, %19, %cst_18 {dimension_numbers = #tpu.dot_dimension_numbers<[0], [0], [1], [1], [0, 1, 1, 1], [], []>} : vector<32x8xf32>, vector<32x8xf32>, vector<8x8xf32> -> vector<8x8xf32>
    %36 = vector.extract_strided_slice %35 {offsets = [0, 0], sizes = [8, 1], strides = [1, 1]} : vector<8x8xf32> to vector<8x1xf32>
    %37 = vector.extract_strided_slice %32 {offsets = [0, 0], sizes = [1, 256], strides = [1, 1]} : vector<8x256xf32> to vector<1x256xf32>
    %38 = vector.broadcast %36 : vector<8x1xf32> to vector<8x256xf32>
    %39 = vector.broadcast %37 : vector<1x256xf32> to vector<8x256xf32>
    %40 = arith.mulf %38, %39 : vector<8x256xf32>
    %41 = vector.extract_strided_slice %35 {offsets = [0, 1], sizes = [8, 1], strides = [1, 1]} : vector<8x8xf32> to vector<8x1xf32>
    %42 = vector.extract_strided_slice %32 {offsets = [1, 0], sizes = [1, 256], strides = [1, 1]} : vector<8x256xf32> to vector<1x256xf32>
    %43 = vector.broadcast %41 : vector<8x1xf32> to vector<8x256xf32>
    %44 = vector.broadcast %42 : vector<1x256xf32> to vector<8x256xf32>
    %45 = arith.mulf %43, %44 : vector<8x256xf32>
    %46 = arith.addf %40, %45 : vector<8x256xf32>
    %47 = vector.extract_strided_slice %35 {offsets = [0, 2], sizes = [8, 1], strides = [1, 1]} : vector<8x8xf32> to vector<8x1xf32>
    %48 = vector.extract_strided_slice %32 {offsets = [2, 0], sizes = [1, 256], strides = [1, 1]} : vector<8x256xf32> to vector<1x256xf32>
    %49 = vector.broadcast %47 : vector<8x1xf32> to vector<8x256xf32>
    %50 = vector.broadcast %48 : vector<1x256xf32> to vector<8x256xf32>
    %51 = arith.mulf %49, %50 : vector<8x256xf32>
    %52 = arith.addf %46, %51 : vector<8x256xf32>
    %53 = vector.extract_strided_slice %35 {offsets = [0, 3], sizes = [8, 1], strides = [1, 1]} : vector<8x8xf32> to vector<8x1xf32>
    %54 = vector.extract_strided_slice %32 {offsets = [3, 0], sizes = [1, 256], strides = [1, 1]} : vector<8x256xf32> to vector<1x256xf32>
    %55 = vector.broadcast %53 : vector<8x1xf32> to vector<8x256xf32>
    %56 = vector.broadcast %54 : vector<1x256xf32> to vector<8x256xf32>
    %57 = arith.mulf %55, %56 : vector<8x256xf32>
    %58 = arith.addf %52, %57 : vector<8x256xf32>
    %59 = vector.extract_strided_slice %35 {offsets = [0, 4], sizes = [8, 1], strides = [1, 1]} : vector<8x8xf32> to vector<8x1xf32>
    %60 = vector.extract_strided_slice %32 {offsets = [4, 0], sizes = [1, 256], strides = [1, 1]} : vector<8x256xf32> to vector<1x256xf32>
    %61 = vector.broadcast %59 : vector<8x1xf32> to vector<8x256xf32>
    %62 = vector.broadcast %60 : vector<1x256xf32> to vector<8x256xf32>
    %63 = arith.mulf %61, %62 : vector<8x256xf32>
    %64 = arith.addf %58, %63 : vector<8x256xf32>
    %65 = vector.extract_strided_slice %35 {offsets = [0, 5], sizes = [8, 1], strides = [1, 1]} : vector<8x8xf32> to vector<8x1xf32>
    %66 = vector.extract_strided_slice %32 {offsets = [5, 0], sizes = [1, 256], strides = [1, 1]} : vector<8x256xf32> to vector<1x256xf32>
    %67 = vector.broadcast %65 : vector<8x1xf32> to vector<8x256xf32>
    %68 = vector.broadcast %66 : vector<1x256xf32> to vector<8x256xf32>
    %69 = arith.mulf %67, %68 : vector<8x256xf32>
    %70 = arith.addf %64, %69 : vector<8x256xf32>
    %71 = vector.extract_strided_slice %35 {offsets = [0, 6], sizes = [8, 1], strides = [1, 1]} : vector<8x8xf32> to vector<8x1xf32>
    %72 = vector.extract_strided_slice %32 {offsets = [6, 0], sizes = [1, 256], strides = [1, 1]} : vector<8x256xf32> to vector<1x256xf32>
    %73 = vector.broadcast %71 : vector<8x1xf32> to vector<8x256xf32>
    %74 = vector.broadcast %72 : vector<1x256xf32> to vector<8x256xf32>
    %75 = arith.mulf %73, %74 : vector<8x256xf32>
    %76 = arith.addf %70, %75 : vector<8x256xf32>
    %77 = vector.extract_strided_slice %35 {offsets = [0, 7], sizes = [8, 1], strides = [1, 1]} : vector<8x8xf32> to vector<8x1xf32>
    %78 = vector.extract_strided_slice %32 {offsets = [7, 0], sizes = [1, 256], strides = [1, 1]} : vector<8x256xf32> to vector<1x256xf32>
    %79 = vector.broadcast %77 : vector<8x1xf32> to vector<8x256xf32>
    %80 = vector.broadcast %78 : vector<1x256xf32> to vector<8x256xf32>
    %81 = arith.mulf %79, %80 : vector<8x256xf32>
    %82 = arith.addf %76, %81 : vector<8x256xf32>
    %83 = arith.mulf %32, %34 : vector<8x256xf32>
    %cst_19 = arith.constant 9.99999997E-7 : f32
    %84 = vector.broadcast %cst_19 : f32 to vector<8x256xf32>
    %85 = arith.addf %82, %84 : vector<8x256xf32>
    %86 = tpu.reciprocal %85 {approx = true} : vector<8x256xf32> -> vector<8x256xf32>
    %87 = arith.mulf %83, %86 : vector<8x256xf32>
    %cst_20 = arith.constant dense<0.000000e+00> : vector<8x8xf32>
    %88 = tpu.matmul %87, %87, %cst_20 {dimension_numbers = #tpu.dot_dimension_numbers<[1], [1], [0], [0], [0, 0, 1, 0], [], []>} : vector<8x256xf32>, vector<8x256xf32>, vector<8x8xf32> -> vector<8x8xf32>
    %89 = arith.mulf %88, %88 : vector<8x8xf32>
    %cst_21 = arith.constant dense<0.000000e+00> : vector<8xf32>
    %90 = vector.multi_reduction <add>, %89, %cst_21 [1] : vector<8x8xf32> to vector<8xf32>
    %91 = vector.shape_cast %90 : vector<8xf32> to vector<8x1xf32>
    %cst_22 = arith.constant dense<0.000000e+00> : vector<1xf32>
    %92 = vector.multi_reduction <add>, %91, %cst_22 [0] : vector<8x1xf32> to vector<1xf32>
    %93 = vector.shape_cast %92 : vector<1xf32> to vector<1x1xf32>
    %94 = math.sqrt %93 : vector<1x1xf32>
    %cst_23 = arith.constant 1.000000e-30 : f32
    %95 = vector.broadcast %cst_23 : f32 to vector<1x1xf32>
    %96 = arith.addf %94, %95 : vector<1x1xf32>
    %97 = vector.broadcast %96 : vector<1x1xf32> to vector<8x8xf32>
    %98 = arith.divf %88, %97 : vector<8x8xf32>
    %cst_24 = arith.constant 1.500000e+00 : f32
    %99 = vector.broadcast %cst_24 : f32 to vector<8x8xf32>
    %100 = arith.mulf %99, %16 : vector<8x8xf32>
    %cst_25 = arith.constant dense<0.000000e+00> : vector<8x8xf32>
    %101 = tpu.matmul %16, %98, %cst_25 {dimension_numbers = #tpu.dot_dimension_numbers<[1], [0], [0], [1], [0, 0, 1, 1], [], []>} : vector<8x8xf32>, vector<8x8xf32>, vector<8x8xf32> -> vector<8x8xf32>
    %cst_26 = arith.constant 5.000000e-01 : f32
    %102 = vector.broadcast %cst_26 : f32 to vector<8x8xf32>
    %103 = arith.mulf %102, %101 : vector<8x8xf32>
    %104 = arith.subf %100, %103 : vector<8x8xf32>
    %cst_27 = arith.constant dense<0.000000e+00> : vector<8x8xf32>
    %105 = tpu.matmul %98, %104, %cst_27 {dimension_numbers = #tpu.dot_dimension_numbers<[1], [0], [0], [1], [0, 0, 1, 1], [], []>} : vector<8x8xf32>, vector<8x8xf32>, vector<8x8xf32> -> vector<8x8xf32>
    %cst_28 = arith.constant dense<0.000000e+00> : vector<8x8xf32>
    %106 = tpu.matmul %104, %16, %cst_28 {dimension_numbers = #tpu.dot_dimension_numbers<[1], [0], [0], [1], [0, 0, 1, 1], [], []>} : vector<8x8xf32>, vector<8x8xf32>, vector<8x8xf32> -> vector<8x8xf32>
    %cst_29 = arith.constant 1.500000e+00 : f32
    %107 = vector.broadcast %cst_29 : f32 to vector<8x8xf32>
    %108 = arith.mulf %107, %16 : vector<8x8xf32>
    %cst_30 = arith.constant dense<0.000000e+00> : vector<8x8xf32>
    %109 = tpu.matmul %106, %105, %cst_30 {dimension_numbers = #tpu.dot_dimension_numbers<[1], [0], [0], [1], [0, 0, 1, 1], [], []>} : vector<8x8xf32>, vector<8x8xf32>, vector<8x8xf32> -> vector<8x8xf32>
    %cst_31 = arith.constant 5.000000e-01 : f32
    %110 = vector.broadcast %cst_31 : f32 to vector<8x8xf32>
    %111 = arith.mulf %110, %109 : vector<8x8xf32>
    %112 = arith.subf %108, %111 : vector<8x8xf32>
    %cst_32 = arith.constant dense<0.000000e+00> : vector<8x8xf32>
    %113 = tpu.matmul %105, %112, %cst_32 {dimension_numbers = #tpu.dot_dimension_numbers<[1], [0], [0], [1], [0, 0, 1, 1], [], []>} : vector<8x8xf32>, vector<8x8xf32>, vector<8x8xf32> -> vector<8x8xf32>
    %cst_33 = arith.constant dense<0.000000e+00> : vector<8x8xf32>
    %114 = tpu.matmul %112, %106, %cst_33 {dimension_numbers = #tpu.dot_dimension_numbers<[1], [0], [0], [1], [0, 0, 1, 1], [], []>} : vector<8x8xf32>, vector<8x8xf32>, vector<8x8xf32> -> vector<8x8xf32>
    %cst_34 = arith.constant 1.500000e+00 : f32
    %115 = vector.broadcast %cst_34 : f32 to vector<8x8xf32>
    %116 = arith.mulf %115, %16 : vector<8x8xf32>
    %cst_35 = arith.constant dense<0.000000e+00> : vector<8x8xf32>
    %117 = tpu.matmul %114, %113, %cst_35 {dimension_numbers = #tpu.dot_dimension_numbers<[1], [0], [0], [1], [0, 0, 1, 1], [], []>} : vector<8x8xf32>, vector<8x8xf32>, vector<8x8xf32> -> vector<8x8xf32>
    %cst_36 = arith.constant 5.000000e-01 : f32
    %118 = vector.broadcast %cst_36 : f32 to vector<8x8xf32>
    %119 = arith.mulf %118, %117 : vector<8x8xf32>
    %120 = arith.subf %116, %119 : vector<8x8xf32>
    %cst_37 = arith.constant dense<0.000000e+00> : vector<8x8xf32>
    %121 = tpu.matmul %113, %120, %cst_37 {dimension_numbers = #tpu.dot_dimension_numbers<[1], [0], [0], [1], [0, 0, 1, 1], [], []>} : vector<8x8xf32>, vector<8x8xf32>, vector<8x8xf32> -> vector<8x8xf32>
    %cst_38 = arith.constant dense<0.000000e+00> : vector<8x8xf32>
    %122 = tpu.matmul %120, %114, %cst_38 {dimension_numbers = #tpu.dot_dimension_numbers<[1], [0], [0], [1], [0, 0, 1, 1], [], []>} : vector<8x8xf32>, vector<8x8xf32>, vector<8x8xf32> -> vector<8x8xf32>
    %cst_39 = arith.constant 1.500000e+00 : f32
    %123 = vector.broadcast %cst_39 : f32 to vector<8x8xf32>
    %124 = arith.mulf %123, %16 : vector<8x8xf32>
    %cst_40 = arith.constant dense<0.000000e+00> : vector<8x8xf32>
    %125 = tpu.matmul %122, %121, %cst_40 {dimension_numbers = #tpu.dot_dimension_numbers<[1], [0], [0], [1], [0, 0, 1, 1], [], []>} : vector<8x8xf32>, vector<8x8xf32>, vector<8x8xf32> -> vector<8x8xf32>
    %cst_41 = arith.constant 5.000000e-01 : f32
    %126 = vector.broadcast %cst_41 : f32 to vector<8x8xf32>
    %127 = arith.mulf %126, %125 : vector<8x8xf32>
    %128 = arith.subf %124, %127 : vector<8x8xf32>
    %cst_42 = arith.constant dense<0.000000e+00> : vector<8x8xf32>
    %129 = tpu.matmul %121, %128, %cst_42 {dimension_numbers = #tpu.dot_dimension_numbers<[1], [0], [0], [1], [0, 0, 1, 1], [], []>} : vector<8x8xf32>, vector<8x8xf32>, vector<8x8xf32> -> vector<8x8xf32>
    %cst_43 = arith.constant dense<0.000000e+00> : vector<8x8xf32>
    %130 = tpu.matmul %128, %122, %cst_43 {dimension_numbers = #tpu.dot_dimension_numbers<[1], [0], [0], [1], [0, 0, 1, 1], [], []>} : vector<8x8xf32>, vector<8x8xf32>, vector<8x8xf32> -> vector<8x8xf32>
    %cst_44 = arith.constant 1.500000e+00 : f32
    %131 = vector.broadcast %cst_44 : f32 to vector<8x8xf32>
    %132 = arith.mulf %131, %16 : vector<8x8xf32>
    %cst_45 = arith.constant dense<0.000000e+00> : vector<8x8xf32>
    %133 = tpu.matmul %130, %129, %cst_45 {dimension_numbers = #tpu.dot_dimension_numbers<[1], [0], [0], [1], [0, 0, 1, 1], [], []>} : vector<8x8xf32>, vector<8x8xf32>, vector<8x8xf32> -> vector<8x8xf32>
    %cst_46 = arith.constant 5.000000e-01 : f32
    %134 = vector.broadcast %cst_46 : f32 to vector<8x8xf32>
    %135 = arith.mulf %134, %133 : vector<8x8xf32>
    %136 = arith.subf %132, %135 : vector<8x8xf32>
    %cst_47 = arith.constant dense<0.000000e+00> : vector<8x8xf32>
    %137 = tpu.matmul %129, %136, %cst_47 {dimension_numbers = #tpu.dot_dimension_numbers<[1], [0], [0], [1], [0, 0, 1, 1], [], []>} : vector<8x8xf32>, vector<8x8xf32>, vector<8x8xf32> -> vector<8x8xf32>
    %cst_48 = arith.constant dense<0.000000e+00> : vector<8x8xf32>
    %138 = tpu.matmul %136, %130, %cst_48 {dimension_numbers = #tpu.dot_dimension_numbers<[1], [0], [0], [1], [0, 0, 1, 1], [], []>} : vector<8x8xf32>, vector<8x8xf32>, vector<8x8xf32> -> vector<8x8xf32>
    %cst_49 = arith.constant 1.500000e+00 : f32
    %139 = vector.broadcast %cst_49 : f32 to vector<8x8xf32>
    %140 = arith.mulf %139, %16 : vector<8x8xf32>
    %cst_50 = arith.constant dense<0.000000e+00> : vector<8x8xf32>
    %141 = tpu.matmul %138, %137, %cst_50 {dimension_numbers = #tpu.dot_dimension_numbers<[1], [0], [0], [1], [0, 0, 1, 1], [], []>} : vector<8x8xf32>, vector<8x8xf32>, vector<8x8xf32> -> vector<8x8xf32>
    %cst_51 = arith.constant 5.000000e-01 : f32
    %142 = vector.broadcast %cst_51 : f32 to vector<8x8xf32>
    %143 = arith.mulf %142, %141 : vector<8x8xf32>
    %144 = arith.subf %140, %143 : vector<8x8xf32>
    %cst_52 = arith.constant dense<0.000000e+00> : vector<8x8xf32>
    %145 = tpu.matmul %137, %144, %cst_52 {dimension_numbers = #tpu.dot_dimension_numbers<[1], [0], [0], [1], [0, 0, 1, 1], [], []>} : vector<8x8xf32>, vector<8x8xf32>, vector<8x8xf32> -> vector<8x8xf32>
    %cst_53 = arith.constant dense<0.000000e+00> : vector<8x8xf32>
    %146 = tpu.matmul %144, %138, %cst_53 {dimension_numbers = #tpu.dot_dimension_numbers<[1], [0], [0], [1], [0, 0, 1, 1], [], []>} : vector<8x8xf32>, vector<8x8xf32>, vector<8x8xf32> -> vector<8x8xf32>
    %cst_54 = arith.constant 1.500000e+00 : f32
    %147 = vector.broadcast %cst_54 : f32 to vector<8x8xf32>
    %148 = arith.mulf %147, %16 : vector<8x8xf32>
    %cst_55 = arith.constant dense<0.000000e+00> : vector<8x8xf32>
    %149 = tpu.matmul %146, %145, %cst_55 {dimension_numbers = #tpu.dot_dimension_numbers<[1], [0], [0], [1], [0, 0, 1, 1], [], []>} : vector<8x8xf32>, vector<8x8xf32>, vector<8x8xf32> -> vector<8x8xf32>
    %cst_56 = arith.constant 5.000000e-01 : f32
    %150 = vector.broadcast %cst_56 : f32 to vector<8x8xf32>
    %151 = arith.mulf %150, %149 : vector<8x8xf32>
    %152 = arith.subf %148, %151 : vector<8x8xf32>
    %cst_57 = arith.constant dense<0.000000e+00> : vector<8x8xf32>
    %153 = tpu.matmul %145, %152, %cst_57 {dimension_numbers = #tpu.dot_dimension_numbers<[1], [0], [0], [1], [0, 0, 1, 1], [], []>} : vector<8x8xf32>, vector<8x8xf32>, vector<8x8xf32> -> vector<8x8xf32>
    %cst_58 = arith.constant dense<0.000000e+00> : vector<8x8xf32>
    %154 = tpu.matmul %152, %146, %cst_58 {dimension_numbers = #tpu.dot_dimension_numbers<[1], [0], [0], [1], [0, 0, 1, 1], [], []>} : vector<8x8xf32>, vector<8x8xf32>, vector<8x8xf32> -> vector<8x8xf32>
    %cst_59 = arith.constant 1.500000e+00 : f32
    %155 = vector.broadcast %cst_59 : f32 to vector<8x8xf32>
    %156 = arith.mulf %155, %16 : vector<8x8xf32>
    %cst_60 = arith.constant dense<0.000000e+00> : vector<8x8xf32>
    %157 = tpu.matmul %154, %153, %cst_60 {dimension_numbers = #tpu.dot_dimension_numbers<[1], [0], [0], [1], [0, 0, 1, 1], [], []>} : vector<8x8xf32>, vector<8x8xf32>, vector<8x8xf32> -> vector<8x8xf32>
    %cst_61 = arith.constant 5.000000e-01 : f32
    %158 = vector.broadcast %cst_61 : f32 to vector<8x8xf32>
    %159 = arith.mulf %158, %157 : vector<8x8xf32>
    %160 = arith.subf %156, %159 : vector<8x8xf32>
    %cst_62 = arith.constant dense<0.000000e+00> : vector<8x8xf32>
    %161 = tpu.matmul %153, %160, %cst_62 {dimension_numbers = #tpu.dot_dimension_numbers<[1], [0], [0], [1], [0, 0, 1, 1], [], []>} : vector<8x8xf32>, vector<8x8xf32>, vector<8x8xf32> -> vector<8x8xf32>
    %cst_63 = arith.constant dense<0.000000e+00> : vector<8x8xf32>
    %162 = tpu.matmul %160, %154, %cst_63 {dimension_numbers = #tpu.dot_dimension_numbers<[1], [0], [0], [1], [0, 0, 1, 1], [], []>} : vector<8x8xf32>, vector<8x8xf32>, vector<8x8xf32> -> vector<8x8xf32>
    %cst_64 = arith.constant 1.500000e+00 : f32
    %163 = vector.broadcast %cst_64 : f32 to vector<8x8xf32>
    %164 = arith.mulf %163, %16 : vector<8x8xf32>
    %cst_65 = arith.constant dense<0.000000e+00> : vector<8x8xf32>
    %165 = tpu.matmul %162, %161, %cst_65 {dimension_numbers = #tpu.dot_dimension_numbers<[1], [0], [0], [1], [0, 0, 1, 1], [], []>} : vector<8x8xf32>, vector<8x8xf32>, vector<8x8xf32> -> vector<8x8xf32>
    %cst_66 = arith.constant 5.000000e-01 : f32
    %166 = vector.broadcast %cst_66 : f32 to vector<8x8xf32>
    %167 = arith.mulf %166, %165 : vector<8x8xf32>
    %168 = arith.subf %164, %167 : vector<8x8xf32>
    %cst_67 = arith.constant dense<0.000000e+00> : vector<8x8xf32>
    %169 = tpu.matmul %161, %168, %cst_67 {dimension_numbers = #tpu.dot_dimension_numbers<[1], [0], [0], [1], [0, 0, 1, 1], [], []>} : vector<8x8xf32>, vector<8x8xf32>, vector<8x8xf32> -> vector<8x8xf32>
    %cst_68 = arith.constant dense<0.000000e+00> : vector<8x8xf32>
    %170 = tpu.matmul %168, %162, %cst_68 {dimension_numbers = #tpu.dot_dimension_numbers<[1], [0], [0], [1], [0, 0, 1, 1], [], []>} : vector<8x8xf32>, vector<8x8xf32>, vector<8x8xf32> -> vector<8x8xf32>
    %cst_69 = arith.constant 1.500000e+00 : f32
    %171 = vector.broadcast %cst_69 : f32 to vector<8x8xf32>
    %172 = arith.mulf %171, %16 : vector<8x8xf32>
    %cst_70 = arith.constant dense<0.000000e+00> : vector<8x8xf32>
    %173 = tpu.matmul %170, %169, %cst_70 {dimension_numbers = #tpu.dot_dimension_numbers<[1], [0], [0], [1], [0, 0, 1, 1], [], []>} : vector<8x8xf32>, vector<8x8xf32>, vector<8x8xf32> -> vector<8x8xf32>
    %cst_71 = arith.constant 5.000000e-01 : f32
    %174 = vector.broadcast %cst_71 : f32 to vector<8x8xf32>
    %175 = arith.mulf %174, %173 : vector<8x8xf32>
    %176 = arith.subf %172, %175 : vector<8x8xf32>
    %cst_72 = arith.constant dense<0.000000e+00> : vector<8x8xf32>
    %177 = tpu.matmul %169, %176, %cst_72 {dimension_numbers = #tpu.dot_dimension_numbers<[1], [0], [0], [1], [0, 0, 1, 1], [], []>} : vector<8x8xf32>, vector<8x8xf32>, vector<8x8xf32> -> vector<8x8xf32>
    %cst_73 = arith.constant dense<0.000000e+00> : vector<8x8xf32>
    %178 = tpu.matmul %176, %170, %cst_73 {dimension_numbers = #tpu.dot_dimension_numbers<[1], [0], [0], [1], [0, 0, 1, 1], [], []>} : vector<8x8xf32>, vector<8x8xf32>, vector<8x8xf32> -> vector<8x8xf32>
    %cst_74 = arith.constant 1.500000e+00 : f32
    %179 = vector.broadcast %cst_74 : f32 to vector<8x8xf32>
    %180 = arith.mulf %179, %16 : vector<8x8xf32>
    %cst_75 = arith.constant dense<0.000000e+00> : vector<8x8xf32>
    %181 = tpu.matmul %178, %177, %cst_75 {dimension_numbers = #tpu.dot_dimension_numbers<[1], [0], [0], [1], [0, 0, 1, 1], [], []>} : vector<8x8xf32>, vector<8x8xf32>, vector<8x8xf32> -> vector<8x8xf32>
    %cst_76 = arith.constant 5.000000e-01 : f32
    %182 = vector.broadcast %cst_76 : f32 to vector<8x8xf32>
    %183 = arith.mulf %182, %181 : vector<8x8xf32>
    %184 = arith.subf %180, %183 : vector<8x8xf32>
    %cst_77 = arith.constant dense<0.000000e+00> : vector<8x8xf32>
    %185 = tpu.matmul %177, %184, %cst_77 {dimension_numbers = #tpu.dot_dimension_numbers<[1], [0], [0], [1], [0, 0, 1, 1], [], []>} : vector<8x8xf32>, vector<8x8xf32>, vector<8x8xf32> -> vector<8x8xf32>
    %cst_78 = arith.constant dense<0.000000e+00> : vector<8x8xf32>
    %186 = tpu.matmul %184, %178, %cst_78 {dimension_numbers = #tpu.dot_dimension_numbers<[1], [0], [0], [1], [0, 0, 1, 1], [], []>} : vector<8x8xf32>, vector<8x8xf32>, vector<8x8xf32> -> vector<8x8xf32>
    %cst_79 = arith.constant 1.500000e+00 : f32
    %187 = vector.broadcast %cst_79 : f32 to vector<8x8xf32>
    %188 = arith.mulf %187, %16 : vector<8x8xf32>
    %cst_80 = arith.constant dense<0.000000e+00> : vector<8x8xf32>
    %189 = tpu.matmul %186, %185, %cst_80 {dimension_numbers = #tpu.dot_dimension_numbers<[1], [0], [0], [1], [0, 0, 1, 1], [], []>} : vector<8x8xf32>, vector<8x8xf32>, vector<8x8xf32> -> vector<8x8xf32>
    %cst_81 = arith.constant 5.000000e-01 : f32
    %190 = vector.broadcast %cst_81 : f32 to vector<8x8xf32>
    %191 = arith.mulf %190, %189 : vector<8x8xf32>
    %192 = arith.subf %188, %191 : vector<8x8xf32>
    %cst_82 = arith.constant dense<0.000000e+00> : vector<8x8xf32>
    %193 = tpu.matmul %185, %192, %cst_82 {dimension_numbers = #tpu.dot_dimension_numbers<[1], [0], [0], [1], [0, 0, 1, 1], [], []>} : vector<8x8xf32>, vector<8x8xf32>, vector<8x8xf32> -> vector<8x8xf32>
    %194 = math.sqrt %96 : vector<1x1xf32>
    %195 = arith.mulf %193, %16 : vector<8x8xf32>
    %cst_83 = arith.constant dense<0.000000e+00> : vector<8xf32>
    %196 = vector.multi_reduction <add>, %195, %cst_83 [1] : vector<8x8xf32> to vector<8xf32>
    %197 = vector.shape_cast %196 : vector<8xf32> to vector<8x1xf32>
    %cst_84 = arith.constant dense<0.000000e+00> : vector<1xf32>
    %198 = vector.multi_reduction <add>, %197, %cst_84 [0] : vector<8x1xf32> to vector<1xf32>
    %199 = vector.shape_cast %198 : vector<1xf32> to vector<1x1xf32>
    %200 = arith.mulf %194, %199 : vector<1x1xf32>
    %cst_85 = arith.constant 9.99999997E-7 : f32
    %201 = vector.broadcast %cst_85 : f32 to vector<1x1xf32>
    %202 = arith.addf %200, %201 : vector<1x1xf32>
    %203 = tpu.reciprocal %202 {approx = true} : vector<1x1xf32> -> vector<1x1xf32>
    %204 = vector.broadcast %203 : vector<1x1xf32> to vector<8x256xf32>
    %205 = arith.mulf %87, %204 : vector<8x256xf32>
    %206 = arith.truncf %205 : vector<8x256xf32> to vector<8x256xbf16>
    %cst_86 = arith.constant dense<0.000000e+00> : vector<32x8xf32>
    %207 = tpu.matmul %11, %206, %cst_86 {dimension_numbers = #tpu.dot_dimension_numbers<[1], [1], [0], [0], [0, 0, 1, 0], [], []>} : vector<32x256xbf16>, vector<8x256xbf16>, vector<32x8xf32> -> vector<32x8xf32>
    %cst_87 = arith.constant dense<0.000000e+00> : vector<8x8xf32>
    %208 = tpu.matmul %206, %206, %cst_87 {dimension_numbers = #tpu.dot_dimension_numbers<[1], [1], [0], [0], [0, 0, 1, 0], [], []>} : vector<8x256xbf16>, vector<8x256xbf16>, vector<8x8xf32> -> vector<8x8xf32>
    %209 = vector.extract_strided_slice %19 {offsets = [0, 0], sizes = [32, 1], strides = [1, 1]} : vector<32x8xf32> to vector<32x1xf32>
    %210 = vector.extract_strided_slice %208 {offsets = [0, 0], sizes = [1, 8], strides = [1, 1]} : vector<8x8xf32> to vector<1x8xf32>
    %211 = vector.broadcast %209 : vector<32x1xf32> to vector<32x8xf32>
    %212 = vector.broadcast %210 : vector<1x8xf32> to vector<32x8xf32>
    %213 = arith.mulf %211, %212 : vector<32x8xf32>
    %214 = vector.extract_strided_slice %19 {offsets = [0, 1], sizes = [32, 1], strides = [1, 1]} : vector<32x8xf32> to vector<32x1xf32>
    %215 = vector.extract_strided_slice %208 {offsets = [1, 0], sizes = [1, 8], strides = [1, 1]} : vector<8x8xf32> to vector<1x8xf32>
    %216 = vector.broadcast %214 : vector<32x1xf32> to vector<32x8xf32>
    %217 = vector.broadcast %215 : vector<1x8xf32> to vector<32x8xf32>
    %218 = arith.mulf %216, %217 : vector<32x8xf32>
    %219 = arith.addf %213, %218 : vector<32x8xf32>
    %220 = vector.extract_strided_slice %19 {offsets = [0, 2], sizes = [32, 1], strides = [1, 1]} : vector<32x8xf32> to vector<32x1xf32>
    %221 = vector.extract_strided_slice %208 {offsets = [2, 0], sizes = [1, 8], strides = [1, 1]} : vector<8x8xf32> to vector<1x8xf32>
    %222 = vector.broadcast %220 : vector<32x1xf32> to vector<32x8xf32>
    %223 = vector.broadcast %221 : vector<1x8xf32> to vector<32x8xf32>
    %224 = arith.mulf %222, %223 : vector<32x8xf32>
    %225 = arith.addf %219, %224 : vector<32x8xf32>
    %226 = vector.extract_strided_slice %19 {offsets = [0, 3], sizes = [32, 1], strides = [1, 1]} : vector<32x8xf32> to vector<32x1xf32>
    %227 = vector.extract_strided_slice %208 {offsets = [3, 0], sizes = [1, 8], strides = [1, 1]} : vector<8x8xf32> to vector<1x8xf32>
    %228 = vector.broadcast %226 : vector<32x1xf32> to vector<32x8xf32>
    %229 = vector.broadcast %227 : vector<1x8xf32> to vector<32x8xf32>
    %230 = arith.mulf %228, %229 : vector<32x8xf32>
    %231 = arith.addf %225, %230 : vector<32x8xf32>
    %232 = vector.extract_strided_slice %19 {offsets = [0, 4], sizes = [32, 1], strides = [1, 1]} : vector<32x8xf32> to vector<32x1xf32>
    %233 = vector.extract_strided_slice %208 {offsets = [4, 0], sizes = [1, 8], strides = [1, 1]} : vector<8x8xf32> to vector<1x8xf32>
    %234 = vector.broadcast %232 : vector<32x1xf32> to vector<32x8xf32>
    %235 = vector.broadcast %233 : vector<1x8xf32> to vector<32x8xf32>
    %236 = arith.mulf %234, %235 : vector<32x8xf32>
    %237 = arith.addf %231, %236 : vector<32x8xf32>
    %238 = vector.extract_strided_slice %19 {offsets = [0, 5], sizes = [32, 1], strides = [1, 1]} : vector<32x8xf32> to vector<32x1xf32>
    %239 = vector.extract_strided_slice %208 {offsets = [5, 0], sizes = [1, 8], strides = [1, 1]} : vector<8x8xf32> to vector<1x8xf32>
    %240 = vector.broadcast %238 : vector<32x1xf32> to vector<32x8xf32>
    %241 = vector.broadcast %239 : vector<1x8xf32> to vector<32x8xf32>
    %242 = arith.mulf %240, %241 : vector<32x8xf32>
    %243 = arith.addf %237, %242 : vector<32x8xf32>
    %244 = vector.extract_strided_slice %19 {offsets = [0, 6], sizes = [32, 1], strides = [1, 1]} : vector<32x8xf32> to vector<32x1xf32>
    %245 = vector.extract_strided_slice %208 {offsets = [6, 0], sizes = [1, 8], strides = [1, 1]} : vector<8x8xf32> to vector<1x8xf32>
    %246 = vector.broadcast %244 : vector<32x1xf32> to vector<32x8xf32>
    %247 = vector.broadcast %245 : vector<1x8xf32> to vector<32x8xf32>
    %248 = arith.mulf %246, %247 : vector<32x8xf32>
    %249 = arith.addf %243, %248 : vector<32x8xf32>
    %250 = vector.extract_strided_slice %19 {offsets = [0, 7], sizes = [32, 1], strides = [1, 1]} : vector<32x8xf32> to vector<32x1xf32>
    %251 = vector.extract_strided_slice %208 {offsets = [7, 0], sizes = [1, 8], strides = [1, 1]} : vector<8x8xf32> to vector<1x8xf32>
    %252 = vector.broadcast %250 : vector<32x1xf32> to vector<32x8xf32>
    %253 = vector.broadcast %251 : vector<1x8xf32> to vector<32x8xf32>
    %254 = arith.mulf %252, %253 : vector<32x8xf32>
    %255 = arith.addf %249, %254 : vector<32x8xf32>
    %256 = arith.mulf %19, %207 : vector<32x8xf32>
    %cst_88 = arith.constant 9.99999997E-7 : f32
    %257 = vector.broadcast %cst_88 : f32 to vector<32x8xf32>
    %258 = arith.addf %255, %257 : vector<32x8xf32>
    %259 = tpu.reciprocal %258 {approx = true} : vector<32x8xf32> -> vector<32x8xf32>
    %260 = arith.mulf %256, %259 : vector<32x8xf32>
    %261 = arith.truncf %260 : vector<32x8xf32> to vector<32x8xbf16>
    %cst_89 = arith.constant dense<0.000000e+00> : vector<8x256xf32>
    %262 = tpu.matmul %261, %11, %cst_89 {dimension_numbers = #tpu.dot_dimension_numbers<[0], [0], [1], [1], [0, 1, 1, 1], [], []>} : vector<32x8xbf16>, vector<32x256xbf16>, vector<8x256xf32> -> vector<8x256xf32>
    %cst_90 = arith.constant dense<0.000000e+00> : vector<8x8xf32>
    %263 = tpu.matmul %260, %260, %cst_90 {dimension_numbers = #tpu.dot_dimension_numbers<[0], [0], [1], [1], [0, 1, 1, 1], [], []>} : vector<32x8xf32>, vector<32x8xf32>, vector<8x8xf32> -> vector<8x8xf32>
    %264 = vector.extract_strided_slice %263 {offsets = [0, 0], sizes = [8, 1], strides = [1, 1]} : vector<8x8xf32> to vector<8x1xf32>
    %265 = vector.extract_strided_slice %205 {offsets = [0, 0], sizes = [1, 256], strides = [1, 1]} : vector<8x256xf32> to vector<1x256xf32>
    %266 = vector.broadcast %264 : vector<8x1xf32> to vector<8x256xf32>
    %267 = vector.broadcast %265 : vector<1x256xf32> to vector<8x256xf32>
    %268 = arith.mulf %266, %267 : vector<8x256xf32>
    %269 = vector.extract_strided_slice %263 {offsets = [0, 1], sizes = [8, 1], strides = [1, 1]} : vector<8x8xf32> to vector<8x1xf32>
    %270 = vector.extract_strided_slice %205 {offsets = [1, 0], sizes = [1, 256], strides = [1, 1]} : vector<8x256xf32> to vector<1x256xf32>
    %271 = vector.broadcast %269 : vector<8x1xf32> to vector<8x256xf32>
    %272 = vector.broadcast %270 : vector<1x256xf32> to vector<8x256xf32>
    %273 = arith.mulf %271, %272 : vector<8x256xf32>
    %274 = arith.addf %268, %273 : vector<8x256xf32>
    %275 = vector.extract_strided_slice %263 {offsets = [0, 2], sizes = [8, 1], strides = [1, 1]} : vector<8x8xf32> to vector<8x1xf32>
    %276 = vector.extract_strided_slice %205 {offsets = [2, 0], sizes = [1, 256], strides = [1, 1]} : vector<8x256xf32> to vector<1x256xf32>
    %277 = vector.broadcast %275 : vector<8x1xf32> to vector<8x256xf32>
    %278 = vector.broadcast %276 : vector<1x256xf32> to vector<8x256xf32>
    %279 = arith.mulf %277, %278 : vector<8x256xf32>
    %280 = arith.addf %274, %279 : vector<8x256xf32>
    %281 = vector.extract_strided_slice %263 {offsets = [0, 3], sizes = [8, 1], strides = [1, 1]} : vector<8x8xf32> to vector<8x1xf32>
    %282 = vector.extract_strided_slice %205 {offsets = [3, 0], sizes = [1, 256], strides = [1, 1]} : vector<8x256xf32> to vector<1x256xf32>
    %283 = vector.broadcast %281 : vector<8x1xf32> to vector<8x256xf32>
    %284 = vector.broadcast %282 : vector<1x256xf32> to vector<8x256xf32>
    %285 = arith.mulf %283, %284 : vector<8x256xf32>
    %286 = arith.addf %280, %285 : vector<8x256xf32>
    %287 = vector.extract_strided_slice %263 {offsets = [0, 4], sizes = [8, 1], strides = [1, 1]} : vector<8x8xf32> to vector<8x1xf32>
    %288 = vector.extract_strided_slice %205 {offsets = [4, 0], sizes = [1, 256], strides = [1, 1]} : vector<8x256xf32> to vector<1x256xf32>
    %289 = vector.broadcast %287 : vector<8x1xf32> to vector<8x256xf32>
    %290 = vector.broadcast %288 : vector<1x256xf32> to vector<8x256xf32>
    %291 = arith.mulf %289, %290 : vector<8x256xf32>
    %292 = arith.addf %286, %291 : vector<8x256xf32>
    %293 = vector.extract_strided_slice %263 {offsets = [0, 5], sizes = [8, 1], strides = [1, 1]} : vector<8x8xf32> to vector<8x1xf32>
    %294 = vector.extract_strided_slice %205 {offsets = [5, 0], sizes = [1, 256], strides = [1, 1]} : vector<8x256xf32> to vector<1x256xf32>
    %295 = vector.broadcast %293 : vector<8x1xf32> to vector<8x256xf32>
    %296 = vector.broadcast %294 : vector<1x256xf32> to vector<8x256xf32>
    %297 = arith.mulf %295, %296 : vector<8x256xf32>
    %298 = arith.addf %292, %297 : vector<8x256xf32>
    %299 = vector.extract_strided_slice %263 {offsets = [0, 6], sizes = [8, 1], strides = [1, 1]} : vector<8x8xf32> to vector<8x1xf32>
    %300 = vector.extract_strided_slice %205 {offsets = [6, 0], sizes = [1, 256], strides = [1, 1]} : vector<8x256xf32> to vector<1x256xf32>
    %301 = vector.broadcast %299 : vector<8x1xf32> to vector<8x256xf32>
    %302 = vector.broadcast %300 : vector<1x256xf32> to vector<8x256xf32>
    %303 = arith.mulf %301, %302 : vector<8x256xf32>
    %304 = arith.addf %298, %303 : vector<8x256xf32>
    %305 = vector.extract_strided_slice %263 {offsets = [0, 7], sizes = [8, 1], strides = [1, 1]} : vector<8x8xf32> to vector<8x1xf32>
    %306 = vector.extract_strided_slice %205 {offsets = [7, 0], sizes = [1, 256], strides = [1, 1]} : vector<8x256xf32> to vector<1x256xf32>
    %307 = vector.broadcast %305 : vector<8x1xf32> to vector<8x256xf32>
    %308 = vector.broadcast %306 : vector<1x256xf32> to vector<8x256xf32>
    %309 = arith.mulf %307, %308 : vector<8x256xf32>
    %310 = arith.addf %304, %309 : vector<8x256xf32>
    %311 = arith.mulf %205, %262 : vector<8x256xf32>
    %cst_91 = arith.constant 9.99999997E-7 : f32
    %312 = vector.broadcast %cst_91 : f32 to vector<8x256xf32>
    %313 = arith.addf %310, %312 : vector<8x256xf32>
    %314 = tpu.reciprocal %313 {approx = true} : vector<8x256xf32> -> vector<8x256xf32>
    %315 = arith.mulf %311, %314 : vector<8x256xf32>
    %cst_92 = arith.constant dense<0.000000e+00> : vector<8x8xf32>
    %316 = tpu.matmul %315, %315, %cst_92 {dimension_numbers = #tpu.dot_dimension_numbers<[1], [1], [0], [0], [0, 0, 1, 0], [], []>} : vector<8x256xf32>, vector<8x256xf32>, vector<8x8xf32> -> vector<8x8xf32>
    %317 = arith.mulf %316, %316 : vector<8x8xf32>
    %cst_93 = arith.constant dense<0.000000e+00> : vector<8xf32>
    %318 = vector.multi_reduction <add>, %317, %cst_93 [1] : vector<8x8xf32> to vector<8xf32>
    %319 = vector.shape_cast %318 : vector<8xf32> to vector<8x1xf32>
    %cst_94 = arith.constant dense<0.000000e+00> : vector<1xf32>
    %320 = vector.multi_reduction <add>, %319, %cst_94 [0] : vector<8x1xf32> to vector<1xf32>
    %321 = vector.shape_cast %320 : vector<1xf32> to vector<1x1xf32>
    %322 = math.sqrt %321 : vector<1x1xf32>
    %cst_95 = arith.constant 1.000000e-30 : f32
    %323 = vector.broadcast %cst_95 : f32 to vector<1x1xf32>
    %324 = arith.addf %322, %323 : vector<1x1xf32>
    %325 = vector.broadcast %324 : vector<1x1xf32> to vector<8x8xf32>
    %326 = arith.divf %316, %325 : vector<8x8xf32>
    %cst_96 = arith.constant 1.500000e+00 : f32
    %327 = vector.broadcast %cst_96 : f32 to vector<8x8xf32>
    %328 = arith.mulf %327, %16 : vector<8x8xf32>
    %cst_97 = arith.constant dense<0.000000e+00> : vector<8x8xf32>
    %329 = tpu.matmul %16, %326, %cst_97 {dimension_numbers = #tpu.dot_dimension_numbers<[1], [0], [0], [1], [0, 0, 1, 1], [], []>} : vector<8x8xf32>, vector<8x8xf32>, vector<8x8xf32> -> vector<8x8xf32>
    %cst_98 = arith.constant 5.000000e-01 : f32
    %330 = vector.broadcast %cst_98 : f32 to vector<8x8xf32>
    %331 = arith.mulf %330, %329 : vector<8x8xf32>
    %332 = arith.subf %328, %331 : vector<8x8xf32>
    %cst_99 = arith.constant dense<0.000000e+00> : vector<8x8xf32>
    %333 = tpu.matmul %326, %332, %cst_99 {dimension_numbers = #tpu.dot_dimension_numbers<[1], [0], [0], [1], [0, 0, 1, 1], [], []>} : vector<8x8xf32>, vector<8x8xf32>, vector<8x8xf32> -> vector<8x8xf32>
    %cst_100 = arith.constant dense<0.000000e+00> : vector<8x8xf32>
    %334 = tpu.matmul %332, %16, %cst_100 {dimension_numbers = #tpu.dot_dimension_numbers<[1], [0], [0], [1], [0, 0, 1, 1], [], []>} : vector<8x8xf32>, vector<8x8xf32>, vector<8x8xf32> -> vector<8x8xf32>
    %cst_101 = arith.constant 1.500000e+00 : f32
    %335 = vector.broadcast %cst_101 : f32 to vector<8x8xf32>
    %336 = arith.mulf %335, %16 : vector<8x8xf32>
    %cst_102 = arith.constant dense<0.000000e+00> : vector<8x8xf32>
    %337 = tpu.matmul %334, %333, %cst_102 {dimension_numbers = #tpu.dot_dimension_numbers<[1], [0], [0], [1], [0, 0, 1, 1], [], []>} : vector<8x8xf32>, vector<8x8xf32>, vector<8x8xf32> -> vector<8x8xf32>
    %cst_103 = arith.constant 5.000000e-01 : f32
    %338 = vector.broadcast %cst_103 : f32 to vector<8x8xf32>
    %339 = arith.mulf %338, %337 : vector<8x8xf32>
    %340 = arith.subf %336, %339 : vector<8x8xf32>
    %cst_104 = arith.constant dense<0.000000e+00> : vector<8x8xf32>
    %341 = tpu.matmul %333, %340, %cst_104 {dimension_numbers = #tpu.dot_dimension_numbers<[1], [0], [0], [1], [0, 0, 1, 1], [], []>} : vector<8x8xf32>, vector<8x8xf32>, vector<8x8xf32> -> vector<8x8xf32>
    %cst_105 = arith.constant dense<0.000000e+00> : vector<8x8xf32>
    %342 = tpu.matmul %340, %334, %cst_105 {dimension_numbers = #tpu.dot_dimension_numbers<[1], [0], [0], [1], [0, 0, 1, 1], [], []>} : vector<8x8xf32>, vector<8x8xf32>, vector<8x8xf32> -> vector<8x8xf32>
    %cst_106 = arith.constant 1.500000e+00 : f32
    %343 = vector.broadcast %cst_106 : f32 to vector<8x8xf32>
    %344 = arith.mulf %343, %16 : vector<8x8xf32>
    %cst_107 = arith.constant dense<0.000000e+00> : vector<8x8xf32>
    %345 = tpu.matmul %342, %341, %cst_107 {dimension_numbers = #tpu.dot_dimension_numbers<[1], [0], [0], [1], [0, 0, 1, 1], [], []>} : vector<8x8xf32>, vector<8x8xf32>, vector<8x8xf32> -> vector<8x8xf32>
    %cst_108 = arith.constant 5.000000e-01 : f32
    %346 = vector.broadcast %cst_108 : f32 to vector<8x8xf32>
    %347 = arith.mulf %346, %345 : vector<8x8xf32>
    %348 = arith.subf %344, %347 : vector<8x8xf32>
    %cst_109 = arith.constant dense<0.000000e+00> : vector<8x8xf32>
    %349 = tpu.matmul %341, %348, %cst_109 {dimension_numbers = #tpu.dot_dimension_numbers<[1], [0], [0], [1], [0, 0, 1, 1], [], []>} : vector<8x8xf32>, vector<8x8xf32>, vector<8x8xf32> -> vector<8x8xf32>
    %cst_110 = arith.constant dense<0.000000e+00> : vector<8x8xf32>
    %350 = tpu.matmul %348, %342, %cst_110 {dimension_numbers = #tpu.dot_dimension_numbers<[1], [0], [0], [1], [0, 0, 1, 1], [], []>} : vector<8x8xf32>, vector<8x8xf32>, vector<8x8xf32> -> vector<8x8xf32>
    %cst_111 = arith.constant 1.500000e+00 : f32
    %351 = vector.broadcast %cst_111 : f32 to vector<8x8xf32>
    %352 = arith.mulf %351, %16 : vector<8x8xf32>
    %cst_112 = arith.constant dense<0.000000e+00> : vector<8x8xf32>
    %353 = tpu.matmul %350, %349, %cst_112 {dimension_numbers = #tpu.dot_dimension_numbers<[1], [0], [0], [1], [0, 0, 1, 1], [], []>} : vector<8x8xf32>, vector<8x8xf32>, vector<8x8xf32> -> vector<8x8xf32>
    %cst_113 = arith.constant 5.000000e-01 : f32
    %354 = vector.broadcast %cst_113 : f32 to vector<8x8xf32>
    %355 = arith.mulf %354, %353 : vector<8x8xf32>
    %356 = arith.subf %352, %355 : vector<8x8xf32>
    %cst_114 = arith.constant dense<0.000000e+00> : vector<8x8xf32>
    %357 = tpu.matmul %349, %356, %cst_114 {dimension_numbers = #tpu.dot_dimension_numbers<[1], [0], [0], [1], [0, 0, 1, 1], [], []>} : vector<8x8xf32>, vector<8x8xf32>, vector<8x8xf32> -> vector<8x8xf32>
    %cst_115 = arith.constant dense<0.000000e+00> : vector<8x8xf32>
    %358 = tpu.matmul %356, %350, %cst_115 {dimension_numbers = #tpu.dot_dimension_numbers<[1], [0], [0], [1], [0, 0, 1, 1], [], []>} : vector<8x8xf32>, vector<8x8xf32>, vector<8x8xf32> -> vector<8x8xf32>
    %cst_116 = arith.constant 1.500000e+00 : f32
    %359 = vector.broadcast %cst_116 : f32 to vector<8x8xf32>
    %360 = arith.mulf %359, %16 : vector<8x8xf32>
    %cst_117 = arith.constant dense<0.000000e+00> : vector<8x8xf32>
    %361 = tpu.matmul %358, %357, %cst_117 {dimension_numbers = #tpu.dot_dimension_numbers<[1], [0], [0], [1], [0, 0, 1, 1], [], []>} : vector<8x8xf32>, vector<8x8xf32>, vector<8x8xf32> -> vector<8x8xf32>
    %cst_118 = arith.constant 5.000000e-01 : f32
    %362 = vector.broadcast %cst_118 : f32 to vector<8x8xf32>
    %363 = arith.mulf %362, %361 : vector<8x8xf32>
    %364 = arith.subf %360, %363 : vector<8x8xf32>
    %cst_119 = arith.constant dense<0.000000e+00> : vector<8x8xf32>
    %365 = tpu.matmul %357, %364, %cst_119 {dimension_numbers = #tpu.dot_dimension_numbers<[1], [0], [0], [1], [0, 0, 1, 1], [], []>} : vector<8x8xf32>, vector<8x8xf32>, vector<8x8xf32> -> vector<8x8xf32>
    %cst_120 = arith.constant dense<0.000000e+00> : vector<8x8xf32>
    %366 = tpu.matmul %364, %358, %cst_120 {dimension_numbers = #tpu.dot_dimension_numbers<[1], [0], [0], [1], [0, 0, 1, 1], [], []>} : vector<8x8xf32>, vector<8x8xf32>, vector<8x8xf32> -> vector<8x8xf32>
    %cst_121 = arith.constant 1.500000e+00 : f32
    %367 = vector.broadcast %cst_121 : f32 to vector<8x8xf32>
    %368 = arith.mulf %367, %16 : vector<8x8xf32>
    %cst_122 = arith.constant dense<0.000000e+00> : vector<8x8xf32>
    %369 = tpu.matmul %366, %365, %cst_122 {dimension_numbers = #tpu.dot_dimension_numbers<[1], [0], [0], [1], [0, 0, 1, 1], [], []>} : vector<8x8xf32>, vector<8x8xf32>, vector<8x8xf32> -> vector<8x8xf32>
    %cst_123 = arith.constant 5.000000e-01 : f32
    %370 = vector.broadcast %cst_123 : f32 to vector<8x8xf32>
    %371 = arith.mulf %370, %369 : vector<8x8xf32>
    %372 = arith.subf %368, %371 : vector<8x8xf32>
    %cst_124 = arith.constant dense<0.000000e+00> : vector<8x8xf32>
    %373 = tpu.matmul %365, %372, %cst_124 {dimension_numbers = #tpu.dot_dimension_numbers<[1], [0], [0], [1], [0, 0, 1, 1], [], []>} : vector<8x8xf32>, vector<8x8xf32>, vector<8x8xf32> -> vector<8x8xf32>
    %cst_125 = arith.constant dense<0.000000e+00> : vector<8x8xf32>
    %374 = tpu.matmul %372, %366, %cst_125 {dimension_numbers = #tpu.dot_dimension_numbers<[1], [0], [0], [1], [0, 0, 1, 1], [], []>} : vector<8x8xf32>, vector<8x8xf32>, vector<8x8xf32> -> vector<8x8xf32>
    %cst_126 = arith.constant 1.500000e+00 : f32
    %375 = vector.broadcast %cst_126 : f32 to vector<8x8xf32>
    %376 = arith.mulf %375, %16 : vector<8x8xf32>
    %cst_127 = arith.constant dense<0.000000e+00> : vector<8x8xf32>
    %377 = tpu.matmul %374, %373, %cst_127 {dimension_numbers = #tpu.dot_dimension_numbers<[1], [0], [0], [1], [0, 0, 1, 1], [], []>} : vector<8x8xf32>, vector<8x8xf32>, vector<8x8xf32> -> vector<8x8xf32>
    %cst_128 = arith.constant 5.000000e-01 : f32
    %378 = vector.broadcast %cst_128 : f32 to vector<8x8xf32>
    %379 = arith.mulf %378, %377 : vector<8x8xf32>
    %380 = arith.subf %376, %379 : vector<8x8xf32>
    %cst_129 = arith.constant dense<0.000000e+00> : vector<8x8xf32>
    %381 = tpu.matmul %373, %380, %cst_129 {dimension_numbers = #tpu.dot_dimension_numbers<[1], [0], [0], [1], [0, 0, 1, 1], [], []>} : vector<8x8xf32>, vector<8x8xf32>, vector<8x8xf32> -> vector<8x8xf32>
    %cst_130 = arith.constant dense<0.000000e+00> : vector<8x8xf32>
    %382 = tpu.matmul %380, %374, %cst_130 {dimension_numbers = #tpu.dot_dimension_numbers<[1], [0], [0], [1], [0, 0, 1, 1], [], []>} : vector<8x8xf32>, vector<8x8xf32>, vector<8x8xf32> -> vector<8x8xf32>
    %cst_131 = arith.constant 1.500000e+00 : f32
    %383 = vector.broadcast %cst_131 : f32 to vector<8x8xf32>
    %384 = arith.mulf %383, %16 : vector<8x8xf32>
    %cst_132 = arith.constant dense<0.000000e+00> : vector<8x8xf32>
    %385 = tpu.matmul %382, %381, %cst_132 {dimension_numbers = #tpu.dot_dimension_numbers<[1], [0], [0], [1], [0, 0, 1, 1], [], []>} : vector<8x8xf32>, vector<8x8xf32>, vector<8x8xf32> -> vector<8x8xf32>
    %cst_133 = arith.constant 5.000000e-01 : f32
    %386 = vector.broadcast %cst_133 : f32 to vector<8x8xf32>
    %387 = arith.mulf %386, %385 : vector<8x8xf32>
    %388 = arith.subf %384, %387 : vector<8x8xf32>
    %cst_134 = arith.constant dense<0.000000e+00> : vector<8x8xf32>
    %389 = tpu.matmul %381, %388, %cst_134 {dimension_numbers = #tpu.dot_dimension_numbers<[1], [0], [0], [1], [0, 0, 1, 1], [], []>} : vector<8x8xf32>, vector<8x8xf32>, vector<8x8xf32> -> vector<8x8xf32>
    %cst_135 = arith.constant dense<0.000000e+00> : vector<8x8xf32>
    %390 = tpu.matmul %388, %382, %cst_135 {dimension_numbers = #tpu.dot_dimension_numbers<[1], [0], [0], [1], [0, 0, 1, 1], [], []>} : vector<8x8xf32>, vector<8x8xf32>, vector<8x8xf32> -> vector<8x8xf32>
    %cst_136 = arith.constant 1.500000e+00 : f32
    %391 = vector.broadcast %cst_136 : f32 to vector<8x8xf32>
    %392 = arith.mulf %391, %16 : vector<8x8xf32>
    %cst_137 = arith.constant dense<0.000000e+00> : vector<8x8xf32>
    %393 = tpu.matmul %390, %389, %cst_137 {dimension_numbers = #tpu.dot_dimension_numbers<[1], [0], [0], [1], [0, 0, 1, 1], [], []>} : vector<8x8xf32>, vector<8x8xf32>, vector<8x8xf32> -> vector<8x8xf32>
    %cst_138 = arith.constant 5.000000e-01 : f32
    %394 = vector.broadcast %cst_138 : f32 to vector<8x8xf32>
    %395 = arith.mulf %394, %393 : vector<8x8xf32>
    %396 = arith.subf %392, %395 : vector<8x8xf32>
    %cst_139 = arith.constant dense<0.000000e+00> : vector<8x8xf32>
    %397 = tpu.matmul %389, %396, %cst_139 {dimension_numbers = #tpu.dot_dimension_numbers<[1], [0], [0], [1], [0, 0, 1, 1], [], []>} : vector<8x8xf32>, vector<8x8xf32>, vector<8x8xf32> -> vector<8x8xf32>
    %cst_140 = arith.constant dense<0.000000e+00> : vector<8x8xf32>
    %398 = tpu.matmul %396, %390, %cst_140 {dimension_numbers = #tpu.dot_dimension_numbers<[1], [0], [0], [1], [0, 0, 1, 1], [], []>} : vector<8x8xf32>, vector<8x8xf32>, vector<8x8xf32> -> vector<8x8xf32>
    %cst_141 = arith.constant 1.500000e+00 : f32
    %399 = vector.broadcast %cst_141 : f32 to vector<8x8xf32>
    %400 = arith.mulf %399, %16 : vector<8x8xf32>
    %cst_142 = arith.constant dense<0.000000e+00> : vector<8x8xf32>
    %401 = tpu.matmul %398, %397, %cst_142 {dimension_numbers = #tpu.dot_dimension_numbers<[1], [0], [0], [1], [0, 0, 1, 1], [], []>} : vector<8x8xf32>, vector<8x8xf32>, vector<8x8xf32> -> vector<8x8xf32>
    %cst_143 = arith.constant 5.000000e-01 : f32
    %402 = vector.broadcast %cst_143 : f32 to vector<8x8xf32>
    %403 = arith.mulf %402, %401 : vector<8x8xf32>
    %404 = arith.subf %400, %403 : vector<8x8xf32>
    %cst_144 = arith.constant dense<0.000000e+00> : vector<8x8xf32>
    %405 = tpu.matmul %397, %404, %cst_144 {dimension_numbers = #tpu.dot_dimension_numbers<[1], [0], [0], [1], [0, 0, 1, 1], [], []>} : vector<8x8xf32>, vector<8x8xf32>, vector<8x8xf32> -> vector<8x8xf32>
    %cst_145 = arith.constant dense<0.000000e+00> : vector<8x8xf32>
    %406 = tpu.matmul %404, %398, %cst_145 {dimension_numbers = #tpu.dot_dimension_numbers<[1], [0], [0], [1], [0, 0, 1, 1], [], []>} : vector<8x8xf32>, vector<8x8xf32>, vector<8x8xf32> -> vector<8x8xf32>
    %cst_146 = arith.constant 1.500000e+00 : f32
    %407 = vector.broadcast %cst_146 : f32 to vector<8x8xf32>
    %408 = arith.mulf %407, %16 : vector<8x8xf32>
    %cst_147 = arith.constant dense<0.000000e+00> : vector<8x8xf32>
    %409 = tpu.matmul %406, %405, %cst_147 {dimension_numbers = #tpu.dot_dimension_numbers<[1], [0], [0], [1], [0, 0, 1, 1], [], []>} : vector<8x8xf32>, vector<8x8xf32>, vector<8x8xf32> -> vector<8x8xf32>
    %cst_148 = arith.constant 5.000000e-01 : f32
    %410 = vector.broadcast %cst_148 : f32 to vector<8x8xf32>
    %411 = arith.mulf %410, %409 : vector<8x8xf32>
    %412 = arith.subf %408, %411 : vector<8x8xf32>
    %cst_149 = arith.constant dense<0.000000e+00> : vector<8x8xf32>
    %413 = tpu.matmul %405, %412, %cst_149 {dimension_numbers = #tpu.dot_dimension_numbers<[1], [0], [0], [1], [0, 0, 1, 1], [], []>} : vector<8x8xf32>, vector<8x8xf32>, vector<8x8xf32> -> vector<8x8xf32>
    %cst_150 = arith.constant dense<0.000000e+00> : vector<8x8xf32>
    %414 = tpu.matmul %412, %406, %cst_150 {dimension_numbers = #tpu.dot_dimension_numbers<[1], [0], [0], [1], [0, 0, 1, 1], [], []>} : vector<8x8xf32>, vector<8x8xf32>, vector<8x8xf32> -> vector<8x8xf32>
    %cst_151 = arith.constant 1.500000e+00 : f32
    %415 = vector.broadcast %cst_151 : f32 to vector<8x8xf32>
    %416 = arith.mulf %415, %16 : vector<8x8xf32>
    %cst_152 = arith.constant dense<0.000000e+00> : vector<8x8xf32>
    %417 = tpu.matmul %414, %413, %cst_152 {dimension_numbers = #tpu.dot_dimension_numbers<[1], [0], [0], [1], [0, 0, 1, 1], [], []>} : vector<8x8xf32>, vector<8x8xf32>, vector<8x8xf32> -> vector<8x8xf32>
    %cst_153 = arith.constant 5.000000e-01 : f32
    %418 = vector.broadcast %cst_153 : f32 to vector<8x8xf32>
    %419 = arith.mulf %418, %417 : vector<8x8xf32>
    %420 = arith.subf %416, %419 : vector<8x8xf32>
    %cst_154 = arith.constant dense<0.000000e+00> : vector<8x8xf32>
    %421 = tpu.matmul %413, %420, %cst_154 {dimension_numbers = #tpu.dot_dimension_numbers<[1], [0], [0], [1], [0, 0, 1, 1], [], []>} : vector<8x8xf32>, vector<8x8xf32>, vector<8x8xf32> -> vector<8x8xf32>
    %422 = math.sqrt %324 : vector<1x1xf32>
    %423 = arith.mulf %421, %16 : vector<8x8xf32>
    %cst_155 = arith.constant dense<0.000000e+00> : vector<8xf32>
    %424 = vector.multi_reduction <add>, %423, %cst_155 [1] : vector<8x8xf32> to vector<8xf32>
    %425 = vector.shape_cast %424 : vector<8xf32> to vector<8x1xf32>
    %cst_156 = arith.constant dense<0.000000e+00> : vector<1xf32>
    %426 = vector.multi_reduction <add>, %425, %cst_156 [0] : vector<8x1xf32> to vector<1xf32>
    %427 = vector.shape_cast %426 : vector<1xf32> to vector<1x1xf32>
    %428 = arith.mulf %422, %427 : vector<1x1xf32>
    %cst_157 = arith.constant 9.99999997E-7 : f32
    %429 = vector.broadcast %cst_157 : f32 to vector<1x1xf32>
    %430 = arith.addf %428, %429 : vector<1x1xf32>
    %431 = tpu.reciprocal %430 {approx = true} : vector<1x1xf32> -> vector<1x1xf32>
    %432 = vector.broadcast %431 : vector<1x1xf32> to vector<8x256xf32>
    %433 = arith.mulf %315, %432 : vector<8x256xf32>
    %434 = arith.truncf %433 : vector<8x256xf32> to vector<8x256xbf16>
    %cst_158 = arith.constant dense<0.000000e+00> : vector<32x8xf32>
    %435 = tpu.matmul %11, %434, %cst_158 {dimension_numbers = #tpu.dot_dimension_numbers<[1], [1], [0], [0], [0, 0, 1, 0], [], []>} : vector<32x256xbf16>, vector<8x256xbf16>, vector<32x8xf32> -> vector<32x8xf32>
    %cst_159 = arith.constant dense<0.000000e+00> : vector<8x8xf32>
    %436 = tpu.matmul %434, %434, %cst_159 {dimension_numbers = #tpu.dot_dimension_numbers<[1], [1], [0], [0], [0, 0, 1, 0], [], []>} : vector<8x256xbf16>, vector<8x256xbf16>, vector<8x8xf32> -> vector<8x8xf32>
    %437 = vector.extract_strided_slice %260 {offsets = [0, 0], sizes = [32, 1], strides = [1, 1]} : vector<32x8xf32> to vector<32x1xf32>
    %438 = vector.extract_strided_slice %436 {offsets = [0, 0], sizes = [1, 8], strides = [1, 1]} : vector<8x8xf32> to vector<1x8xf32>
    %439 = vector.broadcast %437 : vector<32x1xf32> to vector<32x8xf32>
    %440 = vector.broadcast %438 : vector<1x8xf32> to vector<32x8xf32>
    %441 = arith.mulf %439, %440 : vector<32x8xf32>
    %442 = vector.extract_strided_slice %260 {offsets = [0, 1], sizes = [32, 1], strides = [1, 1]} : vector<32x8xf32> to vector<32x1xf32>
    %443 = vector.extract_strided_slice %436 {offsets = [1, 0], sizes = [1, 8], strides = [1, 1]} : vector<8x8xf32> to vector<1x8xf32>
    %444 = vector.broadcast %442 : vector<32x1xf32> to vector<32x8xf32>
    %445 = vector.broadcast %443 : vector<1x8xf32> to vector<32x8xf32>
    %446 = arith.mulf %444, %445 : vector<32x8xf32>
    %447 = arith.addf %441, %446 : vector<32x8xf32>
    %448 = vector.extract_strided_slice %260 {offsets = [0, 2], sizes = [32, 1], strides = [1, 1]} : vector<32x8xf32> to vector<32x1xf32>
    %449 = vector.extract_strided_slice %436 {offsets = [2, 0], sizes = [1, 8], strides = [1, 1]} : vector<8x8xf32> to vector<1x8xf32>
    %450 = vector.broadcast %448 : vector<32x1xf32> to vector<32x8xf32>
    %451 = vector.broadcast %449 : vector<1x8xf32> to vector<32x8xf32>
    %452 = arith.mulf %450, %451 : vector<32x8xf32>
    %453 = arith.addf %447, %452 : vector<32x8xf32>
    %454 = vector.extract_strided_slice %260 {offsets = [0, 3], sizes = [32, 1], strides = [1, 1]} : vector<32x8xf32> to vector<32x1xf32>
    %455 = vector.extract_strided_slice %436 {offsets = [3, 0], sizes = [1, 8], strides = [1, 1]} : vector<8x8xf32> to vector<1x8xf32>
    %456 = vector.broadcast %454 : vector<32x1xf32> to vector<32x8xf32>
    %457 = vector.broadcast %455 : vector<1x8xf32> to vector<32x8xf32>
    %458 = arith.mulf %456, %457 : vector<32x8xf32>
    %459 = arith.addf %453, %458 : vector<32x8xf32>
    %460 = vector.extract_strided_slice %260 {offsets = [0, 4], sizes = [32, 1], strides = [1, 1]} : vector<32x8xf32> to vector<32x1xf32>
    %461 = vector.extract_strided_slice %436 {offsets = [4, 0], sizes = [1, 8], strides = [1, 1]} : vector<8x8xf32> to vector<1x8xf32>
    %462 = vector.broadcast %460 : vector<32x1xf32> to vector<32x8xf32>
    %463 = vector.broadcast %461 : vector<1x8xf32> to vector<32x8xf32>
    %464 = arith.mulf %462, %463 : vector<32x8xf32>
    %465 = arith.addf %459, %464 : vector<32x8xf32>
    %466 = vector.extract_strided_slice %260 {offsets = [0, 5], sizes = [32, 1], strides = [1, 1]} : vector<32x8xf32> to vector<32x1xf32>
    %467 = vector.extract_strided_slice %436 {offsets = [5, 0], sizes = [1, 8], strides = [1, 1]} : vector<8x8xf32> to vector<1x8xf32>
    %468 = vector.broadcast %466 : vector<32x1xf32> to vector<32x8xf32>
    %469 = vector.broadcast %467 : vector<1x8xf32> to vector<32x8xf32>
    %470 = arith.mulf %468, %469 : vector<32x8xf32>
    %471 = arith.addf %465, %470 : vector<32x8xf32>
    %472 = vector.extract_strided_slice %260 {offsets = [0, 6], sizes = [32, 1], strides = [1, 1]} : vector<32x8xf32> to vector<32x1xf32>
    %473 = vector.extract_strided_slice %436 {offsets = [6, 0], sizes = [1, 8], strides = [1, 1]} : vector<8x8xf32> to vector<1x8xf32>
    %474 = vector.broadcast %472 : vector<32x1xf32> to vector<32x8xf32>
    %475 = vector.broadcast %473 : vector<1x8xf32> to vector<32x8xf32>
    %476 = arith.mulf %474, %475 : vector<32x8xf32>
    %477 = arith.addf %471, %476 : vector<32x8xf32>
    %478 = vector.extract_strided_slice %260 {offsets = [0, 7], sizes = [32, 1], strides = [1, 1]} : vector<32x8xf32> to vector<32x1xf32>
    %479 = vector.extract_strided_slice %436 {offsets = [7, 0], sizes = [1, 8], strides = [1, 1]} : vector<8x8xf32> to vector<1x8xf32>
    %480 = vector.broadcast %478 : vector<32x1xf32> to vector<32x8xf32>
    %481 = vector.broadcast %479 : vector<1x8xf32> to vector<32x8xf32>
    %482 = arith.mulf %480, %481 : vector<32x8xf32>
    %483 = arith.addf %477, %482 : vector<32x8xf32>
    %484 = arith.mulf %260, %435 : vector<32x8xf32>
    %cst_160 = arith.constant 9.99999997E-7 : f32
    %485 = vector.broadcast %cst_160 : f32 to vector<32x8xf32>
    %486 = arith.addf %483, %485 : vector<32x8xf32>
    %487 = tpu.reciprocal %486 {approx = true} : vector<32x8xf32> -> vector<32x8xf32>
    %488 = arith.mulf %484, %487 : vector<32x8xf32>
    %489 = arith.truncf %488 : vector<32x8xf32> to vector<32x8xbf16>
    %cst_161 = arith.constant dense<0.000000e+00> : vector<8x256xf32>
    %490 = tpu.matmul %489, %11, %cst_161 {dimension_numbers = #tpu.dot_dimension_numbers<[0], [0], [1], [1], [0, 1, 1, 1], [], []>} : vector<32x8xbf16>, vector<32x256xbf16>, vector<8x256xf32> -> vector<8x256xf32>
    %cst_162 = arith.constant dense<0.000000e+00> : vector<8x8xf32>
    %491 = tpu.matmul %488, %488, %cst_162 {dimension_numbers = #tpu.dot_dimension_numbers<[0], [0], [1], [1], [0, 1, 1, 1], [], []>} : vector<32x8xf32>, vector<32x8xf32>, vector<8x8xf32> -> vector<8x8xf32>
    %492 = vector.extract_strided_slice %491 {offsets = [0, 0], sizes = [8, 1], strides = [1, 1]} : vector<8x8xf32> to vector<8x1xf32>
    %493 = vector.extract_strided_slice %433 {offsets = [0, 0], sizes = [1, 256], strides = [1, 1]} : vector<8x256xf32> to vector<1x256xf32>
    %494 = vector.broadcast %492 : vector<8x1xf32> to vector<8x256xf32>
    %495 = vector.broadcast %493 : vector<1x256xf32> to vector<8x256xf32>
    %496 = arith.mulf %494, %495 : vector<8x256xf32>
    %497 = vector.extract_strided_slice %491 {offsets = [0, 1], sizes = [8, 1], strides = [1, 1]} : vector<8x8xf32> to vector<8x1xf32>
    %498 = vector.extract_strided_slice %433 {offsets = [1, 0], sizes = [1, 256], strides = [1, 1]} : vector<8x256xf32> to vector<1x256xf32>
    %499 = vector.broadcast %497 : vector<8x1xf32> to vector<8x256xf32>
    %500 = vector.broadcast %498 : vector<1x256xf32> to vector<8x256xf32>
    %501 = arith.mulf %499, %500 : vector<8x256xf32>
    %502 = arith.addf %496, %501 : vector<8x256xf32>
    %503 = vector.extract_strided_slice %491 {offsets = [0, 2], sizes = [8, 1], strides = [1, 1]} : vector<8x8xf32> to vector<8x1xf32>
    %504 = vector.extract_strided_slice %433 {offsets = [2, 0], sizes = [1, 256], strides = [1, 1]} : vector<8x256xf32> to vector<1x256xf32>
    %505 = vector.broadcast %503 : vector<8x1xf32> to vector<8x256xf32>
    %506 = vector.broadcast %504 : vector<1x256xf32> to vector<8x256xf32>
    %507 = arith.mulf %505, %506 : vector<8x256xf32>
    %508 = arith.addf %502, %507 : vector<8x256xf32>
    %509 = vector.extract_strided_slice %491 {offsets = [0, 3], sizes = [8, 1], strides = [1, 1]} : vector<8x8xf32> to vector<8x1xf32>
    %510 = vector.extract_strided_slice %433 {offsets = [3, 0], sizes = [1, 256], strides = [1, 1]} : vector<8x256xf32> to vector<1x256xf32>
    %511 = vector.broadcast %509 : vector<8x1xf32> to vector<8x256xf32>
    %512 = vector.broadcast %510 : vector<1x256xf32> to vector<8x256xf32>
    %513 = arith.mulf %511, %512 : vector<8x256xf32>
    %514 = arith.addf %508, %513 : vector<8x256xf32>
    %515 = vector.extract_strided_slice %491 {offsets = [0, 4], sizes = [8, 1], strides = [1, 1]} : vector<8x8xf32> to vector<8x1xf32>
    %516 = vector.extract_strided_slice %433 {offsets = [4, 0], sizes = [1, 256], strides = [1, 1]} : vector<8x256xf32> to vector<1x256xf32>
    %517 = vector.broadcast %515 : vector<8x1xf32> to vector<8x256xf32>
    %518 = vector.broadcast %516 : vector<1x256xf32> to vector<8x256xf32>
    %519 = arith.mulf %517, %518 : vector<8x256xf32>
    %520 = arith.addf %514, %519 : vector<8x256xf32>
    %521 = vector.extract_strided_slice %491 {offsets = [0, 5], sizes = [8, 1], strides = [1, 1]} : vector<8x8xf32> to vector<8x1xf32>
    %522 = vector.extract_strided_slice %433 {offsets = [5, 0], sizes = [1, 256], strides = [1, 1]} : vector<8x256xf32> to vector<1x256xf32>
    %523 = vector.broadcast %521 : vector<8x1xf32> to vector<8x256xf32>
    %524 = vector.broadcast %522 : vector<1x256xf32> to vector<8x256xf32>
    %525 = arith.mulf %523, %524 : vector<8x256xf32>
    %526 = arith.addf %520, %525 : vector<8x256xf32>
    %527 = vector.extract_strided_slice %491 {offsets = [0, 6], sizes = [8, 1], strides = [1, 1]} : vector<8x8xf32> to vector<8x1xf32>
    %528 = vector.extract_strided_slice %433 {offsets = [6, 0], sizes = [1, 256], strides = [1, 1]} : vector<8x256xf32> to vector<1x256xf32>
    %529 = vector.broadcast %527 : vector<8x1xf32> to vector<8x256xf32>
    %530 = vector.broadcast %528 : vector<1x256xf32> to vector<8x256xf32>
    %531 = arith.mulf %529, %530 : vector<8x256xf32>
    %532 = arith.addf %526, %531 : vector<8x256xf32>
    %533 = vector.extract_strided_slice %491 {offsets = [0, 7], sizes = [8, 1], strides = [1, 1]} : vector<8x8xf32> to vector<8x1xf32>
    %534 = vector.extract_strided_slice %433 {offsets = [7, 0], sizes = [1, 256], strides = [1, 1]} : vector<8x256xf32> to vector<1x256xf32>
    %535 = vector.broadcast %533 : vector<8x1xf32> to vector<8x256xf32>
    %536 = vector.broadcast %534 : vector<1x256xf32> to vector<8x256xf32>
    %537 = arith.mulf %535, %536 : vector<8x256xf32>
    %538 = arith.addf %532, %537 : vector<8x256xf32>
    %539 = arith.mulf %433, %490 : vector<8x256xf32>
    %cst_163 = arith.constant 9.99999997E-7 : f32
    %540 = vector.broadcast %cst_163 : f32 to vector<8x256xf32>
    %541 = arith.addf %538, %540 : vector<8x256xf32>
    %542 = tpu.reciprocal %541 {approx = true} : vector<8x256xf32> -> vector<8x256xf32>
    %543 = arith.mulf %539, %542 : vector<8x256xf32>
    %cst_164 = arith.constant dense<0.000000e+00> : vector<8x8xf32>
    %544 = tpu.matmul %543, %543, %cst_164 {dimension_numbers = #tpu.dot_dimension_numbers<[1], [1], [0], [0], [0, 0, 1, 0], [], []>} : vector<8x256xf32>, vector<8x256xf32>, vector<8x8xf32> -> vector<8x8xf32>
    %545 = arith.mulf %544, %544 : vector<8x8xf32>
    %cst_165 = arith.constant dense<0.000000e+00> : vector<8xf32>
    %546 = vector.multi_reduction <add>, %545, %cst_165 [1] : vector<8x8xf32> to vector<8xf32>
    %547 = vector.shape_cast %546 : vector<8xf32> to vector<8x1xf32>
    %cst_166 = arith.constant dense<0.000000e+00> : vector<1xf32>
    %548 = vector.multi_reduction <add>, %547, %cst_166 [0] : vector<8x1xf32> to vector<1xf32>
    %549 = vector.shape_cast %548 : vector<1xf32> to vector<1x1xf32>
    %550 = math.sqrt %549 : vector<1x1xf32>
    %cst_167 = arith.constant 1.000000e-30 : f32
    %551 = vector.broadcast %cst_167 : f32 to vector<1x1xf32>
    %552 = arith.addf %550, %551 : vector<1x1xf32>
    %553 = vector.broadcast %552 : vector<1x1xf32> to vector<8x8xf32>
    %554 = arith.divf %544, %553 : vector<8x8xf32>
    %cst_168 = arith.constant 1.500000e+00 : f32
    %555 = vector.broadcast %cst_168 : f32 to vector<8x8xf32>
    %556 = arith.mulf %555, %16 : vector<8x8xf32>
    %cst_169 = arith.constant dense<0.000000e+00> : vector<8x8xf32>
    %557 = tpu.matmul %16, %554, %cst_169 {dimension_numbers = #tpu.dot_dimension_numbers<[1], [0], [0], [1], [0, 0, 1, 1], [], []>} : vector<8x8xf32>, vector<8x8xf32>, vector<8x8xf32> -> vector<8x8xf32>
    %cst_170 = arith.constant 5.000000e-01 : f32
    %558 = vector.broadcast %cst_170 : f32 to vector<8x8xf32>
    %559 = arith.mulf %558, %557 : vector<8x8xf32>
    %560 = arith.subf %556, %559 : vector<8x8xf32>
    %cst_171 = arith.constant dense<0.000000e+00> : vector<8x8xf32>
    %561 = tpu.matmul %554, %560, %cst_171 {dimension_numbers = #tpu.dot_dimension_numbers<[1], [0], [0], [1], [0, 0, 1, 1], [], []>} : vector<8x8xf32>, vector<8x8xf32>, vector<8x8xf32> -> vector<8x8xf32>
    %cst_172 = arith.constant dense<0.000000e+00> : vector<8x8xf32>
    %562 = tpu.matmul %560, %16, %cst_172 {dimension_numbers = #tpu.dot_dimension_numbers<[1], [0], [0], [1], [0, 0, 1, 1], [], []>} : vector<8x8xf32>, vector<8x8xf32>, vector<8x8xf32> -> vector<8x8xf32>
    %cst_173 = arith.constant 1.500000e+00 : f32
    %563 = vector.broadcast %cst_173 : f32 to vector<8x8xf32>
    %564 = arith.mulf %563, %16 : vector<8x8xf32>
    %cst_174 = arith.constant dense<0.000000e+00> : vector<8x8xf32>
    %565 = tpu.matmul %562, %561, %cst_174 {dimension_numbers = #tpu.dot_dimension_numbers<[1], [0], [0], [1], [0, 0, 1, 1], [], []>} : vector<8x8xf32>, vector<8x8xf32>, vector<8x8xf32> -> vector<8x8xf32>
    %cst_175 = arith.constant 5.000000e-01 : f32
    %566 = vector.broadcast %cst_175 : f32 to vector<8x8xf32>
    %567 = arith.mulf %566, %565 : vector<8x8xf32>
    %568 = arith.subf %564, %567 : vector<8x8xf32>
    %cst_176 = arith.constant dense<0.000000e+00> : vector<8x8xf32>
    %569 = tpu.matmul %561, %568, %cst_176 {dimension_numbers = #tpu.dot_dimension_numbers<[1], [0], [0], [1], [0, 0, 1, 1], [], []>} : vector<8x8xf32>, vector<8x8xf32>, vector<8x8xf32> -> vector<8x8xf32>
    %cst_177 = arith.constant dense<0.000000e+00> : vector<8x8xf32>
    %570 = tpu.matmul %568, %562, %cst_177 {dimension_numbers = #tpu.dot_dimension_numbers<[1], [0], [0], [1], [0, 0, 1, 1], [], []>} : vector<8x8xf32>, vector<8x8xf32>, vector<8x8xf32> -> vector<8x8xf32>
    %cst_178 = arith.constant 1.500000e+00 : f32
    %571 = vector.broadcast %cst_178 : f32 to vector<8x8xf32>
    %572 = arith.mulf %571, %16 : vector<8x8xf32>
    %cst_179 = arith.constant dense<0.000000e+00> : vector<8x8xf32>
    %573 = tpu.matmul %570, %569, %cst_179 {dimension_numbers = #tpu.dot_dimension_numbers<[1], [0], [0], [1], [0, 0, 1, 1], [], []>} : vector<8x8xf32>, vector<8x8xf32>, vector<8x8xf32> -> vector<8x8xf32>
    %cst_180 = arith.constant 5.000000e-01 : f32
    %574 = vector.broadcast %cst_180 : f32 to vector<8x8xf32>
    %575 = arith.mulf %574, %573 : vector<8x8xf32>
    %576 = arith.subf %572, %575 : vector<8x8xf32>
    %cst_181 = arith.constant dense<0.000000e+00> : vector<8x8xf32>
    %577 = tpu.matmul %569, %576, %cst_181 {dimension_numbers = #tpu.dot_dimension_numbers<[1], [0], [0], [1], [0, 0, 1, 1], [], []>} : vector<8x8xf32>, vector<8x8xf32>, vector<8x8xf32> -> vector<8x8xf32>
    %cst_182 = arith.constant dense<0.000000e+00> : vector<8x8xf32>
    %578 = tpu.matmul %576, %570, %cst_182 {dimension_numbers = #tpu.dot_dimension_numbers<[1], [0], [0], [1], [0, 0, 1, 1], [], []>} : vector<8x8xf32>, vector<8x8xf32>, vector<8x8xf32> -> vector<8x8xf32>
    %cst_183 = arith.constant 1.500000e+00 : f32
    %579 = vector.broadcast %cst_183 : f32 to vector<8x8xf32>
    %580 = arith.mulf %579, %16 : vector<8x8xf32>
    %cst_184 = arith.constant dense<0.000000e+00> : vector<8x8xf32>
    %581 = tpu.matmul %578, %577, %cst_184 {dimension_numbers = #tpu.dot_dimension_numbers<[1], [0], [0], [1], [0, 0, 1, 1], [], []>} : vector<8x8xf32>, vector<8x8xf32>, vector<8x8xf32> -> vector<8x8xf32>
    %cst_185 = arith.constant 5.000000e-01 : f32
    %582 = vector.broadcast %cst_185 : f32 to vector<8x8xf32>
    %583 = arith.mulf %582, %581 : vector<8x8xf32>
    %584 = arith.subf %580, %583 : vector<8x8xf32>
    %cst_186 = arith.constant dense<0.000000e+00> : vector<8x8xf32>
    %585 = tpu.matmul %577, %584, %cst_186 {dimension_numbers = #tpu.dot_dimension_numbers<[1], [0], [0], [1], [0, 0, 1, 1], [], []>} : vector<8x8xf32>, vector<8x8xf32>, vector<8x8xf32> -> vector<8x8xf32>
    %cst_187 = arith.constant dense<0.000000e+00> : vector<8x8xf32>
    %586 = tpu.matmul %584, %578, %cst_187 {dimension_numbers = #tpu.dot_dimension_numbers<[1], [0], [0], [1], [0, 0, 1, 1], [], []>} : vector<8x8xf32>, vector<8x8xf32>, vector<8x8xf32> -> vector<8x8xf32>
    %cst_188 = arith.constant 1.500000e+00 : f32
    %587 = vector.broadcast %cst_188 : f32 to vector<8x8xf32>
    %588 = arith.mulf %587, %16 : vector<8x8xf32>
    %cst_189 = arith.constant dense<0.000000e+00> : vector<8x8xf32>
    %589 = tpu.matmul %586, %585, %cst_189 {dimension_numbers = #tpu.dot_dimension_numbers<[1], [0], [0], [1], [0, 0, 1, 1], [], []>} : vector<8x8xf32>, vector<8x8xf32>, vector<8x8xf32> -> vector<8x8xf32>
    %cst_190 = arith.constant 5.000000e-01 : f32
    %590 = vector.broadcast %cst_190 : f32 to vector<8x8xf32>
    %591 = arith.mulf %590, %589 : vector<8x8xf32>
    %592 = arith.subf %588, %591 : vector<8x8xf32>
    %cst_191 = arith.constant dense<0.000000e+00> : vector<8x8xf32>
    %593 = tpu.matmul %585, %592, %cst_191 {dimension_numbers = #tpu.dot_dimension_numbers<[1], [0], [0], [1], [0, 0, 1, 1], [], []>} : vector<8x8xf32>, vector<8x8xf32>, vector<8x8xf32> -> vector<8x8xf32>
    %cst_192 = arith.constant dense<0.000000e+00> : vector<8x8xf32>
    %594 = tpu.matmul %592, %586, %cst_192 {dimension_numbers = #tpu.dot_dimension_numbers<[1], [0], [0], [1], [0, 0, 1, 1], [], []>} : vector<8x8xf32>, vector<8x8xf32>, vector<8x8xf32> -> vector<8x8xf32>
    %cst_193 = arith.constant 1.500000e+00 : f32
    %595 = vector.broadcast %cst_193 : f32 to vector<8x8xf32>
    %596 = arith.mulf %595, %16 : vector<8x8xf32>
    %cst_194 = arith.constant dense<0.000000e+00> : vector<8x8xf32>
    %597 = tpu.matmul %594, %593, %cst_194 {dimension_numbers = #tpu.dot_dimension_numbers<[1], [0], [0], [1], [0, 0, 1, 1], [], []>} : vector<8x8xf32>, vector<8x8xf32>, vector<8x8xf32> -> vector<8x8xf32>
    %cst_195 = arith.constant 5.000000e-01 : f32
    %598 = vector.broadcast %cst_195 : f32 to vector<8x8xf32>
    %599 = arith.mulf %598, %597 : vector<8x8xf32>
    %600 = arith.subf %596, %599 : vector<8x8xf32>
    %cst_196 = arith.constant dense<0.000000e+00> : vector<8x8xf32>
    %601 = tpu.matmul %593, %600, %cst_196 {dimension_numbers = #tpu.dot_dimension_numbers<[1], [0], [0], [1], [0, 0, 1, 1], [], []>} : vector<8x8xf32>, vector<8x8xf32>, vector<8x8xf32> -> vector<8x8xf32>
    %cst_197 = arith.constant dense<0.000000e+00> : vector<8x8xf32>
    %602 = tpu.matmul %600, %594, %cst_197 {dimension_numbers = #tpu.dot_dimension_numbers<[1], [0], [0], [1], [0, 0, 1, 1], [], []>} : vector<8x8xf32>, vector<8x8xf32>, vector<8x8xf32> -> vector<8x8xf32>
    %cst_198 = arith.constant 1.500000e+00 : f32
    %603 = vector.broadcast %cst_198 : f32 to vector<8x8xf32>
    %604 = arith.mulf %603, %16 : vector<8x8xf32>
    %cst_199 = arith.constant dense<0.000000e+00> : vector<8x8xf32>
    %605 = tpu.matmul %602, %601, %cst_199 {dimension_numbers = #tpu.dot_dimension_numbers<[1], [0], [0], [1], [0, 0, 1, 1], [], []>} : vector<8x8xf32>, vector<8x8xf32>, vector<8x8xf32> -> vector<8x8xf32>
    %cst_200 = arith.constant 5.000000e-01 : f32
    %606 = vector.broadcast %cst_200 : f32 to vector<8x8xf32>
    %607 = arith.mulf %606, %605 : vector<8x8xf32>
    %608 = arith.subf %604, %607 : vector<8x8xf32>
    %cst_201 = arith.constant dense<0.000000e+00> : vector<8x8xf32>
    %609 = tpu.matmul %601, %608, %cst_201 {dimension_numbers = #tpu.dot_dimension_numbers<[1], [0], [0], [1], [0, 0, 1, 1], [], []>} : vector<8x8xf32>, vector<8x8xf32>, vector<8x8xf32> -> vector<8x8xf32>
    %cst_202 = arith.constant dense<0.000000e+00> : vector<8x8xf32>
    %610 = tpu.matmul %608, %602, %cst_202 {dimension_numbers = #tpu.dot_dimension_numbers<[1], [0], [0], [1], [0, 0, 1, 1], [], []>} : vector<8x8xf32>, vector<8x8xf32>, vector<8x8xf32> -> vector<8x8xf32>
    %cst_203 = arith.constant 1.500000e+00 : f32
    %611 = vector.broadcast %cst_203 : f32 to vector<8x8xf32>
    %612 = arith.mulf %611, %16 : vector<8x8xf32>
    %cst_204 = arith.constant dense<0.000000e+00> : vector<8x8xf32>
    %613 = tpu.matmul %610, %609, %cst_204 {dimension_numbers = #tpu.dot_dimension_numbers<[1], [0], [0], [1], [0, 0, 1, 1], [], []>} : vector<8x8xf32>, vector<8x8xf32>, vector<8x8xf32> -> vector<8x8xf32>
    %cst_205 = arith.constant 5.000000e-01 : f32
    %614 = vector.broadcast %cst_205 : f32 to vector<8x8xf32>
    %615 = arith.mulf %614, %613 : vector<8x8xf32>
    %616 = arith.subf %612, %615 : vector<8x8xf32>
    %cst_206 = arith.constant dense<0.000000e+00> : vector<8x8xf32>
    %617 = tpu.matmul %609, %616, %cst_206 {dimension_numbers = #tpu.dot_dimension_numbers<[1], [0], [0], [1], [0, 0, 1, 1], [], []>} : vector<8x8xf32>, vector<8x8xf32>, vector<8x8xf32> -> vector<8x8xf32>
    %cst_207 = arith.constant dense<0.000000e+00> : vector<8x8xf32>
    %618 = tpu.matmul %616, %610, %cst_207 {dimension_numbers = #tpu.dot_dimension_numbers<[1], [0], [0], [1], [0, 0, 1, 1], [], []>} : vector<8x8xf32>, vector<8x8xf32>, vector<8x8xf32> -> vector<8x8xf32>
    %cst_208 = arith.constant 1.500000e+00 : f32
    %619 = vector.broadcast %cst_208 : f32 to vector<8x8xf32>
    %620 = arith.mulf %619, %16 : vector<8x8xf32>
    %cst_209 = arith.constant dense<0.000000e+00> : vector<8x8xf32>
    %621 = tpu.matmul %618, %617, %cst_209 {dimension_numbers = #tpu.dot_dimension_numbers<[1], [0], [0], [1], [0, 0, 1, 1], [], []>} : vector<8x8xf32>, vector<8x8xf32>, vector<8x8xf32> -> vector<8x8xf32>
    %cst_210 = arith.constant 5.000000e-01 : f32
    %622 = vector.broadcast %cst_210 : f32 to vector<8x8xf32>
    %623 = arith.mulf %622, %621 : vector<8x8xf32>
    %624 = arith.subf %620, %623 : vector<8x8xf32>
    %cst_211 = arith.constant dense<0.000000e+00> : vector<8x8xf32>
    %625 = tpu.matmul %617, %624, %cst_211 {dimension_numbers = #tpu.dot_dimension_numbers<[1], [0], [0], [1], [0, 0, 1, 1], [], []>} : vector<8x8xf32>, vector<8x8xf32>, vector<8x8xf32> -> vector<8x8xf32>
    %cst_212 = arith.constant dense<0.000000e+00> : vector<8x8xf32>
    %626 = tpu.matmul %624, %618, %cst_212 {dimension_numbers = #tpu.dot_dimension_numbers<[1], [0], [0], [1], [0, 0, 1, 1], [], []>} : vector<8x8xf32>, vector<8x8xf32>, vector<8x8xf32> -> vector<8x8xf32>
    %cst_213 = arith.constant 1.500000e+00 : f32
    %627 = vector.broadcast %cst_213 : f32 to vector<8x8xf32>
    %628 = arith.mulf %627, %16 : vector<8x8xf32>
    %cst_214 = arith.constant dense<0.000000e+00> : vector<8x8xf32>
    %629 = tpu.matmul %626, %625, %cst_214 {dimension_numbers = #tpu.dot_dimension_numbers<[1], [0], [0], [1], [0, 0, 1, 1], [], []>} : vector<8x8xf32>, vector<8x8xf32>, vector<8x8xf32> -> vector<8x8xf32>
    %cst_215 = arith.constant 5.000000e-01 : f32
    %630 = vector.broadcast %cst_215 : f32 to vector<8x8xf32>
    %631 = arith.mulf %630, %629 : vector<8x8xf32>
    %632 = arith.subf %628, %631 : vector<8x8xf32>
    %cst_216 = arith.constant dense<0.000000e+00> : vector<8x8xf32>
    %633 = tpu.matmul %625, %632, %cst_216 {dimension_numbers = #tpu.dot_dimension_numbers<[1], [0], [0], [1], [0, 0, 1, 1], [], []>} : vector<8x8xf32>, vector<8x8xf32>, vector<8x8xf32> -> vector<8x8xf32>
    %cst_217 = arith.constant dense<0.000000e+00> : vector<8x8xf32>
    %634 = tpu.matmul %632, %626, %cst_217 {dimension_numbers = #tpu.dot_dimension_numbers<[1], [0], [0], [1], [0, 0, 1, 1], [], []>} : vector<8x8xf32>, vector<8x8xf32>, vector<8x8xf32> -> vector<8x8xf32>
    %cst_218 = arith.constant 1.500000e+00 : f32
    %635 = vector.broadcast %cst_218 : f32 to vector<8x8xf32>
    %636 = arith.mulf %635, %16 : vector<8x8xf32>
    %cst_219 = arith.constant dense<0.000000e+00> : vector<8x8xf32>
    %637 = tpu.matmul %634, %633, %cst_219 {dimension_numbers = #tpu.dot_dimension_numbers<[1], [0], [0], [1], [0, 0, 1, 1], [], []>} : vector<8x8xf32>, vector<8x8xf32>, vector<8x8xf32> -> vector<8x8xf32>
    %cst_220 = arith.constant 5.000000e-01 : f32
    %638 = vector.broadcast %cst_220 : f32 to vector<8x8xf32>
    %639 = arith.mulf %638, %637 : vector<8x8xf32>
    %640 = arith.subf %636, %639 : vector<8x8xf32>
    %cst_221 = arith.constant dense<0.000000e+00> : vector<8x8xf32>
    %641 = tpu.matmul %633, %640, %cst_221 {dimension_numbers = #tpu.dot_dimension_numbers<[1], [0], [0], [1], [0, 0, 1, 1], [], []>} : vector<8x8xf32>, vector<8x8xf32>, vector<8x8xf32> -> vector<8x8xf32>
    %cst_222 = arith.constant dense<0.000000e+00> : vector<8x8xf32>
    %642 = tpu.matmul %640, %634, %cst_222 {dimension_numbers = #tpu.dot_dimension_numbers<[1], [0], [0], [1], [0, 0, 1, 1], [], []>} : vector<8x8xf32>, vector<8x8xf32>, vector<8x8xf32> -> vector<8x8xf32>
    %cst_223 = arith.constant 1.500000e+00 : f32
    %643 = vector.broadcast %cst_223 : f32 to vector<8x8xf32>
    %644 = arith.mulf %643, %16 : vector<8x8xf32>
    %cst_224 = arith.constant dense<0.000000e+00> : vector<8x8xf32>
    %645 = tpu.matmul %642, %641, %cst_224 {dimension_numbers = #tpu.dot_dimension_numbers<[1], [0], [0], [1], [0, 0, 1, 1], [], []>} : vector<8x8xf32>, vector<8x8xf32>, vector<8x8xf32> -> vector<8x8xf32>
    %cst_225 = arith.constant 5.000000e-01 : f32
    %646 = vector.broadcast %cst_225 : f32 to vector<8x8xf32>
    %647 = arith.mulf %646, %645 : vector<8x8xf32>
    %648 = arith.subf %644, %647 : vector<8x8xf32>
    %cst_226 = arith.constant dense<0.000000e+00> : vector<8x8xf32>
    %649 = tpu.matmul %641, %648, %cst_226 {dimension_numbers = #tpu.dot_dimension_numbers<[1], [0], [0], [1], [0, 0, 1, 1], [], []>} : vector<8x8xf32>, vector<8x8xf32>, vector<8x8xf32> -> vector<8x8xf32>
    %650 = math.sqrt %552 : vector<1x1xf32>
    %651 = arith.mulf %649, %16 : vector<8x8xf32>
    %cst_227 = arith.constant dense<0.000000e+00> : vector<8xf32>
    %652 = vector.multi_reduction <add>, %651, %cst_227 [1] : vector<8x8xf32> to vector<8xf32>
    %653 = vector.shape_cast %652 : vector<8xf32> to vector<8x1xf32>
    %cst_228 = arith.constant dense<0.000000e+00> : vector<1xf32>
    %654 = vector.multi_reduction <add>, %653, %cst_228 [0] : vector<8x1xf32> to vector<1xf32>
    %655 = vector.shape_cast %654 : vector<1xf32> to vector<1x1xf32>
    %656 = arith.mulf %650, %655 : vector<1x1xf32>
    %cst_229 = arith.constant 9.99999997E-7 : f32
    %657 = vector.broadcast %cst_229 : f32 to vector<1x1xf32>
    %658 = arith.addf %656, %657 : vector<1x1xf32>
    %659 = tpu.reciprocal %658 {approx = true} : vector<1x1xf32> -> vector<1x1xf32>
    %660 = vector.broadcast %659 : vector<1x1xf32> to vector<8x256xf32>
    %661 = arith.mulf %543, %660 : vector<8x256xf32>
    %662 = arith.truncf %661 : vector<8x256xf32> to vector<8x256xbf16>
    %cst_230 = arith.constant dense<0.000000e+00> : vector<32x8xf32>
    %663 = tpu.matmul %11, %662, %cst_230 {dimension_numbers = #tpu.dot_dimension_numbers<[1], [1], [0], [0], [0, 0, 1, 0], [], []>} : vector<32x256xbf16>, vector<8x256xbf16>, vector<32x8xf32> -> vector<32x8xf32>
    %cst_231 = arith.constant dense<0.000000e+00> : vector<8x8xf32>
    %664 = tpu.matmul %662, %662, %cst_231 {dimension_numbers = #tpu.dot_dimension_numbers<[1], [1], [0], [0], [0, 0, 1, 0], [], []>} : vector<8x256xbf16>, vector<8x256xbf16>, vector<8x8xf32> -> vector<8x8xf32>
    %665 = vector.extract_strided_slice %488 {offsets = [0, 0], sizes = [32, 1], strides = [1, 1]} : vector<32x8xf32> to vector<32x1xf32>
    %666 = vector.extract_strided_slice %664 {offsets = [0, 0], sizes = [1, 8], strides = [1, 1]} : vector<8x8xf32> to vector<1x8xf32>
    %667 = vector.broadcast %665 : vector<32x1xf32> to vector<32x8xf32>
    %668 = vector.broadcast %666 : vector<1x8xf32> to vector<32x8xf32>
    %669 = arith.mulf %667, %668 : vector<32x8xf32>
    %670 = vector.extract_strided_slice %488 {offsets = [0, 1], sizes = [32, 1], strides = [1, 1]} : vector<32x8xf32> to vector<32x1xf32>
    %671 = vector.extract_strided_slice %664 {offsets = [1, 0], sizes = [1, 8], strides = [1, 1]} : vector<8x8xf32> to vector<1x8xf32>
    %672 = vector.broadcast %670 : vector<32x1xf32> to vector<32x8xf32>
    %673 = vector.broadcast %671 : vector<1x8xf32> to vector<32x8xf32>
    %674 = arith.mulf %672, %673 : vector<32x8xf32>
    %675 = arith.addf %669, %674 : vector<32x8xf32>
    %676 = vector.extract_strided_slice %488 {offsets = [0, 2], sizes = [32, 1], strides = [1, 1]} : vector<32x8xf32> to vector<32x1xf32>
    %677 = vector.extract_strided_slice %664 {offsets = [2, 0], sizes = [1, 8], strides = [1, 1]} : vector<8x8xf32> to vector<1x8xf32>
    %678 = vector.broadcast %676 : vector<32x1xf32> to vector<32x8xf32>
    %679 = vector.broadcast %677 : vector<1x8xf32> to vector<32x8xf32>
    %680 = arith.mulf %678, %679 : vector<32x8xf32>
    %681 = arith.addf %675, %680 : vector<32x8xf32>
    %682 = vector.extract_strided_slice %488 {offsets = [0, 3], sizes = [32, 1], strides = [1, 1]} : vector<32x8xf32> to vector<32x1xf32>
    %683 = vector.extract_strided_slice %664 {offsets = [3, 0], sizes = [1, 8], strides = [1, 1]} : vector<8x8xf32> to vector<1x8xf32>
    %684 = vector.broadcast %682 : vector<32x1xf32> to vector<32x8xf32>
    %685 = vector.broadcast %683 : vector<1x8xf32> to vector<32x8xf32>
    %686 = arith.mulf %684, %685 : vector<32x8xf32>
    %687 = arith.addf %681, %686 : vector<32x8xf32>
    %688 = vector.extract_strided_slice %488 {offsets = [0, 4], sizes = [32, 1], strides = [1, 1]} : vector<32x8xf32> to vector<32x1xf32>
    %689 = vector.extract_strided_slice %664 {offsets = [4, 0], sizes = [1, 8], strides = [1, 1]} : vector<8x8xf32> to vector<1x8xf32>
    %690 = vector.broadcast %688 : vector<32x1xf32> to vector<32x8xf32>
    %691 = vector.broadcast %689 : vector<1x8xf32> to vector<32x8xf32>
    %692 = arith.mulf %690, %691 : vector<32x8xf32>
    %693 = arith.addf %687, %692 : vector<32x8xf32>
    %694 = vector.extract_strided_slice %488 {offsets = [0, 5], sizes = [32, 1], strides = [1, 1]} : vector<32x8xf32> to vector<32x1xf32>
    %695 = vector.extract_strided_slice %664 {offsets = [5, 0], sizes = [1, 8], strides = [1, 1]} : vector<8x8xf32> to vector<1x8xf32>
    %696 = vector.broadcast %694 : vector<32x1xf32> to vector<32x8xf32>
    %697 = vector.broadcast %695 : vector<1x8xf32> to vector<32x8xf32>
    %698 = arith.mulf %696, %697 : vector<32x8xf32>
    %699 = arith.addf %693, %698 : vector<32x8xf32>
    %700 = vector.extract_strided_slice %488 {offsets = [0, 6], sizes = [32, 1], strides = [1, 1]} : vector<32x8xf32> to vector<32x1xf32>
    %701 = vector.extract_strided_slice %664 {offsets = [6, 0], sizes = [1, 8], strides = [1, 1]} : vector<8x8xf32> to vector<1x8xf32>
    %702 = vector.broadcast %700 : vector<32x1xf32> to vector<32x8xf32>
    %703 = vector.broadcast %701 : vector<1x8xf32> to vector<32x8xf32>
    %704 = arith.mulf %702, %703 : vector<32x8xf32>
    %705 = arith.addf %699, %704 : vector<32x8xf32>
    %706 = vector.extract_strided_slice %488 {offsets = [0, 7], sizes = [32, 1], strides = [1, 1]} : vector<32x8xf32> to vector<32x1xf32>
    %707 = vector.extract_strided_slice %664 {offsets = [7, 0], sizes = [1, 8], strides = [1, 1]} : vector<8x8xf32> to vector<1x8xf32>
    %708 = vector.broadcast %706 : vector<32x1xf32> to vector<32x8xf32>
    %709 = vector.broadcast %707 : vector<1x8xf32> to vector<32x8xf32>
    %710 = arith.mulf %708, %709 : vector<32x8xf32>
    %711 = arith.addf %705, %710 : vector<32x8xf32>
    %712 = arith.mulf %488, %663 : vector<32x8xf32>
    %cst_232 = arith.constant 9.99999997E-7 : f32
    %713 = vector.broadcast %cst_232 : f32 to vector<32x8xf32>
    %714 = arith.addf %711, %713 : vector<32x8xf32>
    %715 = tpu.reciprocal %714 {approx = true} : vector<32x8xf32> -> vector<32x8xf32>
    %716 = arith.mulf %712, %715 : vector<32x8xf32>
    %717 = arith.truncf %716 : vector<32x8xf32> to vector<32x8xbf16>
    %cst_233 = arith.constant dense<0.000000e+00> : vector<8x256xf32>
    %718 = tpu.matmul %717, %11, %cst_233 {dimension_numbers = #tpu.dot_dimension_numbers<[0], [0], [1], [1], [0, 1, 1, 1], [], []>} : vector<32x8xbf16>, vector<32x256xbf16>, vector<8x256xf32> -> vector<8x256xf32>
    %cst_234 = arith.constant dense<0.000000e+00> : vector<8x8xf32>
    %719 = tpu.matmul %716, %716, %cst_234 {dimension_numbers = #tpu.dot_dimension_numbers<[0], [0], [1], [1], [0, 1, 1, 1], [], []>} : vector<32x8xf32>, vector<32x8xf32>, vector<8x8xf32> -> vector<8x8xf32>
    %720 = vector.extract_strided_slice %719 {offsets = [0, 0], sizes = [8, 1], strides = [1, 1]} : vector<8x8xf32> to vector<8x1xf32>
    %721 = vector.extract_strided_slice %661 {offsets = [0, 0], sizes = [1, 256], strides = [1, 1]} : vector<8x256xf32> to vector<1x256xf32>
    %722 = vector.broadcast %720 : vector<8x1xf32> to vector<8x256xf32>
    %723 = vector.broadcast %721 : vector<1x256xf32> to vector<8x256xf32>
    %724 = arith.mulf %722, %723 : vector<8x256xf32>
    %725 = vector.extract_strided_slice %719 {offsets = [0, 1], sizes = [8, 1], strides = [1, 1]} : vector<8x8xf32> to vector<8x1xf32>
    %726 = vector.extract_strided_slice %661 {offsets = [1, 0], sizes = [1, 256], strides = [1, 1]} : vector<8x256xf32> to vector<1x256xf32>
    %727 = vector.broadcast %725 : vector<8x1xf32> to vector<8x256xf32>
    %728 = vector.broadcast %726 : vector<1x256xf32> to vector<8x256xf32>
    %729 = arith.mulf %727, %728 : vector<8x256xf32>
    %730 = arith.addf %724, %729 : vector<8x256xf32>
    %731 = vector.extract_strided_slice %719 {offsets = [0, 2], sizes = [8, 1], strides = [1, 1]} : vector<8x8xf32> to vector<8x1xf32>
    %732 = vector.extract_strided_slice %661 {offsets = [2, 0], sizes = [1, 256], strides = [1, 1]} : vector<8x256xf32> to vector<1x256xf32>
    %733 = vector.broadcast %731 : vector<8x1xf32> to vector<8x256xf32>
    %734 = vector.broadcast %732 : vector<1x256xf32> to vector<8x256xf32>
    %735 = arith.mulf %733, %734 : vector<8x256xf32>
    %736 = arith.addf %730, %735 : vector<8x256xf32>
    %737 = vector.extract_strided_slice %719 {offsets = [0, 3], sizes = [8, 1], strides = [1, 1]} : vector<8x8xf32> to vector<8x1xf32>
    %738 = vector.extract_strided_slice %661 {offsets = [3, 0], sizes = [1, 256], strides = [1, 1]} : vector<8x256xf32> to vector<1x256xf32>
    %739 = vector.broadcast %737 : vector<8x1xf32> to vector<8x256xf32>
    %740 = vector.broadcast %738 : vector<1x256xf32> to vector<8x256xf32>
    %741 = arith.mulf %739, %740 : vector<8x256xf32>
    %742 = arith.addf %736, %741 : vector<8x256xf32>
    %743 = vector.extract_strided_slice %719 {offsets = [0, 4], sizes = [8, 1], strides = [1, 1]} : vector<8x8xf32> to vector<8x1xf32>
    %744 = vector.extract_strided_slice %661 {offsets = [4, 0], sizes = [1, 256], strides = [1, 1]} : vector<8x256xf32> to vector<1x256xf32>
    %745 = vector.broadcast %743 : vector<8x1xf32> to vector<8x256xf32>
    %746 = vector.broadcast %744 : vector<1x256xf32> to vector<8x256xf32>
    %747 = arith.mulf %745, %746 : vector<8x256xf32>
    %748 = arith.addf %742, %747 : vector<8x256xf32>
    %749 = vector.extract_strided_slice %719 {offsets = [0, 5], sizes = [8, 1], strides = [1, 1]} : vector<8x8xf32> to vector<8x1xf32>
    %750 = vector.extract_strided_slice %661 {offsets = [5, 0], sizes = [1, 256], strides = [1, 1]} : vector<8x256xf32> to vector<1x256xf32>
    %751 = vector.broadcast %749 : vector<8x1xf32> to vector<8x256xf32>
    %752 = vector.broadcast %750 : vector<1x256xf32> to vector<8x256xf32>
    %753 = arith.mulf %751, %752 : vector<8x256xf32>
    %754 = arith.addf %748, %753 : vector<8x256xf32>
    %755 = vector.extract_strided_slice %719 {offsets = [0, 6], sizes = [8, 1], strides = [1, 1]} : vector<8x8xf32> to vector<8x1xf32>
    %756 = vector.extract_strided_slice %661 {offsets = [6, 0], sizes = [1, 256], strides = [1, 1]} : vector<8x256xf32> to vector<1x256xf32>
    %757 = vector.broadcast %755 : vector<8x1xf32> to vector<8x256xf32>
    %758 = vector.broadcast %756 : vector<1x256xf32> to vector<8x256xf32>
    %759 = arith.mulf %757, %758 : vector<8x256xf32>
    %760 = arith.addf %754, %759 : vector<8x256xf32>
    %761 = vector.extract_strided_slice %719 {offsets = [0, 7], sizes = [8, 1], strides = [1, 1]} : vector<8x8xf32> to vector<8x1xf32>
    %762 = vector.extract_strided_slice %661 {offsets = [7, 0], sizes = [1, 256], strides = [1, 1]} : vector<8x256xf32> to vector<1x256xf32>
    %763 = vector.broadcast %761 : vector<8x1xf32> to vector<8x256xf32>
    %764 = vector.broadcast %762 : vector<1x256xf32> to vector<8x256xf32>
    %765 = arith.mulf %763, %764 : vector<8x256xf32>
    %766 = arith.addf %760, %765 : vector<8x256xf32>
    %767 = arith.mulf %661, %718 : vector<8x256xf32>
    %cst_235 = arith.constant 9.99999997E-7 : f32
    %768 = vector.broadcast %cst_235 : f32 to vector<8x256xf32>
    %769 = arith.addf %766, %768 : vector<8x256xf32>
    %770 = tpu.reciprocal %769 {approx = true} : vector<8x256xf32> -> vector<8x256xf32>
    %771 = arith.mulf %767, %770 : vector<8x256xf32>
    %cst_236 = arith.constant dense<0.000000e+00> : vector<8x8xf32>
    %772 = tpu.matmul %771, %771, %cst_236 {dimension_numbers = #tpu.dot_dimension_numbers<[1], [1], [0], [0], [0, 0, 1, 0], [], []>} : vector<8x256xf32>, vector<8x256xf32>, vector<8x8xf32> -> vector<8x8xf32>
    %773 = arith.mulf %772, %772 : vector<8x8xf32>
    %cst_237 = arith.constant dense<0.000000e+00> : vector<8xf32>
    %774 = vector.multi_reduction <add>, %773, %cst_237 [1] : vector<8x8xf32> to vector<8xf32>
    %775 = vector.shape_cast %774 : vector<8xf32> to vector<8x1xf32>
    %cst_238 = arith.constant dense<0.000000e+00> : vector<1xf32>
    %776 = vector.multi_reduction <add>, %775, %cst_238 [0] : vector<8x1xf32> to vector<1xf32>
    %777 = vector.shape_cast %776 : vector<1xf32> to vector<1x1xf32>
    %778 = math.sqrt %777 : vector<1x1xf32>
    %cst_239 = arith.constant 1.000000e-30 : f32
    %779 = vector.broadcast %cst_239 : f32 to vector<1x1xf32>
    %780 = arith.addf %778, %779 : vector<1x1xf32>
    %781 = vector.broadcast %780 : vector<1x1xf32> to vector<8x8xf32>
    %782 = arith.divf %772, %781 : vector<8x8xf32>
    %cst_240 = arith.constant 1.500000e+00 : f32
    %783 = vector.broadcast %cst_240 : f32 to vector<8x8xf32>
    %784 = arith.mulf %783, %16 : vector<8x8xf32>
    %cst_241 = arith.constant dense<0.000000e+00> : vector<8x8xf32>
    %785 = tpu.matmul %16, %782, %cst_241 {dimension_numbers = #tpu.dot_dimension_numbers<[1], [0], [0], [1], [0, 0, 1, 1], [], []>} : vector<8x8xf32>, vector<8x8xf32>, vector<8x8xf32> -> vector<8x8xf32>
    %cst_242 = arith.constant 5.000000e-01 : f32
    %786 = vector.broadcast %cst_242 : f32 to vector<8x8xf32>
    %787 = arith.mulf %786, %785 : vector<8x8xf32>
    %788 = arith.subf %784, %787 : vector<8x8xf32>
    %cst_243 = arith.constant dense<0.000000e+00> : vector<8x8xf32>
    %789 = tpu.matmul %782, %788, %cst_243 {dimension_numbers = #tpu.dot_dimension_numbers<[1], [0], [0], [1], [0, 0, 1, 1], [], []>} : vector<8x8xf32>, vector<8x8xf32>, vector<8x8xf32> -> vector<8x8xf32>
    %cst_244 = arith.constant dense<0.000000e+00> : vector<8x8xf32>
    %790 = tpu.matmul %788, %16, %cst_244 {dimension_numbers = #tpu.dot_dimension_numbers<[1], [0], [0], [1], [0, 0, 1, 1], [], []>} : vector<8x8xf32>, vector<8x8xf32>, vector<8x8xf32> -> vector<8x8xf32>
    %cst_245 = arith.constant 1.500000e+00 : f32
    %791 = vector.broadcast %cst_245 : f32 to vector<8x8xf32>
    %792 = arith.mulf %791, %16 : vector<8x8xf32>
    %cst_246 = arith.constant dense<0.000000e+00> : vector<8x8xf32>
    %793 = tpu.matmul %790, %789, %cst_246 {dimension_numbers = #tpu.dot_dimension_numbers<[1], [0], [0], [1], [0, 0, 1, 1], [], []>} : vector<8x8xf32>, vector<8x8xf32>, vector<8x8xf32> -> vector<8x8xf32>
    %cst_247 = arith.constant 5.000000e-01 : f32
    %794 = vector.broadcast %cst_247 : f32 to vector<8x8xf32>
    %795 = arith.mulf %794, %793 : vector<8x8xf32>
    %796 = arith.subf %792, %795 : vector<8x8xf32>
    %cst_248 = arith.constant dense<0.000000e+00> : vector<8x8xf32>
    %797 = tpu.matmul %789, %796, %cst_248 {dimension_numbers = #tpu.dot_dimension_numbers<[1], [0], [0], [1], [0, 0, 1, 1], [], []>} : vector<8x8xf32>, vector<8x8xf32>, vector<8x8xf32> -> vector<8x8xf32>
    %cst_249 = arith.constant dense<0.000000e+00> : vector<8x8xf32>
    %798 = tpu.matmul %796, %790, %cst_249 {dimension_numbers = #tpu.dot_dimension_numbers<[1], [0], [0], [1], [0, 0, 1, 1], [], []>} : vector<8x8xf32>, vector<8x8xf32>, vector<8x8xf32> -> vector<8x8xf32>
    %cst_250 = arith.constant 1.500000e+00 : f32
    %799 = vector.broadcast %cst_250 : f32 to vector<8x8xf32>
    %800 = arith.mulf %799, %16 : vector<8x8xf32>
    %cst_251 = arith.constant dense<0.000000e+00> : vector<8x8xf32>
    %801 = tpu.matmul %798, %797, %cst_251 {dimension_numbers = #tpu.dot_dimension_numbers<[1], [0], [0], [1], [0, 0, 1, 1], [], []>} : vector<8x8xf32>, vector<8x8xf32>, vector<8x8xf32> -> vector<8x8xf32>
    %cst_252 = arith.constant 5.000000e-01 : f32
    %802 = vector.broadcast %cst_252 : f32 to vector<8x8xf32>
    %803 = arith.mulf %802, %801 : vector<8x8xf32>
    %804 = arith.subf %800, %803 : vector<8x8xf32>
    %cst_253 = arith.constant dense<0.000000e+00> : vector<8x8xf32>
    %805 = tpu.matmul %797, %804, %cst_253 {dimension_numbers = #tpu.dot_dimension_numbers<[1], [0], [0], [1], [0, 0, 1, 1], [], []>} : vector<8x8xf32>, vector<8x8xf32>, vector<8x8xf32> -> vector<8x8xf32>
    %cst_254 = arith.constant dense<0.000000e+00> : vector<8x8xf32>
    %806 = tpu.matmul %804, %798, %cst_254 {dimension_numbers = #tpu.dot_dimension_numbers<[1], [0], [0], [1], [0, 0, 1, 1], [], []>} : vector<8x8xf32>, vector<8x8xf32>, vector<8x8xf32> -> vector<8x8xf32>
    %cst_255 = arith.constant 1.500000e+00 : f32
    %807 = vector.broadcast %cst_255 : f32 to vector<8x8xf32>
    %808 = arith.mulf %807, %16 : vector<8x8xf32>
    %cst_256 = arith.constant dense<0.000000e+00> : vector<8x8xf32>
    %809 = tpu.matmul %806, %805, %cst_256 {dimension_numbers = #tpu.dot_dimension_numbers<[1], [0], [0], [1], [0, 0, 1, 1], [], []>} : vector<8x8xf32>, vector<8x8xf32>, vector<8x8xf32> -> vector<8x8xf32>
    %cst_257 = arith.constant 5.000000e-01 : f32
    %810 = vector.broadcast %cst_257 : f32 to vector<8x8xf32>
    %811 = arith.mulf %810, %809 : vector<8x8xf32>
    %812 = arith.subf %808, %811 : vector<8x8xf32>
    %cst_258 = arith.constant dense<0.000000e+00> : vector<8x8xf32>
    %813 = tpu.matmul %805, %812, %cst_258 {dimension_numbers = #tpu.dot_dimension_numbers<[1], [0], [0], [1], [0, 0, 1, 1], [], []>} : vector<8x8xf32>, vector<8x8xf32>, vector<8x8xf32> -> vector<8x8xf32>
    %cst_259 = arith.constant dense<0.000000e+00> : vector<8x8xf32>
    %814 = tpu.matmul %812, %806, %cst_259 {dimension_numbers = #tpu.dot_dimension_numbers<[1], [0], [0], [1], [0, 0, 1, 1], [], []>} : vector<8x8xf32>, vector<8x8xf32>, vector<8x8xf32> -> vector<8x8xf32>
    %cst_260 = arith.constant 1.500000e+00 : f32
    %815 = vector.broadcast %cst_260 : f32 to vector<8x8xf32>
    %816 = arith.mulf %815, %16 : vector<8x8xf32>
    %cst_261 = arith.constant dense<0.000000e+00> : vector<8x8xf32>
    %817 = tpu.matmul %814, %813, %cst_261 {dimension_numbers = #tpu.dot_dimension_numbers<[1], [0], [0], [1], [0, 0, 1, 1], [], []>} : vector<8x8xf32>, vector<8x8xf32>, vector<8x8xf32> -> vector<8x8xf32>
    %cst_262 = arith.constant 5.000000e-01 : f32
    %818 = vector.broadcast %cst_262 : f32 to vector<8x8xf32>
    %819 = arith.mulf %818, %817 : vector<8x8xf32>
    %820 = arith.subf %816, %819 : vector<8x8xf32>
    %cst_263 = arith.constant dense<0.000000e+00> : vector<8x8xf32>
    %821 = tpu.matmul %813, %820, %cst_263 {dimension_numbers = #tpu.dot_dimension_numbers<[1], [0], [0], [1], [0, 0, 1, 1], [], []>} : vector<8x8xf32>, vector<8x8xf32>, vector<8x8xf32> -> vector<8x8xf32>
    %cst_264 = arith.constant dense<0.000000e+00> : vector<8x8xf32>
    %822 = tpu.matmul %820, %814, %cst_264 {dimension_numbers = #tpu.dot_dimension_numbers<[1], [0], [0], [1], [0, 0, 1, 1], [], []>} : vector<8x8xf32>, vector<8x8xf32>, vector<8x8xf32> -> vector<8x8xf32>
    %cst_265 = arith.constant 1.500000e+00 : f32
    %823 = vector.broadcast %cst_265 : f32 to vector<8x8xf32>
    %824 = arith.mulf %823, %16 : vector<8x8xf32>
    %cst_266 = arith.constant dense<0.000000e+00> : vector<8x8xf32>
    %825 = tpu.matmul %822, %821, %cst_266 {dimension_numbers = #tpu.dot_dimension_numbers<[1], [0], [0], [1], [0, 0, 1, 1], [], []>} : vector<8x8xf32>, vector<8x8xf32>, vector<8x8xf32> -> vector<8x8xf32>
    %cst_267 = arith.constant 5.000000e-01 : f32
    %826 = vector.broadcast %cst_267 : f32 to vector<8x8xf32>
    %827 = arith.mulf %826, %825 : vector<8x8xf32>
    %828 = arith.subf %824, %827 : vector<8x8xf32>
    %cst_268 = arith.constant dense<0.000000e+00> : vector<8x8xf32>
    %829 = tpu.matmul %821, %828, %cst_268 {dimension_numbers = #tpu.dot_dimension_numbers<[1], [0], [0], [1], [0, 0, 1, 1], [], []>} : vector<8x8xf32>, vector<8x8xf32>, vector<8x8xf32> -> vector<8x8xf32>
    %cst_269 = arith.constant dense<0.000000e+00> : vector<8x8xf32>
    %830 = tpu.matmul %828, %822, %cst_269 {dimension_numbers = #tpu.dot_dimension_numbers<[1], [0], [0], [1], [0, 0, 1, 1], [], []>} : vector<8x8xf32>, vector<8x8xf32>, vector<8x8xf32> -> vector<8x8xf32>
    %cst_270 = arith.constant 1.500000e+00 : f32
    %831 = vector.broadcast %cst_270 : f32 to vector<8x8xf32>
    %832 = arith.mulf %831, %16 : vector<8x8xf32>
    %cst_271 = arith.constant dense<0.000000e+00> : vector<8x8xf32>
    %833 = tpu.matmul %830, %829, %cst_271 {dimension_numbers = #tpu.dot_dimension_numbers<[1], [0], [0], [1], [0, 0, 1, 1], [], []>} : vector<8x8xf32>, vector<8x8xf32>, vector<8x8xf32> -> vector<8x8xf32>
    %cst_272 = arith.constant 5.000000e-01 : f32
    %834 = vector.broadcast %cst_272 : f32 to vector<8x8xf32>
    %835 = arith.mulf %834, %833 : vector<8x8xf32>
    %836 = arith.subf %832, %835 : vector<8x8xf32>
    %cst_273 = arith.constant dense<0.000000e+00> : vector<8x8xf32>
    %837 = tpu.matmul %829, %836, %cst_273 {dimension_numbers = #tpu.dot_dimension_numbers<[1], [0], [0], [1], [0, 0, 1, 1], [], []>} : vector<8x8xf32>, vector<8x8xf32>, vector<8x8xf32> -> vector<8x8xf32>
    %cst_274 = arith.constant dense<0.000000e+00> : vector<8x8xf32>
    %838 = tpu.matmul %836, %830, %cst_274 {dimension_numbers = #tpu.dot_dimension_numbers<[1], [0], [0], [1], [0, 0, 1, 1], [], []>} : vector<8x8xf32>, vector<8x8xf32>, vector<8x8xf32> -> vector<8x8xf32>
    %cst_275 = arith.constant 1.500000e+00 : f32
    %839 = vector.broadcast %cst_275 : f32 to vector<8x8xf32>
    %840 = arith.mulf %839, %16 : vector<8x8xf32>
    %cst_276 = arith.constant dense<0.000000e+00> : vector<8x8xf32>
    %841 = tpu.matmul %838, %837, %cst_276 {dimension_numbers = #tpu.dot_dimension_numbers<[1], [0], [0], [1], [0, 0, 1, 1], [], []>} : vector<8x8xf32>, vector<8x8xf32>, vector<8x8xf32> -> vector<8x8xf32>
    %cst_277 = arith.constant 5.000000e-01 : f32
    %842 = vector.broadcast %cst_277 : f32 to vector<8x8xf32>
    %843 = arith.mulf %842, %841 : vector<8x8xf32>
    %844 = arith.subf %840, %843 : vector<8x8xf32>
    %cst_278 = arith.constant dense<0.000000e+00> : vector<8x8xf32>
    %845 = tpu.matmul %837, %844, %cst_278 {dimension_numbers = #tpu.dot_dimension_numbers<[1], [0], [0], [1], [0, 0, 1, 1], [], []>} : vector<8x8xf32>, vector<8x8xf32>, vector<8x8xf32> -> vector<8x8xf32>
    %cst_279 = arith.constant dense<0.000000e+00> : vector<8x8xf32>
    %846 = tpu.matmul %844, %838, %cst_279 {dimension_numbers = #tpu.dot_dimension_numbers<[1], [0], [0], [1], [0, 0, 1, 1], [], []>} : vector<8x8xf32>, vector<8x8xf32>, vector<8x8xf32> -> vector<8x8xf32>
    %cst_280 = arith.constant 1.500000e+00 : f32
    %847 = vector.broadcast %cst_280 : f32 to vector<8x8xf32>
    %848 = arith.mulf %847, %16 : vector<8x8xf32>
    %cst_281 = arith.constant dense<0.000000e+00> : vector<8x8xf32>
    %849 = tpu.matmul %846, %845, %cst_281 {dimension_numbers = #tpu.dot_dimension_numbers<[1], [0], [0], [1], [0, 0, 1, 1], [], []>} : vector<8x8xf32>, vector<8x8xf32>, vector<8x8xf32> -> vector<8x8xf32>
    %cst_282 = arith.constant 5.000000e-01 : f32
    %850 = vector.broadcast %cst_282 : f32 to vector<8x8xf32>
    %851 = arith.mulf %850, %849 : vector<8x8xf32>
    %852 = arith.subf %848, %851 : vector<8x8xf32>
    %cst_283 = arith.constant dense<0.000000e+00> : vector<8x8xf32>
    %853 = tpu.matmul %845, %852, %cst_283 {dimension_numbers = #tpu.dot_dimension_numbers<[1], [0], [0], [1], [0, 0, 1, 1], [], []>} : vector<8x8xf32>, vector<8x8xf32>, vector<8x8xf32> -> vector<8x8xf32>
    %cst_284 = arith.constant dense<0.000000e+00> : vector<8x8xf32>
    %854 = tpu.matmul %852, %846, %cst_284 {dimension_numbers = #tpu.dot_dimension_numbers<[1], [0], [0], [1], [0, 0, 1, 1], [], []>} : vector<8x8xf32>, vector<8x8xf32>, vector<8x8xf32> -> vector<8x8xf32>
    %cst_285 = arith.constant 1.500000e+00 : f32
    %855 = vector.broadcast %cst_285 : f32 to vector<8x8xf32>
    %856 = arith.mulf %855, %16 : vector<8x8xf32>
    %cst_286 = arith.constant dense<0.000000e+00> : vector<8x8xf32>
    %857 = tpu.matmul %854, %853, %cst_286 {dimension_numbers = #tpu.dot_dimension_numbers<[1], [0], [0], [1], [0, 0, 1, 1], [], []>} : vector<8x8xf32>, vector<8x8xf32>, vector<8x8xf32> -> vector<8x8xf32>
    %cst_287 = arith.constant 5.000000e-01 : f32
    %858 = vector.broadcast %cst_287 : f32 to vector<8x8xf32>
    %859 = arith.mulf %858, %857 : vector<8x8xf32>
    %860 = arith.subf %856, %859 : vector<8x8xf32>
    %cst_288 = arith.constant dense<0.000000e+00> : vector<8x8xf32>
    %861 = tpu.matmul %853, %860, %cst_288 {dimension_numbers = #tpu.dot_dimension_numbers<[1], [0], [0], [1], [0, 0, 1, 1], [], []>} : vector<8x8xf32>, vector<8x8xf32>, vector<8x8xf32> -> vector<8x8xf32>
    %cst_289 = arith.constant dense<0.000000e+00> : vector<8x8xf32>
    %862 = tpu.matmul %860, %854, %cst_289 {dimension_numbers = #tpu.dot_dimension_numbers<[1], [0], [0], [1], [0, 0, 1, 1], [], []>} : vector<8x8xf32>, vector<8x8xf32>, vector<8x8xf32> -> vector<8x8xf32>
    %cst_290 = arith.constant 1.500000e+00 : f32
    %863 = vector.broadcast %cst_290 : f32 to vector<8x8xf32>
    %864 = arith.mulf %863, %16 : vector<8x8xf32>
    %cst_291 = arith.constant dense<0.000000e+00> : vector<8x8xf32>
    %865 = tpu.matmul %862, %861, %cst_291 {dimension_numbers = #tpu.dot_dimension_numbers<[1], [0], [0], [1], [0, 0, 1, 1], [], []>} : vector<8x8xf32>, vector<8x8xf32>, vector<8x8xf32> -> vector<8x8xf32>
    %cst_292 = arith.constant 5.000000e-01 : f32
    %866 = vector.broadcast %cst_292 : f32 to vector<8x8xf32>
    %867 = arith.mulf %866, %865 : vector<8x8xf32>
    %868 = arith.subf %864, %867 : vector<8x8xf32>
    %cst_293 = arith.constant dense<0.000000e+00> : vector<8x8xf32>
    %869 = tpu.matmul %861, %868, %cst_293 {dimension_numbers = #tpu.dot_dimension_numbers<[1], [0], [0], [1], [0, 0, 1, 1], [], []>} : vector<8x8xf32>, vector<8x8xf32>, vector<8x8xf32> -> vector<8x8xf32>
    %cst_294 = arith.constant dense<0.000000e+00> : vector<8x8xf32>
    %870 = tpu.matmul %868, %862, %cst_294 {dimension_numbers = #tpu.dot_dimension_numbers<[1], [0], [0], [1], [0, 0, 1, 1], [], []>} : vector<8x8xf32>, vector<8x8xf32>, vector<8x8xf32> -> vector<8x8xf32>
    %cst_295 = arith.constant 1.500000e+00 : f32
    %871 = vector.broadcast %cst_295 : f32 to vector<8x8xf32>
    %872 = arith.mulf %871, %16 : vector<8x8xf32>
    %cst_296 = arith.constant dense<0.000000e+00> : vector<8x8xf32>
    %873 = tpu.matmul %870, %869, %cst_296 {dimension_numbers = #tpu.dot_dimension_numbers<[1], [0], [0], [1], [0, 0, 1, 1], [], []>} : vector<8x8xf32>, vector<8x8xf32>, vector<8x8xf32> -> vector<8x8xf32>
    %cst_297 = arith.constant 5.000000e-01 : f32
    %874 = vector.broadcast %cst_297 : f32 to vector<8x8xf32>
    %875 = arith.mulf %874, %873 : vector<8x8xf32>
    %876 = arith.subf %872, %875 : vector<8x8xf32>
    %cst_298 = arith.constant dense<0.000000e+00> : vector<8x8xf32>
    %877 = tpu.matmul %869, %876, %cst_298 {dimension_numbers = #tpu.dot_dimension_numbers<[1], [0], [0], [1], [0, 0, 1, 1], [], []>} : vector<8x8xf32>, vector<8x8xf32>, vector<8x8xf32> -> vector<8x8xf32>
    %878 = math.sqrt %780 : vector<1x1xf32>
    %879 = arith.mulf %877, %16 : vector<8x8xf32>
    %cst_299 = arith.constant dense<0.000000e+00> : vector<8xf32>
    %880 = vector.multi_reduction <add>, %879, %cst_299 [1] : vector<8x8xf32> to vector<8xf32>
    %881 = vector.shape_cast %880 : vector<8xf32> to vector<8x1xf32>
    %cst_300 = arith.constant dense<0.000000e+00> : vector<1xf32>
    %882 = vector.multi_reduction <add>, %881, %cst_300 [0] : vector<8x1xf32> to vector<1xf32>
    %883 = vector.shape_cast %882 : vector<1xf32> to vector<1x1xf32>
    %884 = arith.mulf %878, %883 : vector<1x1xf32>
    %cst_301 = arith.constant 9.99999997E-7 : f32
    %885 = vector.broadcast %cst_301 : f32 to vector<1x1xf32>
    %886 = arith.addf %884, %885 : vector<1x1xf32>
    %887 = tpu.reciprocal %886 {approx = true} : vector<1x1xf32> -> vector<1x1xf32>
    %888 = vector.broadcast %887 : vector<1x1xf32> to vector<8x256xf32>
    %889 = arith.mulf %771, %888 : vector<8x256xf32>
    %890 = arith.truncf %889 : vector<8x256xf32> to vector<8x256xbf16>
    %cst_302 = arith.constant dense<0.000000e+00> : vector<32x8xf32>
    %891 = tpu.matmul %11, %890, %cst_302 {dimension_numbers = #tpu.dot_dimension_numbers<[1], [1], [0], [0], [0, 0, 1, 0], [], []>} : vector<32x256xbf16>, vector<8x256xbf16>, vector<32x8xf32> -> vector<32x8xf32>
    %cst_303 = arith.constant dense<0.000000e+00> : vector<8x8xf32>
    %892 = tpu.matmul %890, %890, %cst_303 {dimension_numbers = #tpu.dot_dimension_numbers<[1], [1], [0], [0], [0, 0, 1, 0], [], []>} : vector<8x256xbf16>, vector<8x256xbf16>, vector<8x8xf32> -> vector<8x8xf32>
    %893 = vector.extract_strided_slice %716 {offsets = [0, 0], sizes = [32, 1], strides = [1, 1]} : vector<32x8xf32> to vector<32x1xf32>
    %894 = vector.extract_strided_slice %892 {offsets = [0, 0], sizes = [1, 8], strides = [1, 1]} : vector<8x8xf32> to vector<1x8xf32>
    %895 = vector.broadcast %893 : vector<32x1xf32> to vector<32x8xf32>
    %896 = vector.broadcast %894 : vector<1x8xf32> to vector<32x8xf32>
    %897 = arith.mulf %895, %896 : vector<32x8xf32>
    %898 = vector.extract_strided_slice %716 {offsets = [0, 1], sizes = [32, 1], strides = [1, 1]} : vector<32x8xf32> to vector<32x1xf32>
    %899 = vector.extract_strided_slice %892 {offsets = [1, 0], sizes = [1, 8], strides = [1, 1]} : vector<8x8xf32> to vector<1x8xf32>
    %900 = vector.broadcast %898 : vector<32x1xf32> to vector<32x8xf32>
    %901 = vector.broadcast %899 : vector<1x8xf32> to vector<32x8xf32>
    %902 = arith.mulf %900, %901 : vector<32x8xf32>
    %903 = arith.addf %897, %902 : vector<32x8xf32>
    %904 = vector.extract_strided_slice %716 {offsets = [0, 2], sizes = [32, 1], strides = [1, 1]} : vector<32x8xf32> to vector<32x1xf32>
    %905 = vector.extract_strided_slice %892 {offsets = [2, 0], sizes = [1, 8], strides = [1, 1]} : vector<8x8xf32> to vector<1x8xf32>
    %906 = vector.broadcast %904 : vector<32x1xf32> to vector<32x8xf32>
    %907 = vector.broadcast %905 : vector<1x8xf32> to vector<32x8xf32>
    %908 = arith.mulf %906, %907 : vector<32x8xf32>
    %909 = arith.addf %903, %908 : vector<32x8xf32>
    %910 = vector.extract_strided_slice %716 {offsets = [0, 3], sizes = [32, 1], strides = [1, 1]} : vector<32x8xf32> to vector<32x1xf32>
    %911 = vector.extract_strided_slice %892 {offsets = [3, 0], sizes = [1, 8], strides = [1, 1]} : vector<8x8xf32> to vector<1x8xf32>
    %912 = vector.broadcast %910 : vector<32x1xf32> to vector<32x8xf32>
    %913 = vector.broadcast %911 : vector<1x8xf32> to vector<32x8xf32>
    %914 = arith.mulf %912, %913 : vector<32x8xf32>
    %915 = arith.addf %909, %914 : vector<32x8xf32>
    %916 = vector.extract_strided_slice %716 {offsets = [0, 4], sizes = [32, 1], strides = [1, 1]} : vector<32x8xf32> to vector<32x1xf32>
    %917 = vector.extract_strided_slice %892 {offsets = [4, 0], sizes = [1, 8], strides = [1, 1]} : vector<8x8xf32> to vector<1x8xf32>
    %918 = vector.broadcast %916 : vector<32x1xf32> to vector<32x8xf32>
    %919 = vector.broadcast %917 : vector<1x8xf32> to vector<32x8xf32>
    %920 = arith.mulf %918, %919 : vector<32x8xf32>
    %921 = arith.addf %915, %920 : vector<32x8xf32>
    %922 = vector.extract_strided_slice %716 {offsets = [0, 5], sizes = [32, 1], strides = [1, 1]} : vector<32x8xf32> to vector<32x1xf32>
    %923 = vector.extract_strided_slice %892 {offsets = [5, 0], sizes = [1, 8], strides = [1, 1]} : vector<8x8xf32> to vector<1x8xf32>
    %924 = vector.broadcast %922 : vector<32x1xf32> to vector<32x8xf32>
    %925 = vector.broadcast %923 : vector<1x8xf32> to vector<32x8xf32>
    %926 = arith.mulf %924, %925 : vector<32x8xf32>
    %927 = arith.addf %921, %926 : vector<32x8xf32>
    %928 = vector.extract_strided_slice %716 {offsets = [0, 6], sizes = [32, 1], strides = [1, 1]} : vector<32x8xf32> to vector<32x1xf32>
    %929 = vector.extract_strided_slice %892 {offsets = [6, 0], sizes = [1, 8], strides = [1, 1]} : vector<8x8xf32> to vector<1x8xf32>
    %930 = vector.broadcast %928 : vector<32x1xf32> to vector<32x8xf32>
    %931 = vector.broadcast %929 : vector<1x8xf32> to vector<32x8xf32>
    %932 = arith.mulf %930, %931 : vector<32x8xf32>
    %933 = arith.addf %927, %932 : vector<32x8xf32>
    %934 = vector.extract_strided_slice %716 {offsets = [0, 7], sizes = [32, 1], strides = [1, 1]} : vector<32x8xf32> to vector<32x1xf32>
    %935 = vector.extract_strided_slice %892 {offsets = [7, 0], sizes = [1, 8], strides = [1, 1]} : vector<8x8xf32> to vector<1x8xf32>
    %936 = vector.broadcast %934 : vector<32x1xf32> to vector<32x8xf32>
    %937 = vector.broadcast %935 : vector<1x8xf32> to vector<32x8xf32>
    %938 = arith.mulf %936, %937 : vector<32x8xf32>
    %939 = arith.addf %933, %938 : vector<32x8xf32>
    %940 = arith.mulf %716, %891 : vector<32x8xf32>
    %cst_304 = arith.constant 9.99999997E-7 : f32
    %941 = vector.broadcast %cst_304 : f32 to vector<32x8xf32>
    %942 = arith.addf %939, %941 : vector<32x8xf32>
    %943 = tpu.reciprocal %942 {approx = true} : vector<32x8xf32> -> vector<32x8xf32>
    %944 = arith.mulf %940, %943 : vector<32x8xf32>
    %945 = arith.truncf %944 : vector<32x8xf32> to vector<32x8xbf16>
    %cst_305 = arith.constant dense<0.000000e+00> : vector<8x256xf32>
    %946 = tpu.matmul %945, %11, %cst_305 {dimension_numbers = #tpu.dot_dimension_numbers<[0], [0], [1], [1], [0, 1, 1, 1], [], []>} : vector<32x8xbf16>, vector<32x256xbf16>, vector<8x256xf32> -> vector<8x256xf32>
    %cst_306 = arith.constant dense<0.000000e+00> : vector<8x8xf32>
    %947 = tpu.matmul %944, %944, %cst_306 {dimension_numbers = #tpu.dot_dimension_numbers<[0], [0], [1], [1], [0, 1, 1, 1], [], []>} : vector<32x8xf32>, vector<32x8xf32>, vector<8x8xf32> -> vector<8x8xf32>
    %948 = vector.extract_strided_slice %947 {offsets = [0, 0], sizes = [8, 1], strides = [1, 1]} : vector<8x8xf32> to vector<8x1xf32>
    %949 = vector.extract_strided_slice %889 {offsets = [0, 0], sizes = [1, 256], strides = [1, 1]} : vector<8x256xf32> to vector<1x256xf32>
    %950 = vector.broadcast %948 : vector<8x1xf32> to vector<8x256xf32>
    %951 = vector.broadcast %949 : vector<1x256xf32> to vector<8x256xf32>
    %952 = arith.mulf %950, %951 : vector<8x256xf32>
    %953 = vector.extract_strided_slice %947 {offsets = [0, 1], sizes = [8, 1], strides = [1, 1]} : vector<8x8xf32> to vector<8x1xf32>
    %954 = vector.extract_strided_slice %889 {offsets = [1, 0], sizes = [1, 256], strides = [1, 1]} : vector<8x256xf32> to vector<1x256xf32>
    %955 = vector.broadcast %953 : vector<8x1xf32> to vector<8x256xf32>
    %956 = vector.broadcast %954 : vector<1x256xf32> to vector<8x256xf32>
    %957 = arith.mulf %955, %956 : vector<8x256xf32>
    %958 = arith.addf %952, %957 : vector<8x256xf32>
    %959 = vector.extract_strided_slice %947 {offsets = [0, 2], sizes = [8, 1], strides = [1, 1]} : vector<8x8xf32> to vector<8x1xf32>
    %960 = vector.extract_strided_slice %889 {offsets = [2, 0], sizes = [1, 256], strides = [1, 1]} : vector<8x256xf32> to vector<1x256xf32>
    %961 = vector.broadcast %959 : vector<8x1xf32> to vector<8x256xf32>
    %962 = vector.broadcast %960 : vector<1x256xf32> to vector<8x256xf32>
    %963 = arith.mulf %961, %962 : vector<8x256xf32>
    %964 = arith.addf %958, %963 : vector<8x256xf32>
    %965 = vector.extract_strided_slice %947 {offsets = [0, 3], sizes = [8, 1], strides = [1, 1]} : vector<8x8xf32> to vector<8x1xf32>
    %966 = vector.extract_strided_slice %889 {offsets = [3, 0], sizes = [1, 256], strides = [1, 1]} : vector<8x256xf32> to vector<1x256xf32>
    %967 = vector.broadcast %965 : vector<8x1xf32> to vector<8x256xf32>
    %968 = vector.broadcast %966 : vector<1x256xf32> to vector<8x256xf32>
    %969 = arith.mulf %967, %968 : vector<8x256xf32>
    %970 = arith.addf %964, %969 : vector<8x256xf32>
    %971 = vector.extract_strided_slice %947 {offsets = [0, 4], sizes = [8, 1], strides = [1, 1]} : vector<8x8xf32> to vector<8x1xf32>
    %972 = vector.extract_strided_slice %889 {offsets = [4, 0], sizes = [1, 256], strides = [1, 1]} : vector<8x256xf32> to vector<1x256xf32>
    %973 = vector.broadcast %971 : vector<8x1xf32> to vector<8x256xf32>
    %974 = vector.broadcast %972 : vector<1x256xf32> to vector<8x256xf32>
    %975 = arith.mulf %973, %974 : vector<8x256xf32>
    %976 = arith.addf %970, %975 : vector<8x256xf32>
    %977 = vector.extract_strided_slice %947 {offsets = [0, 5], sizes = [8, 1], strides = [1, 1]} : vector<8x8xf32> to vector<8x1xf32>
    %978 = vector.extract_strided_slice %889 {offsets = [5, 0], sizes = [1, 256], strides = [1, 1]} : vector<8x256xf32> to vector<1x256xf32>
    %979 = vector.broadcast %977 : vector<8x1xf32> to vector<8x256xf32>
    %980 = vector.broadcast %978 : vector<1x256xf32> to vector<8x256xf32>
    %981 = arith.mulf %979, %980 : vector<8x256xf32>
    %982 = arith.addf %976, %981 : vector<8x256xf32>
    %983 = vector.extract_strided_slice %947 {offsets = [0, 6], sizes = [8, 1], strides = [1, 1]} : vector<8x8xf32> to vector<8x1xf32>
    %984 = vector.extract_strided_slice %889 {offsets = [6, 0], sizes = [1, 256], strides = [1, 1]} : vector<8x256xf32> to vector<1x256xf32>
    %985 = vector.broadcast %983 : vector<8x1xf32> to vector<8x256xf32>
    %986 = vector.broadcast %984 : vector<1x256xf32> to vector<8x256xf32>
    %987 = arith.mulf %985, %986 : vector<8x256xf32>
    %988 = arith.addf %982, %987 : vector<8x256xf32>
    %989 = vector.extract_strided_slice %947 {offsets = [0, 7], sizes = [8, 1], strides = [1, 1]} : vector<8x8xf32> to vector<8x1xf32>
    %990 = vector.extract_strided_slice %889 {offsets = [7, 0], sizes = [1, 256], strides = [1, 1]} : vector<8x256xf32> to vector<1x256xf32>
    %991 = vector.broadcast %989 : vector<8x1xf32> to vector<8x256xf32>
    %992 = vector.broadcast %990 : vector<1x256xf32> to vector<8x256xf32>
    %993 = arith.mulf %991, %992 : vector<8x256xf32>
    %994 = arith.addf %988, %993 : vector<8x256xf32>
    %995 = arith.mulf %889, %946 : vector<8x256xf32>
    %cst_307 = arith.constant 9.99999997E-7 : f32
    %996 = vector.broadcast %cst_307 : f32 to vector<8x256xf32>
    %997 = arith.addf %994, %996 : vector<8x256xf32>
    %998 = tpu.reciprocal %997 {approx = true} : vector<8x256xf32> -> vector<8x256xf32>
    %999 = arith.mulf %995, %998 : vector<8x256xf32>
    %cst_308 = arith.constant dense<0.000000e+00> : vector<8x8xf32>
    %1000 = tpu.matmul %999, %999, %cst_308 {dimension_numbers = #tpu.dot_dimension_numbers<[1], [1], [0], [0], [0, 0, 1, 0], [], []>} : vector<8x256xf32>, vector<8x256xf32>, vector<8x8xf32> -> vector<8x8xf32>
    %1001 = arith.mulf %1000, %1000 : vector<8x8xf32>
    %cst_309 = arith.constant dense<0.000000e+00> : vector<8xf32>
    %1002 = vector.multi_reduction <add>, %1001, %cst_309 [1] : vector<8x8xf32> to vector<8xf32>
    %1003 = vector.shape_cast %1002 : vector<8xf32> to vector<8x1xf32>
    %cst_310 = arith.constant dense<0.000000e+00> : vector<1xf32>
    %1004 = vector.multi_reduction <add>, %1003, %cst_310 [0] : vector<8x1xf32> to vector<1xf32>
    %1005 = vector.shape_cast %1004 : vector<1xf32> to vector<1x1xf32>
    %1006 = math.sqrt %1005 : vector<1x1xf32>
    %cst_311 = arith.constant 1.000000e-30 : f32
    %1007 = vector.broadcast %cst_311 : f32 to vector<1x1xf32>
    %1008 = arith.addf %1006, %1007 : vector<1x1xf32>
    %1009 = vector.broadcast %1008 : vector<1x1xf32> to vector<8x8xf32>
    %1010 = arith.divf %1000, %1009 : vector<8x8xf32>
    %cst_312 = arith.constant 1.500000e+00 : f32
    %1011 = vector.broadcast %cst_312 : f32 to vector<8x8xf32>
    %1012 = arith.mulf %1011, %16 : vector<8x8xf32>
    %cst_313 = arith.constant dense<0.000000e+00> : vector<8x8xf32>
    %1013 = tpu.matmul %16, %1010, %cst_313 {dimension_numbers = #tpu.dot_dimension_numbers<[1], [0], [0], [1], [0, 0, 1, 1], [], []>} : vector<8x8xf32>, vector<8x8xf32>, vector<8x8xf32> -> vector<8x8xf32>
    %cst_314 = arith.constant 5.000000e-01 : f32
    %1014 = vector.broadcast %cst_314 : f32 to vector<8x8xf32>
    %1015 = arith.mulf %1014, %1013 : vector<8x8xf32>
    %1016 = arith.subf %1012, %1015 : vector<8x8xf32>
    %cst_315 = arith.constant dense<0.000000e+00> : vector<8x8xf32>
    %1017 = tpu.matmul %1010, %1016, %cst_315 {dimension_numbers = #tpu.dot_dimension_numbers<[1], [0], [0], [1], [0, 0, 1, 1], [], []>} : vector<8x8xf32>, vector<8x8xf32>, vector<8x8xf32> -> vector<8x8xf32>
    %cst_316 = arith.constant dense<0.000000e+00> : vector<8x8xf32>
    %1018 = tpu.matmul %1016, %16, %cst_316 {dimension_numbers = #tpu.dot_dimension_numbers<[1], [0], [0], [1], [0, 0, 1, 1], [], []>} : vector<8x8xf32>, vector<8x8xf32>, vector<8x8xf32> -> vector<8x8xf32>
    %cst_317 = arith.constant 1.500000e+00 : f32
    %1019 = vector.broadcast %cst_317 : f32 to vector<8x8xf32>
    %1020 = arith.mulf %1019, %16 : vector<8x8xf32>
    %cst_318 = arith.constant dense<0.000000e+00> : vector<8x8xf32>
    %1021 = tpu.matmul %1018, %1017, %cst_318 {dimension_numbers = #tpu.dot_dimension_numbers<[1], [0], [0], [1], [0, 0, 1, 1], [], []>} : vector<8x8xf32>, vector<8x8xf32>, vector<8x8xf32> -> vector<8x8xf32>
    %cst_319 = arith.constant 5.000000e-01 : f32
    %1022 = vector.broadcast %cst_319 : f32 to vector<8x8xf32>
    %1023 = arith.mulf %1022, %1021 : vector<8x8xf32>
    %1024 = arith.subf %1020, %1023 : vector<8x8xf32>
    %cst_320 = arith.constant dense<0.000000e+00> : vector<8x8xf32>
    %1025 = tpu.matmul %1017, %1024, %cst_320 {dimension_numbers = #tpu.dot_dimension_numbers<[1], [0], [0], [1], [0, 0, 1, 1], [], []>} : vector<8x8xf32>, vector<8x8xf32>, vector<8x8xf32> -> vector<8x8xf32>
    %cst_321 = arith.constant dense<0.000000e+00> : vector<8x8xf32>
    %1026 = tpu.matmul %1024, %1018, %cst_321 {dimension_numbers = #tpu.dot_dimension_numbers<[1], [0], [0], [1], [0, 0, 1, 1], [], []>} : vector<8x8xf32>, vector<8x8xf32>, vector<8x8xf32> -> vector<8x8xf32>
    %cst_322 = arith.constant 1.500000e+00 : f32
    %1027 = vector.broadcast %cst_322 : f32 to vector<8x8xf32>
    %1028 = arith.mulf %1027, %16 : vector<8x8xf32>
    %cst_323 = arith.constant dense<0.000000e+00> : vector<8x8xf32>
    %1029 = tpu.matmul %1026, %1025, %cst_323 {dimension_numbers = #tpu.dot_dimension_numbers<[1], [0], [0], [1], [0, 0, 1, 1], [], []>} : vector<8x8xf32>, vector<8x8xf32>, vector<8x8xf32> -> vector<8x8xf32>
    %cst_324 = arith.constant 5.000000e-01 : f32
    %1030 = vector.broadcast %cst_324 : f32 to vector<8x8xf32>
    %1031 = arith.mulf %1030, %1029 : vector<8x8xf32>
    %1032 = arith.subf %1028, %1031 : vector<8x8xf32>
    %cst_325 = arith.constant dense<0.000000e+00> : vector<8x8xf32>
    %1033 = tpu.matmul %1025, %1032, %cst_325 {dimension_numbers = #tpu.dot_dimension_numbers<[1], [0], [0], [1], [0, 0, 1, 1], [], []>} : vector<8x8xf32>, vector<8x8xf32>, vector<8x8xf32> -> vector<8x8xf32>
    %cst_326 = arith.constant dense<0.000000e+00> : vector<8x8xf32>
    %1034 = tpu.matmul %1032, %1026, %cst_326 {dimension_numbers = #tpu.dot_dimension_numbers<[1], [0], [0], [1], [0, 0, 1, 1], [], []>} : vector<8x8xf32>, vector<8x8xf32>, vector<8x8xf32> -> vector<8x8xf32>
    %cst_327 = arith.constant 1.500000e+00 : f32
    %1035 = vector.broadcast %cst_327 : f32 to vector<8x8xf32>
    %1036 = arith.mulf %1035, %16 : vector<8x8xf32>
    %cst_328 = arith.constant dense<0.000000e+00> : vector<8x8xf32>
    %1037 = tpu.matmul %1034, %1033, %cst_328 {dimension_numbers = #tpu.dot_dimension_numbers<[1], [0], [0], [1], [0, 0, 1, 1], [], []>} : vector<8x8xf32>, vector<8x8xf32>, vector<8x8xf32> -> vector<8x8xf32>
    %cst_329 = arith.constant 5.000000e-01 : f32
    %1038 = vector.broadcast %cst_329 : f32 to vector<8x8xf32>
    %1039 = arith.mulf %1038, %1037 : vector<8x8xf32>
    %1040 = arith.subf %1036, %1039 : vector<8x8xf32>
    %cst_330 = arith.constant dense<0.000000e+00> : vector<8x8xf32>
    %1041 = tpu.matmul %1033, %1040, %cst_330 {dimension_numbers = #tpu.dot_dimension_numbers<[1], [0], [0], [1], [0, 0, 1, 1], [], []>} : vector<8x8xf32>, vector<8x8xf32>, vector<8x8xf32> -> vector<8x8xf32>
    %cst_331 = arith.constant dense<0.000000e+00> : vector<8x8xf32>
    %1042 = tpu.matmul %1040, %1034, %cst_331 {dimension_numbers = #tpu.dot_dimension_numbers<[1], [0], [0], [1], [0, 0, 1, 1], [], []>} : vector<8x8xf32>, vector<8x8xf32>, vector<8x8xf32> -> vector<8x8xf32>
    %cst_332 = arith.constant 1.500000e+00 : f32
    %1043 = vector.broadcast %cst_332 : f32 to vector<8x8xf32>
    %1044 = arith.mulf %1043, %16 : vector<8x8xf32>
    %cst_333 = arith.constant dense<0.000000e+00> : vector<8x8xf32>
    %1045 = tpu.matmul %1042, %1041, %cst_333 {dimension_numbers = #tpu.dot_dimension_numbers<[1], [0], [0], [1], [0, 0, 1, 1], [], []>} : vector<8x8xf32>, vector<8x8xf32>, vector<8x8xf32> -> vector<8x8xf32>
    %cst_334 = arith.constant 5.000000e-01 : f32
    %1046 = vector.broadcast %cst_334 : f32 to vector<8x8xf32>
    %1047 = arith.mulf %1046, %1045 : vector<8x8xf32>
    %1048 = arith.subf %1044, %1047 : vector<8x8xf32>
    %cst_335 = arith.constant dense<0.000000e+00> : vector<8x8xf32>
    %1049 = tpu.matmul %1041, %1048, %cst_335 {dimension_numbers = #tpu.dot_dimension_numbers<[1], [0], [0], [1], [0, 0, 1, 1], [], []>} : vector<8x8xf32>, vector<8x8xf32>, vector<8x8xf32> -> vector<8x8xf32>
    %cst_336 = arith.constant dense<0.000000e+00> : vector<8x8xf32>
    %1050 = tpu.matmul %1048, %1042, %cst_336 {dimension_numbers = #tpu.dot_dimension_numbers<[1], [0], [0], [1], [0, 0, 1, 1], [], []>} : vector<8x8xf32>, vector<8x8xf32>, vector<8x8xf32> -> vector<8x8xf32>
    %cst_337 = arith.constant 1.500000e+00 : f32
    %1051 = vector.broadcast %cst_337 : f32 to vector<8x8xf32>
    %1052 = arith.mulf %1051, %16 : vector<8x8xf32>
    %cst_338 = arith.constant dense<0.000000e+00> : vector<8x8xf32>
    %1053 = tpu.matmul %1050, %1049, %cst_338 {dimension_numbers = #tpu.dot_dimension_numbers<[1], [0], [0], [1], [0, 0, 1, 1], [], []>} : vector<8x8xf32>, vector<8x8xf32>, vector<8x8xf32> -> vector<8x8xf32>
    %cst_339 = arith.constant 5.000000e-01 : f32
    %1054 = vector.broadcast %cst_339 : f32 to vector<8x8xf32>
    %1055 = arith.mulf %1054, %1053 : vector<8x8xf32>
    %1056 = arith.subf %1052, %1055 : vector<8x8xf32>
    %cst_340 = arith.constant dense<0.000000e+00> : vector<8x8xf32>
    %1057 = tpu.matmul %1049, %1056, %cst_340 {dimension_numbers = #tpu.dot_dimension_numbers<[1], [0], [0], [1], [0, 0, 1, 1], [], []>} : vector<8x8xf32>, vector<8x8xf32>, vector<8x8xf32> -> vector<8x8xf32>
    %cst_341 = arith.constant dense<0.000000e+00> : vector<8x8xf32>
    %1058 = tpu.matmul %1056, %1050, %cst_341 {dimension_numbers = #tpu.dot_dimension_numbers<[1], [0], [0], [1], [0, 0, 1, 1], [], []>} : vector<8x8xf32>, vector<8x8xf32>, vector<8x8xf32> -> vector<8x8xf32>
    %cst_342 = arith.constant 1.500000e+00 : f32
    %1059 = vector.broadcast %cst_342 : f32 to vector<8x8xf32>
    %1060 = arith.mulf %1059, %16 : vector<8x8xf32>
    %cst_343 = arith.constant dense<0.000000e+00> : vector<8x8xf32>
    %1061 = tpu.matmul %1058, %1057, %cst_343 {dimension_numbers = #tpu.dot_dimension_numbers<[1], [0], [0], [1], [0, 0, 1, 1], [], []>} : vector<8x8xf32>, vector<8x8xf32>, vector<8x8xf32> -> vector<8x8xf32>
    %cst_344 = arith.constant 5.000000e-01 : f32
    %1062 = vector.broadcast %cst_344 : f32 to vector<8x8xf32>
    %1063 = arith.mulf %1062, %1061 : vector<8x8xf32>
    %1064 = arith.subf %1060, %1063 : vector<8x8xf32>
    %cst_345 = arith.constant dense<0.000000e+00> : vector<8x8xf32>
    %1065 = tpu.matmul %1057, %1064, %cst_345 {dimension_numbers = #tpu.dot_dimension_numbers<[1], [0], [0], [1], [0, 0, 1, 1], [], []>} : vector<8x8xf32>, vector<8x8xf32>, vector<8x8xf32> -> vector<8x8xf32>
    %cst_346 = arith.constant dense<0.000000e+00> : vector<8x8xf32>
    %1066 = tpu.matmul %1064, %1058, %cst_346 {dimension_numbers = #tpu.dot_dimension_numbers<[1], [0], [0], [1], [0, 0, 1, 1], [], []>} : vector<8x8xf32>, vector<8x8xf32>, vector<8x8xf32> -> vector<8x8xf32>
    %cst_347 = arith.constant 1.500000e+00 : f32
    %1067 = vector.broadcast %cst_347 : f32 to vector<8x8xf32>
    %1068 = arith.mulf %1067, %16 : vector<8x8xf32>
    %cst_348 = arith.constant dense<0.000000e+00> : vector<8x8xf32>
    %1069 = tpu.matmul %1066, %1065, %cst_348 {dimension_numbers = #tpu.dot_dimension_numbers<[1], [0], [0], [1], [0, 0, 1, 1], [], []>} : vector<8x8xf32>, vector<8x8xf32>, vector<8x8xf32> -> vector<8x8xf32>
    %cst_349 = arith.constant 5.000000e-01 : f32
    %1070 = vector.broadcast %cst_349 : f32 to vector<8x8xf32>
    %1071 = arith.mulf %1070, %1069 : vector<8x8xf32>
    %1072 = arith.subf %1068, %1071 : vector<8x8xf32>
    %cst_350 = arith.constant dense<0.000000e+00> : vector<8x8xf32>
    %1073 = tpu.matmul %1065, %1072, %cst_350 {dimension_numbers = #tpu.dot_dimension_numbers<[1], [0], [0], [1], [0, 0, 1, 1], [], []>} : vector<8x8xf32>, vector<8x8xf32>, vector<8x8xf32> -> vector<8x8xf32>
    %cst_351 = arith.constant dense<0.000000e+00> : vector<8x8xf32>
    %1074 = tpu.matmul %1072, %1066, %cst_351 {dimension_numbers = #tpu.dot_dimension_numbers<[1], [0], [0], [1], [0, 0, 1, 1], [], []>} : vector<8x8xf32>, vector<8x8xf32>, vector<8x8xf32> -> vector<8x8xf32>
    %cst_352 = arith.constant 1.500000e+00 : f32
    %1075 = vector.broadcast %cst_352 : f32 to vector<8x8xf32>
    %1076 = arith.mulf %1075, %16 : vector<8x8xf32>
    %cst_353 = arith.constant dense<0.000000e+00> : vector<8x8xf32>
    %1077 = tpu.matmul %1074, %1073, %cst_353 {dimension_numbers = #tpu.dot_dimension_numbers<[1], [0], [0], [1], [0, 0, 1, 1], [], []>} : vector<8x8xf32>, vector<8x8xf32>, vector<8x8xf32> -> vector<8x8xf32>
    %cst_354 = arith.constant 5.000000e-01 : f32
    %1078 = vector.broadcast %cst_354 : f32 to vector<8x8xf32>
    %1079 = arith.mulf %1078, %1077 : vector<8x8xf32>
    %1080 = arith.subf %1076, %1079 : vector<8x8xf32>
    %cst_355 = arith.constant dense<0.000000e+00> : vector<8x8xf32>
    %1081 = tpu.matmul %1073, %1080, %cst_355 {dimension_numbers = #tpu.dot_dimension_numbers<[1], [0], [0], [1], [0, 0, 1, 1], [], []>} : vector<8x8xf32>, vector<8x8xf32>, vector<8x8xf32> -> vector<8x8xf32>
    %cst_356 = arith.constant dense<0.000000e+00> : vector<8x8xf32>
    %1082 = tpu.matmul %1080, %1074, %cst_356 {dimension_numbers = #tpu.dot_dimension_numbers<[1], [0], [0], [1], [0, 0, 1, 1], [], []>} : vector<8x8xf32>, vector<8x8xf32>, vector<8x8xf32> -> vector<8x8xf32>
    %cst_357 = arith.constant 1.500000e+00 : f32
    %1083 = vector.broadcast %cst_357 : f32 to vector<8x8xf32>
    %1084 = arith.mulf %1083, %16 : vector<8x8xf32>
    %cst_358 = arith.constant dense<0.000000e+00> : vector<8x8xf32>
    %1085 = tpu.matmul %1082, %1081, %cst_358 {dimension_numbers = #tpu.dot_dimension_numbers<[1], [0], [0], [1], [0, 0, 1, 1], [], []>} : vector<8x8xf32>, vector<8x8xf32>, vector<8x8xf32> -> vector<8x8xf32>
    %cst_359 = arith.constant 5.000000e-01 : f32
    %1086 = vector.broadcast %cst_359 : f32 to vector<8x8xf32>
    %1087 = arith.mulf %1086, %1085 : vector<8x8xf32>
    %1088 = arith.subf %1084, %1087 : vector<8x8xf32>
    %cst_360 = arith.constant dense<0.000000e+00> : vector<8x8xf32>
    %1089 = tpu.matmul %1081, %1088, %cst_360 {dimension_numbers = #tpu.dot_dimension_numbers<[1], [0], [0], [1], [0, 0, 1, 1], [], []>} : vector<8x8xf32>, vector<8x8xf32>, vector<8x8xf32> -> vector<8x8xf32>
    %cst_361 = arith.constant dense<0.000000e+00> : vector<8x8xf32>
    %1090 = tpu.matmul %1088, %1082, %cst_361 {dimension_numbers = #tpu.dot_dimension_numbers<[1], [0], [0], [1], [0, 0, 1, 1], [], []>} : vector<8x8xf32>, vector<8x8xf32>, vector<8x8xf32> -> vector<8x8xf32>
    %cst_362 = arith.constant 1.500000e+00 : f32
    %1091 = vector.broadcast %cst_362 : f32 to vector<8x8xf32>
    %1092 = arith.mulf %1091, %16 : vector<8x8xf32>
    %cst_363 = arith.constant dense<0.000000e+00> : vector<8x8xf32>
    %1093 = tpu.matmul %1090, %1089, %cst_363 {dimension_numbers = #tpu.dot_dimension_numbers<[1], [0], [0], [1], [0, 0, 1, 1], [], []>} : vector<8x8xf32>, vector<8x8xf32>, vector<8x8xf32> -> vector<8x8xf32>
    %cst_364 = arith.constant 5.000000e-01 : f32
    %1094 = vector.broadcast %cst_364 : f32 to vector<8x8xf32>
    %1095 = arith.mulf %1094, %1093 : vector<8x8xf32>
    %1096 = arith.subf %1092, %1095 : vector<8x8xf32>
    %cst_365 = arith.constant dense<0.000000e+00> : vector<8x8xf32>
    %1097 = tpu.matmul %1089, %1096, %cst_365 {dimension_numbers = #tpu.dot_dimension_numbers<[1], [0], [0], [1], [0, 0, 1, 1], [], []>} : vector<8x8xf32>, vector<8x8xf32>, vector<8x8xf32> -> vector<8x8xf32>
    %cst_366 = arith.constant dense<0.000000e+00> : vector<8x8xf32>
    %1098 = tpu.matmul %1096, %1090, %cst_366 {dimension_numbers = #tpu.dot_dimension_numbers<[1], [0], [0], [1], [0, 0, 1, 1], [], []>} : vector<8x8xf32>, vector<8x8xf32>, vector<8x8xf32> -> vector<8x8xf32>
    %cst_367 = arith.constant 1.500000e+00 : f32
    %1099 = vector.broadcast %cst_367 : f32 to vector<8x8xf32>
    %1100 = arith.mulf %1099, %16 : vector<8x8xf32>
    %cst_368 = arith.constant dense<0.000000e+00> : vector<8x8xf32>
    %1101 = tpu.matmul %1098, %1097, %cst_368 {dimension_numbers = #tpu.dot_dimension_numbers<[1], [0], [0], [1], [0, 0, 1, 1], [], []>} : vector<8x8xf32>, vector<8x8xf32>, vector<8x8xf32> -> vector<8x8xf32>
    %cst_369 = arith.constant 5.000000e-01 : f32
    %1102 = vector.broadcast %cst_369 : f32 to vector<8x8xf32>
    %1103 = arith.mulf %1102, %1101 : vector<8x8xf32>
    %1104 = arith.subf %1100, %1103 : vector<8x8xf32>
    %cst_370 = arith.constant dense<0.000000e+00> : vector<8x8xf32>
    %1105 = tpu.matmul %1097, %1104, %cst_370 {dimension_numbers = #tpu.dot_dimension_numbers<[1], [0], [0], [1], [0, 0, 1, 1], [], []>} : vector<8x8xf32>, vector<8x8xf32>, vector<8x8xf32> -> vector<8x8xf32>
    %1106 = math.sqrt %1008 : vector<1x1xf32>
    %1107 = arith.mulf %1105, %16 : vector<8x8xf32>
    %cst_371 = arith.constant dense<0.000000e+00> : vector<8xf32>
    %1108 = vector.multi_reduction <add>, %1107, %cst_371 [1] : vector<8x8xf32> to vector<8xf32>
    %1109 = vector.shape_cast %1108 : vector<8xf32> to vector<8x1xf32>
    %cst_372 = arith.constant dense<0.000000e+00> : vector<1xf32>
    %1110 = vector.multi_reduction <add>, %1109, %cst_372 [0] : vector<8x1xf32> to vector<1xf32>
    %1111 = vector.shape_cast %1110 : vector<1xf32> to vector<1x1xf32>
    %1112 = arith.mulf %1106, %1111 : vector<1x1xf32>
    %cst_373 = arith.constant 9.99999997E-7 : f32
    %1113 = vector.broadcast %cst_373 : f32 to vector<1x1xf32>
    %1114 = arith.addf %1112, %1113 : vector<1x1xf32>
    %1115 = tpu.reciprocal %1114 {approx = true} : vector<1x1xf32> -> vector<1x1xf32>
    %1116 = vector.broadcast %1115 : vector<1x1xf32> to vector<8x256xf32>
    %1117 = arith.mulf %999, %1116 : vector<8x256xf32>
    %1118 = arith.truncf %1117 : vector<8x256xf32> to vector<8x256xbf16>
    %cst_374 = arith.constant dense<0.000000e+00> : vector<32x8xf32>
    %1119 = tpu.matmul %11, %1118, %cst_374 {dimension_numbers = #tpu.dot_dimension_numbers<[1], [1], [0], [0], [0, 0, 1, 0], [], []>} : vector<32x256xbf16>, vector<8x256xbf16>, vector<32x8xf32> -> vector<32x8xf32>
    %cst_375 = arith.constant dense<0.000000e+00> : vector<8x8xf32>
    %1120 = tpu.matmul %1118, %1118, %cst_375 {dimension_numbers = #tpu.dot_dimension_numbers<[1], [1], [0], [0], [0, 0, 1, 0], [], []>} : vector<8x256xbf16>, vector<8x256xbf16>, vector<8x8xf32> -> vector<8x8xf32>
    %1121 = vector.extract_strided_slice %944 {offsets = [0, 0], sizes = [32, 1], strides = [1, 1]} : vector<32x8xf32> to vector<32x1xf32>
    %1122 = vector.extract_strided_slice %1120 {offsets = [0, 0], sizes = [1, 8], strides = [1, 1]} : vector<8x8xf32> to vector<1x8xf32>
    %1123 = vector.broadcast %1121 : vector<32x1xf32> to vector<32x8xf32>
    %1124 = vector.broadcast %1122 : vector<1x8xf32> to vector<32x8xf32>
    %1125 = arith.mulf %1123, %1124 : vector<32x8xf32>
    %1126 = vector.extract_strided_slice %944 {offsets = [0, 1], sizes = [32, 1], strides = [1, 1]} : vector<32x8xf32> to vector<32x1xf32>
    %1127 = vector.extract_strided_slice %1120 {offsets = [1, 0], sizes = [1, 8], strides = [1, 1]} : vector<8x8xf32> to vector<1x8xf32>
    %1128 = vector.broadcast %1126 : vector<32x1xf32> to vector<32x8xf32>
    %1129 = vector.broadcast %1127 : vector<1x8xf32> to vector<32x8xf32>
    %1130 = arith.mulf %1128, %1129 : vector<32x8xf32>
    %1131 = arith.addf %1125, %1130 : vector<32x8xf32>
    %1132 = vector.extract_strided_slice %944 {offsets = [0, 2], sizes = [32, 1], strides = [1, 1]} : vector<32x8xf32> to vector<32x1xf32>
    %1133 = vector.extract_strided_slice %1120 {offsets = [2, 0], sizes = [1, 8], strides = [1, 1]} : vector<8x8xf32> to vector<1x8xf32>
    %1134 = vector.broadcast %1132 : vector<32x1xf32> to vector<32x8xf32>
    %1135 = vector.broadcast %1133 : vector<1x8xf32> to vector<32x8xf32>
    %1136 = arith.mulf %1134, %1135 : vector<32x8xf32>
    %1137 = arith.addf %1131, %1136 : vector<32x8xf32>
    %1138 = vector.extract_strided_slice %944 {offsets = [0, 3], sizes = [32, 1], strides = [1, 1]} : vector<32x8xf32> to vector<32x1xf32>
    %1139 = vector.extract_strided_slice %1120 {offsets = [3, 0], sizes = [1, 8], strides = [1, 1]} : vector<8x8xf32> to vector<1x8xf32>
    %1140 = vector.broadcast %1138 : vector<32x1xf32> to vector<32x8xf32>
    %1141 = vector.broadcast %1139 : vector<1x8xf32> to vector<32x8xf32>
    %1142 = arith.mulf %1140, %1141 : vector<32x8xf32>
    %1143 = arith.addf %1137, %1142 : vector<32x8xf32>
    %1144 = vector.extract_strided_slice %944 {offsets = [0, 4], sizes = [32, 1], strides = [1, 1]} : vector<32x8xf32> to vector<32x1xf32>
    %1145 = vector.extract_strided_slice %1120 {offsets = [4, 0], sizes = [1, 8], strides = [1, 1]} : vector<8x8xf32> to vector<1x8xf32>
    %1146 = vector.broadcast %1144 : vector<32x1xf32> to vector<32x8xf32>
    %1147 = vector.broadcast %1145 : vector<1x8xf32> to vector<32x8xf32>
    %1148 = arith.mulf %1146, %1147 : vector<32x8xf32>
    %1149 = arith.addf %1143, %1148 : vector<32x8xf32>
    %1150 = vector.extract_strided_slice %944 {offsets = [0, 5], sizes = [32, 1], strides = [1, 1]} : vector<32x8xf32> to vector<32x1xf32>
    %1151 = vector.extract_strided_slice %1120 {offsets = [5, 0], sizes = [1, 8], strides = [1, 1]} : vector<8x8xf32> to vector<1x8xf32>
    %1152 = vector.broadcast %1150 : vector<32x1xf32> to vector<32x8xf32>
    %1153 = vector.broadcast %1151 : vector<1x8xf32> to vector<32x8xf32>
    %1154 = arith.mulf %1152, %1153 : vector<32x8xf32>
    %1155 = arith.addf %1149, %1154 : vector<32x8xf32>
    %1156 = vector.extract_strided_slice %944 {offsets = [0, 6], sizes = [32, 1], strides = [1, 1]} : vector<32x8xf32> to vector<32x1xf32>
    %1157 = vector.extract_strided_slice %1120 {offsets = [6, 0], sizes = [1, 8], strides = [1, 1]} : vector<8x8xf32> to vector<1x8xf32>
    %1158 = vector.broadcast %1156 : vector<32x1xf32> to vector<32x8xf32>
    %1159 = vector.broadcast %1157 : vector<1x8xf32> to vector<32x8xf32>
    %1160 = arith.mulf %1158, %1159 : vector<32x8xf32>
    %1161 = arith.addf %1155, %1160 : vector<32x8xf32>
    %1162 = vector.extract_strided_slice %944 {offsets = [0, 7], sizes = [32, 1], strides = [1, 1]} : vector<32x8xf32> to vector<32x1xf32>
    %1163 = vector.extract_strided_slice %1120 {offsets = [7, 0], sizes = [1, 8], strides = [1, 1]} : vector<8x8xf32> to vector<1x8xf32>
    %1164 = vector.broadcast %1162 : vector<32x1xf32> to vector<32x8xf32>
    %1165 = vector.broadcast %1163 : vector<1x8xf32> to vector<32x8xf32>
    %1166 = arith.mulf %1164, %1165 : vector<32x8xf32>
    %1167 = arith.addf %1161, %1166 : vector<32x8xf32>
    %1168 = arith.mulf %944, %1119 : vector<32x8xf32>
    %cst_376 = arith.constant 9.99999997E-7 : f32
    %1169 = vector.broadcast %cst_376 : f32 to vector<32x8xf32>
    %1170 = arith.addf %1167, %1169 : vector<32x8xf32>
    %1171 = tpu.reciprocal %1170 {approx = true} : vector<32x8xf32> -> vector<32x8xf32>
    %1172 = arith.mulf %1168, %1171 : vector<32x8xf32>
    %1173 = arith.truncf %1172 : vector<32x8xf32> to vector<32x8xbf16>
    %cst_377 = arith.constant dense<0.000000e+00> : vector<8x256xf32>
    %1174 = tpu.matmul %1173, %11, %cst_377 {dimension_numbers = #tpu.dot_dimension_numbers<[0], [0], [1], [1], [0, 1, 1, 1], [], []>} : vector<32x8xbf16>, vector<32x256xbf16>, vector<8x256xf32> -> vector<8x256xf32>
    %cst_378 = arith.constant dense<0.000000e+00> : vector<8x8xf32>
    %1175 = tpu.matmul %1172, %1172, %cst_378 {dimension_numbers = #tpu.dot_dimension_numbers<[0], [0], [1], [1], [0, 1, 1, 1], [], []>} : vector<32x8xf32>, vector<32x8xf32>, vector<8x8xf32> -> vector<8x8xf32>
    %1176 = vector.extract_strided_slice %1175 {offsets = [0, 0], sizes = [8, 1], strides = [1, 1]} : vector<8x8xf32> to vector<8x1xf32>
    %1177 = vector.extract_strided_slice %1117 {offsets = [0, 0], sizes = [1, 256], strides = [1, 1]} : vector<8x256xf32> to vector<1x256xf32>
    %1178 = vector.broadcast %1176 : vector<8x1xf32> to vector<8x256xf32>
    %1179 = vector.broadcast %1177 : vector<1x256xf32> to vector<8x256xf32>
    %1180 = arith.mulf %1178, %1179 : vector<8x256xf32>
    %1181 = vector.extract_strided_slice %1175 {offsets = [0, 1], sizes = [8, 1], strides = [1, 1]} : vector<8x8xf32> to vector<8x1xf32>
    %1182 = vector.extract_strided_slice %1117 {offsets = [1, 0], sizes = [1, 256], strides = [1, 1]} : vector<8x256xf32> to vector<1x256xf32>
    %1183 = vector.broadcast %1181 : vector<8x1xf32> to vector<8x256xf32>
    %1184 = vector.broadcast %1182 : vector<1x256xf32> to vector<8x256xf32>
    %1185 = arith.mulf %1183, %1184 : vector<8x256xf32>
    %1186 = arith.addf %1180, %1185 : vector<8x256xf32>
    %1187 = vector.extract_strided_slice %1175 {offsets = [0, 2], sizes = [8, 1], strides = [1, 1]} : vector<8x8xf32> to vector<8x1xf32>
    %1188 = vector.extract_strided_slice %1117 {offsets = [2, 0], sizes = [1, 256], strides = [1, 1]} : vector<8x256xf32> to vector<1x256xf32>
    %1189 = vector.broadcast %1187 : vector<8x1xf32> to vector<8x256xf32>
    %1190 = vector.broadcast %1188 : vector<1x256xf32> to vector<8x256xf32>
    %1191 = arith.mulf %1189, %1190 : vector<8x256xf32>
    %1192 = arith.addf %1186, %1191 : vector<8x256xf32>
    %1193 = vector.extract_strided_slice %1175 {offsets = [0, 3], sizes = [8, 1], strides = [1, 1]} : vector<8x8xf32> to vector<8x1xf32>
    %1194 = vector.extract_strided_slice %1117 {offsets = [3, 0], sizes = [1, 256], strides = [1, 1]} : vector<8x256xf32> to vector<1x256xf32>
    %1195 = vector.broadcast %1193 : vector<8x1xf32> to vector<8x256xf32>
    %1196 = vector.broadcast %1194 : vector<1x256xf32> to vector<8x256xf32>
    %1197 = arith.mulf %1195, %1196 : vector<8x256xf32>
    %1198 = arith.addf %1192, %1197 : vector<8x256xf32>
    %1199 = vector.extract_strided_slice %1175 {offsets = [0, 4], sizes = [8, 1], strides = [1, 1]} : vector<8x8xf32> to vector<8x1xf32>
    %1200 = vector.extract_strided_slice %1117 {offsets = [4, 0], sizes = [1, 256], strides = [1, 1]} : vector<8x256xf32> to vector<1x256xf32>
    %1201 = vector.broadcast %1199 : vector<8x1xf32> to vector<8x256xf32>
    %1202 = vector.broadcast %1200 : vector<1x256xf32> to vector<8x256xf32>
    %1203 = arith.mulf %1201, %1202 : vector<8x256xf32>
    %1204 = arith.addf %1198, %1203 : vector<8x256xf32>
    %1205 = vector.extract_strided_slice %1175 {offsets = [0, 5], sizes = [8, 1], strides = [1, 1]} : vector<8x8xf32> to vector<8x1xf32>
    %1206 = vector.extract_strided_slice %1117 {offsets = [5, 0], sizes = [1, 256], strides = [1, 1]} : vector<8x256xf32> to vector<1x256xf32>
    %1207 = vector.broadcast %1205 : vector<8x1xf32> to vector<8x256xf32>
    %1208 = vector.broadcast %1206 : vector<1x256xf32> to vector<8x256xf32>
    %1209 = arith.mulf %1207, %1208 : vector<8x256xf32>
    %1210 = arith.addf %1204, %1209 : vector<8x256xf32>
    %1211 = vector.extract_strided_slice %1175 {offsets = [0, 6], sizes = [8, 1], strides = [1, 1]} : vector<8x8xf32> to vector<8x1xf32>
    %1212 = vector.extract_strided_slice %1117 {offsets = [6, 0], sizes = [1, 256], strides = [1, 1]} : vector<8x256xf32> to vector<1x256xf32>
    %1213 = vector.broadcast %1211 : vector<8x1xf32> to vector<8x256xf32>
    %1214 = vector.broadcast %1212 : vector<1x256xf32> to vector<8x256xf32>
    %1215 = arith.mulf %1213, %1214 : vector<8x256xf32>
    %1216 = arith.addf %1210, %1215 : vector<8x256xf32>
    %1217 = vector.extract_strided_slice %1175 {offsets = [0, 7], sizes = [8, 1], strides = [1, 1]} : vector<8x8xf32> to vector<8x1xf32>
    %1218 = vector.extract_strided_slice %1117 {offsets = [7, 0], sizes = [1, 256], strides = [1, 1]} : vector<8x256xf32> to vector<1x256xf32>
    %1219 = vector.broadcast %1217 : vector<8x1xf32> to vector<8x256xf32>
    %1220 = vector.broadcast %1218 : vector<1x256xf32> to vector<8x256xf32>
    %1221 = arith.mulf %1219, %1220 : vector<8x256xf32>
    %1222 = arith.addf %1216, %1221 : vector<8x256xf32>
    %1223 = arith.mulf %1117, %1174 : vector<8x256xf32>
    %cst_379 = arith.constant 9.99999997E-7 : f32
    %1224 = vector.broadcast %cst_379 : f32 to vector<8x256xf32>
    %1225 = arith.addf %1222, %1224 : vector<8x256xf32>
    %1226 = tpu.reciprocal %1225 {approx = true} : vector<8x256xf32> -> vector<8x256xf32>
    %1227 = arith.mulf %1223, %1226 : vector<8x256xf32>
    %cst_380 = arith.constant dense<0.000000e+00> : vector<8x8xf32>
    %1228 = tpu.matmul %1227, %1227, %cst_380 {dimension_numbers = #tpu.dot_dimension_numbers<[1], [1], [0], [0], [0, 0, 1, 0], [], []>} : vector<8x256xf32>, vector<8x256xf32>, vector<8x8xf32> -> vector<8x8xf32>
    %1229 = arith.mulf %1228, %1228 : vector<8x8xf32>
    %cst_381 = arith.constant dense<0.000000e+00> : vector<8xf32>
    %1230 = vector.multi_reduction <add>, %1229, %cst_381 [1] : vector<8x8xf32> to vector<8xf32>
    %1231 = vector.shape_cast %1230 : vector<8xf32> to vector<8x1xf32>
    %cst_382 = arith.constant dense<0.000000e+00> : vector<1xf32>
    %1232 = vector.multi_reduction <add>, %1231, %cst_382 [0] : vector<8x1xf32> to vector<1xf32>
    %1233 = vector.shape_cast %1232 : vector<1xf32> to vector<1x1xf32>
    %1234 = math.sqrt %1233 : vector<1x1xf32>
    %cst_383 = arith.constant 1.000000e-30 : f32
    %1235 = vector.broadcast %cst_383 : f32 to vector<1x1xf32>
    %1236 = arith.addf %1234, %1235 : vector<1x1xf32>
    %1237 = vector.broadcast %1236 : vector<1x1xf32> to vector<8x8xf32>
    %1238 = arith.divf %1228, %1237 : vector<8x8xf32>
    %cst_384 = arith.constant 1.500000e+00 : f32
    %1239 = vector.broadcast %cst_384 : f32 to vector<8x8xf32>
    %1240 = arith.mulf %1239, %16 : vector<8x8xf32>
    %cst_385 = arith.constant dense<0.000000e+00> : vector<8x8xf32>
    %1241 = tpu.matmul %16, %1238, %cst_385 {dimension_numbers = #tpu.dot_dimension_numbers<[1], [0], [0], [1], [0, 0, 1, 1], [], []>} : vector<8x8xf32>, vector<8x8xf32>, vector<8x8xf32> -> vector<8x8xf32>
    %cst_386 = arith.constant 5.000000e-01 : f32
    %1242 = vector.broadcast %cst_386 : f32 to vector<8x8xf32>
    %1243 = arith.mulf %1242, %1241 : vector<8x8xf32>
    %1244 = arith.subf %1240, %1243 : vector<8x8xf32>
    %cst_387 = arith.constant dense<0.000000e+00> : vector<8x8xf32>
    %1245 = tpu.matmul %1238, %1244, %cst_387 {dimension_numbers = #tpu.dot_dimension_numbers<[1], [0], [0], [1], [0, 0, 1, 1], [], []>} : vector<8x8xf32>, vector<8x8xf32>, vector<8x8xf32> -> vector<8x8xf32>
    %cst_388 = arith.constant dense<0.000000e+00> : vector<8x8xf32>
    %1246 = tpu.matmul %1244, %16, %cst_388 {dimension_numbers = #tpu.dot_dimension_numbers<[1], [0], [0], [1], [0, 0, 1, 1], [], []>} : vector<8x8xf32>, vector<8x8xf32>, vector<8x8xf32> -> vector<8x8xf32>
    %cst_389 = arith.constant 1.500000e+00 : f32
    %1247 = vector.broadcast %cst_389 : f32 to vector<8x8xf32>
    %1248 = arith.mulf %1247, %16 : vector<8x8xf32>
    %cst_390 = arith.constant dense<0.000000e+00> : vector<8x8xf32>
    %1249 = tpu.matmul %1246, %1245, %cst_390 {dimension_numbers = #tpu.dot_dimension_numbers<[1], [0], [0], [1], [0, 0, 1, 1], [], []>} : vector<8x8xf32>, vector<8x8xf32>, vector<8x8xf32> -> vector<8x8xf32>
    %cst_391 = arith.constant 5.000000e-01 : f32
    %1250 = vector.broadcast %cst_391 : f32 to vector<8x8xf32>
    %1251 = arith.mulf %1250, %1249 : vector<8x8xf32>
    %1252 = arith.subf %1248, %1251 : vector<8x8xf32>
    %cst_392 = arith.constant dense<0.000000e+00> : vector<8x8xf32>
    %1253 = tpu.matmul %1245, %1252, %cst_392 {dimension_numbers = #tpu.dot_dimension_numbers<[1], [0], [0], [1], [0, 0, 1, 1], [], []>} : vector<8x8xf32>, vector<8x8xf32>, vector<8x8xf32> -> vector<8x8xf32>
    %cst_393 = arith.constant dense<0.000000e+00> : vector<8x8xf32>
    %1254 = tpu.matmul %1252, %1246, %cst_393 {dimension_numbers = #tpu.dot_dimension_numbers<[1], [0], [0], [1], [0, 0, 1, 1], [], []>} : vector<8x8xf32>, vector<8x8xf32>, vector<8x8xf32> -> vector<8x8xf32>
    %cst_394 = arith.constant 1.500000e+00 : f32
    %1255 = vector.broadcast %cst_394 : f32 to vector<8x8xf32>
    %1256 = arith.mulf %1255, %16 : vector<8x8xf32>
    %cst_395 = arith.constant dense<0.000000e+00> : vector<8x8xf32>
    %1257 = tpu.matmul %1254, %1253, %cst_395 {dimension_numbers = #tpu.dot_dimension_numbers<[1], [0], [0], [1], [0, 0, 1, 1], [], []>} : vector<8x8xf32>, vector<8x8xf32>, vector<8x8xf32> -> vector<8x8xf32>
    %cst_396 = arith.constant 5.000000e-01 : f32
    %1258 = vector.broadcast %cst_396 : f32 to vector<8x8xf32>
    %1259 = arith.mulf %1258, %1257 : vector<8x8xf32>
    %1260 = arith.subf %1256, %1259 : vector<8x8xf32>
    %cst_397 = arith.constant dense<0.000000e+00> : vector<8x8xf32>
    %1261 = tpu.matmul %1253, %1260, %cst_397 {dimension_numbers = #tpu.dot_dimension_numbers<[1], [0], [0], [1], [0, 0, 1, 1], [], []>} : vector<8x8xf32>, vector<8x8xf32>, vector<8x8xf32> -> vector<8x8xf32>
    %cst_398 = arith.constant dense<0.000000e+00> : vector<8x8xf32>
    %1262 = tpu.matmul %1260, %1254, %cst_398 {dimension_numbers = #tpu.dot_dimension_numbers<[1], [0], [0], [1], [0, 0, 1, 1], [], []>} : vector<8x8xf32>, vector<8x8xf32>, vector<8x8xf32> -> vector<8x8xf32>
    %cst_399 = arith.constant 1.500000e+00 : f32
    %1263 = vector.broadcast %cst_399 : f32 to vector<8x8xf32>
    %1264 = arith.mulf %1263, %16 : vector<8x8xf32>
    %cst_400 = arith.constant dense<0.000000e+00> : vector<8x8xf32>
    %1265 = tpu.matmul %1262, %1261, %cst_400 {dimension_numbers = #tpu.dot_dimension_numbers<[1], [0], [0], [1], [0, 0, 1, 1], [], []>} : vector<8x8xf32>, vector<8x8xf32>, vector<8x8xf32> -> vector<8x8xf32>
    %cst_401 = arith.constant 5.000000e-01 : f32
    %1266 = vector.broadcast %cst_401 : f32 to vector<8x8xf32>
    %1267 = arith.mulf %1266, %1265 : vector<8x8xf32>
    %1268 = arith.subf %1264, %1267 : vector<8x8xf32>
    %cst_402 = arith.constant dense<0.000000e+00> : vector<8x8xf32>
    %1269 = tpu.matmul %1261, %1268, %cst_402 {dimension_numbers = #tpu.dot_dimension_numbers<[1], [0], [0], [1], [0, 0, 1, 1], [], []>} : vector<8x8xf32>, vector<8x8xf32>, vector<8x8xf32> -> vector<8x8xf32>
    %cst_403 = arith.constant dense<0.000000e+00> : vector<8x8xf32>
    %1270 = tpu.matmul %1268, %1262, %cst_403 {dimension_numbers = #tpu.dot_dimension_numbers<[1], [0], [0], [1], [0, 0, 1, 1], [], []>} : vector<8x8xf32>, vector<8x8xf32>, vector<8x8xf32> -> vector<8x8xf32>
    %cst_404 = arith.constant 1.500000e+00 : f32
    %1271 = vector.broadcast %cst_404 : f32 to vector<8x8xf32>
    %1272 = arith.mulf %1271, %16 : vector<8x8xf32>
    %cst_405 = arith.constant dense<0.000000e+00> : vector<8x8xf32>
    %1273 = tpu.matmul %1270, %1269, %cst_405 {dimension_numbers = #tpu.dot_dimension_numbers<[1], [0], [0], [1], [0, 0, 1, 1], [], []>} : vector<8x8xf32>, vector<8x8xf32>, vector<8x8xf32> -> vector<8x8xf32>
    %cst_406 = arith.constant 5.000000e-01 : f32
    %1274 = vector.broadcast %cst_406 : f32 to vector<8x8xf32>
    %1275 = arith.mulf %1274, %1273 : vector<8x8xf32>
    %1276 = arith.subf %1272, %1275 : vector<8x8xf32>
    %cst_407 = arith.constant dense<0.000000e+00> : vector<8x8xf32>
    %1277 = tpu.matmul %1269, %1276, %cst_407 {dimension_numbers = #tpu.dot_dimension_numbers<[1], [0], [0], [1], [0, 0, 1, 1], [], []>} : vector<8x8xf32>, vector<8x8xf32>, vector<8x8xf32> -> vector<8x8xf32>
    %cst_408 = arith.constant dense<0.000000e+00> : vector<8x8xf32>
    %1278 = tpu.matmul %1276, %1270, %cst_408 {dimension_numbers = #tpu.dot_dimension_numbers<[1], [0], [0], [1], [0, 0, 1, 1], [], []>} : vector<8x8xf32>, vector<8x8xf32>, vector<8x8xf32> -> vector<8x8xf32>
    %cst_409 = arith.constant 1.500000e+00 : f32
    %1279 = vector.broadcast %cst_409 : f32 to vector<8x8xf32>
    %1280 = arith.mulf %1279, %16 : vector<8x8xf32>
    %cst_410 = arith.constant dense<0.000000e+00> : vector<8x8xf32>
    %1281 = tpu.matmul %1278, %1277, %cst_410 {dimension_numbers = #tpu.dot_dimension_numbers<[1], [0], [0], [1], [0, 0, 1, 1], [], []>} : vector<8x8xf32>, vector<8x8xf32>, vector<8x8xf32> -> vector<8x8xf32>
    %cst_411 = arith.constant 5.000000e-01 : f32
    %1282 = vector.broadcast %cst_411 : f32 to vector<8x8xf32>
    %1283 = arith.mulf %1282, %1281 : vector<8x8xf32>
    %1284 = arith.subf %1280, %1283 : vector<8x8xf32>
    %cst_412 = arith.constant dense<0.000000e+00> : vector<8x8xf32>
    %1285 = tpu.matmul %1277, %1284, %cst_412 {dimension_numbers = #tpu.dot_dimension_numbers<[1], [0], [0], [1], [0, 0, 1, 1], [], []>} : vector<8x8xf32>, vector<8x8xf32>, vector<8x8xf32> -> vector<8x8xf32>
    %cst_413 = arith.constant dense<0.000000e+00> : vector<8x8xf32>
    %1286 = tpu.matmul %1284, %1278, %cst_413 {dimension_numbers = #tpu.dot_dimension_numbers<[1], [0], [0], [1], [0, 0, 1, 1], [], []>} : vector<8x8xf32>, vector<8x8xf32>, vector<8x8xf32> -> vector<8x8xf32>
    %cst_414 = arith.constant 1.500000e+00 : f32
    %1287 = vector.broadcast %cst_414 : f32 to vector<8x8xf32>
    %1288 = arith.mulf %1287, %16 : vector<8x8xf32>
    %cst_415 = arith.constant dense<0.000000e+00> : vector<8x8xf32>
    %1289 = tpu.matmul %1286, %1285, %cst_415 {dimension_numbers = #tpu.dot_dimension_numbers<[1], [0], [0], [1], [0, 0, 1, 1], [], []>} : vector<8x8xf32>, vector<8x8xf32>, vector<8x8xf32> -> vector<8x8xf32>
    %cst_416 = arith.constant 5.000000e-01 : f32
    %1290 = vector.broadcast %cst_416 : f32 to vector<8x8xf32>
    %1291 = arith.mulf %1290, %1289 : vector<8x8xf32>
    %1292 = arith.subf %1288, %1291 : vector<8x8xf32>
    %cst_417 = arith.constant dense<0.000000e+00> : vector<8x8xf32>
    %1293 = tpu.matmul %1285, %1292, %cst_417 {dimension_numbers = #tpu.dot_dimension_numbers<[1], [0], [0], [1], [0, 0, 1, 1], [], []>} : vector<8x8xf32>, vector<8x8xf32>, vector<8x8xf32> -> vector<8x8xf32>
    %cst_418 = arith.constant dense<0.000000e+00> : vector<8x8xf32>
    %1294 = tpu.matmul %1292, %1286, %cst_418 {dimension_numbers = #tpu.dot_dimension_numbers<[1], [0], [0], [1], [0, 0, 1, 1], [], []>} : vector<8x8xf32>, vector<8x8xf32>, vector<8x8xf32> -> vector<8x8xf32>
    %cst_419 = arith.constant 1.500000e+00 : f32
    %1295 = vector.broadcast %cst_419 : f32 to vector<8x8xf32>
    %1296 = arith.mulf %1295, %16 : vector<8x8xf32>
    %cst_420 = arith.constant dense<0.000000e+00> : vector<8x8xf32>
    %1297 = tpu.matmul %1294, %1293, %cst_420 {dimension_numbers = #tpu.dot_dimension_numbers<[1], [0], [0], [1], [0, 0, 1, 1], [], []>} : vector<8x8xf32>, vector<8x8xf32>, vector<8x8xf32> -> vector<8x8xf32>
    %cst_421 = arith.constant 5.000000e-01 : f32
    %1298 = vector.broadcast %cst_421 : f32 to vector<8x8xf32>
    %1299 = arith.mulf %1298, %1297 : vector<8x8xf32>
    %1300 = arith.subf %1296, %1299 : vector<8x8xf32>
    %cst_422 = arith.constant dense<0.000000e+00> : vector<8x8xf32>
    %1301 = tpu.matmul %1293, %1300, %cst_422 {dimension_numbers = #tpu.dot_dimension_numbers<[1], [0], [0], [1], [0, 0, 1, 1], [], []>} : vector<8x8xf32>, vector<8x8xf32>, vector<8x8xf32> -> vector<8x8xf32>
    %cst_423 = arith.constant dense<0.000000e+00> : vector<8x8xf32>
    %1302 = tpu.matmul %1300, %1294, %cst_423 {dimension_numbers = #tpu.dot_dimension_numbers<[1], [0], [0], [1], [0, 0, 1, 1], [], []>} : vector<8x8xf32>, vector<8x8xf32>, vector<8x8xf32> -> vector<8x8xf32>
    %cst_424 = arith.constant 1.500000e+00 : f32
    %1303 = vector.broadcast %cst_424 : f32 to vector<8x8xf32>
    %1304 = arith.mulf %1303, %16 : vector<8x8xf32>
    %cst_425 = arith.constant dense<0.000000e+00> : vector<8x8xf32>
    %1305 = tpu.matmul %1302, %1301, %cst_425 {dimension_numbers = #tpu.dot_dimension_numbers<[1], [0], [0], [1], [0, 0, 1, 1], [], []>} : vector<8x8xf32>, vector<8x8xf32>, vector<8x8xf32> -> vector<8x8xf32>
    %cst_426 = arith.constant 5.000000e-01 : f32
    %1306 = vector.broadcast %cst_426 : f32 to vector<8x8xf32>
    %1307 = arith.mulf %1306, %1305 : vector<8x8xf32>
    %1308 = arith.subf %1304, %1307 : vector<8x8xf32>
    %cst_427 = arith.constant dense<0.000000e+00> : vector<8x8xf32>
    %1309 = tpu.matmul %1301, %1308, %cst_427 {dimension_numbers = #tpu.dot_dimension_numbers<[1], [0], [0], [1], [0, 0, 1, 1], [], []>} : vector<8x8xf32>, vector<8x8xf32>, vector<8x8xf32> -> vector<8x8xf32>
    %cst_428 = arith.constant dense<0.000000e+00> : vector<8x8xf32>
    %1310 = tpu.matmul %1308, %1302, %cst_428 {dimension_numbers = #tpu.dot_dimension_numbers<[1], [0], [0], [1], [0, 0, 1, 1], [], []>} : vector<8x8xf32>, vector<8x8xf32>, vector<8x8xf32> -> vector<8x8xf32>
    %cst_429 = arith.constant 1.500000e+00 : f32
    %1311 = vector.broadcast %cst_429 : f32 to vector<8x8xf32>
    %1312 = arith.mulf %1311, %16 : vector<8x8xf32>
    %cst_430 = arith.constant dense<0.000000e+00> : vector<8x8xf32>
    %1313 = tpu.matmul %1310, %1309, %cst_430 {dimension_numbers = #tpu.dot_dimension_numbers<[1], [0], [0], [1], [0, 0, 1, 1], [], []>} : vector<8x8xf32>, vector<8x8xf32>, vector<8x8xf32> -> vector<8x8xf32>
    %cst_431 = arith.constant 5.000000e-01 : f32
    %1314 = vector.broadcast %cst_431 : f32 to vector<8x8xf32>
    %1315 = arith.mulf %1314, %1313 : vector<8x8xf32>
    %1316 = arith.subf %1312, %1315 : vector<8x8xf32>
    %cst_432 = arith.constant dense<0.000000e+00> : vector<8x8xf32>
    %1317 = tpu.matmul %1309, %1316, %cst_432 {dimension_numbers = #tpu.dot_dimension_numbers<[1], [0], [0], [1], [0, 0, 1, 1], [], []>} : vector<8x8xf32>, vector<8x8xf32>, vector<8x8xf32> -> vector<8x8xf32>
    %cst_433 = arith.constant dense<0.000000e+00> : vector<8x8xf32>
    %1318 = tpu.matmul %1316, %1310, %cst_433 {dimension_numbers = #tpu.dot_dimension_numbers<[1], [0], [0], [1], [0, 0, 1, 1], [], []>} : vector<8x8xf32>, vector<8x8xf32>, vector<8x8xf32> -> vector<8x8xf32>
    %cst_434 = arith.constant 1.500000e+00 : f32
    %1319 = vector.broadcast %cst_434 : f32 to vector<8x8xf32>
    %1320 = arith.mulf %1319, %16 : vector<8x8xf32>
    %cst_435 = arith.constant dense<0.000000e+00> : vector<8x8xf32>
    %1321 = tpu.matmul %1318, %1317, %cst_435 {dimension_numbers = #tpu.dot_dimension_numbers<[1], [0], [0], [1], [0, 0, 1, 1], [], []>} : vector<8x8xf32>, vector<8x8xf32>, vector<8x8xf32> -> vector<8x8xf32>
    %cst_436 = arith.constant 5.000000e-01 : f32
    %1322 = vector.broadcast %cst_436 : f32 to vector<8x8xf32>
    %1323 = arith.mulf %1322, %1321 : vector<8x8xf32>
    %1324 = arith.subf %1320, %1323 : vector<8x8xf32>
    %cst_437 = arith.constant dense<0.000000e+00> : vector<8x8xf32>
    %1325 = tpu.matmul %1317, %1324, %cst_437 {dimension_numbers = #tpu.dot_dimension_numbers<[1], [0], [0], [1], [0, 0, 1, 1], [], []>} : vector<8x8xf32>, vector<8x8xf32>, vector<8x8xf32> -> vector<8x8xf32>
    %cst_438 = arith.constant dense<0.000000e+00> : vector<8x8xf32>
    %1326 = tpu.matmul %1324, %1318, %cst_438 {dimension_numbers = #tpu.dot_dimension_numbers<[1], [0], [0], [1], [0, 0, 1, 1], [], []>} : vector<8x8xf32>, vector<8x8xf32>, vector<8x8xf32> -> vector<8x8xf32>
    %cst_439 = arith.constant 1.500000e+00 : f32
    %1327 = vector.broadcast %cst_439 : f32 to vector<8x8xf32>
    %1328 = arith.mulf %1327, %16 : vector<8x8xf32>
    %cst_440 = arith.constant dense<0.000000e+00> : vector<8x8xf32>
    %1329 = tpu.matmul %1326, %1325, %cst_440 {dimension_numbers = #tpu.dot_dimension_numbers<[1], [0], [0], [1], [0, 0, 1, 1], [], []>} : vector<8x8xf32>, vector<8x8xf32>, vector<8x8xf32> -> vector<8x8xf32>
    %cst_441 = arith.constant 5.000000e-01 : f32
    %1330 = vector.broadcast %cst_441 : f32 to vector<8x8xf32>
    %1331 = arith.mulf %1330, %1329 : vector<8x8xf32>
    %1332 = arith.subf %1328, %1331 : vector<8x8xf32>
    %cst_442 = arith.constant dense<0.000000e+00> : vector<8x8xf32>
    %1333 = tpu.matmul %1325, %1332, %cst_442 {dimension_numbers = #tpu.dot_dimension_numbers<[1], [0], [0], [1], [0, 0, 1, 1], [], []>} : vector<8x8xf32>, vector<8x8xf32>, vector<8x8xf32> -> vector<8x8xf32>
    %1334 = math.sqrt %1236 : vector<1x1xf32>
    %1335 = arith.mulf %1333, %16 : vector<8x8xf32>
    %cst_443 = arith.constant dense<0.000000e+00> : vector<8xf32>
    %1336 = vector.multi_reduction <add>, %1335, %cst_443 [1] : vector<8x8xf32> to vector<8xf32>
    %1337 = vector.shape_cast %1336 : vector<8xf32> to vector<8x1xf32>
    %cst_444 = arith.constant dense<0.000000e+00> : vector<1xf32>
    %1338 = vector.multi_reduction <add>, %1337, %cst_444 [0] : vector<8x1xf32> to vector<1xf32>
    %1339 = vector.shape_cast %1338 : vector<1xf32> to vector<1x1xf32>
    %1340 = arith.mulf %1334, %1339 : vector<1x1xf32>
    %cst_445 = arith.constant 9.99999997E-7 : f32
    %1341 = vector.broadcast %cst_445 : f32 to vector<1x1xf32>
    %1342 = arith.addf %1340, %1341 : vector<1x1xf32>
    %1343 = tpu.reciprocal %1342 {approx = true} : vector<1x1xf32> -> vector<1x1xf32>
    %1344 = vector.broadcast %1343 : vector<1x1xf32> to vector<8x256xf32>
    %1345 = arith.mulf %1227, %1344 : vector<8x256xf32>
    %1346 = arith.truncf %1345 : vector<8x256xf32> to vector<8x256xbf16>
    %cst_446 = arith.constant dense<0.000000e+00> : vector<32x8xf32>
    %1347 = tpu.matmul %11, %1346, %cst_446 {dimension_numbers = #tpu.dot_dimension_numbers<[1], [1], [0], [0], [0, 0, 1, 0], [], []>} : vector<32x256xbf16>, vector<8x256xbf16>, vector<32x8xf32> -> vector<32x8xf32>
    %cst_447 = arith.constant dense<0.000000e+00> : vector<8x8xf32>
    %1348 = tpu.matmul %1346, %1346, %cst_447 {dimension_numbers = #tpu.dot_dimension_numbers<[1], [1], [0], [0], [0, 0, 1, 0], [], []>} : vector<8x256xbf16>, vector<8x256xbf16>, vector<8x8xf32> -> vector<8x8xf32>
    %1349 = vector.extract_strided_slice %1172 {offsets = [0, 0], sizes = [32, 1], strides = [1, 1]} : vector<32x8xf32> to vector<32x1xf32>
    %1350 = vector.extract_strided_slice %1348 {offsets = [0, 0], sizes = [1, 8], strides = [1, 1]} : vector<8x8xf32> to vector<1x8xf32>
    %1351 = vector.broadcast %1349 : vector<32x1xf32> to vector<32x8xf32>
    %1352 = vector.broadcast %1350 : vector<1x8xf32> to vector<32x8xf32>
    %1353 = arith.mulf %1351, %1352 : vector<32x8xf32>
    %1354 = vector.extract_strided_slice %1172 {offsets = [0, 1], sizes = [32, 1], strides = [1, 1]} : vector<32x8xf32> to vector<32x1xf32>
    %1355 = vector.extract_strided_slice %1348 {offsets = [1, 0], sizes = [1, 8], strides = [1, 1]} : vector<8x8xf32> to vector<1x8xf32>
    %1356 = vector.broadcast %1354 : vector<32x1xf32> to vector<32x8xf32>
    %1357 = vector.broadcast %1355 : vector<1x8xf32> to vector<32x8xf32>
    %1358 = arith.mulf %1356, %1357 : vector<32x8xf32>
    %1359 = arith.addf %1353, %1358 : vector<32x8xf32>
    %1360 = vector.extract_strided_slice %1172 {offsets = [0, 2], sizes = [32, 1], strides = [1, 1]} : vector<32x8xf32> to vector<32x1xf32>
    %1361 = vector.extract_strided_slice %1348 {offsets = [2, 0], sizes = [1, 8], strides = [1, 1]} : vector<8x8xf32> to vector<1x8xf32>
    %1362 = vector.broadcast %1360 : vector<32x1xf32> to vector<32x8xf32>
    %1363 = vector.broadcast %1361 : vector<1x8xf32> to vector<32x8xf32>
    %1364 = arith.mulf %1362, %1363 : vector<32x8xf32>
    %1365 = arith.addf %1359, %1364 : vector<32x8xf32>
    %1366 = vector.extract_strided_slice %1172 {offsets = [0, 3], sizes = [32, 1], strides = [1, 1]} : vector<32x8xf32> to vector<32x1xf32>
    %1367 = vector.extract_strided_slice %1348 {offsets = [3, 0], sizes = [1, 8], strides = [1, 1]} : vector<8x8xf32> to vector<1x8xf32>
    %1368 = vector.broadcast %1366 : vector<32x1xf32> to vector<32x8xf32>
    %1369 = vector.broadcast %1367 : vector<1x8xf32> to vector<32x8xf32>
    %1370 = arith.mulf %1368, %1369 : vector<32x8xf32>
    %1371 = arith.addf %1365, %1370 : vector<32x8xf32>
    %1372 = vector.extract_strided_slice %1172 {offsets = [0, 4], sizes = [32, 1], strides = [1, 1]} : vector<32x8xf32> to vector<32x1xf32>
    %1373 = vector.extract_strided_slice %1348 {offsets = [4, 0], sizes = [1, 8], strides = [1, 1]} : vector<8x8xf32> to vector<1x8xf32>
    %1374 = vector.broadcast %1372 : vector<32x1xf32> to vector<32x8xf32>
    %1375 = vector.broadcast %1373 : vector<1x8xf32> to vector<32x8xf32>
    %1376 = arith.mulf %1374, %1375 : vector<32x8xf32>
    %1377 = arith.addf %1371, %1376 : vector<32x8xf32>
    %1378 = vector.extract_strided_slice %1172 {offsets = [0, 5], sizes = [32, 1], strides = [1, 1]} : vector<32x8xf32> to vector<32x1xf32>
    %1379 = vector.extract_strided_slice %1348 {offsets = [5, 0], sizes = [1, 8], strides = [1, 1]} : vector<8x8xf32> to vector<1x8xf32>
    %1380 = vector.broadcast %1378 : vector<32x1xf32> to vector<32x8xf32>
    %1381 = vector.broadcast %1379 : vector<1x8xf32> to vector<32x8xf32>
    %1382 = arith.mulf %1380, %1381 : vector<32x8xf32>
    %1383 = arith.addf %1377, %1382 : vector<32x8xf32>
    %1384 = vector.extract_strided_slice %1172 {offsets = [0, 6], sizes = [32, 1], strides = [1, 1]} : vector<32x8xf32> to vector<32x1xf32>
    %1385 = vector.extract_strided_slice %1348 {offsets = [6, 0], sizes = [1, 8], strides = [1, 1]} : vector<8x8xf32> to vector<1x8xf32>
    %1386 = vector.broadcast %1384 : vector<32x1xf32> to vector<32x8xf32>
    %1387 = vector.broadcast %1385 : vector<1x8xf32> to vector<32x8xf32>
    %1388 = arith.mulf %1386, %1387 : vector<32x8xf32>
    %1389 = arith.addf %1383, %1388 : vector<32x8xf32>
    %1390 = vector.extract_strided_slice %1172 {offsets = [0, 7], sizes = [32, 1], strides = [1, 1]} : vector<32x8xf32> to vector<32x1xf32>
    %1391 = vector.extract_strided_slice %1348 {offsets = [7, 0], sizes = [1, 8], strides = [1, 1]} : vector<8x8xf32> to vector<1x8xf32>
    %1392 = vector.broadcast %1390 : vector<32x1xf32> to vector<32x8xf32>
    %1393 = vector.broadcast %1391 : vector<1x8xf32> to vector<32x8xf32>
    %1394 = arith.mulf %1392, %1393 : vector<32x8xf32>
    %1395 = arith.addf %1389, %1394 : vector<32x8xf32>
    %1396 = arith.mulf %1172, %1347 : vector<32x8xf32>
    %cst_448 = arith.constant 9.99999997E-7 : f32
    %1397 = vector.broadcast %cst_448 : f32 to vector<32x8xf32>
    %1398 = arith.addf %1395, %1397 : vector<32x8xf32>
    %1399 = tpu.reciprocal %1398 {approx = true} : vector<32x8xf32> -> vector<32x8xf32>
    %1400 = arith.mulf %1396, %1399 : vector<32x8xf32>
    %1401 = arith.truncf %1400 : vector<32x8xf32> to vector<32x8xbf16>
    %cst_449 = arith.constant dense<0.000000e+00> : vector<8x256xf32>
    %1402 = tpu.matmul %1401, %11, %cst_449 {dimension_numbers = #tpu.dot_dimension_numbers<[0], [0], [1], [1], [0, 1, 1, 1], [], []>} : vector<32x8xbf16>, vector<32x256xbf16>, vector<8x256xf32> -> vector<8x256xf32>
    %cst_450 = arith.constant dense<0.000000e+00> : vector<8x8xf32>
    %1403 = tpu.matmul %1400, %1400, %cst_450 {dimension_numbers = #tpu.dot_dimension_numbers<[0], [0], [1], [1], [0, 1, 1, 1], [], []>} : vector<32x8xf32>, vector<32x8xf32>, vector<8x8xf32> -> vector<8x8xf32>
    %1404 = vector.extract_strided_slice %1403 {offsets = [0, 0], sizes = [8, 1], strides = [1, 1]} : vector<8x8xf32> to vector<8x1xf32>
    %1405 = vector.extract_strided_slice %1345 {offsets = [0, 0], sizes = [1, 256], strides = [1, 1]} : vector<8x256xf32> to vector<1x256xf32>
    %1406 = vector.broadcast %1404 : vector<8x1xf32> to vector<8x256xf32>
    %1407 = vector.broadcast %1405 : vector<1x256xf32> to vector<8x256xf32>
    %1408 = arith.mulf %1406, %1407 : vector<8x256xf32>
    %1409 = vector.extract_strided_slice %1403 {offsets = [0, 1], sizes = [8, 1], strides = [1, 1]} : vector<8x8xf32> to vector<8x1xf32>
    %1410 = vector.extract_strided_slice %1345 {offsets = [1, 0], sizes = [1, 256], strides = [1, 1]} : vector<8x256xf32> to vector<1x256xf32>
    %1411 = vector.broadcast %1409 : vector<8x1xf32> to vector<8x256xf32>
    %1412 = vector.broadcast %1410 : vector<1x256xf32> to vector<8x256xf32>
    %1413 = arith.mulf %1411, %1412 : vector<8x256xf32>
    %1414 = arith.addf %1408, %1413 : vector<8x256xf32>
    %1415 = vector.extract_strided_slice %1403 {offsets = [0, 2], sizes = [8, 1], strides = [1, 1]} : vector<8x8xf32> to vector<8x1xf32>
    %1416 = vector.extract_strided_slice %1345 {offsets = [2, 0], sizes = [1, 256], strides = [1, 1]} : vector<8x256xf32> to vector<1x256xf32>
    %1417 = vector.broadcast %1415 : vector<8x1xf32> to vector<8x256xf32>
    %1418 = vector.broadcast %1416 : vector<1x256xf32> to vector<8x256xf32>
    %1419 = arith.mulf %1417, %1418 : vector<8x256xf32>
    %1420 = arith.addf %1414, %1419 : vector<8x256xf32>
    %1421 = vector.extract_strided_slice %1403 {offsets = [0, 3], sizes = [8, 1], strides = [1, 1]} : vector<8x8xf32> to vector<8x1xf32>
    %1422 = vector.extract_strided_slice %1345 {offsets = [3, 0], sizes = [1, 256], strides = [1, 1]} : vector<8x256xf32> to vector<1x256xf32>
    %1423 = vector.broadcast %1421 : vector<8x1xf32> to vector<8x256xf32>
    %1424 = vector.broadcast %1422 : vector<1x256xf32> to vector<8x256xf32>
    %1425 = arith.mulf %1423, %1424 : vector<8x256xf32>
    %1426 = arith.addf %1420, %1425 : vector<8x256xf32>
    %1427 = vector.extract_strided_slice %1403 {offsets = [0, 4], sizes = [8, 1], strides = [1, 1]} : vector<8x8xf32> to vector<8x1xf32>
    %1428 = vector.extract_strided_slice %1345 {offsets = [4, 0], sizes = [1, 256], strides = [1, 1]} : vector<8x256xf32> to vector<1x256xf32>
    %1429 = vector.broadcast %1427 : vector<8x1xf32> to vector<8x256xf32>
    %1430 = vector.broadcast %1428 : vector<1x256xf32> to vector<8x256xf32>
    %1431 = arith.mulf %1429, %1430 : vector<8x256xf32>
    %1432 = arith.addf %1426, %1431 : vector<8x256xf32>
    %1433 = vector.extract_strided_slice %1403 {offsets = [0, 5], sizes = [8, 1], strides = [1, 1]} : vector<8x8xf32> to vector<8x1xf32>
    %1434 = vector.extract_strided_slice %1345 {offsets = [5, 0], sizes = [1, 256], strides = [1, 1]} : vector<8x256xf32> to vector<1x256xf32>
    %1435 = vector.broadcast %1433 : vector<8x1xf32> to vector<8x256xf32>
    %1436 = vector.broadcast %1434 : vector<1x256xf32> to vector<8x256xf32>
    %1437 = arith.mulf %1435, %1436 : vector<8x256xf32>
    %1438 = arith.addf %1432, %1437 : vector<8x256xf32>
    %1439 = vector.extract_strided_slice %1403 {offsets = [0, 6], sizes = [8, 1], strides = [1, 1]} : vector<8x8xf32> to vector<8x1xf32>
    %1440 = vector.extract_strided_slice %1345 {offsets = [6, 0], sizes = [1, 256], strides = [1, 1]} : vector<8x256xf32> to vector<1x256xf32>
    %1441 = vector.broadcast %1439 : vector<8x1xf32> to vector<8x256xf32>
    %1442 = vector.broadcast %1440 : vector<1x256xf32> to vector<8x256xf32>
    %1443 = arith.mulf %1441, %1442 : vector<8x256xf32>
    %1444 = arith.addf %1438, %1443 : vector<8x256xf32>
    %1445 = vector.extract_strided_slice %1403 {offsets = [0, 7], sizes = [8, 1], strides = [1, 1]} : vector<8x8xf32> to vector<8x1xf32>
    %1446 = vector.extract_strided_slice %1345 {offsets = [7, 0], sizes = [1, 256], strides = [1, 1]} : vector<8x256xf32> to vector<1x256xf32>
    %1447 = vector.broadcast %1445 : vector<8x1xf32> to vector<8x256xf32>
    %1448 = vector.broadcast %1446 : vector<1x256xf32> to vector<8x256xf32>
    %1449 = arith.mulf %1447, %1448 : vector<8x256xf32>
    %1450 = arith.addf %1444, %1449 : vector<8x256xf32>
    %1451 = arith.mulf %1345, %1402 : vector<8x256xf32>
    %cst_451 = arith.constant 9.99999997E-7 : f32
    %1452 = vector.broadcast %cst_451 : f32 to vector<8x256xf32>
    %1453 = arith.addf %1450, %1452 : vector<8x256xf32>
    %1454 = tpu.reciprocal %1453 {approx = true} : vector<8x256xf32> -> vector<8x256xf32>
    %1455 = arith.mulf %1451, %1454 : vector<8x256xf32>
    %cst_452 = arith.constant dense<0.000000e+00> : vector<8x8xf32>
    %1456 = tpu.matmul %1455, %1455, %cst_452 {dimension_numbers = #tpu.dot_dimension_numbers<[1], [1], [0], [0], [0, 0, 1, 0], [], []>} : vector<8x256xf32>, vector<8x256xf32>, vector<8x8xf32> -> vector<8x8xf32>
    %1457 = arith.mulf %1456, %1456 : vector<8x8xf32>
    %cst_453 = arith.constant dense<0.000000e+00> : vector<8xf32>
    %1458 = vector.multi_reduction <add>, %1457, %cst_453 [1] : vector<8x8xf32> to vector<8xf32>
    %1459 = vector.shape_cast %1458 : vector<8xf32> to vector<8x1xf32>
    %cst_454 = arith.constant dense<0.000000e+00> : vector<1xf32>
    %1460 = vector.multi_reduction <add>, %1459, %cst_454 [0] : vector<8x1xf32> to vector<1xf32>
    %1461 = vector.shape_cast %1460 : vector<1xf32> to vector<1x1xf32>
    %1462 = math.sqrt %1461 : vector<1x1xf32>
    %cst_455 = arith.constant 1.000000e-30 : f32
    %1463 = vector.broadcast %cst_455 : f32 to vector<1x1xf32>
    %1464 = arith.addf %1462, %1463 : vector<1x1xf32>
    %1465 = vector.broadcast %1464 : vector<1x1xf32> to vector<8x8xf32>
    %1466 = arith.divf %1456, %1465 : vector<8x8xf32>
    %cst_456 = arith.constant 1.500000e+00 : f32
    %1467 = vector.broadcast %cst_456 : f32 to vector<8x8xf32>
    %1468 = arith.mulf %1467, %16 : vector<8x8xf32>
    %cst_457 = arith.constant dense<0.000000e+00> : vector<8x8xf32>
    %1469 = tpu.matmul %16, %1466, %cst_457 {dimension_numbers = #tpu.dot_dimension_numbers<[1], [0], [0], [1], [0, 0, 1, 1], [], []>} : vector<8x8xf32>, vector<8x8xf32>, vector<8x8xf32> -> vector<8x8xf32>
    %cst_458 = arith.constant 5.000000e-01 : f32
    %1470 = vector.broadcast %cst_458 : f32 to vector<8x8xf32>
    %1471 = arith.mulf %1470, %1469 : vector<8x8xf32>
    %1472 = arith.subf %1468, %1471 : vector<8x8xf32>
    %cst_459 = arith.constant dense<0.000000e+00> : vector<8x8xf32>
    %1473 = tpu.matmul %1466, %1472, %cst_459 {dimension_numbers = #tpu.dot_dimension_numbers<[1], [0], [0], [1], [0, 0, 1, 1], [], []>} : vector<8x8xf32>, vector<8x8xf32>, vector<8x8xf32> -> vector<8x8xf32>
    %cst_460 = arith.constant dense<0.000000e+00> : vector<8x8xf32>
    %1474 = tpu.matmul %1472, %16, %cst_460 {dimension_numbers = #tpu.dot_dimension_numbers<[1], [0], [0], [1], [0, 0, 1, 1], [], []>} : vector<8x8xf32>, vector<8x8xf32>, vector<8x8xf32> -> vector<8x8xf32>
    %cst_461 = arith.constant 1.500000e+00 : f32
    %1475 = vector.broadcast %cst_461 : f32 to vector<8x8xf32>
    %1476 = arith.mulf %1475, %16 : vector<8x8xf32>
    %cst_462 = arith.constant dense<0.000000e+00> : vector<8x8xf32>
    %1477 = tpu.matmul %1474, %1473, %cst_462 {dimension_numbers = #tpu.dot_dimension_numbers<[1], [0], [0], [1], [0, 0, 1, 1], [], []>} : vector<8x8xf32>, vector<8x8xf32>, vector<8x8xf32> -> vector<8x8xf32>
    %cst_463 = arith.constant 5.000000e-01 : f32
    %1478 = vector.broadcast %cst_463 : f32 to vector<8x8xf32>
    %1479 = arith.mulf %1478, %1477 : vector<8x8xf32>
    %1480 = arith.subf %1476, %1479 : vector<8x8xf32>
    %cst_464 = arith.constant dense<0.000000e+00> : vector<8x8xf32>
    %1481 = tpu.matmul %1473, %1480, %cst_464 {dimension_numbers = #tpu.dot_dimension_numbers<[1], [0], [0], [1], [0, 0, 1, 1], [], []>} : vector<8x8xf32>, vector<8x8xf32>, vector<8x8xf32> -> vector<8x8xf32>
    %cst_465 = arith.constant dense<0.000000e+00> : vector<8x8xf32>
    %1482 = tpu.matmul %1480, %1474, %cst_465 {dimension_numbers = #tpu.dot_dimension_numbers<[1], [0], [0], [1], [0, 0, 1, 1], [], []>} : vector<8x8xf32>, vector<8x8xf32>, vector<8x8xf32> -> vector<8x8xf32>
    %cst_466 = arith.constant 1.500000e+00 : f32
    %1483 = vector.broadcast %cst_466 : f32 to vector<8x8xf32>
    %1484 = arith.mulf %1483, %16 : vector<8x8xf32>
    %cst_467 = arith.constant dense<0.000000e+00> : vector<8x8xf32>
    %1485 = tpu.matmul %1482, %1481, %cst_467 {dimension_numbers = #tpu.dot_dimension_numbers<[1], [0], [0], [1], [0, 0, 1, 1], [], []>} : vector<8x8xf32>, vector<8x8xf32>, vector<8x8xf32> -> vector<8x8xf32>
    %cst_468 = arith.constant 5.000000e-01 : f32
    %1486 = vector.broadcast %cst_468 : f32 to vector<8x8xf32>
    %1487 = arith.mulf %1486, %1485 : vector<8x8xf32>
    %1488 = arith.subf %1484, %1487 : vector<8x8xf32>
    %cst_469 = arith.constant dense<0.000000e+00> : vector<8x8xf32>
    %1489 = tpu.matmul %1481, %1488, %cst_469 {dimension_numbers = #tpu.dot_dimension_numbers<[1], [0], [0], [1], [0, 0, 1, 1], [], []>} : vector<8x8xf32>, vector<8x8xf32>, vector<8x8xf32> -> vector<8x8xf32>
    %cst_470 = arith.constant dense<0.000000e+00> : vector<8x8xf32>
    %1490 = tpu.matmul %1488, %1482, %cst_470 {dimension_numbers = #tpu.dot_dimension_numbers<[1], [0], [0], [1], [0, 0, 1, 1], [], []>} : vector<8x8xf32>, vector<8x8xf32>, vector<8x8xf32> -> vector<8x8xf32>
    %cst_471 = arith.constant 1.500000e+00 : f32
    %1491 = vector.broadcast %cst_471 : f32 to vector<8x8xf32>
    %1492 = arith.mulf %1491, %16 : vector<8x8xf32>
    %cst_472 = arith.constant dense<0.000000e+00> : vector<8x8xf32>
    %1493 = tpu.matmul %1490, %1489, %cst_472 {dimension_numbers = #tpu.dot_dimension_numbers<[1], [0], [0], [1], [0, 0, 1, 1], [], []>} : vector<8x8xf32>, vector<8x8xf32>, vector<8x8xf32> -> vector<8x8xf32>
    %cst_473 = arith.constant 5.000000e-01 : f32
    %1494 = vector.broadcast %cst_473 : f32 to vector<8x8xf32>
    %1495 = arith.mulf %1494, %1493 : vector<8x8xf32>
    %1496 = arith.subf %1492, %1495 : vector<8x8xf32>
    %cst_474 = arith.constant dense<0.000000e+00> : vector<8x8xf32>
    %1497 = tpu.matmul %1489, %1496, %cst_474 {dimension_numbers = #tpu.dot_dimension_numbers<[1], [0], [0], [1], [0, 0, 1, 1], [], []>} : vector<8x8xf32>, vector<8x8xf32>, vector<8x8xf32> -> vector<8x8xf32>
    %cst_475 = arith.constant dense<0.000000e+00> : vector<8x8xf32>
    %1498 = tpu.matmul %1496, %1490, %cst_475 {dimension_numbers = #tpu.dot_dimension_numbers<[1], [0], [0], [1], [0, 0, 1, 1], [], []>} : vector<8x8xf32>, vector<8x8xf32>, vector<8x8xf32> -> vector<8x8xf32>
    %cst_476 = arith.constant 1.500000e+00 : f32
    %1499 = vector.broadcast %cst_476 : f32 to vector<8x8xf32>
    %1500 = arith.mulf %1499, %16 : vector<8x8xf32>
    %cst_477 = arith.constant dense<0.000000e+00> : vector<8x8xf32>
    %1501 = tpu.matmul %1498, %1497, %cst_477 {dimension_numbers = #tpu.dot_dimension_numbers<[1], [0], [0], [1], [0, 0, 1, 1], [], []>} : vector<8x8xf32>, vector<8x8xf32>, vector<8x8xf32> -> vector<8x8xf32>
    %cst_478 = arith.constant 5.000000e-01 : f32
    %1502 = vector.broadcast %cst_478 : f32 to vector<8x8xf32>
    %1503 = arith.mulf %1502, %1501 : vector<8x8xf32>
    %1504 = arith.subf %1500, %1503 : vector<8x8xf32>
    %cst_479 = arith.constant dense<0.000000e+00> : vector<8x8xf32>
    %1505 = tpu.matmul %1497, %1504, %cst_479 {dimension_numbers = #tpu.dot_dimension_numbers<[1], [0], [0], [1], [0, 0, 1, 1], [], []>} : vector<8x8xf32>, vector<8x8xf32>, vector<8x8xf32> -> vector<8x8xf32>
    %cst_480 = arith.constant dense<0.000000e+00> : vector<8x8xf32>
    %1506 = tpu.matmul %1504, %1498, %cst_480 {dimension_numbers = #tpu.dot_dimension_numbers<[1], [0], [0], [1], [0, 0, 1, 1], [], []>} : vector<8x8xf32>, vector<8x8xf32>, vector<8x8xf32> -> vector<8x8xf32>
    %cst_481 = arith.constant 1.500000e+00 : f32
    %1507 = vector.broadcast %cst_481 : f32 to vector<8x8xf32>
    %1508 = arith.mulf %1507, %16 : vector<8x8xf32>
    %cst_482 = arith.constant dense<0.000000e+00> : vector<8x8xf32>
    %1509 = tpu.matmul %1506, %1505, %cst_482 {dimension_numbers = #tpu.dot_dimension_numbers<[1], [0], [0], [1], [0, 0, 1, 1], [], []>} : vector<8x8xf32>, vector<8x8xf32>, vector<8x8xf32> -> vector<8x8xf32>
    %cst_483 = arith.constant 5.000000e-01 : f32
    %1510 = vector.broadcast %cst_483 : f32 to vector<8x8xf32>
    %1511 = arith.mulf %1510, %1509 : vector<8x8xf32>
    %1512 = arith.subf %1508, %1511 : vector<8x8xf32>
    %cst_484 = arith.constant dense<0.000000e+00> : vector<8x8xf32>
    %1513 = tpu.matmul %1505, %1512, %cst_484 {dimension_numbers = #tpu.dot_dimension_numbers<[1], [0], [0], [1], [0, 0, 1, 1], [], []>} : vector<8x8xf32>, vector<8x8xf32>, vector<8x8xf32> -> vector<8x8xf32>
    %cst_485 = arith.constant dense<0.000000e+00> : vector<8x8xf32>
    %1514 = tpu.matmul %1512, %1506, %cst_485 {dimension_numbers = #tpu.dot_dimension_numbers<[1], [0], [0], [1], [0, 0, 1, 1], [], []>} : vector<8x8xf32>, vector<8x8xf32>, vector<8x8xf32> -> vector<8x8xf32>
    %cst_486 = arith.constant 1.500000e+00 : f32
    %1515 = vector.broadcast %cst_486 : f32 to vector<8x8xf32>
    %1516 = arith.mulf %1515, %16 : vector<8x8xf32>
    %cst_487 = arith.constant dense<0.000000e+00> : vector<8x8xf32>
    %1517 = tpu.matmul %1514, %1513, %cst_487 {dimension_numbers = #tpu.dot_dimension_numbers<[1], [0], [0], [1], [0, 0, 1, 1], [], []>} : vector<8x8xf32>, vector<8x8xf32>, vector<8x8xf32> -> vector<8x8xf32>
    %cst_488 = arith.constant 5.000000e-01 : f32
    %1518 = vector.broadcast %cst_488 : f32 to vector<8x8xf32>
    %1519 = arith.mulf %1518, %1517 : vector<8x8xf32>
    %1520 = arith.subf %1516, %1519 : vector<8x8xf32>
    %cst_489 = arith.constant dense<0.000000e+00> : vector<8x8xf32>
    %1521 = tpu.matmul %1513, %1520, %cst_489 {dimension_numbers = #tpu.dot_dimension_numbers<[1], [0], [0], [1], [0, 0, 1, 1], [], []>} : vector<8x8xf32>, vector<8x8xf32>, vector<8x8xf32> -> vector<8x8xf32>
    %cst_490 = arith.constant dense<0.000000e+00> : vector<8x8xf32>
    %1522 = tpu.matmul %1520, %1514, %cst_490 {dimension_numbers = #tpu.dot_dimension_numbers<[1], [0], [0], [1], [0, 0, 1, 1], [], []>} : vector<8x8xf32>, vector<8x8xf32>, vector<8x8xf32> -> vector<8x8xf32>
    %cst_491 = arith.constant 1.500000e+00 : f32
    %1523 = vector.broadcast %cst_491 : f32 to vector<8x8xf32>
    %1524 = arith.mulf %1523, %16 : vector<8x8xf32>
    %cst_492 = arith.constant dense<0.000000e+00> : vector<8x8xf32>
    %1525 = tpu.matmul %1522, %1521, %cst_492 {dimension_numbers = #tpu.dot_dimension_numbers<[1], [0], [0], [1], [0, 0, 1, 1], [], []>} : vector<8x8xf32>, vector<8x8xf32>, vector<8x8xf32> -> vector<8x8xf32>
    %cst_493 = arith.constant 5.000000e-01 : f32
    %1526 = vector.broadcast %cst_493 : f32 to vector<8x8xf32>
    %1527 = arith.mulf %1526, %1525 : vector<8x8xf32>
    %1528 = arith.subf %1524, %1527 : vector<8x8xf32>
    %cst_494 = arith.constant dense<0.000000e+00> : vector<8x8xf32>
    %1529 = tpu.matmul %1521, %1528, %cst_494 {dimension_numbers = #tpu.dot_dimension_numbers<[1], [0], [0], [1], [0, 0, 1, 1], [], []>} : vector<8x8xf32>, vector<8x8xf32>, vector<8x8xf32> -> vector<8x8xf32>
    %cst_495 = arith.constant dense<0.000000e+00> : vector<8x8xf32>
    %1530 = tpu.matmul %1528, %1522, %cst_495 {dimension_numbers = #tpu.dot_dimension_numbers<[1], [0], [0], [1], [0, 0, 1, 1], [], []>} : vector<8x8xf32>, vector<8x8xf32>, vector<8x8xf32> -> vector<8x8xf32>
    %cst_496 = arith.constant 1.500000e+00 : f32
    %1531 = vector.broadcast %cst_496 : f32 to vector<8x8xf32>
    %1532 = arith.mulf %1531, %16 : vector<8x8xf32>
    %cst_497 = arith.constant dense<0.000000e+00> : vector<8x8xf32>
    %1533 = tpu.matmul %1530, %1529, %cst_497 {dimension_numbers = #tpu.dot_dimension_numbers<[1], [0], [0], [1], [0, 0, 1, 1], [], []>} : vector<8x8xf32>, vector<8x8xf32>, vector<8x8xf32> -> vector<8x8xf32>
    %cst_498 = arith.constant 5.000000e-01 : f32
    %1534 = vector.broadcast %cst_498 : f32 to vector<8x8xf32>
    %1535 = arith.mulf %1534, %1533 : vector<8x8xf32>
    %1536 = arith.subf %1532, %1535 : vector<8x8xf32>
    %cst_499 = arith.constant dense<0.000000e+00> : vector<8x8xf32>
    %1537 = tpu.matmul %1529, %1536, %cst_499 {dimension_numbers = #tpu.dot_dimension_numbers<[1], [0], [0], [1], [0, 0, 1, 1], [], []>} : vector<8x8xf32>, vector<8x8xf32>, vector<8x8xf32> -> vector<8x8xf32>
    %cst_500 = arith.constant dense<0.000000e+00> : vector<8x8xf32>
    %1538 = tpu.matmul %1536, %1530, %cst_500 {dimension_numbers = #tpu.dot_dimension_numbers<[1], [0], [0], [1], [0, 0, 1, 1], [], []>} : vector<8x8xf32>, vector<8x8xf32>, vector<8x8xf32> -> vector<8x8xf32>
    %cst_501 = arith.constant 1.500000e+00 : f32
    %1539 = vector.broadcast %cst_501 : f32 to vector<8x8xf32>
    %1540 = arith.mulf %1539, %16 : vector<8x8xf32>
    %cst_502 = arith.constant dense<0.000000e+00> : vector<8x8xf32>
    %1541 = tpu.matmul %1538, %1537, %cst_502 {dimension_numbers = #tpu.dot_dimension_numbers<[1], [0], [0], [1], [0, 0, 1, 1], [], []>} : vector<8x8xf32>, vector<8x8xf32>, vector<8x8xf32> -> vector<8x8xf32>
    %cst_503 = arith.constant 5.000000e-01 : f32
    %1542 = vector.broadcast %cst_503 : f32 to vector<8x8xf32>
    %1543 = arith.mulf %1542, %1541 : vector<8x8xf32>
    %1544 = arith.subf %1540, %1543 : vector<8x8xf32>
    %cst_504 = arith.constant dense<0.000000e+00> : vector<8x8xf32>
    %1545 = tpu.matmul %1537, %1544, %cst_504 {dimension_numbers = #tpu.dot_dimension_numbers<[1], [0], [0], [1], [0, 0, 1, 1], [], []>} : vector<8x8xf32>, vector<8x8xf32>, vector<8x8xf32> -> vector<8x8xf32>
    %cst_505 = arith.constant dense<0.000000e+00> : vector<8x8xf32>
    %1546 = tpu.matmul %1544, %1538, %cst_505 {dimension_numbers = #tpu.dot_dimension_numbers<[1], [0], [0], [1], [0, 0, 1, 1], [], []>} : vector<8x8xf32>, vector<8x8xf32>, vector<8x8xf32> -> vector<8x8xf32>
    %cst_506 = arith.constant 1.500000e+00 : f32
    %1547 = vector.broadcast %cst_506 : f32 to vector<8x8xf32>
    %1548 = arith.mulf %1547, %16 : vector<8x8xf32>
    %cst_507 = arith.constant dense<0.000000e+00> : vector<8x8xf32>
    %1549 = tpu.matmul %1546, %1545, %cst_507 {dimension_numbers = #tpu.dot_dimension_numbers<[1], [0], [0], [1], [0, 0, 1, 1], [], []>} : vector<8x8xf32>, vector<8x8xf32>, vector<8x8xf32> -> vector<8x8xf32>
    %cst_508 = arith.constant 5.000000e-01 : f32
    %1550 = vector.broadcast %cst_508 : f32 to vector<8x8xf32>
    %1551 = arith.mulf %1550, %1549 : vector<8x8xf32>
    %1552 = arith.subf %1548, %1551 : vector<8x8xf32>
    %cst_509 = arith.constant dense<0.000000e+00> : vector<8x8xf32>
    %1553 = tpu.matmul %1545, %1552, %cst_509 {dimension_numbers = #tpu.dot_dimension_numbers<[1], [0], [0], [1], [0, 0, 1, 1], [], []>} : vector<8x8xf32>, vector<8x8xf32>, vector<8x8xf32> -> vector<8x8xf32>
    %cst_510 = arith.constant dense<0.000000e+00> : vector<8x8xf32>
    %1554 = tpu.matmul %1552, %1546, %cst_510 {dimension_numbers = #tpu.dot_dimension_numbers<[1], [0], [0], [1], [0, 0, 1, 1], [], []>} : vector<8x8xf32>, vector<8x8xf32>, vector<8x8xf32> -> vector<8x8xf32>
    %cst_511 = arith.constant 1.500000e+00 : f32
    %1555 = vector.broadcast %cst_511 : f32 to vector<8x8xf32>
    %1556 = arith.mulf %1555, %16 : vector<8x8xf32>
    %cst_512 = arith.constant dense<0.000000e+00> : vector<8x8xf32>
    %1557 = tpu.matmul %1554, %1553, %cst_512 {dimension_numbers = #tpu.dot_dimension_numbers<[1], [0], [0], [1], [0, 0, 1, 1], [], []>} : vector<8x8xf32>, vector<8x8xf32>, vector<8x8xf32> -> vector<8x8xf32>
    %cst_513 = arith.constant 5.000000e-01 : f32
    %1558 = vector.broadcast %cst_513 : f32 to vector<8x8xf32>
    %1559 = arith.mulf %1558, %1557 : vector<8x8xf32>
    %1560 = arith.subf %1556, %1559 : vector<8x8xf32>
    %cst_514 = arith.constant dense<0.000000e+00> : vector<8x8xf32>
    %1561 = tpu.matmul %1553, %1560, %cst_514 {dimension_numbers = #tpu.dot_dimension_numbers<[1], [0], [0], [1], [0, 0, 1, 1], [], []>} : vector<8x8xf32>, vector<8x8xf32>, vector<8x8xf32> -> vector<8x8xf32>
    %1562 = math.sqrt %1464 : vector<1x1xf32>
    %1563 = arith.mulf %1561, %16 : vector<8x8xf32>
    %cst_515 = arith.constant dense<0.000000e+00> : vector<8xf32>
    %1564 = vector.multi_reduction <add>, %1563, %cst_515 [1] : vector<8x8xf32> to vector<8xf32>
    %1565 = vector.shape_cast %1564 : vector<8xf32> to vector<8x1xf32>
    %cst_516 = arith.constant dense<0.000000e+00> : vector<1xf32>
    %1566 = vector.multi_reduction <add>, %1565, %cst_516 [0] : vector<8x1xf32> to vector<1xf32>
    %1567 = vector.shape_cast %1566 : vector<1xf32> to vector<1x1xf32>
    %1568 = arith.mulf %1562, %1567 : vector<1x1xf32>
    %cst_517 = arith.constant 9.99999997E-7 : f32
    %1569 = vector.broadcast %cst_517 : f32 to vector<1x1xf32>
    %1570 = arith.addf %1568, %1569 : vector<1x1xf32>
    %1571 = tpu.reciprocal %1570 {approx = true} : vector<1x1xf32> -> vector<1x1xf32>
    %1572 = vector.broadcast %1571 : vector<1x1xf32> to vector<8x256xf32>
    %1573 = arith.mulf %1455, %1572 : vector<8x256xf32>
    %1574 = arith.truncf %17 : vector<32x32xf32> to vector<32x32xbf16>
    %1575 = arith.truncf %1400 : vector<32x8xf32> to vector<32x8xbf16>
    %cst_518 = arith.constant dense<0.000000e+00> : vector<32x8xf32>
    %1576 = tpu.matmul %1574, %1575, %cst_518 {dimension_numbers = #tpu.dot_dimension_numbers<[1], [0], [0], [1], [0, 0, 1, 1], [], []>} : vector<32x32xbf16>, vector<32x8xbf16>, vector<32x8xf32> -> vector<32x8xf32>
    %1577 = arith.truncf %1576 : vector<32x8xf32> to vector<32x8xbf16>
    %1578 = arith.truncf %1573 : vector<8x256xf32> to vector<8x256xbf16>
    %cst_519 = arith.constant dense<0.000000e+00> : vector<32x256xf32>
    %1579 = tpu.matmul %1577, %1578, %cst_519 {dimension_numbers = #tpu.dot_dimension_numbers<[1], [0], [0], [1], [0, 0, 1, 1], [], []>} : vector<32x8xbf16>, vector<8x256xbf16>, vector<32x256xf32> -> vector<32x256xf32>
    %1580 = arith.addf %1, %1579 : vector<32x256xf32>
    %c0_520 = arith.constant 0 : index
    %c0_521 = arith.constant 0 : index
    %1581 = vector.load %arg5[%c0_520, %c0_521] : memref<32x1xf32, #tpu.memory_space<vmem>>, vector<32x1xf32>
    %1582 = vector.broadcast %1581 : vector<32x1xf32> to vector<32x256xf32>
    %1583 = arith.addf %1580, %1582 : vector<32x256xf32>
    %cst_522 = arith.constant 0.000000e+00 : f32
    %1584 = vector.broadcast %cst_522 : f32 to vector<32x256xf32>
    %1585 = arith.maximumf %1583, %1584 : vector<32x256xf32>
    %c0_523 = arith.constant 0 : index
    %c0_524 = arith.constant 0 : index
    %c0_525 = arith.constant 0 : index
    %1586 = vector.load %arg7[%c0_523, %c0_524, %c0_525] : memref<1x32x256xf32, #tpu.memory_space<vmem>>, vector<1x32x256xf32>
    %1587 = vector.shape_cast %1586 : vector<1x32x256xf32> to vector<32x256xf32>
    %1588 = vector.shape_cast %1585 : vector<32x256xf32> to vector<1x32x256xf32>
    tpu.vector_store %arg7[%c0_523, %c0_524, %c0_525], %1588 {strides = array<i32>} : memref<1x32x256xf32, #tpu.memory_space<vmem>>, vector<1x32x256xf32>,
    return
  }
  func.func @transform_0(%arg0: i32) -> (i32, i32, i32) {
    %c0_i32 = arith.constant 0 : i32
    %c0_i32_0 = arith.constant 0 : i32
    %c0_i32_1 = arith.constant 0 : i32
    return %arg0, %c0_i32, %c0_i32_0 : i32, i32, i32
  }
  func.func @transform_1(%arg0: i32) -> (i32, i32) {
    %c0_i32 = arith.constant 0 : i32
    %c0_i32_0 = arith.constant 0 : i32
    %c0_i32_1 = arith.constant 0 : i32
    return %c0_i32, %c0_i32_0 : i32, i32
  }
  func.func @transform_2(%arg0: i32) -> (i32, i32) {
    %c0_i32 = arith.constant 0 : i32
    %c0_i32_0 = arith.constant 0 : i32
    %c0_i32_1 = arith.constant 0 : i32
    return %c0_i32, %c0_i32_0 : i32, i32
  }
  func.func @transform_3(%arg0: i32) -> (i32, i32) {
    %c0_i32 = arith.constant 0 : i32
    %c0_i32_0 = arith.constant 0 : i32
    %c0_i32_1 = arith.constant 0 : i32
    return %c0_i32, %c0_i32_0 : i32, i32
  }
  func.func @transform_4(%arg0: i32) -> (i32, i32) {
    %c0_i32 = arith.constant 0 : i32
    %c0_i32_0 = arith.constant 0 : i32
    %c0_i32_1 = arith.constant 0 : i32
    return %c0_i32, %c0_i32_0 : i32, i32
  }
  func.func @transform_5(%arg0: i32) -> (i32, i32, i32, i32) {
    %c0_i32 = arith.constant 0 : i32
    %c0_i32_0 = arith.constant 0 : i32
    %c0_i32_1 = arith.constant 0 : i32
    %c0_i32_2 = arith.constant 0 : i32
    return %arg0, %c0_i32, %c0_i32_0, %c0_i32_1 : i32, i32, i32, i32
  }
  func.func @transform_6(%arg0: i32) -> (i32, i32, i32) {
    %c0_i32 = arith.constant 0 : i32
    %c0_i32_0 = arith.constant 0 : i32
    %c0_i32_1 = arith.constant 0 : i32
    return %arg0, %c0_i32, %c0_i32_0 : i32, i32, i32
  }
}

</mosaic_0001>

<bundles_post_ra>
// kernel: hamburger_forward.1
= control target key start
LH: loop header
LB: loop body
LE: loop exit
PB: predicated region body
PF: predicated region fallthrough
CT: control target
= control target key end

     0   :  { %s10944_s21 = smov 0   ;;  %s12597_s0 = inlined_call_operand.vmem [shape: f32[2,32,256], index: 0, kind: input, shape index: {}]   ;;  %s12598_s1 = inlined_call_operand.vmem [shape: f32[32,32], index: 1, kind: input, shape index: {}]   ;;  %s12599_s2 = inlined_call_operand.vmem [shape: f32[32,1], index: 2, kind: input, shape index: {}]   ;;  %s12600_s3 = inlined_call_operand.vmem [shape: f32[32,32], index: 3, kind: input, shape index: {}]   ;;  %s12601_s4 = inlined_call_operand.vmem [shape: f32[32,1], index: 4, kind: input, shape index: {}]   ;;  %s12602_s5 = inlined_call_operand.vmem [shape: f32[2,1,32,8], index: 5, kind: input, shape index: {}]   ;;  %s12603_s6 = inlined_call_operand.vmem [shape: f32[2,32,256], index: 6, kind: output, shape index: {}]  }
   0x1 LB: > { %s10189_s22 = sadd.s32 4294967295, %s10897_s21   ;;  %p10193_p0 = scmp.ge.s32.totalorder %s10897_s21, 1  ;;  %s10897_s21 = sphi %s10944_s21, %s16_s21  }
   0x2   : > { %p222_p1 = scmp.lt.s32.totalorder %s10897_s21, 3 }
   0x4   : > { %p223_p2 = pnand %p10193_p0, %p222_p1 }
   0x6   : > { %226 = sbr.rel (%p223_p2) target bundleno = 29969 (0x7511), region = 44 }
   0xb   : > { %v293_v0 = vld [vmem:[%s12599_s2 + $0x10] sm:$0xff]  ;;  %p257_p3 = scmp.lt.s32.totalorder %s10189_s22, 1  ;;  %v12612_v1 = vmov 0   ;;  %v291_v2 = vld [vmem:[%s12599_s2] sm:$0xff]  ;;  %v294_v3 = vld [vmem:[%s12599_s2 + $0x18] sm:$0xff]  ;;  %vm315_vm0 = vcmask 261120  }
   0xc   : > { %10509 = vset.pattern.permute.xlu0 %v12612_v1  ;;  %10510 = vset.pattern.permute.xlu1 %v12612_v1  ;;  %v283_v15 = vld [vmem:[%s12598_s1 + $0x10] sm:$0xff]  ;;  %v284_v16 = vld [vmem:[%s12598_s1 + $0x18] sm:$0xff]  ;;  %v281_v18 = vld [vmem:[%s12598_s1] sm:$0xff]  ;;  %vm677_vm9 = vcmask 64512  }
   0xd   : > { %307 = vperm.xlu0 %10509, %v293_v0   ;;  %s12785_s22 = smov (!%p257_p3, %s10189_s22), 1  ;;  %297 = vperm.xlu1 %10510, %v291_v2   ;;  %v282_v19 = vld [vmem:[%s12598_s1 + $0x8] sm:$0xff]  ;;  %v286_v23 = vpack.c.bf16 %v284_v16, %v283_v15  ;;  %v12616_v2 = vmov 2   ;;  %v12606_v15 = vmov 7  }
   0xe   : > { %s10487_s27 = sshll.u32 %s12785_s22, 5  ;;  %s10486_s28 = sshll.u32 %s12785_s22, 6  ;;  %v292_v22 = vld [vmem:[%s12599_s2 + $0x8] sm:$0xff]  ;;  %v285_v24 = vpack.c.bf16 %v282_v19, %v281_v18 }
   0xf   : > { %s10967_s7 = scalar_lea.vmem %s12602_s5, %s10487_s27  ;;  %s10974_s10 = scalar_lea.vmem %s12597_s0, %s10486_s28 }
  0x10   : > { %v10980_v4 = vld [vmem:[%s10967_s7] sm:$0xff]  ;;  %v10983_v5 = vld [vmem:[%s10967_s7 + $0x8] sm:$0xff]  ;;  %v279_v8 = vld [vmem:[%s10974_s10 + $0x30] sm:$0xff]  ;;  %s12577_s23 = scalar_lea.vmem %s12603_s6, %s10486_s28 }
  0x11   : > { %v277_v6 = vld [vmem:[%s10974_s10 + $0x20] sm:$0xff]  ;;  %v387_v7 = vpack.c.bf16 %v10983_v5, %v10980_v4  ;;  %v275_v10 = vld [vmem:[%s10974_s10 + $0x10] sm:$0xff]  ;;  %v278_v12 = vld [vmem:[%s10974_s10 + $0x28] sm:$0xff] }
  0x12   : > { %v273_v9 = vld [vmem:[%s10974_s10] sm:$0xff]  ;;  %v289_v11 = vpack.c.bf16 %v279_v8, %v277_v6  ;;  %v280_v13 = vld [vmem:[%s10974_s10 + $0x38] sm:$0xff]  ;;  %v274_v20 = vld [vmem:[%s10974_s10 + $0x8] sm:$0xff] }
  0x13   : > { %389 = vxpose.xlu2.c.b16.start [1/2] (short) (narrow) %v387_v7, 16  ;;  %v287_v14 = vpack.c.bf16 %v275_v10, %v273_v9  ;;  %v290_v17 = vpack.c.bf16 %v280_v13, %v278_v12  ;;  %v276_v21 = vld [vmem:[%s10974_s10 + $0x18] sm:$0xff]  ;;  %v11012_v26 = vld [vmem:[%s10967_s7 + $0x10] sm:$0xff]  ;;  %v12618_v7 = vmov 4   ;;  %v12614_v9 = vmov 1  }
  0x14   : > { %10489 = vmatpush.bf16.msra.mxu1 %v289_v11  ;;  %328 = vmatpush.bf16.msra.mxu0 %v289_v11  ;;  %v288_v25 = vpack.c.bf16 %v276_v21, %v274_v20  ;;  %v11015_v27 = vld [vmem:[%s10967_s7 + $0x18] sm:$0xff]  ;;  %v12610_v10 = vmov 3   ;;  %v12608_v11 = vmov 5   ;;  %v12620_v12 = vmov 6  }
  0x15   : > { %312 = vperm.xlu0 %10509, %v294_v3   ;;  %302 = vperm.xlu1 %10510, %v292_v22   ;;  %v388_v28 = vpack.c.bf16 %v11015_v27, %v11012_v26 }
  0x18   : > { %10490 = vmatpush.bf16.msra.mxu1 %v287_v14  ;;  %329 = vmatpush.bf16.msra.mxu0 %v287_v14 }
  0x1b   : > { %10201 = vmatmul.msk.bf16.vlgmr.msra.gmra.mxu1 %vm315_vm0, %v286_v23  ;;  %10200 = vmatmul.msk.bf16.vlgmr.msra.gmra.mxu0 %vm315_vm0, %v285_v24 }
  0x1c   : > { %347 = vmatpush.bf16.msrb.mxu1 %v290_v17 }
  0x20   : > { %348 = vmatpush.bf16.msrb.mxu1 %v288_v25 }
  0x23   : > { %390 = vxpose.xlu2.c.b16.end [2/2] (short) (narrow) %v388_v28, 16 }
  0x2b   : > { %10202 = vmatmul.msk.bf16.vlgmr.msrb.gmra.mxu1 %vm315_vm0, %v285_v24 }
  0x37   : > { %494 = vxpose.xlu0.b32.start [1/4] (short) (narrow) %v10980_v4, 8 }
  0x3b   : > { %10203 = vmatmul.msk.bf16.gmra.mxu1 %vm315_vm0, %v286_v23 }
  0x3f   : > { %495 = vxpose.xlu0.b32.cont [2/4] (short) (narrow) %v10983_v5, 8 }
  0x47   : > { %496 = vxpose.xlu0.b32.cont [3/4] (short) (narrow) %v11012_v26, 8 }
  0x4f   : > { %497 = vxpose.xlu0.b32.end [4/4] (short) (narrow) %v11015_v27, 8 }
  0x7f   : > { %v298_v29 = vpop.permute.xlu1 %297  ;;  %v308_v30 = vpop.permute.xlu0 %307 }
  0x85   : > { %10512 = vset.pattern.permute.xlu2 %v12616_v2 }
  0x87   : > { %v303_v35 = vpop.permute.xlu1 %302  ;;  %v313_v36 = vpop.permute.xlu0 %312 }
  0x98   : > { %v336_v31 = vpop.f32.mrf.mxu1  ;;  %v331_v32 = vpop.f32.mrf.mxu0 }
  0x99   : > { %v337_v33 = vadd.f32 %v336_v31, %v308_v30  ;;  %v332_v34 = vadd.f32 %v331_v32, %v298_v29 }
  0x9b   : > { %v364_v41 = vmax.f32 %v337_v33, 0.0  ;;  %v360_v43 = vmax.f32 %v332_v34, 0.0 }
  0xa0   : > { %v338_v37 = vpop.f32.mrf.mxu1  ;;  %v333_v39 = vpop.f32.mrf.mxu0 }
  0xa1   : > { %v339_v38 = vadd.f32 %v338_v37, %v313_v36  ;;  %v334_v40 = vadd.f32 %v333_v39, %v303_v35 }
  0xa3   : > { %v366_v42 = vmax.f32 %v339_v38, 0.0  ;;  %v362_v44 = vmax.f32 %v334_v40, 0.0 }
  0xa5   : > { %v11026_v45 = vpack.c.bf16 %v366_v42, %v364_v41  ;;  %v11029_v46 = vpack.c.bf16 %v362_v44, %v360_v43 }
  0xa7   : > { %12693 = vst [vmem:[#allocation2_spill] sm:$0xff] %v11026_v45  ;;  %414 = vmatpush.bf16.msra.mxu2 %v11026_v45 }
  0xa8   : > { %12694 = vst [vmem:[#allocation3_spill] sm:$0xff] %v11029_v46  ;;  %v350_v47 = vpop.f32.mrf.mxu1 }
  0xa9   : > { %v351_v53 = vadd.f32 %v350_v47, %v298_v29 }
  0xab   : > { %415 = vmatpush.bf16.msra.mxu2 %v11029_v46  ;;  %v361_v58 = vmax.f32 %v351_v53, 0.0 }
  0xaf   : > { %541 = vmatpush.msrb.mxu2 %v11015_v27 }
  0xb0   : > { %v352_v48 = vpop.f32.mrf.mxu1 }
  0xb1   : > { %542 = vmatpush.msrb.mxu2 %v11012_v26  ;;  %v353_v54 = vadd.f32 %v352_v48, %v303_v35 }
  0xb3   : > { %543 = vmatpush.msrb.mxu2 %v10983_v5  ;;  %v363_v59 = vmax.f32 %v353_v54, 0.0 }
  0xb4   : > { %v397_v49 = vpop.trf.xlu2 }
  0xb5   : > { %544 = vmatpush.msrb.mxu2 %v10980_v4  ;;  %v11040_v61 = vpack.c.bf16 %v363_v59, %v361_v58 }
  0xb6   : > { %10205 = vmatmul.msk.bf16.vlgmr.msra.gmra.mxu2 %vm315_vm0, %v397_v49  ;;  %10532 = vset.pattern.permute.xlu0 %v12618_v7 }
  0xb7   : > { %12696 = vst [vmem:[#allocation5_spill] sm:$0xff] %v11040_v61 }
  0xb8   : > { %v355_v50 = vpop.f32.mrf.mxu1 }
  0xb9   : > { %v356_v51 = vadd.f32 %v355_v50, %v308_v30 }
  0xbb   : > { %v365_v56 = vmax.f32 %v356_v51, 0.0 }
  0xc0   : > { %v357_v52 = vpop.f32.mrf.mxu1 }
  0xc1   : > { %v358_v55 = vadd.f32 %v357_v52, %v313_v36 }
  0xc3   : > { %v367_v57 = vmax.f32 %v358_v55, 0.0 }
  0xc5   : > { %v11037_v60 = vpack.c.bf16 %v367_v57, %v365_v56 }
  0xc7   : > { %12695 = vst [vmem:[#allocation4_spill] sm:$0xff] %v11037_v60  ;;  %427 = vmatpush.bf16.msra.mxu3 %v11037_v60 }
  0xcb   : > { %428 = vmatpush.bf16.msra.mxu3 %v11040_v61 }
  0xce   : > { %10206 = vmatmul.msk.bf16.vlgmr.msra.gmra.mxu3 %vm315_vm0, %v397_v49 }
  0xdb   : > { %v510_v62 = vpop.trf.xlu0 }
  0xdc   : > { %10207 = vmatmul.msk.f32.vlgmr.msrb.gmra.mxu2 %vm315_vm0, %v510_v62 }
 0x139   : > { %v11045_v63 = vpop.f32.mrf.mxu2 }
 0x13a   : > { %v434_v13 = vrot.slane %v11045_v63, 4 }
 0x13c   : > { %v435_v16 = vmax.f32 %v11045_v63, %v434_v13 }
 0x13e   : > { %v436_v18 = vrot.slane %v435_v16, 2 }
 0x140   : > { %v437_v20 = vmax.f32 %v435_v16, %v436_v18 }
 0x141   : > { %v419_v0 = vpop.f32.mrf.mxu2 }
 0x142   : > { %v438_v22 = vrot.slane %v437_v20, 1 }
 0x144   : > { %v439_v24 = vmax.f32 %v437_v20, %v438_v22 }
 0x146   : > { %v446_v28 = vsub.f32 %v11045_v63, %v439_v24 }
 0x148   : > { %v448_v30 = vmul.f32 1.442695, %v446_v28 }
 0x14a   : > { %10739 = vpow2.f32 %v448_v30 }
 0x150   : > { %v10740_v32 = vpop.eup %10739 }
 0x151   : > { %v11048_v3 = vpop.f32.mrf.mxu3  ;;  %v452_v34 = vrot.slane %v10740_v32, 4 }
 0x152   : > { %v440_v14 = vrot.slane %v11048_v3, 4 }
 0x153   : > { %v453_v36 = vadd.f32 %v10740_v32, %v452_v34 }
 0x154   : > { %v441_v17 = vmax.f32 %v11048_v3, %v440_v14 }
 0x155   : > { %v454_v38 = vrot.slane %v453_v36, 2 }
 0x156   : > { %v442_v19 = vrot.slane %v441_v17, 2 }
 0x157   : > { %v455_v40 = vadd.f32 %v454_v38, %v453_v36 }
 0x158   : > { %v443_v21 = vmax.f32 %v441_v17, %v442_v19 }
 0x159   : > { %v432_v6 = vpop.f32.mrf.mxu3  ;;  %v456_v42 = vrot.slane %v455_v40, 1 }
 0x15a   : > { %v444_v23 = vrot.slane %v443_v21, 1 }
 0x15b   : > { %v457_v44 = vadd.f32 %v456_v42, %v455_v40 }
 0x15c   : > { %v445_v25 = vmax.f32 %v443_v21, %v444_v23 }
 0x15d   : > { %vm469_vm3 = vweird.f32 %v457_v44  ;;  %v475_v0 = vand.u32 2147483648, %v457_v44 }
 0x15e   : > { %v447_v29 = vsub.f32 %v11048_v3, %v445_v25 }
 0x15f   : > { %v546_v8 = vpop.f32.mrf.mxu2  ;;  %v476_v18 = vor.u32 1.1754944e-38, %v475_v0 }
 0x160   : > { %569 = vperm.xlu2 %10512, %v546_v8   ;;  %551 = vperm.xlu1 %10510, %v546_v8   ;;  %v450_v31 = vmul.f32 1.442695, %v447_v29 }
 0x162   : > { %10741 = vpow2.f32 %v450_v31 }
 0x163   : > { %10743 = vrcp.f32 %v457_v44 }
 0x168   : > { %10511 = vset.pattern.permute.xlu1 %v12614_v9  ;;  %10519 = vset.pattern.permute.xlu2 %v12614_v9  ;;  %v10742_v33 = vpop.eup %10741 }
 0x169   : > { %559 = vperm.xlu1 %10511, %v546_v8   ;;  %1664 = vperm.xlu2 %10519, %v10980_v4   ;;  %v458_v35 = vrot.slane %v10742_v33, 4  ;;  %v10744_v49 = vpop.eup %10743 }
 0x16a   : > { %v465_v52 = vmul.f32 %v10744_v49, %v457_v44  ;;  %vm470_vm1 = vweird.f32 %v10744_v49 }
 0x16b   : > { %v459_v37 = vadd.f32 %v10742_v33, %v458_v35  ;;  %vm471_vm4 = vmor %vm469_vm3, %vm470_vm1 }
 0x16c   : > { %v466_v54 = vsub.f32 1.0, %v465_v52 }
 0x16d   : > { %v460_v39 = vrot.slane %v459_v37, 2 }
 0x16e   : > { %v467_v57 = vmul.f32 %v10744_v49, %v466_v54 }
 0x16f   : > { %v461_v41 = vadd.f32 %v460_v39, %v459_v37 }
 0x170   : > { %v468_v59 = vadd.f32 %v10744_v49, %v467_v57 }
 0x171   : > { %10513 = vset.pattern.permute.xlu1 %v12610_v10  ;;  %10520 = vset.pattern.permute.xlu2 %v12616_v2  ;;  %v462_v43 = vrot.slane %v461_v41, 1 }
 0x172   : > { %579 = vperm.xlu1 %10513, %v546_v8   ;;  %1689 = vperm.xlu2 %10520, %v10980_v4   ;;  %v472_v14 = vsel %vm471_vm4, %v10744_v49, %v468_v59 }
 0x173   : > { %v463_v47 = vadd.f32 %v462_v43, %v461_v41 }
 0x175   : > { %10745 = vrcp.f32 %v463_v47  ;;  %v490_v6 = vand.u32 2147483648, %v463_v47  ;;  %vm484_vm5 = vweird.f32 %v463_v47  ;;  %v488_v13 = vand.u32 2147483647, %v463_v47 }
 0x177   : > { %v491_v19 = vor.u32 1.1754944e-38, %v490_v6  ;;  %vm489_vm8 = vcmp.eq.f32.partialorder %v488_v13, 8.507059e+37 }
 0x17a   : > { %10514 = vset.pattern.permute.xlu1 %v12618_v7  ;;  %10521 = vset.pattern.permute.xlu2 %v12614_v9 }
 0x17b   : > { %589 = vperm.xlu1 %10514, %v546_v8   ;;  %1668 = vperm.xlu2 %10521, %v10983_v5   ;;  %v10746_v50 = vpop.eup %10745 }
 0x17c   : > { %v480_v53 = vmul.f32 %v10746_v50, %v463_v47  ;;  %vm485_vm2 = vweird.f32 %v10746_v50 }
 0x17d   : > { %vm486_vm6 = vmor %vm484_vm5, %vm485_vm2 }
 0x17e   : > { %v481_v55 = vsub.f32 1.0, %v480_v53 }
 0x180   : > { %v482_v58 = vmul.f32 %v10746_v50, %v481_v55 }
 0x182   : > { %v483_v62 = vadd.f32 %v10746_v50, %v482_v58 }
 0x183   : > { %10515 = vset.pattern.permute.xlu1 %v12608_v11  ;;  %10523 = vset.pattern.permute.xlu2 %v12616_v2 }
 0x184   : > { %599 = vperm.xlu1 %10515, %v546_v8   ;;  %1693 = vperm.xlu2 %10523, %v10983_v5   ;;  %v487_v16 = vsel %vm486_vm6, %v10746_v50, %v483_v62 }
 0x185   : > { %v492_v21 = vsel %vm489_vm8, %v491_v19, %v487_v16 }
 0x186   : > { %v493_v23 = vmul.f32 %v10742_v33, %v492_v21 }
 0x188   : > { %v563_v28 = vperm.slane %v493_v23, 1  ;;  %v555_v30 = vperm.slane %v493_v23, 0  ;;  %v573_v40 = vperm.slane %v493_v23, 2  ;;  %v583_v43 = vperm.slane %v493_v23, 3 }
 0x189   : > { %v593_v47 = vperm.slane %v493_v23, 4  ;;  %v603_v54 = vperm.slane %v493_v23, 5  ;;  %v613_v59 = vperm.slane %v493_v23, 6  ;;  %v623_v21 = vperm.slane %v493_v23, 7 }
 0x18c   : > { %10516 = vset.pattern.permute.xlu1 %v12620_v12  ;;  %10525 = vset.pattern.permute.xlu2 %v12614_v9 }
 0x18d   : > { %609 = vperm.xlu1 %10516, %v546_v8   ;;  %1672 = vperm.xlu2 %10525, %v11012_v26  }
 0x195   : > { %10517 = vset.pattern.permute.xlu1 %v12606_v15  ;;  %10527 = vset.pattern.permute.xlu2 %v12610_v10 }
 0x196   : > { %619 = vperm.xlu1 %10517, %v546_v8   ;;  %1718 = vperm.xlu2 %10527, %v10983_v5   ;;  %v473_v8 = vand.u32 2147483647, %v457_v44 }
 0x198   : > { %vm474_vm7 = vcmp.eq.f32.partialorder %v473_v8, 8.507059e+37 }
 0x199   : > { %v477_v20 = vsel %vm474_vm7, %v476_v18, %v472_v14 }
 0x19a   : > { %v478_v22 = vmul.f32 %v10740_v32, %v477_v20 }
 0x19c   : > { %v562_v25 = vperm.slane %v478_v22, 1  ;;  %v554_v29 = vperm.slane %v478_v22, 0  ;;  %v572_v37 = vperm.slane %v478_v22, 2  ;;  %v582_v39 = vperm.slane %v478_v22, 3 }
 0x19d   : > { %v592_v44 = vperm.slane %v478_v22, 4  ;;  %v602_v53 = vperm.slane %v478_v22, 5  ;;  %v612_v58 = vperm.slane %v478_v22, 6 }
 0x19e   : > { %10518 = vset.pattern.permute.xlu1 %v12612_v1  ;;  %10529 = vset.pattern.permute.xlu2 %v12608_v11 }
 0x19f   : > { %1764 = vperm.xlu2 %10529, %v10980_v4  }
 0x1a7   : > { %10531 = vset.pattern.permute.xlu2 %v12614_v9 }
 0x1a8   : > { %1676 = vperm.xlu2 %10531, %v11015_v27  }
 0x1b0   : > { %10534 = vset.pattern.permute.xlu2 %v12620_v12 }
 0x1b1   : > { %1789 = vperm.xlu2 %10534, %v10980_v4  }
 0x1b9   : > { %10536 = vset.pattern.permute.xlu2 %v12608_v11 }
 0x1ba   : > { %1768 = vperm.xlu2 %10536, %v10983_v5   ;;  %v570_v38 = vpop.permute.xlu2 %569 }
 0x1bb   : > { %v574_v32 = vmul.f32 %v572_v37, %v570_v38  ;;  %v575_v33 = vmul.f32 %v573_v40, %v570_v38  ;;  %v629_v38 = vmul.f32 %v493_v23, %v11048_v3 }
 0x1c2   : > { %10538 = vset.pattern.permute.xlu2 %v12606_v15 }
 0x1c3   : > { %1814 = vperm.xlu2 %10538, %v10980_v4  }
 0x1cb   : > { %10540 = vset.pattern.permute.xlu2 %v12620_v12 }
 0x1cc   : > { %1793 = vperm.xlu2 %10540, %v10983_v5  }
 0x1d2   : > { %v552_v48 = vpop.permute.xlu1 %551 }
 0x1d3   : > { %v556_v35 = vmul.f32 %v554_v29, %v552_v48  ;;  %v557_v36 = vmul.f32 %v555_v30, %v552_v48 }
 0x1d4   : > { %10542 = vset.pattern.permute.xlu2 %v12618_v7 }
 0x1d5   : > { %1751 = vperm.xlu2 %10542, %v11015_v27  }
 0x1db   : > { %v560_v51 = vpop.permute.xlu1 %559 }
 0x1dc   : > { %v564_v31 = vmul.f32 %v562_v25, %v560_v51  ;;  %v565_v34 = vmul.f32 %v563_v28, %v560_v51 }
 0x1dd   : > { %10545 = vset.pattern.permute.xlu2 %v12608_v11 }
 0x1de   : > { %1776 = vperm.xlu2 %10545, %v11015_v27   ;;  %v566_v41 = vadd.f32 %v564_v31, %v556_v35  ;;  %v567_v42 = vadd.f32 %v565_v34, %v557_v36 }
 0x1e0   : > { %v576_v55 = vadd.f32 %v574_v32, %v566_v41  ;;  %v577_v51 = vadd.f32 %v575_v33, %v567_v42 }
 0x1e4   : > { %v580_v56 = vpop.permute.xlu1 %579 }
 0x1e5   : > { %v584_v49 = vmul.f32 %v582_v39, %v580_v56  ;;  %v585_v50 = vmul.f32 %v583_v43, %v580_v56  ;;  %v622_v56 = vperm.slane %v478_v22, 7 }
 0x1e6   : > { %10547 = vset.pattern.permute.xlu2 %v12620_v12 }
 0x1e7   : > { %1801 = vperm.xlu2 %10547, %v11015_v27   ;;  %v586_v62 = vadd.f32 %v584_v49, %v576_v55  ;;  %v587_v0 = vadd.f32 %v585_v50, %v577_v51 }
 0x1ed   : > { %v590_v17 = vpop.permute.xlu1 %589 }
 0x1ee   : > { %v594_v57 = vmul.f32 %v592_v44, %v590_v17  ;;  %v595_v48 = vmul.f32 %v593_v47, %v590_v17 }
 0x1f0   : > { %v596_v13 = vadd.f32 %v594_v57, %v586_v62  ;;  %v597_v14 = vadd.f32 %v595_v48, %v587_v0 }
 0x1f6   : > { %v600_v24 = vpop.permute.xlu1 %599 }
 0x1f7   : > { %v604_v6 = vmul.f32 %v602_v53, %v600_v24  ;;  %v605_v8 = vmul.f32 %v603_v54, %v600_v24  ;;  %v628_v24 = vmul.f32 %v478_v22, %v11045_v63 }
 0x1f9   : > { %v606_v19 = vadd.f32 %v604_v6, %v596_v13  ;;  %v607_v20 = vadd.f32 %v605_v8, %v597_v14  ;;  %v372_v6 = vlaneseq }
 0x1ff   : > { %v610_v52 = vpop.permute.xlu1 %609 }
 0x200   : > { %v614_v16 = vmul.f32 %v612_v58, %v610_v52  ;;  %v615_v18 = vmul.f32 %v613_v59, %v610_v52 }
 0x202   : > { %v616_v28 = vadd.f32 %v614_v16, %v606_v19  ;;  %v617_v29 = vadd.f32 %v615_v18, %v607_v20  ;;  %v373_v19 = vshrl.u32 %v372_v6, 7  ;;  %v375_v20 = vand.u32 127, %v372_v6 }
 0x204   : > { %vm11135_vm15 = vcmp.eq.s32.totalorder %v373_v19, %v375_v20 }
 0x208   : > { %v620_v25 = vpop.permute.xlu1 %619 }
 0x209   : > { %v624_v30 = vmul.f32 %v622_v56, %v620_v25  ;;  %v625_v31 = vmul.f32 %v623_v21, %v620_v25 }
 0x20b   : > { %v626_v17 = vadd.f32 %v624_v30, %v616_v28  ;;  %v627_v34 = vadd.f32 %v625_v31, %v617_v29  ;;  %v12697_v30 = vmov 0 }
 0x20c   : > { %v12698_v30 = vsel %vm11135_vm15, 4294967295, %v12697_v30 }
 0x20d   : > { %v630_v35 = vadd.f32 1e-06, %v626_v17  ;;  %v631_v36 = vadd.f32 1e-06, %v627_v34  ;;  %12699 = vst [vmem:[#allocation6_spill] sm:$0xff] %v12698_v30 }
 0x20f   : > { %10747 = vrcp.f32 %v630_v35 }
 0x210   : > { %10749 = vrcp.f32 %v631_v36 }
 0x215   : > { %v10748_v37 = vpop.eup %10747 }
 0x216   : > { %v10750_v39 = vpop.eup %10749  ;;  %v11096_v40 = vmul.f32 %v10748_v37, %v628_v24  ;;  %v10907_v24 = vmov 0.0  }
 0x217   : > { %v11098_v41 = vmul.f32 %v10750_v39, %v629_v38  ;;  %v11142_v37 = vsel %vm11135_vm15, 1.0, %v10907_v24 }
 0x218   : > { %651 = vmatpush.xpose.msrb.mxu3 %v11096_v40  ;;  %12700 = vst [vmem:[#allocation7_spill] sm:$0xff] %v11142_v37 }
 0x219   : > { %671 = vmatpush.xpose.msra.mxu2 %v11098_v41 }
 0x21b   : > { %652 = vmatmul.f32.vlgmr.msrb.gmra.mxu3 %v11096_v40 }
 0x21c   : > { %672 = vmatmul.f32.vlgmr.msra.gmra.mxu2 %v11098_v41 }
 0x29e   : > { %v653_v42 = vpop.f32.mrf.mxu3 }
 0x29f   : > { %v673_v43 = vpop.f32.mrf.mxu2 }
 0x2a0   : > { %v11104_v44 = vadd.f32 %v673_v43, %v653_v42  ;;  %v12604_v43 = vmov 1.0  }
 0x2a1   : > { %10210 = vmatpush.msk.msra.mxu1 %vm11135_vm15, %v12604_v43 }
 0x2a2   : > { %v676_v63 = vmul.f32 %v11104_v44, %v11104_v44 }
 0x2a4   : > { %v678_v3 = vsel %vm677_vm9, %v676_v63, 0.0 }
 0x2a5   : > { %679 = vadd.xlane.f32.xlu1 %v678_v3 }
 0x2be   : > { %1640 = vperm.xlu1 %10518, %v10980_v4  }
 0x2c6   : > { %1645 = vperm.xlu1 %10518, %v10983_v5  }
 0x2ce   : > { %10522 = vset.pattern.permute.xlu1 %v12610_v10 }
 0x2cf   : > { %1714 = vperm.xlu1 %10522, %v10980_v4  }
 0x2d7   : > { %10524 = vset.pattern.permute.xlu1 %v12612_v1 }
 0x2d8   : > { %1650 = vperm.xlu1 %10524, %v11012_v26  }
 0x2e0   : > { %10526 = vset.pattern.permute.xlu1 %v12618_v7 }
 0x2e1   : > { %1739 = vperm.xlu1 %10526, %v10980_v4  }
 0x2e9   : > { %10528 = vset.pattern.permute.xlu1 %v12616_v2 }
 0x2ea   : > { %1697 = vperm.xlu1 %10528, %v11012_v26  }
 0x2f2   : > { %10530 = vset.pattern.permute.xlu1 %v12612_v1 }
 0x2f3   : > { %1655 = vperm.xlu1 %10530, %v11015_v27  }
 0x2fb   : > { %10533 = vset.pattern.permute.xlu1 %v12610_v10 }
 0x2fc   : > { %1722 = vperm.xlu1 %10533, %v11012_v26  }
 0x304   : > { %10535 = vset.pattern.permute.xlu1 %v12616_v2 }
 0x305   : > { %1701 = vperm.xlu1 %10535, %v11015_v27  }
 0x30d   : > { %10537 = vset.pattern.permute.xlu1 %v12618_v7 }
 0x30e   : > { %1747 = vperm.xlu1 %10537, %v11012_v26  }
 0x316   : > { %10539 = vset.pattern.permute.xlu1 %v12610_v10 }
 0x317   : > { %1726 = vperm.xlu1 %10539, %v11015_v27  }
 0x318   : > { %v680_v4 = vpop.xlane.xlu1 %679 }
 0x319   : > { %v681_v22 = vrot.slane %v680_v4, 4 }
 0x31b   : > { %v682_v23 = vadd.f32 %v681_v22, %v680_v4 }
 0x31d   : > { %v683_v47 = vrot.slane %v682_v23, 2 }
 0x31f   : > { %v684_v32 = vadd.f32 %v683_v47, %v682_v23  ;;  %10541 = vset.pattern.permute.xlu1 %v12608_v11 }
 0x320   : > { %1772 = vperm.xlu1 %10541, %v11012_v26  }
 0x321   : > { %v685_v33 = vrot.slane %v684_v32, 1 }
 0x323   : > { %v686_v49 = vadd.f32 %v685_v33, %v684_v32 }
 0x325   : > { %10751 = vrsqrt.f32 %v686_v49  ;;  %vm694_vm10 = vcmp.eq.f32.partialorder %v686_v49, inf  ;;  %v697_v48 = vand.u32 2147483648, %v686_v49  ;;  %vm696_vm11 = vcmp.eq.f32.partialorder %v686_v49, 0.0 }
 0x328   : > { %10544 = vset.pattern.permute.xlu1 %v12620_v12 }
 0x329   : > { %1797 = vperm.xlu1 %10544, %v11012_v26  }
 0x32b   : > { %v10752_v50 = vpop.eup %10751 }
 0x32c   : > { %v688_v52 = vmul.f32 %v10752_v50, %v686_v49 }
 0x32e   : > { %v689_v53 = vmul.f32 %v10752_v50, %v688_v52 }
 0x330   : > { %v690_v54 = vmul.f32 0.5, %v689_v53 }
 0x331   : > { %10546 = vset.pattern.permute.xlu1 %v12606_v15 }
 0x332   : > { %v691_v55 = vsub.f32 1.5, %v690_v54  ;;  %1822 = vperm.xlu1 %10546, %v11012_v26  }
 0x334   : > { %v692_v51 = vmul.f32 %v10752_v50, %v691_v55 }
 0x336   : > { %v693_v57 = vmul.f32 %v692_v51, %v686_v49 }
 0x338   : > { %v695_v58 = vsel %vm694_vm10, %v686_v49, %v693_v57 }
 0x339   : > { %v698_v59 = vsel %vm696_vm11, %v697_v48, %v695_v58 }
 0x33a   : > { %v699_v62 = vadd.f32 1e-30, %v698_v59 }
 0x33c   : > { %10753 = vrcp.f32 %v699_v62  ;;  %v711_v18 = vand.u32 2147483648, %v699_v62  ;;  %v709_v21 = vand.u32 2147483647, %v699_v62  ;;  %vm705_vm13 = vweird.f32 %v699_v62 }
 0x33d   : > { %10755 = vrsqrt.f32 %v699_v62  ;;  %vm1552_vm2 = vcmp.eq.f32.partialorder %v699_v62, inf  ;;  %vm1554_vm3 = vcmp.eq.f32.partialorder %v699_v62, 0.0 }
 0x33e   : > { %v712_v29 = vor.u32 1.1754944e-38, %v711_v18  ;;  %vm710_vm1 = vcmp.eq.f32.partialorder %v709_v21, 8.507059e+37 }
 0x342   : > { %v10754_v0 = vpop.eup %10753 }
 0x343   : > { %v10756_v8 = vpop.eup %10755  ;;  %v701_v13 = vmul.f32 %v10754_v0, %v699_v62  ;;  %vm706_vm12 = vweird.f32 %v10754_v0 }
 0x344   : > { %v1546_v14 = vmul.f32 %v10756_v8, %v699_v62  ;;  %vm707_vm14 = vmor %vm705_vm13, %vm706_vm12 }
 0x345   : > { %v702_v16 = vsub.f32 1.0, %v701_v13 }
 0x346   : > { %v1547_v26 = vmul.f32 %v10756_v8, %v1546_v14 }
 0x347   : > { %v703_v56 = vmul.f32 %v10754_v0, %v702_v16 }
 0x348   : > { %v1548_v25 = vmul.f32 0.5, %v1547_v26 }
 0x349   : > { %v704_v28 = vadd.f32 %v10754_v0, %v703_v56 }
 0x34a   : > { %v1549_v31 = vsub.f32 1.5, %v1548_v25 }
 0x34b   : > { %v708_v17 = vsel %vm707_vm14, %v10754_v0, %v704_v28 }
 0x34c   : > { %v713_v34 = vsel %vm710_vm1, %v712_v29, %v708_v17  ;;  %v1550_v35 = vmul.f32 %v10756_v8, %v1549_v31 }
 0x34d   : > { %v714_v36 = vmul.f32 %v713_v34, %v11104_v44  ;;  %v11152_v44 = vmul.f32 1.5, %v11142_v37 }
 0x34e   : > { %v1551_v38 = vmul.f32 %v1550_v35, %v699_v62 }
 0x34f   : > { %734 = vmatpush.msra.mxu3 %v714_v36  ;;  %12701 = vst [vmem:[#allocation8_spill] sm:$0xff] %v11152_v44 }
 0x350   : > { %10208 = vmatmul.msk.f32.vlgmr.msra.gmra.mxu3 %vm677_vm9, %v11142_v37  ;;  %v1553_v39 = vsel %vm1552_vm2, %v699_v62, %v1551_v38 }
 0x351   : > { %v11146_v42 = vsel %vm1554_vm3, %v711_v18, %v1553_v39 }
 0x3d3   : > { %v736_v63 = vpop.f32.mrf.mxu3 }
 0x3d4   : > { %v739_v3 = vmul.f32 0.5, %v736_v63 }
 0x3d6   : > { %v740_v4 = vsub.f32 %v11152_v44, %v739_v3 }
 0x3d8   : > { %759 = vmatpush.msrb.mxu0 %v740_v4  ;;  %10211 = vmatmul.msk.f32.vlgmr.msra.gmra.mxu1 %vm677_vm9, %v740_v4 }
 0x3d9   : > { %10209 = vmatmul.msk.f32.vlgmr.msrb.gmra.mxu0 %vm677_vm9, %v714_v36 }
 0x455   : > { %v784_v22 = vpop.f32.mrf.mxu1 }
 0x456   : > { %v761_v23 = vpop.f32.mrf.mxu0  ;;  %853 = vmatpush.msra.mxu0 %v784_v22 }
 0x457   : > { %805 = vmatpush.msrb.mxu2 %v761_v23 }
 0x458   : > { %10212 = vmatmul.msk.f32.vlgmr.msrb.gmra.mxu2 %vm677_vm9, %v784_v22 }
 0x4db   : > { %v807_v47 = vpop.f32.mrf.mxu2 }
 0x4dc   : > { %v810_v32 = vmul.f32 0.5, %v807_v47 }
 0x4de   : > { %v811_v33 = vsub.f32 %v11152_v44, %v810_v32 }
 0x4e0   : > { %830 = vmatpush.msrb.mxu3 %v811_v33  ;;  %10214 = vmatmul.msk.f32.vlgmr.msra.gmra.mxu0 %vm677_vm9, %v811_v33 }
 0x4e1   : > { %10213 = vmatmul.msk.f32.vlgmr.msrb.gmra.mxu3 %vm677_vm9, %v761_v23 }
 0x55d   : > { %v855_v49 = vpop.f32.mrf.mxu0 }
 0x55e   : > { %924 = vmatpush.msra.mxu3 %v855_v49 }
 0x564   : > { %v832_v50 = vpop.f32.mrf.mxu3 }
 0x565   : > { %876 = vmatpush.msrb.mxu1 %v832_v50 }
 0x566   : > { %10215 = vmatmul.msk.f32.vlgmr.msrb.gmra.mxu1 %vm677_vm9, %v855_v49 }
 0x5e3   : > { %v878_v52 = vpop.f32.mrf.mxu1 }
 0x5e4   : > { %v881_v53 = vmul.f32 0.5, %v878_v52 }
 0x5e6   : > { %v882_v54 = vsub.f32 %v11152_v44, %v881_v53 }
 0x5e8   : > { %901 = vmatpush.msra.mxu2 %v882_v54  ;;  %10217 = vmatmul.msk.f32.vlgmr.msra.gmra.mxu3 %vm677_vm9, %v882_v54 }
 0x5e9   : > { %10216 = vmatmul.msk.f32.vlgmr.msra.gmra.mxu2 %vm677_vm9, %v832_v50 }
 0x66b   : > { %v926_v55 = vpop.f32.mrf.mxu3 }
 0x66c   : > { %v903_v51 = vpop.f32.mrf.mxu2  ;;  %995 = vmatpush.msrb.mxu2 %v926_v55 }
 0x66d   : > { %947 = vmatpush.msrb.mxu0 %v903_v51 }
 0x66e   : > { %10218 = vmatmul.msk.f32.vlgmr.msrb.gmra.mxu0 %vm677_vm9, %v926_v55 }
 0x6eb   : > { %v949_v57 = vpop.f32.mrf.mxu0 }
 0x6ec   : > { %v952_v48 = vmul.f32 0.5, %v949_v57 }
 0x6ee   : > { %v953_v58 = vsub.f32 %v11152_v44, %v952_v48 }
 0x6f0   : > { %972 = vmatpush.msra.mxu1 %v953_v58  ;;  %10220 = vmatmul.msk.f32.vlgmr.msrb.gmra.mxu2 %vm677_vm9, %v953_v58 }
 0x6f1   : > { %10219 = vmatmul.msk.f32.vlgmr.msra.gmra.mxu1 %vm677_vm9, %v903_v51 }
 0x76e   : > { %v974_v59 = vpop.f32.mrf.mxu1 }
 0x76f   : > { %1018 = vmatpush.msrb.mxu3 %v974_v59 }
 0x773   : > { %v997_v62 = vpop.f32.mrf.mxu2 }
 0x774   : > { %10221 = vmatmul.msk.f32.vlgmr.msrb.gmra.mxu3 %vm677_vm9, %v997_v62  ;;  %1066 = vmatpush.msrb.mxu1 %v997_v62 }
 0x7f7   : > { %v1020_v0 = vpop.f32.mrf.mxu3 }
 0x7f8   : > { %v1023_v6 = vmul.f32 0.5, %v1020_v0 }
 0x7fa   : > { %v1024_v8 = vsub.f32 %v11152_v44, %v1023_v6 }
 0x7fc   : > { %1043 = vmatpush.msra.mxu0 %v1024_v8  ;;  %10223 = vmatmul.msk.f32.vlgmr.msrb.gmra.mxu1 %vm677_vm9, %v1024_v8 }
 0x7fd   : > { %10222 = vmatmul.msk.f32.vlgmr.msra.gmra.mxu0 %vm677_vm9, %v974_v59 }
 0x879   : > { %v1068_v13 = vpop.f32.mrf.mxu1 }
 0x87a   : > { %v1045_v14 = vpop.f32.mrf.mxu0  ;;  %1137 = vmatpush.msrb.mxu0 %v1068_v13 }
 0x87b   : > { %1089 = vmatpush.msra.mxu2 %v1045_v14 }
 0x87c   : > { %10224 = vmatmul.msk.f32.vlgmr.msra.gmra.mxu2 %vm677_vm9, %v1068_v13 }
 0x8ff   : > { %v1091_v16 = vpop.f32.mrf.mxu2 }
 0x900   : > { %v1094_v18 = vmul.f32 0.5, %v1091_v16 }
 0x902   : > { %v1095_v19 = vsub.f32 %v11152_v44, %v1094_v18 }
 0x904   : > { %1114 = vmatpush.msra.mxu3 %v1095_v19  ;;  %10226 = vmatmul.msk.f32.vlgmr.msrb.gmra.mxu0 %vm677_vm9, %v1095_v19 }
 0x905   : > { %10225 = vmatmul.msk.f32.vlgmr.msra.gmra.mxu3 %vm677_vm9, %v1045_v14 }
 0x981   : > { %v1139_v20 = vpop.f32.mrf.mxu0 }
 0x982   : > { %1208 = vmatpush.msrb.mxu3 %v1139_v20 }
 0x988   : > { %v1116_v26 = vpop.f32.mrf.mxu3 }
 0x989   : > { %1160 = vmatpush.msra.mxu1 %v1116_v26 }
 0x98a   : > { %10227 = vmatmul.msk.f32.vlgmr.msra.gmra.mxu1 %vm677_vm9, %v1139_v20 }
 0xa07   : > { %v1162_v56 = vpop.f32.mrf.mxu1 }
 0xa08   : > { %v1165_v21 = vmul.f32 0.5, %v1162_v56 }
 0xa0a   : > { %v1166_v25 = vsub.f32 %v11152_v44, %v1165_v21 }
 0xa0c   : > { %1185 = vmatpush.msrb.mxu2 %v1166_v25  ;;  %10229 = vmatmul.msk.f32.vlgmr.msrb.gmra.mxu3 %vm677_vm9, %v1166_v25 }
 0xa0d   : > { %10228 = vmatmul.msk.f32.vlgmr.msrb.gmra.mxu2 %vm677_vm9, %v1116_v26 }
 0xa8f   : > { %v1210_v28 = vpop.f32.mrf.mxu3 }
 0xa90   : > { %v1187_v29 = vpop.f32.mrf.mxu2  ;;  %1279 = vmatpush.msra.mxu2 %v1210_v28 }
 0xa91   : > { %1231 = vmatpush.msra.mxu0 %v1187_v29 }
 0xa92   : > { %10230 = vmatmul.msk.f32.vlgmr.msra.gmra.mxu0 %vm677_vm9, %v1210_v28 }
 0xb0f   : > { %v1233_v31 = vpop.f32.mrf.mxu0 }
 0xb10   : > { %v1236_v17 = vmul.f32 0.5, %v1233_v31 }
 0xb12   : > { %v1237_v34 = vsub.f32 %v11152_v44, %v1236_v17 }
 0xb14   : > { %1256 = vmatpush.msrb.mxu1 %v1237_v34  ;;  %10232 = vmatmul.msk.f32.vlgmr.msra.gmra.mxu2 %vm677_vm9, %v1237_v34 }
 0xb15   : > { %10231 = vmatmul.msk.f32.vlgmr.msrb.gmra.mxu1 %vm677_vm9, %v1187_v29 }
 0xb92   : > { %v1258_v35 = vpop.f32.mrf.mxu1 }
 0xb93   : > { %1302 = vmatpush.msra.mxu3 %v1258_v35 }
 0xb97   : > { %v1281_v36 = vpop.f32.mrf.mxu2 }
 0xb98   : > { %10233 = vmatmul.msk.f32.vlgmr.msra.gmra.mxu3 %vm677_vm9, %v1281_v36  ;;  %1350 = vmatpush.msra.mxu1 %v1281_v36 }
 0xc1b   : > { %v1304_v24 = vpop.f32.mrf.mxu3 }
 0xc1c   : > { %v1307_v38 = vmul.f32 0.5, %v1304_v24 }
 0xc1e   : > { %v1308_v39 = vsub.f32 %v11152_v44, %v1307_v38 }
 0xc20   : > { %1327 = vmatpush.msrb.mxu0 %v1308_v39  ;;  %10235 = vmatmul.msk.f32.vlgmr.msra.gmra.mxu1 %vm677_vm9, %v1308_v39 }
 0xc21   : > { %10234 = vmatmul.msk.f32.vlgmr.msrb.gmra.mxu0 %vm677_vm9, %v1258_v35 }
 0xc9d   : > { %v1352_v63 = vpop.f32.mrf.mxu1 }
 0xc9e   : > { %v1329_v3 = vpop.f32.mrf.mxu0  ;;  %1421 = vmatpush.msra.mxu0 %v1352_v63 }
 0xc9f   : > { %1373 = vmatpush.msrb.mxu2 %v1329_v3 }
 0xca0   : > { %10236 = vmatmul.msk.f32.vlgmr.msrb.gmra.mxu2 %vm677_vm9, %v1352_v63 }
 0xd23   : > { %v1375_v4 = vpop.f32.mrf.mxu2 }
 0xd24   : > { %v1378_v22 = vmul.f32 0.5, %v1375_v4 }
 0xd26   : > { %v1379_v23 = vsub.f32 %v11152_v44, %v1378_v22 }
 0xd28   : > { %1398 = vmatpush.msrb.mxu3 %v1379_v23  ;;  %10238 = vmatmul.msk.f32.vlgmr.msra.gmra.mxu0 %vm677_vm9, %v1379_v23 }
 0xd29   : > { %10237 = vmatmul.msk.f32.vlgmr.msrb.gmra.mxu3 %vm677_vm9, %v1329_v3 }
 0xda5   : > { %v1423_v47 = vpop.f32.mrf.mxu0 }
 0xda6   : > { %1492 = vmatpush.msra.mxu3 %v1423_v47 }
 0xdac   : > { %v1400_v32 = vpop.f32.mrf.mxu3 }
 0xdad   : > { %1444 = vmatpush.msrb.mxu1 %v1400_v32 }
 0xdae   : > { %10239 = vmatmul.msk.f32.vlgmr.msrb.gmra.mxu1 %vm677_vm9, %v1423_v47 }
 0xe2b   : > { %v1446_v33 = vpop.f32.mrf.mxu1 }
 0xe2c   : > { %v1449_v49 = vmul.f32 0.5, %v1446_v33 }
 0xe2e   : > { %v1450_v50 = vsub.f32 %v11152_v44, %v1449_v49 }
 0xe30   : > { %1469 = vmatpush.msra.mxu2 %v1450_v50  ;;  %10241 = vmatmul.msk.f32.vlgmr.msra.gmra.mxu3 %vm677_vm9, %v1450_v50 }
 0xe31   : > { %10240 = vmatmul.msk.f32.vlgmr.msra.gmra.mxu2 %vm677_vm9, %v1400_v32 }
 0xeb3   : > { %v1494_v53 = vpop.f32.mrf.mxu3 }
 0xeb4   : > { %v1471_v52 = vpop.f32.mrf.mxu2 }
 0xeb5   : > { %1515 = vmatpush.msrb.mxu0 %v1471_v52 }
 0xeb6   : > { %10242 = vmatmul.msk.f32.vlgmr.msrb.gmra.mxu0 %vm677_vm9, %v1494_v53 }
 0xf33   : > { %v1517_v54 = vpop.f32.mrf.mxu0 }
 0xf34   : > { %v1520_v55 = vmul.f32 0.5, %v1517_v54 }
 0xf36   : > { %v1521_v51 = vsub.f32 %v11152_v44, %v1520_v55 }
 0xf38   : > { %1540 = vmatpush.msra.mxu1 %v1521_v51 }
 0xf39   : > { %10243 = vmatmul.msk.f32.vlgmr.msra.gmra.mxu1 %vm677_vm9, %v1471_v52 }
 0xfb6   : > { %v1542_v57 = vpop.f32.mrf.mxu1 }
 0xfb7   : > { %v1557_v48 = vmul.f32 %v11142_v37, %v1542_v57 }
 0xfb9   : > { %v1558_v58 = vsel %vm677_vm9, %v1557_v48, 0.0 }
 0xfba   : > { %1559 = vadd.xlane.f32.xlu0 %v1558_v58 }
 0xfce   : > { %1743 = vperm.xlu0 %10532, %v10983_v5  }
 0xfd6   : > { %10543 = vset.pattern.permute.xlu0 %v12606_v15 }
 0xfd7   : > { %1818 = vperm.xlu0 %10543, %v10983_v5  }
 0xfdf   : > { %1826 = vperm.xlu0 %10543, %v11015_v27  }
 0xfe7   : > { %10548 = vset.pattern.permute.xlu0 %v12612_v1 }
0x102d   : > { %v1560_v59 = vpop.xlane.xlu0 %1559 }
0x102e   : > { %v1561_v62 = vrot.slane %v1560_v59, 4 }
0x1030   : > { %v1562_v0 = vadd.f32 %v1561_v62, %v1560_v59 }
0x1032   : > { %v1563_v6 = vrot.slane %v1562_v0, 2 }
0x1034   : > { %v1564_v8 = vadd.f32 %v1563_v6, %v1562_v0 }
0x1036   : > { %v1565_v13 = vrot.slane %v1564_v8, 1 }
0x1038   : > { %v1566_v14 = vadd.f32 %v1565_v13, %v1564_v8 }
0x103a   : > { %v1567_v16 = vmul.f32 %v1566_v14, %v11146_v42  ;;  %v11220_v42 = vpop.permute.xlu2 %1664 }
0x103c   : > { %v1568_v18 = vadd.f32 1e-06, %v1567_v16 }
0x103e   : > { %10757 = vrcp.f32 %v1568_v18 }
0x1040   : > { %v11252_v49 = vpop.permute.xlu0 %1743 }
0x1044   : > { %v10758_v19 = vpop.eup %10757 }
0x1045   : > { %v11209_v20 = vmul.f32 %v10758_v19, %v11096_v40  ;;  %v11212_v5 = vmul.f32 %v10758_v19, %v11098_v41  ;;  %v11226_v40 = vpop.permute.xlu2 %1689  ;;  %v1641_v41 = vpop.permute.xlu1 %1640 }
0x1047   : > { %v1572_v27 = vpack.c.bf16 %v11209_v20, %v11209_v20  ;;  %v1573_v26 = vpack.c.bf16 %v11212_v5, %v11212_v5 }
0x1049   : > { %1581 = vmatpush.bf16.xpose.msrb.mxu2 %v1572_v27  ;;  %1600 = vmatpush.bf16.xpose.msrb.mxu3 %v1573_v26  ;;  %v11254_v51 = vpop.permute.xlu0 %1818 }
0x104a   : > { %1619 = vmatpush.bf16.xpose.msra.mxu0 %v1572_v27  ;;  %1632 = vmatpush.bf16.xpose.msrb.mxu1 %v1573_v26 }
0x104d   : > { %v11230_v56 = vpop.permute.xlu2 %1668  ;;  %v11232_v21 = vpop.permute.xlu1 %1645 }
0x1050   : > { %1582 = vmatmul.bf16.vlgmr.msrb.gmra.mxu2 %v11029_v46  ;;  %1601 = vmatmul.bf16.vlgmr.msrb.gmra.mxu3 %v11040_v61 }
0x1051   : > { %1620 = vmatmul.bf16.vlgmr.msra.gmra.mxu0 %v1572_v27  ;;  %1633 = vmatmul.bf16.vlgmr.msrb.gmra.mxu1 %v1573_v26 }
0x1052   : > { %1881 = vmatpush.bf16.msrb.mxu0 %v11026_v45  ;;  %1894 = vmatpush.bf16.msra.mxu1 %v11037_v60 }
0x1055   : > { %v11234_v25 = vpop.permute.xlu2 %1693  ;;  %v11236_v28 = vpop.permute.xlu1 %1714 }
0x1056   : > { %1882 = vmatpush.bf16.msrb.mxu0 %v11029_v46  ;;  %1895 = vmatpush.bf16.msra.mxu1 %v11040_v61 }
0x105d   : > { %v1673_v29 = vpop.permute.xlu2 %1672  ;;  %v1651_v31 = vpop.permute.xlu1 %1650 }
0x1060   : > { %1587 = vmatmul.bf16.gmra.mxu2 %v11026_v45  ;;  %1606 = vmatmul.bf16.gmra.mxu3 %v11037_v60 }
0x1065   : > { %v11238_v17 = vpop.permute.xlu2 %1718  ;;  %v11240_v34 = vpop.permute.xlu1 %1739 }
0x106d   : > { %v11242_v35 = vpop.permute.xlu2 %1764  ;;  %v1698_v36 = vpop.permute.xlu1 %1697 }
0x1075   : > { %v1677_v24 = vpop.permute.xlu2 %1676  ;;  %v1656_v38 = vpop.permute.xlu1 %1655 }
0x107d   : > { %v11244_v39 = vpop.permute.xlu2 %1789  ;;  %v1723_v63 = vpop.permute.xlu1 %1722 }
0x1085   : > { %v11246_v3 = vpop.permute.xlu2 %1768  ;;  %v1702_v4 = vpop.permute.xlu1 %1701 }
0x108d   : > { %v11248_v22 = vpop.permute.xlu2 %1814  ;;  %v1748_v23 = vpop.permute.xlu1 %1747 }
0x1095   : > { %v11250_v47 = vpop.permute.xlu2 %1793  ;;  %v1727_v32 = vpop.permute.xlu1 %1726 }
0x109d   : > { %v1752_v33 = vpop.permute.xlu2 %1751  ;;  %v1773_v50 = vpop.permute.xlu1 %1772 }
0x10a5   : > { %v1777_v54 = vpop.permute.xlu2 %1776  ;;  %v1798_v59 = vpop.permute.xlu1 %1797 }
0x10ad   : > { %v1802_v2 = vpop.permute.xlu2 %1801 }
0x10ce   : > { %v1621_v52 = vpop.f32.mrf.mxu0  ;;  %v1634_v53 = vpop.f32.mrf.mxu1 }
0x10cf   : > { %v1635_v55 = vadd.f32 %v1634_v53, %v1621_v52 }
0x10d1   : > { %v1658_v57 = vperm.slane %v1635_v55, 0  ;;  %v1679_v48 = vperm.slane %v1635_v55, 1  ;;  %v1704_v58 = vperm.slane %v1635_v55, 2  ;;  %v1729_v6 = vperm.slane %v1635_v55, 3 }
0x10d2   : > { %v1754_v14 = vperm.slane %v1635_v55, 4  ;;  %v1779_v26 = vperm.slane %v1635_v55, 5  ;;  %v1804_v1 = vperm.slane %v1635_v55, 6 }
0x10d3   : > { %v1662_v62 = vmul.f32 %v1658_v57, %v1656_v38  ;;  %v1683_v0 = vmul.f32 %v1679_v48, %v1677_v24  ;;  %v11256_v8 = vpop.f32.mrf.mxu2  ;;  %v11258_v13 = vpop.f32.mrf.mxu3  ;;  %v1708_v18 = vmul.f32 %v1704_v58, %v1702_v4  ;;  %v1661_v19 = vmul.f32 %v1658_v57, %v1651_v31 }
0x10d4   : > { %v1682_v27 = vmul.f32 %v1679_v48, %v1673_v29  ;;  %v1733_v15 = vmul.f32 %v1729_v6, %v1727_v32  ;;  %v1707_v10 = vmul.f32 %v1704_v58, %v1698_v36  ;;  %v1829_v38 = vperm.slane %v1635_v55, 7  ;;  %v1827_v31 = vpop.permute.xlu0 %1826 }
0x10d5   : > { %v1687_v16 = vadd.f32 %v1683_v0, %v1662_v62  ;;  %v1659_v24 = vmul.f32 %v1658_v57, %v1641_v41  ;;  %v1680_v9 = vmul.f32 %v1679_v48, %v11220_v42  ;;  %v1758_v12 = vmul.f32 %v1754_v14, %v1752_v33 }
0x10d6   : > { %v1623_v52 = vpop.f32.mrf.mxu0  ;;  %v1636_v53 = vpop.f32.mrf.mxu1  ;;  %v1686_v11 = vadd.f32 %v1682_v27, %v1661_v19  ;;  %v1732_v62 = vmul.f32 %v1729_v6, %v1723_v63  ;;  %v1783_v4 = vmul.f32 %v1779_v26, %v1777_v54  ;;  %v1757_v29 = vmul.f32 %v1754_v14, %v1748_v23 }
0x10d7   : > { %v1712_v43 = vadd.f32 %v1708_v18, %v1687_v16  ;;  %v1684_v0 = vadd.f32 %v1680_v9, %v1659_v24  ;;  %v1705_v52 = vmul.f32 %v1704_v58, %v11226_v40  ;;  %v1660_v55 = vmul.f32 %v1658_v57, %v11232_v21  ;;  %v1823_v63 = vpop.permute.xlu1 %1822 }
0x10d8   : > { %v1711_v61 = vadd.f32 %v1707_v10, %v1686_v11  ;;  %v1681_v41 = vmul.f32 %v1679_v48, %v11230_v56  ;;  %v1808_v42 = vmul.f32 %v1804_v1, %v1802_v2  ;;  %v1782_v19 = vmul.f32 %v1779_v26, %v1773_v50 }
0x10d9   : > { %v1737_v7 = vadd.f32 %v1733_v15, %v1712_v43  ;;  %v1709_v15 = vadd.f32 %v1705_v52, %v1684_v0  ;;  %v1730_v10 = vmul.f32 %v1729_v6, %v11236_v28  ;;  %v1706_v9 = vmul.f32 %v1704_v58, %v11234_v25 }
0x10da   : > { %v1736_v32 = vadd.f32 %v1732_v62, %v1711_v61  ;;  %v1685_v23 = vadd.f32 %v1681_v41, %v1660_v55  ;;  %v1833_v40 = vmul.f32 %v1829_v38, %v1827_v31  ;;  %v1731_v2 = vmul.f32 %v1729_v6, %v11238_v17 }
0x10db   : > { %v1762_v16 = vadd.f32 %v1758_v12, %v1737_v7  ;;  %v1585_v18 = vpop.f32.mrf.mxu2  ;;  %v1604_v36 = vpop.f32.mrf.mxu3  ;;  %v1807_v7 = vmul.f32 %v1804_v1, %v1798_v59  ;;  %v1734_v61 = vadd.f32 %v1730_v10, %v1709_v15  ;;  %v1755_v12 = vmul.f32 %v1754_v14, %v11240_v34 }
0x10dc   : > { %v1761_v43 = vadd.f32 %v1757_v29, %v1736_v32  ;;  %v1710_v54 = vadd.f32 %v1706_v9, %v1685_v23  ;;  %v1832_v56 = vmul.f32 %v1829_v38, %v1823_v63  ;;  %v1780_v28 = vmul.f32 %v1779_v26, %v11242_v35 }
0x10dd   : > { %v1787_v11 = vadd.f32 %v1783_v4, %v1762_v16  ;;  %v1759_v50 = vadd.f32 %v1755_v12, %v1734_v61  ;;  %v1756_v53 = vmul.f32 %v1754_v14, %v11252_v49  ;;  %v1805_v58 = vmul.f32 %v1804_v1, %v11244_v39 }
0x10de   : > { %v1786_v21 = vadd.f32 %v1782_v19, %v1761_v43  ;;  %v1735_v27 = vadd.f32 %v1731_v2, %v1710_v54  ;;  %v1781_v34 = vmul.f32 %v1779_v26, %v11246_v3  ;;  %v1830_v6 = vmul.f32 %v1829_v38, %v11248_v22  ;;  %v10880_v19 = vld [vmem:[%s10967_s7] sm:$0xff] }
0x10df   : > { %v1812_v33 = vadd.f32 %v1808_v42, %v1787_v11  ;;  %v1784_v25 = vadd.f32 %v1780_v28, %v1759_v50  ;;  %v1806_v0 = vmul.f32 %v1804_v1, %v11250_v47  ;;  %v1831_v49 = vmul.f32 %v1829_v38, %v11254_v51  ;;  %v10879_v51 = vld [vmem:[%s10967_s7 + $0x18] sm:$0xff]  ;;  %v10881_v11 = vld [vmem:[%s10967_s7 + $0x10] sm:$0xff] }
0x10e0   : > { %v1811_v48 = vadd.f32 %v1807_v7, %v1786_v21  ;;  %v1760_v24 = vadd.f32 %v1756_v53, %v1735_v27  ;;  %v1603_v14 = vadd.f32 %v11258_v13, %v11256_v8  ;;  %v1605_v41 = vadd.f32 %v1604_v36, %v1585_v18  ;;  %v10882_v13 = vld [vmem:[%s10967_s7 + $0x8] sm:$0xff] }
0x10e1   : > { %v1837_v57 = vadd.f32 %v1833_v40, %v1812_v33  ;;  %v1809_v17 = vadd.f32 %v1805_v58, %v1784_v25  ;;  %v12702_v61 = vmov 6   ;;  %v12703_v12 = vmov 4  }
0x10e2   : > { %v1836_v59 = vadd.f32 %v1832_v56, %v1811_v48  ;;  %v1785_v35 = vadd.f32 %v1781_v34, %v1760_v24  ;;  %v1838_v15 = vmul.f32 %v10880_v19, %v1603_v14  ;;  %v1839_v23 = vmul.f32 %v10882_v13, %v1605_v41 }
0x10e3   : > { %v1588_v62 = vpop.f32.mrf.mxu2  ;;  %v1607_v4 = vpop.f32.mrf.mxu3  ;;  %v1845_v31 = vadd.f32 1e-06, %v1837_v57  ;;  %v1834_v52 = vadd.f32 %v1830_v6, %v1809_v17  ;;  %v12704_v57 = vmov 2   ;;  %v12705_v48 = vmov 1  }
0x10e4   : > { %v1844_v29 = vadd.f32 1e-06, %v1836_v59  ;;  %v1810_v16 = vadd.f32 %v1806_v0, %v1785_v35  ;;  %v1608_v1 = vadd.f32 %v1607_v4, %v1588_v62  ;;  %v12706_v27 = vmov 0  }
0x10e5   : > { %10759 = vrcp.f32 %v1845_v31  ;;  %v1842_v39 = vadd.f32 1e-06, %v1834_v52  ;;  %v12707_v53 = vmov 3   ;;  %v12708_v25 = vmov 5  }
0x10e6   : > { %10761 = vrcp.f32 %v1844_v29  ;;  %v1835_v3 = vadd.f32 %v1831_v49, %v1810_v16  ;;  %v1840_v43 = vmul.f32 %v10881_v11, %v1608_v1  ;;  %v12709_v58 = vmov 7  }
0x10e7   : > { %10763 = vrcp.f32 %v1842_v39  ;;  %v1969_v62 = vperm.slane %v11209_v20, 1  ;;  %v1970_v4 = vperm.slane %v11212_v5, 1  ;;  %v1961_v17 = vperm.slane %v11209_v20, 0 }
0x10e8   : > { %v1843_v22 = vadd.f32 1e-06, %v1835_v3  ;;  %v1962_v6 = vperm.slane %v11212_v5, 0  ;;  %v1979_v0 = vperm.slane %v11209_v20, 2  ;;  %v1980_v52 = vperm.slane %v11212_v5, 2 }
0x10e9   : > { %v1989_v16 = vperm.slane %v11209_v20, 3  ;;  %v1990_v49 = vperm.slane %v11212_v5, 3  ;;  %v2009_v11 = vperm.slane %v11209_v20, 5 }
0x10ea   : > { %10765 = vrcp.f32 %v1843_v22 }
0x10eb   : > { %v1590_v26 = vpop.f32.mrf.mxu2  ;;  %v1609_v32 = vpop.f32.mrf.mxu3 }
0x10ec   : > { %v1610_v47 = vadd.f32 %v1609_v32, %v1590_v26  ;;  %v10760_v55 = vpop.eup %10759 }
0x10ed   : > { %v10762_v42 = vpop.eup %10761 }
0x10ee   : > { %v1841_v38 = vmul.f32 %v10879_v51, %v1610_v47  ;;  %v10764_v10 = vpop.eup %10763  ;;  %v11285_v9 = vmul.f32 %v10762_v42, %v1840_v43  ;;  %v1999_v51 = vperm.slane %v11209_v20, 4  ;;  %v2010_v43 = vperm.slane %v11212_v5, 5 }
0x10ef   : > { %v11282_v8 = vmul.f32 %v10764_v10, %v1838_v15 }
0x10f0   : > { %v11280_v63 = vmul.f32 %v10760_v55, %v1841_v38  ;;  %v10766_v40 = vpop.eup %10765  ;;  %v2000_v38 = vperm.slane %v11212_v5, 4 }
0x10f1   : > { %1901 = vxpose.xlu1.b32.start [1/4] (short) (narrow) %v11282_v8, 8  ;;  %v11289_v18 = vmul.f32 %v10766_v40, %v1839_v23 }
0x10f2   : > { %1948 = vmatpush.msra.mxu2 %v11280_v63  ;;  %v1855_v7 = vpack.c.bf16 %v11280_v63, %v11285_v9 }
0x10f3   : > { %v1854_v36 = vpack.c.bf16 %v11289_v18, %v11282_v8 }
0x10f4   : > { %1949 = vmatpush.msra.mxu2 %v11285_v9 }
0x10f5   : > { %1856 = vxpose.xlu2.c.b16.start [1/2] (short) (narrow) %v1854_v36, 16 }
0x10f6   : > { %1950 = vmatpush.msra.mxu2 %v11289_v18 }
0x10f8   : > { %1951 = vmatpush.msra.mxu2 %v11282_v8 }
0x10f9   : > { %1902 = vxpose.xlu1.b32.cont [2/4] (short) (narrow) %v11289_v18, 8 }
0x1101   : > { %1903 = vxpose.xlu1.b32.cont [3/4] (short) (narrow) %v11285_v9, 8 }
0x1105   : > { %1857 = vxpose.xlu2.c.b16.end [2/2] (short) (narrow) %v1855_v7, 16 }
0x1109   : > { %1904 = vxpose.xlu1.b32.end [4/4] (short) (narrow) %v11280_v63, 8 }
0x115c   : > { %10554 = vset.pattern.permute.xlu1 %v12702_v61 }
0x1167   : > { %10552 = vset.pattern.permute.xlu2 %v12703_v12 }
0x1195   : > { %v1917_v33 = vpop.trf.xlu1 }
0x1196   : > { %10246 = vmatmul.msk.f32.vlgmr.msra.gmra.mxu2 %vm315_vm0, %v1917_v33  ;;  %v1864_v21 = vpop.trf.xlu2 }
0x1197   : > { %10244 = vmatmul.msk.bf16.vlgmr.msrb.gmra.mxu0 %vm315_vm0, %v1864_v21  ;;  %10245 = vmatmul.msk.bf16.vlgmr.msra.gmra.mxu1 %vm315_vm0, %v1864_v21 }
0x1214   : > { %v11306_v54 = vpop.f32.mrf.mxu0  ;;  %v11308_v2 = vpop.f32.mrf.mxu1 }
0x1219   : > { %v1953_v56 = vpop.f32.mrf.mxu2 }
0x121a   : > { %2016 = vperm.xlu1 %10554, %v1953_v56   ;;  %1958 = vperm.xlu0 %10548, %v1953_v56  }
0x121b   : > { %1996 = vperm.xlu2 %10552, %v1953_v56  }
0x121c   : > { %v1886_v50 = vpop.f32.mrf.mxu0  ;;  %v1899_v28 = vpop.f32.mrf.mxu1 }
0x121d   : > { %v2020_v50 = vperm.slane %v11212_v5, 6 }
0x1222   : > { %10558 = vset.pattern.permute.xlu1 %v12704_v57  ;;  %10549 = vset.pattern.permute.xlu0 %v12705_v48 }
0x1223   : > { %10557 = vset.pattern.permute.xlu2 %v12705_v48  ;;  %3091 = vperm.xlu1 %10558, %v11282_v8  }
0x1224   : > { %1966 = vperm.xlu0 %10549, %v1953_v56   ;;  %3066 = vperm.xlu2 %10557, %v11282_v8  }
0x122b   : > { %10560 = vset.pattern.permute.xlu1 %v12705_v48 }
0x122c   : > { %10550 = vset.pattern.permute.xlu0 %v12704_v57  ;;  %10559 = vset.pattern.permute.xlu2 %v12706_v27 }
0x122d   : > { %3070 = vperm.xlu1 %10560, %v11289_v18   ;;  %1976 = vperm.xlu0 %10550, %v1953_v56  }
0x122e   : > { %3047 = vperm.xlu2 %10559, %v11289_v18  }
0x1235   : > { %10562 = vset.pattern.permute.xlu1 %v12704_v57  ;;  %10551 = vset.pattern.permute.xlu0 %v12707_v53 }
0x1236   : > { %10561 = vset.pattern.permute.xlu2 %v12707_v53  ;;  %3095 = vperm.xlu1 %10562, %v11289_v18  }
0x1237   : > { %1986 = vperm.xlu0 %10551, %v1953_v56   ;;  %3116 = vperm.xlu2 %10561, %v11282_v8  }
0x123e   : > { %10564 = vset.pattern.permute.xlu1 %v12705_v48 }
0x123f   : > { %10553 = vset.pattern.permute.xlu0 %v12708_v25  ;;  %10563 = vset.pattern.permute.xlu2 %v12706_v27 }
0x1240   : > { %3074 = vperm.xlu1 %10564, %v11285_v9   ;;  %2006 = vperm.xlu0 %10553, %v1953_v56  }
0x1241   : > { %3052 = vperm.xlu2 %10563, %v11285_v9  }
0x1248   : > { %10567 = vset.pattern.permute.xlu1 %v12704_v57  ;;  %10555 = vset.pattern.permute.xlu0 %v12709_v58 }
0x1249   : > { %10566 = vset.pattern.permute.xlu2 %v12707_v53  ;;  %3099 = vperm.xlu1 %10567, %v11285_v9  }
0x124a   : > { %2026 = vperm.xlu0 %10555, %v1953_v56   ;;  %3120 = vperm.xlu2 %10566, %v11289_v18   ;;  %v2019_v56 = vperm.slane %v11209_v20, 6 }
0x1251   : > { %10569 = vset.pattern.permute.xlu1 %v12706_v27 }
0x1252   : > { %10568 = vset.pattern.permute.xlu2 %v12708_v25  ;;  %3057 = vperm.xlu1 %10569, %v11280_v63  }
0x1253   : > { %3166 = vperm.xlu2 %10568, %v11282_v8   ;;  %10556 = vset.pattern.permute.xlu0 %v12706_v27 }
0x125a   : > { %10572 = vset.pattern.permute.xlu1 %v12707_v53 }
0x125b   : > { %10571 = vset.pattern.permute.xlu2 %v12703_v12  ;;  %3124 = vperm.xlu1 %10572, %v11285_v9  }
0x125c   : > { %3145 = vperm.xlu2 %10571, %v11289_v18  }
0x1263   : > { %10574 = vset.pattern.permute.xlu1 %v12704_v57 }
0x1264   : > { %10573 = vset.pattern.permute.xlu2 %v12702_v61  ;;  %3103 = vperm.xlu1 %10574, %v11280_v63  }
0x1265   : > { %3191 = vperm.xlu2 %10573, %v11282_v8  }
0x126c   : > { %10577 = vset.pattern.permute.xlu1 %v12709_v58 }
0x126d   : > { %10576 = vset.pattern.permute.xlu2 %v12703_v12  ;;  %3216 = vperm.xlu1 %10577, %v11282_v8  }
0x126e   : > { %3149 = vperm.xlu2 %10576, %v11285_v9  }
0x1275   : > { %10579 = vset.pattern.permute.xlu1 %v12702_v61  ;;  %v1997_v42 = vpop.permute.xlu2 %1996 }
0x1276   : > { %10578 = vset.pattern.permute.xlu2 %v12707_v53  ;;  %3195 = vperm.xlu1 %10579, %v11289_v18   ;;  %v2001_v13 = vmul.f32 %v1999_v51, %v1997_v42  ;;  %v2002_v23 = vmul.f32 %v2000_v38, %v1997_v42 }
0x1277   : > { %3128 = vperm.xlu2 %10578, %v11280_v63  }
0x127e   : > { %10581 = vset.pattern.permute.xlu1 %v12709_v58 }
0x127f   : > { %10580 = vset.pattern.permute.xlu2 %v12703_v12  ;;  %3220 = vperm.xlu1 %10581, %v11289_v18  }
0x1280   : > { %3153 = vperm.xlu2 %10580, %v11280_v63  }
0x1287   : > { %3224 = vperm.xlu1 %10581, %v11285_v9  }
0x1288   : > { %10583 = vset.pattern.permute.xlu2 %v12708_v25 }
0x1289   : > { %3178 = vperm.xlu2 %10583, %v11280_v63  }
0x128c   : > { %v1959_v59 = vpop.permute.xlu0 %1958  ;;  %v2017_v21 = vpop.permute.xlu1 %2016 }
0x128d   : > { %v1963_v39 = vmul.f32 %v1961_v17, %v1959_v59  ;;  %v1964_v3 = vmul.f32 %v1962_v6, %v1959_v59 }
0x128f   : > { %3228 = vperm.xlu1 %10581, %v11280_v63  }
0x1291   : > { %10584 = vset.pattern.permute.xlu2 %v12702_v61 }
0x1292   : > { %3203 = vperm.xlu2 %10584, %v11280_v63  }
0x1296   : > { %v1967_v24 = vpop.permute.xlu0 %1966 }
0x1297   : > { %10585 = vset.pattern.permute.xlu1 %v12706_v27  ;;  %v1971_v29 = vmul.f32 %v1969_v62, %v1967_v24  ;;  %v1972_v35 = vmul.f32 %v1970_v4, %v1967_v24  ;;  %v2021_v24 = vmul.f32 %v2019_v56, %v2017_v21  ;;  %v2029_v62 = vperm.slane %v11209_v20, 7 }
0x1298   : > { %v2030_v4 = vperm.slane %v11212_v5, 7 }
0x1299   : > { %v1973_v26 = vadd.f32 %v1971_v29, %v1963_v39  ;;  %v1974_v32 = vadd.f32 %v1972_v35, %v1964_v3  ;;  %v2035_v39 = vmul.f32 %v11306_v54, %v11209_v20 }
0x129f   : > { %v1977_v34 = vpop.permute.xlu0 %1976 }
0x12a0   : > { %v1981_v14 = vmul.f32 %v1979_v0, %v1977_v34  ;;  %v1982_v22 = vmul.f32 %v1980_v52, %v1977_v34  ;;  %v2022_v34 = vmul.f32 %v2020_v50, %v2017_v21 }
0x12a2   : > { %v1983_v55 = vadd.f32 %v1981_v14, %v1973_v26  ;;  %v1984_v41 = vadd.f32 %v1982_v22, %v1974_v32  ;;  %v2036_v14 = vmul.f32 %v11308_v2, %v11212_v5 }
0x12a9   : > { %v1987_v31 = vpop.permute.xlu0 %1986 }
0x12aa   : > { %v1991_v1 = vmul.f32 %v1989_v16, %v1987_v31  ;;  %v1992_v47 = vmul.f32 %v1990_v49, %v1987_v31 }
0x12ac   : > { %v1993_v15 = vadd.f32 %v1991_v1, %v1983_v55  ;;  %v1994_v10 = vadd.f32 %v1992_v47, %v1984_v41  ;;  %v12710_v1 = vmov 1.0  }
0x12ae   : > { %v2003_v7 = vadd.f32 %v2001_v13, %v1993_v15  ;;  %v2004_v33 = vadd.f32 %v2002_v23, %v1994_v10 }
0x12b2   : > { %v2007_v19 = vpop.permute.xlu0 %2006 }
0x12b3   : > { %v2011_v40 = vmul.f32 %v2009_v11, %v2007_v19  ;;  %v2012_v36 = vmul.f32 %v2010_v43, %v2007_v19 }
0x12b5   : > { %v2013_v28 = vadd.f32 %v2011_v40, %v2003_v7  ;;  %v2014_v59 = vadd.f32 %v2012_v36, %v2004_v33 }
0x12b7   : > { %v2023_v17 = vadd.f32 %v2021_v24, %v2013_v28  ;;  %v2024_v6 = vadd.f32 %v2022_v34, %v2014_v59 }
0x12bc   : > { %v2027_v31 = vpop.permute.xlu0 %2026 }
0x12bd   : > { %v2031_v29 = vmul.f32 %v2029_v62, %v2027_v31  ;;  %v2032_v35 = vmul.f32 %v2030_v4, %v2027_v31 }
0x12bf   : > { %v2033_v0 = vadd.f32 %v2031_v29, %v2023_v17  ;;  %v2034_v52 = vadd.f32 %v2032_v35, %v2024_v6 }
0x12c1   : > { %v2037_v16 = vadd.f32 1e-06, %v2033_v0  ;;  %v2038_v49 = vadd.f32 1e-06, %v2034_v52 }
0x12c3   : > { %10767 = vrcp.f32 %v2037_v16 }
0x12c4   : > { %10769 = vrcp.f32 %v2038_v49 }
0x12c9   : > { %v10768_v3 = vpop.eup %10767 }
0x12ca   : > { %v10770_v22 = vpop.eup %10769  ;;  %v11387_v26 = vmul.f32 %v10768_v3, %v2035_v39 }
0x12cb   : > { %v11389_v32 = vmul.f32 %v10770_v22, %v2036_v14 }
0x12cc   : > { %2058 = vmatpush.xpose.msra.mxu3 %v11387_v26 }
0x12cd   : > { %2078 = vmatpush.xpose.msra.mxu0 %v11389_v32 }
0x12cf   : > { %2059 = vmatmul.f32.vlgmr.msra.gmra.mxu3 %v11387_v26 }
0x12d0   : > { %10249 = vmatpush.msk.msrb.mxu3 %vm11135_vm15, %v12710_v1  ;;  %2079 = vmatmul.f32.vlgmr.msra.gmra.mxu0 %v11389_v32 }
0x134d   : > { %v2080_v20 = vpop.f32.mrf.mxu0 }
0x1352   : > { %v2060_v54 = vpop.f32.mrf.mxu3 }
0x1353   : > { %v2081_v5 = vadd.f32 %v2080_v20, %v2060_v54 }
0x1355   : > { %v2083_v2 = vmul.f32 %v2081_v5, %v2081_v5 }
0x1357   : > { %v2084_v47 = vsel %vm677_vm9, %v2083_v2, 0.0 }
0x1358   : > { %2085 = vadd.xlane.f32.xlu0 %v2084_v47 }
0x13cb   : > { %v2086_v55 = vpop.xlane.xlu0 %2085 }
0x13cc   : > { %v2087_v41 = vrot.slane %v2086_v55, 4 }
0x13ce   : > { %v2088_v51 = vadd.f32 %v2087_v41, %v2086_v55 }
0x13d0   : > { %v2089_v38 = vrot.slane %v2088_v51, 2 }
0x13d2   : > { %v2090_v42 = vadd.f32 %v2089_v38, %v2088_v51 }
0x13d4   : > { %v2091_v19 = vrot.slane %v2090_v42, 1 }
0x13d6   : > { %v2092_v15 = vadd.f32 %v2091_v19, %v2090_v42 }
0x13d8   : > { %10771 = vrsqrt.f32 %v2092_v15  ;;  %vm2100_vm4 = vcmp.eq.f32.partialorder %v2092_v15, inf  ;;  %v2103_v7 = vand.u32 2147483648, %v2092_v15  ;;  %vm2102_vm5 = vcmp.eq.f32.partialorder %v2092_v15, 0.0 }
0x13de   : > { %v10772_v10 = vpop.eup %10771 }
0x13df   : > { %v2094_v11 = vmul.f32 %v10772_v10, %v2092_v15 }
0x13e1   : > { %v2095_v43 = vmul.f32 %v10772_v10, %v2094_v11 }
0x13e3   : > { %v2096_v13 = vmul.f32 0.5, %v2095_v43 }
0x13e5   : > { %v2097_v23 = vsub.f32 1.5, %v2096_v13 }
0x13e7   : > { %v2098_v40 = vmul.f32 %v10772_v10, %v2097_v23 }
0x13e9   : > { %v2099_v36 = vmul.f32 %v2098_v40, %v2092_v15 }
0x13eb   : > { %v2101_v33 = vsel %vm2100_vm4, %v2092_v15, %v2099_v36 }
0x13ec   : > { %v2104_v21 = vsel %vm2102_vm5, %v2103_v7, %v2101_v33 }
0x13ed   : > { %v2105_v56 = vadd.f32 1e-30, %v2104_v21 }
0x13ef   : > { %10773 = vrcp.f32 %v2105_v56  ;;  %v2117_v62 = vand.u32 2147483648, %v2105_v56  ;;  %v2115_v17 = vand.u32 2147483647, %v2105_v56  ;;  %vm2111_vm7 = vweird.f32 %v2105_v56 }
0x13f0   : > { %10775 = vrsqrt.f32 %v2105_v56  ;;  %vm2954_vm11 = vcmp.eq.f32.partialorder %v2105_v56, inf  ;;  %vm2956_vm12 = vcmp.eq.f32.partialorder %v2105_v56, 0.0 }
0x13f1   : > { %v2118_v35 = vor.u32 1.1754944e-38, %v2117_v62  ;;  %vm2116_vm10 = vcmp.eq.f32.partialorder %v2115_v17, 8.507059e+37 }
0x13f5   : > { %v10774_v50 = vpop.eup %10773 }
0x13f6   : > { %v10776_v28 = vpop.eup %10775  ;;  %v2107_v59 = vmul.f32 %v10774_v50, %v2105_v56  ;;  %vm2112_vm6 = vweird.f32 %v10774_v50 }
0x13f7   : > { %v2948_v24 = vmul.f32 %v10776_v28, %v2105_v56  ;;  %vm2113_vm8 = vmor %vm2111_vm7, %vm2112_vm6 }
0x13f8   : > { %v2108_v34 = vsub.f32 1.0, %v2107_v59 }
0x13f9   : > { %v2949_v4 = vmul.f32 %v10776_v28, %v2948_v24 }
0x13fa   : > { %v2109_v31 = vmul.f32 %v10774_v50, %v2108_v34 }
0x13fb   : > { %v2950_v6 = vmul.f32 0.5, %v2949_v4 }
0x13fc   : > { %v2110_v29 = vadd.f32 %v10774_v50, %v2109_v31 }
0x13fd   : > { %v2951_v0 = vsub.f32 1.5, %v2950_v6 }
0x13fe   : > { %v2114_v52 = vsel %vm2113_vm8, %v10774_v50, %v2110_v29 }
0x13ff   : > { %v2119_v16 = vsel %vm2116_vm10, %v2118_v35, %v2114_v52  ;;  %v2952_v49 = vmul.f32 %v10776_v28, %v2951_v0 }
0x1400   : > { %v2120_v39 = vmul.f32 %v2119_v16, %v2081_v5 }
0x1401   : > { %v2953_v3 = vmul.f32 %v2952_v49, %v2105_v56 }
0x1402   : > { %2136 = vmatpush.msrb.mxu1 %v2120_v39 }
0x1403   : > { %10247 = vmatmul.msk.f32.vlgmr.msrb.gmra.mxu1 %vm677_vm9, %v11142_v37  ;;  %v2955_v14 = vsel %vm2954_vm11, %v2105_v56, %v2953_v3 }
0x1404   : > { %v11401_v22 = vsel %vm2956_vm12, %v2117_v62, %v2955_v14 }
0x1480   : > { %v2138_v20 = vpop.f32.mrf.mxu1 }
0x1481   : > { %v2141_v54 = vmul.f32 0.5, %v2138_v20 }
0x1483   : > { %v2142_v2 = vsub.f32 %v11152_v44, %v2141_v54 }
0x1485   : > { %2161 = vmatpush.msrb.mxu2 %v2142_v2  ;;  %10250 = vmatmul.msk.f32.vlgmr.msrb.gmra.mxu3 %vm677_vm9, %v2142_v2 }
0x1486   : > { %10248 = vmatmul.msk.f32.vlgmr.msrb.gmra.mxu2 %vm677_vm9, %v2120_v39 }
0x1508   : > { %v2186_v5 = vpop.f32.mrf.mxu3 }
0x1509   : > { %v2163_v47 = vpop.f32.mrf.mxu2  ;;  %2255 = vmatpush.msra.mxu2 %v2186_v5 }
0x150a   : > { %2207 = vmatpush.msrb.mxu0 %v2163_v47 }
0x150b   : > { %10251 = vmatmul.msk.f32.vlgmr.msrb.gmra.mxu0 %vm677_vm9, %v2186_v5 }
0x1588   : > { %v2209_v55 = vpop.f32.mrf.mxu0 }
0x1589   : > { %v2212_v41 = vmul.f32 0.5, %v2209_v55 }
0x158b   : > { %v2213_v51 = vsub.f32 %v11152_v44, %v2212_v41 }
0x158d   : > { %2232 = vmatpush.msra.mxu1 %v2213_v51  ;;  %10253 = vmatmul.msk.f32.vlgmr.msra.gmra.mxu2 %vm677_vm9, %v2213_v51 }
0x158e   : > { %10252 = vmatmul.msk.f32.vlgmr.msra.gmra.mxu1 %vm677_vm9, %v2163_v47 }
0x160b   : > { %v2234_v38 = vpop.f32.mrf.mxu1 }
0x160c   : > { %2278 = vmatpush.msra.mxu3 %v2234_v38 }
0x1610   : > { %v2257_v42 = vpop.f32.mrf.mxu2 }
0x1611   : > { %10254 = vmatmul.msk.f32.vlgmr.msra.gmra.mxu3 %vm677_vm9, %v2257_v42  ;;  %2326 = vmatpush.msrb.mxu1 %v2257_v42 }
0x1694   : > { %v2280_v19 = vpop.f32.mrf.mxu3 }
0x1695   : > { %v2283_v15 = vmul.f32 0.5, %v2280_v19 }
0x1697   : > { %v2284_v10 = vsub.f32 %v11152_v44, %v2283_v15 }
0x1699   : > { %2303 = vmatpush.msra.mxu0 %v2284_v10  ;;  %10256 = vmatmul.msk.f32.vlgmr.msrb.gmra.mxu1 %vm677_vm9, %v2284_v10 }
0x169a   : > { %10255 = vmatmul.msk.f32.vlgmr.msra.gmra.mxu0 %vm677_vm9, %v2234_v38 }
0x1716   : > { %v2328_v11 = vpop.f32.mrf.mxu1 }
0x1717   : > { %v2305_v43 = vpop.f32.mrf.mxu0  ;;  %2397 = vmatpush.msrb.mxu0 %v2328_v11 }
0x1718   : > { %2349 = vmatpush.msrb.mxu2 %v2305_v43 }
0x1719   : > { %10257 = vmatmul.msk.f32.vlgmr.msrb.gmra.mxu2 %vm677_vm9, %v2328_v11 }
0x179c   : > { %v2351_v13 = vpop.f32.mrf.mxu2 }
0x179d   : > { %v2354_v23 = vmul.f32 0.5, %v2351_v13 }
0x179f   : > { %v2355_v40 = vsub.f32 %v11152_v44, %v2354_v23 }
0x17a1   : > { %2374 = vmatpush.msrb.mxu3 %v2355_v40  ;;  %10259 = vmatmul.msk.f32.vlgmr.msrb.gmra.mxu0 %vm677_vm9, %v2355_v40 }
0x17a2   : > { %10258 = vmatmul.msk.f32.vlgmr.msrb.gmra.mxu3 %vm677_vm9, %v2305_v43 }
0x181e   : > { %v2399_v36 = vpop.f32.mrf.mxu0 }
0x181f   : > { %2468 = vmatpush.msra.mxu3 %v2399_v36 }
0x1825   : > { %v2376_v7 = vpop.f32.mrf.mxu3 }
0x1826   : > { %2420 = vmatpush.msra.mxu1 %v2376_v7 }
0x1827   : > { %10260 = vmatmul.msk.f32.vlgmr.msra.gmra.mxu1 %vm677_vm9, %v2399_v36 }
0x18a4   : > { %v2422_v33 = vpop.f32.mrf.mxu1 }
0x18a5   : > { %v2425_v21 = vmul.f32 0.5, %v2422_v33 }
0x18a7   : > { %v2426_v56 = vsub.f32 %v11152_v44, %v2425_v21 }
0x18a9   : > { %2445 = vmatpush.msra.mxu2 %v2426_v56  ;;  %10262 = vmatmul.msk.f32.vlgmr.msra.gmra.mxu3 %vm677_vm9, %v2426_v56 }
0x18aa   : > { %10261 = vmatmul.msk.f32.vlgmr.msra.gmra.mxu2 %vm677_vm9, %v2376_v7 }
0x192c   : > { %v2470_v50 = vpop.f32.mrf.mxu3 }
0x192d   : > { %v2447_v28 = vpop.f32.mrf.mxu2  ;;  %2539 = vmatpush.msrb.mxu2 %v2470_v50 }
0x192e   : > { %2491 = vmatpush.msra.mxu0 %v2447_v28 }
0x192f   : > { %10263 = vmatmul.msk.f32.vlgmr.msra.gmra.mxu0 %vm677_vm9, %v2470_v50 }
0x19ac   : > { %v2493_v59 = vpop.f32.mrf.mxu0 }
0x19ad   : > { %v2496_v24 = vmul.f32 0.5, %v2493_v59 }
0x19af   : > { %v2497_v34 = vsub.f32 %v11152_v44, %v2496_v24 }
0x19b1   : > { %2516 = vmatpush.msrb.mxu1 %v2497_v34  ;;  %10265 = vmatmul.msk.f32.vlgmr.msrb.gmra.mxu2 %vm677_vm9, %v2497_v34 }
0x19b2   : > { %10264 = vmatmul.msk.f32.vlgmr.msrb.gmra.mxu1 %vm677_vm9, %v2447_v28 }
0x1a2f   : > { %v2518_v62 = vpop.f32.mrf.mxu1 }
0x1a30   : > { %2562 = vmatpush.msrb.mxu3 %v2518_v62 }
0x1a34   : > { %v2541_v4 = vpop.f32.mrf.mxu2 }
0x1a35   : > { %10266 = vmatmul.msk.f32.vlgmr.msrb.gmra.mxu3 %vm677_vm9, %v2541_v4  ;;  %2610 = vmatpush.msra.mxu1 %v2541_v4 }
0x1ab8   : > { %v2564_v31 = vpop.f32.mrf.mxu3 }
0x1ab9   : > { %v2567_v17 = vmul.f32 0.5, %v2564_v31 }
0x1abb   : > { %v2568_v6 = vsub.f32 %v11152_v44, %v2567_v17 }
0x1abd   : > { %2587 = vmatpush.msrb.mxu0 %v2568_v6  ;;  %10268 = vmatmul.msk.f32.vlgmr.msra.gmra.mxu1 %vm677_vm9, %v2568_v6 }
0x1abe   : > { %10267 = vmatmul.msk.f32.vlgmr.msrb.gmra.mxu0 %vm677_vm9, %v2518_v62 }
0x1b3a   : > { %v2612_v29 = vpop.f32.mrf.mxu1 }
0x1b3b   : > { %v2589_v35 = vpop.f32.mrf.mxu0  ;;  %2681 = vmatpush.msra.mxu0 %v2612_v29 }
0x1b3c   : > { %2633 = vmatpush.msra.mxu2 %v2589_v35 }
0x1b3d   : > { %10269 = vmatmul.msk.f32.vlgmr.msra.gmra.mxu2 %vm677_vm9, %v2612_v29 }
0x1bc0   : > { %v2635_v0 = vpop.f32.mrf.mxu2 }
0x1bc1   : > { %v2638_v52 = vmul.f32 0.5, %v2635_v0 }
0x1bc3   : > { %v2639_v16 = vsub.f32 %v11152_v44, %v2638_v52 }
0x1bc5   : > { %2658 = vmatpush.msra.mxu3 %v2639_v16  ;;  %10271 = vmatmul.msk.f32.vlgmr.msra.gmra.mxu0 %vm677_vm9, %v2639_v16 }
0x1bc6   : > { %10270 = vmatmul.msk.f32.vlgmr.msra.gmra.mxu3 %vm677_vm9, %v2589_v35 }
0x1c42   : > { %v2683_v49 = vpop.f32.mrf.mxu0 }
0x1c43   : > { %2752 = vmatpush.msrb.mxu3 %v2683_v49 }
0x1c49   : > { %v2660_v39 = vpop.f32.mrf.mxu3 }
0x1c4a   : > { %2704 = vmatpush.msrb.mxu1 %v2660_v39 }
0x1c4b   : > { %10272 = vmatmul.msk.f32.vlgmr.msrb.gmra.mxu1 %vm677_vm9, %v2683_v49 }
0x1cc8   : > { %v2706_v3 = vpop.f32.mrf.mxu1 }
0x1cc9   : > { %v2709_v14 = vmul.f32 0.5, %v2706_v3 }
0x1ccb   : > { %v2710_v20 = vsub.f32 %v11152_v44, %v2709_v14 }
0x1ccd   : > { %2729 = vmatpush.msrb.mxu2 %v2710_v20  ;;  %10274 = vmatmul.msk.f32.vlgmr.msrb.gmra.mxu3 %vm677_vm9, %v2710_v20 }
0x1cce   : > { %10273 = vmatmul.msk.f32.vlgmr.msrb.gmra.mxu2 %vm677_vm9, %v2660_v39 }
0x1d50   : > { %v2754_v54 = vpop.f32.mrf.mxu3 }
0x1d51   : > { %v2731_v2 = vpop.f32.mrf.mxu2  ;;  %2823 = vmatpush.msra.mxu2 %v2754_v54 }
0x1d52   : > { %2775 = vmatpush.msrb.mxu0 %v2731_v2 }
0x1d53   : > { %10275 = vmatmul.msk.f32.vlgmr.msrb.gmra.mxu0 %vm677_vm9, %v2754_v54 }
0x1dd0   : > { %v2777_v5 = vpop.f32.mrf.mxu0 }
0x1dd1   : > { %v2780_v47 = vmul.f32 0.5, %v2777_v5 }
0x1dd3   : > { %v2781_v55 = vsub.f32 %v11152_v44, %v2780_v47 }
0x1dd5   : > { %2800 = vmatpush.msra.mxu1 %v2781_v55  ;;  %10277 = vmatmul.msk.f32.vlgmr.msra.gmra.mxu2 %vm677_vm9, %v2781_v55 }
0x1dd6   : > { %10276 = vmatmul.msk.f32.vlgmr.msra.gmra.mxu1 %vm677_vm9, %v2731_v2 }
0x1e53   : > { %v2802_v41 = vpop.f32.mrf.mxu1 }
0x1e54   : > { %2846 = vmatpush.msra.mxu3 %v2802_v41 }
0x1e58   : > { %v2825_v51 = vpop.f32.mrf.mxu2 }
0x1e59   : > { %10278 = vmatmul.msk.f32.vlgmr.msra.gmra.mxu3 %vm677_vm9, %v2825_v51  ;;  %2894 = vmatpush.msrb.mxu1 %v2825_v51 }
0x1edc   : > { %v2848_v38 = vpop.f32.mrf.mxu3 }
0x1edd   : > { %v2851_v42 = vmul.f32 0.5, %v2848_v38 }
0x1edf   : > { %v2852_v19 = vsub.f32 %v11152_v44, %v2851_v42 }
0x1ee1   : > { %2871 = vmatpush.msra.mxu0 %v2852_v19  ;;  %10280 = vmatmul.msk.f32.vlgmr.msrb.gmra.mxu1 %vm677_vm9, %v2852_v19 }
0x1ee2   : > { %10279 = vmatmul.msk.f32.vlgmr.msra.gmra.mxu0 %vm677_vm9, %v2802_v41 }
0x1f5e   : > { %v2896_v10 = vpop.f32.mrf.mxu1 }
0x1f5f   : > { %v2873_v15 = vpop.f32.mrf.mxu0 }
0x1f60   : > { %2917 = vmatpush.msrb.mxu2 %v2873_v15 }
0x1f61   : > { %10281 = vmatmul.msk.f32.vlgmr.msrb.gmra.mxu2 %vm677_vm9, %v2896_v10 }
0x1fe4   : > { %v2919_v11 = vpop.f32.mrf.mxu2 }
0x1fe5   : > { %v2922_v43 = vmul.f32 0.5, %v2919_v11 }
0x1fe7   : > { %v2923_v13 = vsub.f32 %v11152_v44, %v2922_v43 }
0x1fe9   : > { %2942 = vmatpush.msrb.mxu3 %v2923_v13 }
0x1fea   : > { %10282 = vmatmul.msk.f32.vlgmr.msrb.gmra.mxu3 %vm677_vm9, %v2873_v15 }
0x206d   : > { %v2944_v23 = vpop.f32.mrf.mxu3 }
0x206e   : > { %v2959_v40 = vmul.f32 %v11142_v37, %v2944_v23 }
0x2070   : > { %v2960_v36 = vsel %vm677_vm9, %v2959_v40, 0.0 }
0x2071   : > { %2961 = vadd.xlane.f32.xlu0 %v2960_v36 }
0x2085   : > { %3042 = vperm.xlu0 %10556, %v11282_v8  }
0x208d   : > { %10565 = vset.pattern.permute.xlu0 %v12703_v12 }
0x208e   : > { %3141 = vperm.xlu0 %10565, %v11282_v8  }
0x2096   : > { %10570 = vset.pattern.permute.xlu0 %v12705_v48 }
0x2097   : > { %3078 = vperm.xlu0 %10570, %v11280_v63  }
0x209f   : > { %10575 = vset.pattern.permute.xlu0 %v12708_v25 }
0x20a0   : > { %3170 = vperm.xlu0 %10575, %v11289_v18  }
0x20a8   : > { %3174 = vperm.xlu0 %10575, %v11285_v9  }
0x20b0   : > { %10582 = vset.pattern.permute.xlu0 %v12702_v61 }
0x20b1   : > { %3199 = vperm.xlu0 %10582, %v11285_v9  }
0x20e4   : > { %v2962_v7 = vpop.xlane.xlu0 %2961 }
0x20e5   : > { %v2963_v33 = vrot.slane %v2962_v7, 4 }
0x20e7   : > { %v2964_v21 = vadd.f32 %v2963_v33, %v2962_v7 }
0x20e9   : > { %v2965_v56 = vrot.slane %v2964_v21, 2 }
0x20eb   : > { %v2966_v50 = vadd.f32 %v2965_v56, %v2964_v21 }
0x20ed   : > { %v2967_v28 = vrot.slane %v2966_v50, 1 }
0x20ef   : > { %v2968_v59 = vadd.f32 %v2967_v28, %v2966_v50 }
0x20f1   : > { %v2969_v24 = vmul.f32 %v2968_v59, %v11401_v22  ;;  %v3092_v22 = vpop.permute.xlu1 %3091 }
0x20f3   : > { %v2970_v34 = vadd.f32 1e-06, %v2969_v24 }
0x20f5   : > { %10777 = vrcp.f32 %v2970_v34 }
0x20f7   : > { %v3043_v5 = vpop.permute.xlu0 %3042 }
0x20f9   : > { %v3071_v35 = vpop.permute.xlu1 %3070 }
0x20fb   : > { %v10778_v62 = vpop.eup %10777 }
0x20fc   : > { %v11463_v4 = vmul.f32 %v10778_v62, %v11387_v26  ;;  %v11466_v31 = vmul.f32 %v10778_v62, %v11389_v32  ;;  %v12713_v26 = vld [vmem:[#allocation5_spill] sm:$0xff]  ;;  %v3067_v32 = vpop.permute.xlu2 %3066 }
0x20fe   : > { %12711 = vst [vmem:[#allocation9_spill] sm:$0xff] %v11463_v4  ;;  %v2974_v17 = vpack.c.bf16 %v11463_v4, %v11463_v4  ;;  %v2975_v6 = vpack.c.bf16 %v11466_v31, %v11466_v31 }
0x20ff   : > { %12712 = vst [vmem:[#allocation10_spill] sm:$0xff] %v11466_v31 }
0x2100   : > { %2983 = vmatpush.bf16.xpose.msrb.mxu0 %v2974_v17  ;;  %3002 = vmatpush.bf16.xpose.msra.mxu1 %v2975_v6  ;;  %v3142_v41 = vpop.permute.xlu0 %3141 }
0x2101   : > { %3021 = vmatpush.bf16.xpose.msra.mxu2 %v2974_v17  ;;  %3034 = vmatpush.bf16.xpose.msra.mxu3 %v2975_v6  ;;  %v3096_v52 = vpop.permute.xlu1 %3095 }
0x2104   : > { %v3048_v29 = vpop.permute.xlu2 %3047 }
0x2107   : > { %2984 = vmatmul.bf16.vlgmr.msrb.gmra.mxu0 %v11029_v46  ;;  %3003 = vmatmul.bf16.vlgmr.msra.gmra.mxu1 %v12713_v26 }
0x2108   : > { %3022 = vmatmul.bf16.vlgmr.msra.gmra.mxu2 %v2974_v17  ;;  %3035 = vmatmul.bf16.vlgmr.msra.gmra.mxu3 %v2975_v6 }
0x2109   : > { %3283 = vmatpush.bf16.msrb.mxu2 %v11026_v45  ;;  %3296 = vmatpush.bf16.msrb.mxu3 %v11037_v60  ;;  %v3075_v49 = vpop.permute.xlu1 %3074  ;;  %v3079_v42 = vpop.permute.xlu0 %3078 }
0x210c   : > { %v3117_v0 = vpop.permute.xlu2 %3116 }
0x210d   : > { %3284 = vmatpush.bf16.msrb.mxu2 %v11029_v46  ;;  %3297 = vmatpush.bf16.msrb.mxu3 %v12713_v26 }
0x2111   : > { %v3100_v3 = vpop.permute.xlu1 %3099 }
0x2112   : > { %v3171_v10 = vpop.permute.xlu0 %3170 }
0x2114   : > { %v3053_v16 = vpop.permute.xlu2 %3052 }
0x2117   : > { %2989 = vmatmul.bf16.gmra.mxu0 %v11026_v45  ;;  %3008 = vmatmul.bf16.gmra.mxu1 %v11037_v60 }
0x2119   : > { %v3058_v20 = vpop.permute.xlu1 %3057 }
0x211c   : > { %v3121_v39 = vpop.permute.xlu2 %3120 }
0x2121   : > { %v3125_v2 = vpop.permute.xlu1 %3124 }
0x2124   : > { %v3167_v14 = vpop.permute.xlu2 %3166 }
0x2129   : > { %v11480_v55 = vpop.permute.xlu1 %3103 }
0x212c   : > { %v3146_v54 = vpop.permute.xlu2 %3145 }
0x2131   : > { %v11482_v38 = vpop.permute.xlu1 %3216 }
0x2134   : > { %v3192_v47 = vpop.permute.xlu2 %3191 }
0x2139   : > { %v3196_v15 = vpop.permute.xlu1 %3195 }
0x213c   : > { %v3150_v51 = vpop.permute.xlu2 %3149 }
0x2141   : > { %v3221_v50 = vpop.permute.xlu1 %3220 }
0x2144   : > { %v11484_v19 = vpop.permute.xlu2 %3128 }
0x214c   : > { %v11490_v36 = vpop.permute.xlu2 %3153 }
0x2184   : > { %v11486_v11 = vpop.f32.mrf.mxu0  ;;  %v11488_v43 = vpop.f32.mrf.mxu1 }
0x218b   : > { %v3023_v13 = vpop.f32.mrf.mxu2  ;;  %v3036_v23 = vpop.f32.mrf.mxu3 }
0x218c   : > { %v3037_v40 = vadd.f32 %v3036_v23, %v3023_v13  ;;  %v3175_v13 = vpop.permute.xlu0 %3174  ;;  %v2987_v31 = vpop.f32.mrf.mxu0 }
0x218d   : > { %v3006_v4 = vpop.f32.mrf.mxu1 }
0x218e   : > { %v3060_v7 = vperm.slane %v3037_v40, 0  ;;  %v3081_v33 = vperm.slane %v3037_v40, 1  ;;  %v3106_v21 = vperm.slane %v3037_v40, 2  ;;  %v3131_v56 = vperm.slane %v3037_v40, 3 }
0x218f   : > { %v3156_v62 = vperm.slane %v3037_v40, 4  ;;  %v3181_v60 = vperm.slane %v3037_v40, 5  ;;  %v3206_v61 = vperm.slane %v3037_v40, 6 }
0x2190   : > { %v3061_v28 = vmul.f32 %v3060_v7, %v3043_v5  ;;  %v3082_v59 = vmul.f32 %v3081_v33, %v3067_v32  ;;  %v3062_v24 = vmul.f32 %v3060_v7, %v3048_v29  ;;  %v3083_v34 = vmul.f32 %v3081_v33, %v3071_v35 }
0x2191   : > { %v3107_v26 = vmul.f32 %v3106_v21, %v3092_v22  ;;  %v3108_v46 = vmul.f32 %v3106_v21, %v3096_v52  ;;  %v3132_v30 = vmul.f32 %v3131_v56, %v3117_v0  ;;  %v3133_v1 = vmul.f32 %v3131_v56, %v3121_v39 }
0x2192   : > { %v3086_v17 = vadd.f32 %v3082_v59, %v3061_v28  ;;  %v3087_v6 = vadd.f32 %v3083_v34, %v3062_v24  ;;  %v3063_v5 = vmul.f32 %v3060_v7, %v3053_v16  ;;  %v3084_v32 = vmul.f32 %v3081_v33, %v3075_v49  ;;  %v3179_v24 = vpop.permute.xlu2 %3178 }
0x2193   : > { %v3025_v45 = vpop.f32.mrf.mxu2  ;;  %v3038_v44 = vpop.f32.mrf.mxu3  ;;  %v3157_v25 = vmul.f32 %v3156_v62, %v3142_v41  ;;  %v3158_v28 = vmul.f32 %v3156_v62, %v3146_v54  ;;  %v3231_v59 = vperm.slane %v3037_v40, 7  ;;  %v3109_v52 = vmul.f32 %v3106_v21, %v3100_v3 }
0x2194   : > { %v3111_v23 = vadd.f32 %v3107_v26, %v3086_v17  ;;  %v3112_v37 = vadd.f32 %v3108_v46, %v3087_v6  ;;  %v3088_v22 = vadd.f32 %v3084_v32, %v3063_v5  ;;  %v3182_v34 = vmul.f32 %v3181_v60, %v3167_v14  ;;  %v3225_v6 = vpop.permute.xlu1 %3224 }
0x2195   : > { %v3183_v26 = vmul.f32 %v3181_v60, %v3171_v10  ;;  %v3134_v0 = vmul.f32 %v3131_v56, %v3125_v2  ;;  %v3064_v39 = vmul.f32 %v3060_v7, %v3058_v20  ;;  %v3085_v17 = vmul.f32 %v3081_v33, %v3079_v42  ;;  %v3200_v42 = vpop.permute.xlu0 %3199 }
0x2196   : > { %v3136_v29 = vadd.f32 %v3132_v30, %v3111_v23  ;;  %v3137_v35 = vadd.f32 %v3133_v1, %v3112_v37  ;;  %v3113_v46 = vadd.f32 %v3109_v52, %v3088_v22  ;;  %v3207_v49 = vmul.f32 %v3206_v61, %v3192_v47  ;;  %v2990_v47 = vpop.f32.mrf.mxu0 }
0x2197   : > { %v3208_v30 = vmul.f32 %v3206_v61, %v3196_v15  ;;  %v3159_v1 = vmul.f32 %v3156_v62, %v3150_v51  ;;  %v3089_v54 = vadd.f32 %v3085_v17, %v3064_v39  ;;  %v3110_v41 = vmul.f32 %v3106_v21, %v11480_v55  ;;  %v3009_v15 = vpop.f32.mrf.mxu1 }
0x2198   : > { %v3161_v45 = vadd.f32 %v3157_v25, %v3136_v29  ;;  %v3162_v44 = vadd.f32 %v3158_v28, %v3137_v35  ;;  %v3138_v37 = vadd.f32 %v3134_v0, %v3113_v46  ;;  %v3232_v25 = vmul.f32 %v3231_v59, %v11482_v38 }
0x2199   : > { %v3233_v14 = vmul.f32 %v3231_v59, %v3221_v50  ;;  %v3184_v23 = vmul.f32 %v3181_v60, %v3175_v13  ;;  %v3114_v2 = vadd.f32 %v3110_v41, %v3089_v54  ;;  %v3135_v20 = vmul.f32 %v3131_v56, %v11484_v19 }
0x219a   : > { %v3186_v27 = vadd.f32 %v3182_v34, %v3161_v45  ;;  %v3187_v16 = vadd.f32 %v3183_v26, %v3162_v44  ;;  %v3163_v10 = vadd.f32 %v3159_v1, %v3138_v37  ;;  %v3209_v51 = vmul.f32 %v3206_v61, %v3200_v42  ;;  %v3204_v13 = vpop.permute.xlu2 %3203 }
0x219b   : > { %v3139_v32 = vadd.f32 %v3135_v20, %v3114_v2  ;;  %v3160_v55 = vmul.f32 %v3156_v62, %v11490_v36  ;;  %v3234_v38 = vmul.f32 %v3231_v59, %v3225_v6  ;;  %v3185_v35 = vmul.f32 %v3181_v60, %v3179_v24 }
0x219c   : > { %v3211_v3 = vadd.f32 %v3207_v49, %v3186_v27  ;;  %v3212_v40 = vadd.f32 %v3208_v30, %v3187_v16  ;;  %v3188_v5 = vadd.f32 %v3184_v23, %v3163_v10  ;;  %v3005_v19 = vadd.f32 %v11488_v43, %v11486_v11  ;;  %v3229_v52 = vpop.permute.xlu1 %3228 }
0x219d   : > { %v3164_v50 = vadd.f32 %v3160_v55, %v3139_v32  ;;  %v3210_v22 = vmul.f32 %v3206_v61, %v3204_v13  ;;  %v3007_v45 = vadd.f32 %v3006_v4, %v2987_v31  ;;  %v3235_v34 = vmul.f32 %v3231_v59, %v3229_v52 }
0x219e   : > { %v3236_v7 = vadd.f32 %v3232_v25, %v3211_v3  ;;  %v3237_v33 = vadd.f32 %v3233_v14, %v3212_v40  ;;  %v3213_v29 = vadd.f32 %v3209_v51, %v3188_v5  ;;  %v3240_v62 = vmul.f32 %v3005_v19, %v11282_v8  ;;  %v2992_v11 = vpop.f32.mrf.mxu0 }
0x219f   : > { %v3189_v28 = vadd.f32 %v3185_v35, %v3164_v50  ;;  %v3241_v60 = vmul.f32 %v3007_v45, %v11289_v18  ;;  %v3011_v43 = vpop.f32.mrf.mxu1  ;;  %v3010_v4 = vadd.f32 %v3009_v15, %v2990_v47  ;;  %v12714_v40 = vmov 0   ;;  %v12718_v47 = vld [vmem:[#allocation10_spill] sm:$0xff] }
0x21a0   : > { %v3244_v27 = vadd.f32 1e-06, %v3236_v7  ;;  %v3245_v21 = vadd.f32 1e-06, %v3237_v33  ;;  %v3238_v56 = vadd.f32 %v3234_v38, %v3213_v29  ;;  %v3012_v61 = vadd.f32 %v3011_v43, %v2992_v11  ;;  %v12717_v7 = vld [vmem:[#allocation9_spill] sm:$0xff] }
0x21a1   : > { %v3214_v44 = vadd.f32 %v3210_v22, %v3189_v28  ;;  %v3242_v6 = vmul.f32 %v3010_v4, %v11285_v9  ;;  %v12715_v25 = vmov 5   ;;  %v12716_v14 = vmov 6  }
0x21a2   : > { %10779 = vrcp.f32 %v3244_v27  ;;  %v3246_v36 = vadd.f32 1e-06, %v3238_v56  ;;  %v3243_v18 = vmul.f32 %v3012_v61, %v11280_v63  ;;  %v3371_v33 = vperm.slane %v12717_v7, 1 }
0x21a3   : > { %10781 = vrcp.f32 %v3245_v21  ;;  %v3239_v26 = vadd.f32 %v3235_v34, %v3214_v44  ;;  %v3372_v15 = vperm.slane %v12718_v47, 1  ;;  %v3363_v5 = vperm.slane %v12717_v7, 0 }
0x21a4   : > { %10783 = vrcp.f32 %v3246_v36  ;;  %v3364_v51 = vperm.slane %v12718_v47, 0  ;;  %v3381_v27 = vperm.slane %v12717_v7, 2  ;;  %v3382_v21 = vperm.slane %v12718_v47, 2 }
0x21a5   : > { %v3247_v39 = vadd.f32 1e-06, %v3239_v26  ;;  %v3391_v29 = vperm.slane %v12717_v7, 3  ;;  %v3392_v38 = vperm.slane %v12718_v47, 3  ;;  %v3401_v28 = vperm.slane %v12717_v7, 4 }
0x21a6   : > { %v3402_v22 = vperm.slane %v12718_v47, 4  ;;  %v3411_v36 = vperm.slane %v12717_v7, 5 }
0x21a7   : > { %10785 = vrcp.f32 %v3247_v39 }
0x21a8   : > { %v10780_v46 = vpop.eup %10779 }
0x21a9   : > { %v10782_v24 = vpop.eup %10781  ;;  %v11500_v0 = vmul.f32 %v10780_v46, %v3240_v62  ;;  %v3412_v62 = vperm.slane %v12718_v47, 5 }
0x21aa   : > { %v11502_v17 = vmul.f32 %v10782_v24, %v3241_v60  ;;  %v10784_v31 = vpop.eup %10783 }
0x21ab   : > { %3303 = vxpose.xlu0.b32.start [1/4] (short) (narrow) %v11500_v0, 8  ;;  %v11512_v49 = vmul.f32 %v10784_v31, %v3242_v6  ;;  %v3421_v31 = vperm.slane %v12717_v7, 6  ;;  %v3432_v6 = vperm.slane %v12718_v47, 7 }
0x21ac   : > { %v3256_v8 = vpack.c.bf16 %v11502_v17, %v11500_v0 }
0x21ad   : > { %v10786_v59 = vpop.eup %10785 }
0x21ae   : > { %3258 = vxpose.xlu2.c.b16.start [1/2] (short) (narrow) %v3256_v8, 16  ;;  %v11509_v16 = vmul.f32 %v10786_v59, %v3243_v18  ;;  %v3422_v18 = vperm.slane %v12718_v47, 6  ;;  %v3431_v59 = vperm.slane %v12717_v7, 7 }
0x21b0   : > { %3350 = vmatpush.msra.mxu0 %v11509_v16  ;;  %v3257_v63 = vpack.c.bf16 %v11509_v16, %v11512_v49 }
0x21b2   : > { %3351 = vmatpush.msra.mxu0 %v11512_v49 }
0x21b3   : > { %3304 = vxpose.xlu0.b32.cont [2/4] (short) (narrow) %v11502_v17, 8 }
0x21b4   : > { %3352 = vmatpush.msra.mxu0 %v11502_v17 }
0x21b6   : > { %3353 = vmatpush.msra.mxu0 %v11500_v0 }
0x21bb   : > { %3305 = vxpose.xlu0.b32.cont [3/4] (short) (narrow) %v11512_v49, 8 }
0x21be   : > { %3259 = vxpose.xlu2.c.b16.end [2/2] (short) (narrow) %v3257_v63, 16 }
0x21c3   : > { %3306 = vxpose.xlu0.b32.end [4/4] (short) (narrow) %v11509_v16, 8 }
0x2220   : > { %10592 = vset.pattern.permute.xlu2 %v12709_v58 }
0x222a   : > { %10602 = vset.pattern.permute.xlu0 %v12703_v12 }
0x224f   : > { %v3266_v9 = vpop.trf.xlu2  ;;  %v3319_v30 = vpop.trf.xlu0 }
0x2250   : > { %10283 = vmatmul.msk.bf16.vlgmr.msrb.gmra.mxu2 %vm315_vm0, %v3266_v9  ;;  %10284 = vmatmul.msk.bf16.vlgmr.msrb.gmra.mxu3 %vm315_vm0, %v3266_v9 }
0x2251   : > { %10285 = vmatmul.msk.f32.vlgmr.msra.gmra.mxu0 %vm315_vm0, %v3319_v30 }
0x22ce   : > { %v3355_v37 = vpop.f32.mrf.mxu0 }
0x22cf   : > { %3360 = vperm.xlu1 %10585, %v3355_v37   ;;  %3428 = vperm.xlu2 %10592, %v3355_v37  }
0x22d3   : > { %v11527_v1 = vpop.f32.mrf.mxu2  ;;  %v11529_v54 = vpop.f32.mrf.mxu3 }
0x22d7   : > { %10586 = vset.pattern.permute.xlu1 %v12705_v48  ;;  %10599 = vset.pattern.permute.xlu2 %v12704_v57 }
0x22d8   : > { %3368 = vperm.xlu1 %10586, %v3355_v37   ;;  %4497 = vperm.xlu2 %10599, %v11502_v17  }
0x22db   : > { %v3288_v41 = vpop.f32.mrf.mxu2  ;;  %v3301_v3 = vpop.f32.mrf.mxu3 }
0x22e0   : > { %10587 = vset.pattern.permute.xlu1 %v12704_v57  ;;  %10601 = vset.pattern.permute.xlu2 %v12705_v48 }
0x22e1   : > { %3378 = vperm.xlu1 %10587, %v3355_v37   ;;  %4476 = vperm.xlu2 %10601, %v11512_v49  }
0x22e9   : > { %10588 = vset.pattern.permute.xlu1 %v12707_v53  ;;  %10604 = vset.pattern.permute.xlu2 %v12704_v57 }
0x22ea   : > { %3388 = vperm.xlu1 %10588, %v3355_v37   ;;  %4501 = vperm.xlu2 %10604, %v11512_v49  }
0x22f2   : > { %10589 = vset.pattern.permute.xlu1 %v12703_v12  ;;  %10606 = vset.pattern.permute.xlu2 %v12714_v40 }
0x22f3   : > { %3398 = vperm.xlu1 %10589, %v3355_v37   ;;  %4459 = vperm.xlu2 %10606, %v11509_v16  }
0x22fb   : > { %10590 = vset.pattern.permute.xlu1 %v12715_v25  ;;  %10608 = vset.pattern.permute.xlu2 %v12703_v12 }
0x22fc   : > { %3408 = vperm.xlu1 %10590, %v3355_v37   ;;  %4547 = vperm.xlu2 %10608, %v11502_v17  }
0x2304   : > { %10591 = vset.pattern.permute.xlu1 %v12716_v14  ;;  %10610 = vset.pattern.permute.xlu2 %v12716_v14 }
0x2305   : > { %3418 = vperm.xlu1 %10591, %v3355_v37   ;;  %4593 = vperm.xlu2 %10610, %v11500_v0  }
0x230d   : > { %10612 = vset.pattern.permute.xlu2 %v12715_v25  ;;  %10593 = vset.pattern.permute.xlu1 %v12714_v40 }
0x230e   : > { %4572 = vperm.xlu2 %10612, %v11502_v17  }
0x2316   : > { %10614 = vset.pattern.permute.xlu2 %v12707_v53 }
0x2317   : > { %4530 = vperm.xlu2 %10614, %v11509_v16  }
0x231f   : > { %10617 = vset.pattern.permute.xlu2 %v12703_v12 }
0x2320   : > { %4555 = vperm.xlu2 %10617, %v11509_v16  }
0x2328   : > { %10619 = vset.pattern.permute.xlu2 %v12716_v14 }
0x2329   : > { %4601 = vperm.xlu2 %10619, %v11512_v49   ;;  %v3429_v63 = vpop.permute.xlu2 %3428 }
0x2331   : > { %4605 = vperm.xlu2 %10619, %v11509_v16  }
0x2341   : > { %v3361_v10 = vpop.permute.xlu1 %3360 }
0x2342   : > { %v3365_v50 = vmul.f32 %v3363_v5, %v3361_v10  ;;  %v3366_v35 = vmul.f32 %v3364_v51, %v3361_v10  ;;  %v3433_v10 = vmul.f32 %v3431_v59, %v3429_v63  ;;  %v3437_v51 = vmul.f32 %v11527_v1, %v12717_v7 }
0x234a   : > { %v3369_v23 = vpop.permute.xlu1 %3368 }
0x234b   : > { %v3373_v32 = vmul.f32 %v3371_v33, %v3369_v23  ;;  %v3374_v55 = vmul.f32 %v3372_v15, %v3369_v23  ;;  %v3434_v23 = vmul.f32 %v3432_v6, %v3429_v63 }
0x234d   : > { %v3375_v52 = vadd.f32 %v3373_v32, %v3365_v50  ;;  %v3376_v45 = vadd.f32 %v3374_v55, %v3366_v35  ;;  %v3438_v55 = vmul.f32 %v11529_v54, %v12718_v47 }
0x2353   : > { %v3379_v2 = vpop.permute.xlu1 %3378 }
0x2354   : > { %v3383_v13 = vmul.f32 %v3381_v27, %v3379_v2  ;;  %v3384_v19 = vmul.f32 %v3382_v21, %v3379_v2 }
0x2356   : > { %v3385_v26 = vadd.f32 %v3383_v13, %v3375_v52  ;;  %v3386_v46 = vadd.f32 %v3384_v19, %v3376_v45 }
0x235c   : > { %v3389_v20 = vpop.permute.xlu1 %3388 }
0x235d   : > { %v3393_v44 = vmul.f32 %v3391_v29, %v3389_v20  ;;  %v3394_v34 = vmul.f32 %v3392_v38, %v3389_v20  ;;  %v12719_v38 = vmov 1.0  }
0x235f   : > { %v3395_v11 = vadd.f32 %v3393_v44, %v3385_v26  ;;  %v3396_v43 = vadd.f32 %v3394_v34, %v3386_v46 }
0x2365   : > { %v3399_v42 = vpop.permute.xlu1 %3398 }
0x2366   : > { %v3403_v60 = vmul.f32 %v3401_v28, %v3399_v42  ;;  %v3404_v24 = vmul.f32 %v3402_v22, %v3399_v42 }
0x2368   : > { %v3405_v8 = vadd.f32 %v3403_v60, %v3395_v11  ;;  %v3406_v4 = vadd.f32 %v3404_v24, %v3396_v43 }
0x236e   : > { %v3409_v56 = vpop.permute.xlu1 %3408 }
0x236f   : > { %v3413_v39 = vmul.f32 %v3411_v36, %v3409_v56  ;;  %v3414_v61 = vmul.f32 %v3412_v62, %v3409_v56 }
0x2371   : > { %v3415_v30 = vadd.f32 %v3413_v39, %v3405_v8  ;;  %v3416_v37 = vadd.f32 %v3414_v61, %v3406_v4 }
0x2377   : > { %v3419_v9 = vpop.permute.xlu1 %3418 }
0x2378   : > { %v3423_v41 = vmul.f32 %v3421_v31, %v3419_v9  ;;  %v3424_v3 = vmul.f32 %v3422_v18, %v3419_v9 }
0x237a   : > { %v3425_v2 = vadd.f32 %v3423_v41, %v3415_v30  ;;  %v3426_v20 = vadd.f32 %v3424_v3, %v3416_v37 }
0x237c   : > { %v3435_v42 = vadd.f32 %v3433_v10, %v3425_v2  ;;  %v3436_v33 = vadd.f32 %v3434_v23, %v3426_v20 }
0x237e   : > { %v3439_v15 = vadd.f32 1e-06, %v3435_v42  ;;  %v3440_v5 = vadd.f32 1e-06, %v3436_v33  ;;  %v12721_v33 = vld [vmem:[#allocation7_spill] sm:$0xff] }
0x2380   : > { %10787 = vrcp.f32 %v3439_v15 }
0x2381   : > { %10789 = vrcp.f32 %v3440_v5 }
0x2386   : > { %v10788_v32 = vpop.eup %10787 }
0x2387   : > { %v10790_v27 = vpop.eup %10789  ;;  %v11579_v21 = vmul.f32 %v10788_v32, %v3437_v51 }
0x2388   : > { %v11581_v29 = vmul.f32 %v10790_v27, %v3438_v55  ;;  %v12722_v55 = vld [vmem:[#allocation8_spill] sm:$0xff] }
0x2389   : > { %3460 = vmatpush.xpose.msrb.mxu1 %v11579_v21 }
0x238a   : > { %3480 = vmatpush.xpose.msra.mxu2 %v11581_v29 }
0x238c   : > { %3461 = vmatmul.f32.vlgmr.msrb.gmra.mxu1 %v11579_v21 }
0x238d   : > { %10288 = vmatpush.msk.msra.mxu1 %vm11135_vm15, %v12719_v38  ;;  %3481 = vmatmul.f32.vlgmr.msra.gmra.mxu2 %v11581_v29 }
0x2409   : > { %v3462_v1 = vpop.f32.mrf.mxu1 }
0x2410   : > { %v3482_v7 = vpop.f32.mrf.mxu2 }
0x2411   : > { %v3483_v54 = vadd.f32 %v3482_v7, %v3462_v1 }
0x2413   : > { %v3485_v47 = vmul.f32 %v3483_v54, %v3483_v54 }
0x2415   : > { %v3486_v35 = vsel %vm677_vm9, %v3485_v47, 0.0 }
0x2416   : > { %3487 = vadd.xlane.f32.xlu0 %v3486_v35 }
0x242a   : > { %4543 = vperm.xlu0 %10602, %v11500_v0  }
0x2432   : > { %4551 = vperm.xlu0 %10602, %v11512_v49  }
0x243a   : > { %10615 = vset.pattern.permute.xlu0 %v12716_v14 }
0x243b   : > { %4597 = vperm.xlu0 %10615, %v11502_v17  }
0x2443   : > { %10620 = vset.pattern.permute.xlu0 %v12715_v25 }
0x2444   : > { %4580 = vperm.xlu0 %10620, %v11509_v16  }
0x2489   : > { %v3488_v13 = vpop.xlane.xlu0 %3487 }
0x248a   : > { %v3489_v19 = vrot.slane %v3488_v13, 4 }
0x248c   : > { %v3490_v56 = vadd.f32 %v3489_v19, %v3488_v13 }
0x248e   : > { %v3491_v28 = vrot.slane %v3490_v56, 2 }
0x2490   : > { %v3492_v22 = vadd.f32 %v3491_v28, %v3490_v56 }
0x2492   : > { %v3493_v52 = vrot.slane %v3492_v22, 1 }
0x2494   : > { %v3494_v45 = vadd.f32 %v3493_v52, %v3492_v22 }
0x2496   : > { %10791 = vrsqrt.f32 %v3494_v45  ;;  %vm3502_vm13 = vcmp.eq.f32.partialorder %v3494_v45, inf  ;;  %v3505_v24 = vand.u32 2147483648, %v3494_v45  ;;  %vm3504_vm14 = vcmp.eq.f32.partialorder %v3494_v45, 0.0 }
0x249c   : > { %v10792_v44 = vpop.eup %10791 }
0x249d   : > { %v3496_v34 = vmul.f32 %v10792_v44, %v3494_v45 }
0x249f   : > { %v3497_v36 = vmul.f32 %v10792_v44, %v3496_v34 }
0x24a1   : > { %v3498_v62 = vmul.f32 0.5, %v3497_v36 }
0x24a3   : > { %v3499_v26 = vsub.f32 1.5, %v3498_v62 }
0x24a5   : > { %v3500_v46 = vmul.f32 %v10792_v44, %v3499_v26 }
0x24a7   : > { %v3501_v60 = vmul.f32 %v3500_v46, %v3494_v45 }
0x24a9   : > { %v3503_v11 = vsel %vm3502_vm13, %v3494_v45, %v3501_v60 }
0x24aa   : > { %v3506_v43 = vsel %vm3504_vm14, %v3505_v24, %v3503_v11 }
0x24ab   : > { %v3507_v39 = vadd.f32 1e-30, %v3506_v43 }
0x24ad   : > { %10793 = vrcp.f32 %v3507_v39  ;;  %v3519_v59 = vand.u32 2147483648, %v3507_v39  ;;  %v3517_v9 = vand.u32 2147483647, %v3507_v39  ;;  %vm3513_vm2 = vweird.f32 %v3507_v39 }
0x24ae   : > { %10795 = vrsqrt.f32 %v3507_v39  ;;  %vm4356_vm5 = vcmp.eq.f32.partialorder %v3507_v39, inf  ;;  %vm4358_vm6 = vcmp.eq.f32.partialorder %v3507_v39, 0.0 }
0x24af   : > { %v3520_v41 = vor.u32 1.1754944e-38, %v3519_v59  ;;  %vm3518_vm4 = vcmp.eq.f32.partialorder %v3517_v9, 8.507059e+37 }
0x24b3   : > { %v10794_v61 = vpop.eup %10793 }
0x24b4   : > { %v10796_v8 = vpop.eup %10795  ;;  %v3509_v4 = vmul.f32 %v10794_v61, %v3507_v39  ;;  %vm3514_vm1 = vweird.f32 %v10794_v61 }
0x24b5   : > { %v4350_v31 = vmul.f32 %v10796_v8, %v3507_v39  ;;  %vm3515_vm3 = vmor %vm3513_vm2, %vm3514_vm1 }
0x24b6   : > { %v3510_v18 = vsub.f32 1.0, %v3509_v4 }
0x24b7   : > { %v4351_v6 = vmul.f32 %v10796_v8, %v4350_v31 }
0x24b8   : > { %v3511_v63 = vmul.f32 %v10794_v61, %v3510_v18 }
0x24b9   : > { %v4352_v30 = vmul.f32 0.5, %v4351_v6 }
0x24ba   : > { %v3512_v37 = vadd.f32 %v10794_v61, %v3511_v63 }
0x24bb   : > { %v4353_v3 = vsub.f32 1.5, %v4352_v30 }
0x24bc   : > { %v3516_v10 = vsel %vm3515_vm3, %v10794_v61, %v3512_v37 }
0x24bd   : > { %v3521_v23 = vsel %vm3518_vm4, %v3520_v41, %v3516_v10  ;;  %v4354_v2 = vmul.f32 %v10796_v8, %v4353_v3 }
0x24be   : > { %v3522_v20 = vmul.f32 %v3521_v23, %v3483_v54 }
0x24bf   : > { %v4355_v42 = vmul.f32 %v4354_v2, %v3507_v39 }
0x24c0   : > { %3538 = vmatpush.msra.mxu3 %v3522_v20 }
0x24c1   : > { %10286 = vmatmul.msk.f32.vlgmr.msra.gmra.mxu3 %vm677_vm9, %v12721_v33  ;;  %v4357_v15 = vsel %vm4356_vm5, %v3507_v39, %v4355_v42 }
0x24c2   : > { %v11599_v5 = vsel %vm4358_vm6, %v3519_v59, %v4357_v15 }
0x2544   : > { %v3540_v51 = vpop.f32.mrf.mxu3 }
0x2545   : > { %v3543_v32 = vmul.f32 0.5, %v3540_v51 }
0x2547   : > { %v3544_v27 = vsub.f32 %v12722_v55, %v3543_v32 }
0x2549   : > { %3563 = vmatpush.msrb.mxu0 %v3544_v27  ;;  %10289 = vmatmul.msk.f32.vlgmr.msra.gmra.mxu1 %vm677_vm9, %v3544_v27 }
0x254a   : > { %10287 = vmatmul.msk.f32.vlgmr.msrb.gmra.mxu0 %vm677_vm9, %v3522_v20 }
0x25c6   : > { %v3588_v1 = vpop.f32.mrf.mxu1 }
0x25c7   : > { %v3565_v7 = vpop.f32.mrf.mxu0  ;;  %3657 = vmatpush.msra.mxu0 %v3588_v1 }
0x25c8   : > { %3609 = vmatpush.msrb.mxu2 %v3565_v7 }
0x25c9   : > { %10290 = vmatmul.msk.f32.vlgmr.msrb.gmra.mxu2 %vm677_vm9, %v3588_v1 }
0x264c   : > { %v3611_v54 = vpop.f32.mrf.mxu2 }
0x264d   : > { %v3614_v47 = vmul.f32 0.5, %v3611_v54 }
0x264f   : > { %v3615_v35 = vsub.f32 %v12722_v55, %v3614_v47 }
0x2651   : > { %3634 = vmatpush.msrb.mxu3 %v3615_v35  ;;  %10292 = vmatmul.msk.f32.vlgmr.msra.gmra.mxu0 %vm677_vm9, %v3615_v35 }
0x2652   : > { %10291 = vmatmul.msk.f32.vlgmr.msrb.gmra.mxu3 %vm677_vm9, %v3565_v7 }
0x26ce   : > { %v3659_v13 = vpop.f32.mrf.mxu0 }
0x26cf   : > { %3728 = vmatpush.msra.mxu3 %v3659_v13 }
0x26d5   : > { %v3636_v19 = vpop.f32.mrf.mxu3 }
0x26d6   : > { %3680 = vmatpush.msrb.mxu1 %v3636_v19 }
0x26d7   : > { %10293 = vmatmul.msk.f32.vlgmr.msrb.gmra.mxu1 %vm677_vm9, %v3659_v13 }
0x2754   : > { %v3682_v56 = vpop.f32.mrf.mxu1 }
0x2755   : > { %v3685_v28 = vmul.f32 0.5, %v3682_v56 }
0x2757   : > { %v3686_v22 = vsub.f32 %v12722_v55, %v3685_v28 }
0x2759   : > { %3705 = vmatpush.msra.mxu2 %v3686_v22  ;;  %10295 = vmatmul.msk.f32.vlgmr.msra.gmra.mxu3 %vm677_vm9, %v3686_v22 }
0x275a   : > { %10294 = vmatmul.msk.f32.vlgmr.msra.gmra.mxu2 %vm677_vm9, %v3636_v19 }
0x27dc   : > { %v3730_v52 = vpop.f32.mrf.mxu3 }
0x27dd   : > { %v3707_v45 = vpop.f32.mrf.mxu2  ;;  %3799 = vmatpush.msrb.mxu2 %v3730_v52 }
0x27de   : > { %3751 = vmatpush.msrb.mxu0 %v3707_v45 }
0x27df   : > { %10296 = vmatmul.msk.f32.vlgmr.msrb.gmra.mxu0 %vm677_vm9, %v3730_v52 }
0x285c   : > { %v3753_v44 = vpop.f32.mrf.mxu0 }
0x285d   : > { %v3756_v34 = vmul.f32 0.5, %v3753_v44 }
0x285f   : > { %v3757_v36 = vsub.f32 %v12722_v55, %v3756_v34 }
0x2861   : > { %3776 = vmatpush.msra.mxu1 %v3757_v36  ;;  %10298 = vmatmul.msk.f32.vlgmr.msrb.gmra.mxu2 %vm677_vm9, %v3757_v36 }
0x2862   : > { %10297 = vmatmul.msk.f32.vlgmr.msra.gmra.mxu1 %vm677_vm9, %v3707_v45 }
0x28df   : > { %v3778_v62 = vpop.f32.mrf.mxu1 }
0x28e0   : > { %3822 = vmatpush.msrb.mxu3 %v3778_v62 }
0x28e4   : > { %v3801_v26 = vpop.f32.mrf.mxu2 }
0x28e5   : > { %10299 = vmatmul.msk.f32.vlgmr.msrb.gmra.mxu3 %vm677_vm9, %v3801_v26  ;;  %3870 = vmatpush.msrb.mxu1 %v3801_v26 }
0x2968   : > { %v3824_v46 = vpop.f32.mrf.mxu3 }
0x2969   : > { %v3827_v60 = vmul.f32 0.5, %v3824_v46 }
0x296b   : > { %v3828_v24 = vsub.f32 %v12722_v55, %v3827_v60 }
0x296d   : > { %3847 = vmatpush.msra.mxu0 %v3828_v24  ;;  %10301 = vmatmul.msk.f32.vlgmr.msrb.gmra.mxu1 %vm677_vm9, %v3828_v24 }
0x296e   : > { %10300 = vmatmul.msk.f32.vlgmr.msra.gmra.mxu0 %vm677_vm9, %v3778_v62 }
0x29ea   : > { %v3872_v11 = vpop.f32.mrf.mxu1 }
0x29eb   : > { %v3849_v43 = vpop.f32.mrf.mxu0  ;;  %3941 = vmatpush.msrb.mxu0 %v3872_v11 }
0x29ec   : > { %3893 = vmatpush.msra.mxu2 %v3849_v43 }
0x29ed   : > { %10302 = vmatmul.msk.f32.vlgmr.msra.gmra.mxu2 %vm677_vm9, %v3872_v11 }
0x2a70   : > { %v3895_v39 = vpop.f32.mrf.mxu2 }
0x2a71   : > { %v3898_v61 = vmul.f32 0.5, %v3895_v39 }
0x2a73   : > { %v3899_v8 = vsub.f32 %v12722_v55, %v3898_v61 }
0x2a75   : > { %3918 = vmatpush.msra.mxu3 %v3899_v8  ;;  %10304 = vmatmul.msk.f32.vlgmr.msrb.gmra.mxu0 %vm677_vm9, %v3899_v8 }
0x2a76   : > { %10303 = vmatmul.msk.f32.vlgmr.msra.gmra.mxu3 %vm677_vm9, %v3849_v43 }
0x2af2   : > { %v3943_v4 = vpop.f32.mrf.mxu0 }
0x2af3   : > { %4012 = vmatpush.msrb.mxu3 %v3943_v4 }
0x2af9   : > { %v3920_v31 = vpop.f32.mrf.mxu3 }
0x2afa   : > { %3964 = vmatpush.msra.mxu1 %v3920_v31 }
0x2afb   : > { %10305 = vmatmul.msk.f32.vlgmr.msra.gmra.mxu1 %vm677_vm9, %v3943_v4 }
0x2b78   : > { %v3966_v18 = vpop.f32.mrf.mxu1 }
0x2b79   : > { %v3969_v59 = vmul.f32 0.5, %v3966_v18  ;;  %v12726_v18 = vld [vmem:[#allocation4_spill] sm:$0xff] }
0x2b7b   : > { %v3970_v6 = vsub.f32 %v12722_v55, %v3969_v59  ;;  %v12727_v59 = vld [vmem:[#allocation3_spill] sm:$0xff] }
0x2b7d   : > { %3989 = vmatpush.msrb.mxu2 %v3970_v6  ;;  %10307 = vmatmul.msk.f32.vlgmr.msrb.gmra.mxu3 %vm677_vm9, %v3970_v6  ;;  %v12728_v6 = vld [vmem:[#allocation5_spill] sm:$0xff] }
0x2b7e   : > { %10306 = vmatmul.msk.f32.vlgmr.msrb.gmra.mxu2 %vm677_vm9, %v3920_v31 }
0x2c00   : > { %v4014_v63 = vpop.f32.mrf.mxu3 }
0x2c01   : > { %v3991_v9 = vpop.f32.mrf.mxu2  ;;  %4083 = vmatpush.msra.mxu2 %v4014_v63 }
0x2c02   : > { %4035 = vmatpush.msra.mxu0 %v3991_v9 }
0x2c03   : > { %10308 = vmatmul.msk.f32.vlgmr.msra.gmra.mxu0 %vm677_vm9, %v4014_v63 }
0x2c80   : > { %v4037_v30 = vpop.f32.mrf.mxu0 }
0x2c81   : > { %v4040_v37 = vmul.f32 0.5, %v4037_v30 }
0x2c83   : > { %v4041_v41 = vsub.f32 %v12722_v55, %v4040_v37 }
0x2c85   : > { %4060 = vmatpush.msrb.mxu1 %v4041_v41  ;;  %10310 = vmatmul.msk.f32.vlgmr.msra.gmra.mxu2 %vm677_vm9, %v4041_v41  ;;  %v4498_v41 = vpop.permute.xlu2 %4497 }
0x2c86   : > { %10309 = vmatmul.msk.f32.vlgmr.msrb.gmra.mxu1 %vm677_vm9, %v3991_v9 }
0x2d03   : > { %v4062_v3 = vpop.f32.mrf.mxu1 }
0x2d04   : > { %4106 = vmatpush.msra.mxu3 %v4062_v3 }
0x2d08   : > { %v4085_v10 = vpop.f32.mrf.mxu2 }
0x2d09   : > { %10311 = vmatmul.msk.f32.vlgmr.msra.gmra.mxu3 %vm677_vm9, %v4085_v10  ;;  %4154 = vmatpush.msra.mxu1 %v4085_v10  ;;  %v4477_v10 = vpop.permute.xlu2 %4476 }
0x2d8c   : > { %v4108_v23 = vpop.f32.mrf.mxu3 }
0x2d8d   : > { %v4111_v2 = vmul.f32 0.5, %v4108_v23 }
0x2d8f   : > { %v4112_v20 = vsub.f32 %v12722_v55, %v4111_v2  ;;  %v11700_v2 = vpop.permute.xlu2 %4501 }
0x2d91   : > { %4131 = vmatpush.msrb.mxu0 %v4112_v20  ;;  %10313 = vmatmul.msk.f32.vlgmr.msra.gmra.mxu1 %vm677_vm9, %v4112_v20 }
0x2d92   : > { %10312 = vmatmul.msk.f32.vlgmr.msrb.gmra.mxu0 %vm677_vm9, %v4062_v3 }
0x2e0e   : > { %v4156_v42 = vpop.f32.mrf.mxu1 }
0x2e0f   : > { %v4133_v15 = vpop.f32.mrf.mxu0  ;;  %4225 = vmatpush.msra.mxu0 %v4156_v42 }
0x2e10   : > { %4177 = vmatpush.msrb.mxu2 %v4133_v15 }
0x2e11   : > { %10314 = vmatmul.msk.f32.vlgmr.msrb.gmra.mxu2 %vm677_vm9, %v4156_v42  ;;  %v4460_v42 = vpop.permute.xlu2 %4459 }
0x2e94   : > { %v4179_v51 = vpop.f32.mrf.mxu2 }
0x2e95   : > { %v4182_v32 = vmul.f32 0.5, %v4179_v51  ;;  %v11702_v51 = vpop.permute.xlu2 %4547 }
0x2e97   : > { %v4183_v27 = vsub.f32 %v12722_v55, %v4182_v32 }
0x2e99   : > { %4202 = vmatpush.msrb.mxu3 %v4183_v27  ;;  %10316 = vmatmul.msk.f32.vlgmr.msra.gmra.mxu0 %vm677_vm9, %v4183_v27 }
0x2e9a   : > { %10315 = vmatmul.msk.f32.vlgmr.msrb.gmra.mxu3 %vm677_vm9, %v4133_v15 }
0x2e9d   : > { %v4594_v27 = vpop.permute.xlu2 %4593 }
0x2f16   : > { %v4227_v1 = vpop.f32.mrf.mxu0 }
0x2f17   : > { %4296 = vmatpush.msra.mxu3 %v4227_v1 }
0x2f1d   : > { %v4204_v7 = vpop.f32.mrf.mxu3 }
0x2f1e   : > { %4248 = vmatpush.msrb.mxu1 %v4204_v7 }
0x2f1f   : > { %10317 = vmatmul.msk.f32.vlgmr.msrb.gmra.mxu1 %vm677_vm9, %v4227_v1 }
0x2f9c   : > { %v4250_v54 = vpop.f32.mrf.mxu1 }
0x2f9d   : > { %v4253_v47 = vmul.f32 0.5, %v4250_v54 }
0x2f9f   : > { %v4254_v35 = vsub.f32 %v12722_v55, %v4253_v47  ;;  %v4544_v47 = vpop.permute.xlu0 %4543 }
0x2fa1   : > { %4273 = vmatpush.msra.mxu2 %v4254_v35  ;;  %10319 = vmatmul.msk.f32.vlgmr.msra.gmra.mxu3 %vm677_vm9, %v4254_v35 }
0x2fa2   : > { %10318 = vmatmul.msk.f32.vlgmr.msra.gmra.mxu2 %vm677_vm9, %v4204_v7  ;;  %v11706_v7 = vpop.permute.xlu2 %4572 }
0x2faa   : > { %v4531_v35 = vpop.permute.xlu2 %4530 }
0x3024   : > { %v4298_v19 = vpop.f32.mrf.mxu3 }
0x3025   : > { %v4275_v13 = vpop.f32.mrf.mxu2 }
0x3026   : > { %4319 = vmatpush.msrb.mxu0 %v4275_v13 }
0x3027   : > { %10320 = vmatmul.msk.f32.vlgmr.msrb.gmra.mxu0 %vm677_vm9, %v4298_v19  ;;  %v11712_v19 = vpop.permute.xlu0 %4551 }
0x30a4   : > { %v4321_v56 = vpop.f32.mrf.mxu0 }
0x30a5   : > { %v4324_v28 = vmul.f32 0.5, %v4321_v56  ;;  %v4556_v56 = vpop.permute.xlu2 %4555 }
0x30a7   : > { %v4325_v22 = vsub.f32 %v12722_v55, %v4324_v28 }
0x30a9   : > { %4344 = vmatpush.msra.mxu1 %v4325_v22 }
0x30aa   : > { %10321 = vmatmul.msk.f32.vlgmr.msra.gmra.mxu1 %vm677_vm9, %v4275_v13 }
0x3127   : > { %v4346_v52 = vpop.f32.mrf.mxu1 }
0x3128   : > { %v4361_v45 = vmul.f32 %v12721_v33, %v4346_v52 }
0x312a   : > { %v4362_v44 = vsel %vm677_vm9, %v4361_v45, 0.0 }
0x312b   : > { %4363 = vadd.xlane.f32.xlu1 %v4362_v44 }
0x3144   : > { %4444 = vperm.xlu1 %10593, %v11500_v0  }
0x314c   : > { %10594 = vset.pattern.permute.xlu1 %v12705_v48 }
0x314d   : > { %4468 = vperm.xlu1 %10594, %v11500_v0  }
0x3155   : > { %10595 = vset.pattern.permute.xlu1 %v12704_v57 }
0x3156   : > { %4493 = vperm.xlu1 %10595, %v11500_v0  }
0x315e   : > { %10596 = vset.pattern.permute.xlu1 %v12714_v40 }
0x315f   : > { %4449 = vperm.xlu1 %10596, %v11502_v17  }
0x3167   : > { %10597 = vset.pattern.permute.xlu1 %v12705_v48 }
0x3168   : > { %4472 = vperm.xlu1 %10597, %v11502_v17  }
0x3170   : > { %10598 = vset.pattern.permute.xlu1 %v12707_v53 }
0x3171   : > { %4518 = vperm.xlu1 %10598, %v11500_v0  }
0x3179   : > { %10600 = vset.pattern.permute.xlu1 %v12714_v40 }
0x317a   : > { %4454 = vperm.xlu1 %10600, %v11512_v49  }
0x3182   : > { %10603 = vset.pattern.permute.xlu1 %v12707_v53 }
0x3183   : > { %4522 = vperm.xlu1 %10603, %v11502_v17  }
0x318b   : > { %10605 = vset.pattern.permute.xlu1 %v12715_v25 }
0x318c   : > { %4568 = vperm.xlu1 %10605, %v11500_v0  }
0x3194   : > { %10607 = vset.pattern.permute.xlu1 %v12705_v48 }
0x3195   : > { %4480 = vperm.xlu1 %10607, %v11509_v16  }
0x319d   : > { %10609 = vset.pattern.permute.xlu1 %v12707_v53 }
0x319e   : > { %4526 = vperm.xlu1 %10609, %v11512_v49   ;;  %v4364_v34 = vpop.xlane.xlu1 %4363 }
0x319f   : > { %v4365_v36 = vrot.slane %v4364_v34, 4 }
0x31a1   : > { %v4366_v62 = vadd.f32 %v4365_v36, %v4364_v34 }
0x31a3   : > { %v4367_v26 = vrot.slane %v4366_v62, 2 }
0x31a5   : > { %v4368_v46 = vadd.f32 %v4367_v26, %v4366_v62  ;;  %v11718_v26 = vpop.permute.xlu0 %4597 }
0x31a6   : > { %10611 = vset.pattern.permute.xlu1 %v12704_v57 }
0x31a7   : > { %v4369_v60 = vrot.slane %v4368_v46, 1  ;;  %4505 = vperm.xlu1 %10611, %v11509_v16  }
0x31a9   : > { %v4370_v24 = vadd.f32 %v4369_v60, %v4368_v46 }
0x31ab   : > { %v4371_v11 = vmul.f32 %v4370_v24, %v11599_v5 }
0x31ad   : > { %v4372_v43 = vadd.f32 1e-06, %v4371_v11 }
0x31af   : > { %10797 = vrcp.f32 %v4372_v43  ;;  %10613 = vset.pattern.permute.xlu1 %v12709_v58  ;;  %v11722_v43 = vpop.permute.xlu2 %4601 }
0x31b0   : > { %4618 = vperm.xlu1 %10613, %v11500_v0  }
0x31b5   : > { %v10798_v39 = vpop.eup %10797 }
0x31b6   : > { %v11676_v61 = vmul.f32 %v10798_v39, %v11579_v21  ;;  %v11679_v8 = vmul.f32 %v10798_v39, %v11581_v29  ;;  %v4445_v4 = vpop.permute.xlu1 %4444  ;;  %v12725_v21 = vld [vmem:[#allocation2_spill] sm:$0xff] }
0x31b8   : > { %12723 = vst [vmem:[#allocation9_spill] sm:$0xff] %v11676_v61  ;;  %10616 = vset.pattern.permute.xlu1 %v12715_v25  ;;  %v4376_v31 = vpack.c.bf16 %v11676_v61, %v11676_v61  ;;  %v4377_v5 = vpack.c.bf16 %v11679_v8, %v11679_v8 }
0x31b9   : > { %12724 = vst [vmem:[#allocation10_spill] sm:$0xff] %v11679_v8  ;;  %4576 = vperm.xlu1 %10616, %v11512_v49  }
0x31ba   : > { %4385 = vmatpush.bf16.xpose.msrb.mxu2 %v4376_v31  ;;  %4404 = vmatpush.bf16.xpose.msrb.mxu3 %v4377_v5 }
0x31bb   : > { %4423 = vmatpush.bf16.xpose.msra.mxu0 %v4376_v31  ;;  %4436 = vmatpush.bf16.xpose.msrb.mxu1 %v4377_v5 }
0x31bf   : > { %v4469_v29 = vpop.permute.xlu1 %4468 }
0x31c1   : > { %10618 = vset.pattern.permute.xlu1 %v12709_v58  ;;  %4386 = vmatmul.bf16.vlgmr.msrb.gmra.mxu2 %v12727_v59 }
0x31c2   : > { %4405 = vmatmul.bf16.vlgmr.msrb.gmra.mxu3 %v12728_v6  ;;  %4424 = vmatmul.bf16.vlgmr.msra.gmra.mxu0 %v4376_v31 }
0x31c3   : > { %4685 = vmatpush.bf16.msrb.mxu0 %v12725_v21  ;;  %4698 = vmatpush.bf16.msra.mxu1 %v12726_v18 }
0x31c4   : > { %4437 = vmatmul.bf16.vlgmr.msrb.gmra.mxu1 %v4377_v5  ;;  %4622 = vperm.xlu1 %10618, %v11502_v17  }
0x31c7   : > { %4686 = vmatpush.bf16.msrb.mxu0 %v12727_v59  ;;  %4699 = vmatpush.bf16.msra.mxu1 %v12728_v6 }
0x31c8   : > { %v4494_v63 = vpop.permute.xlu1 %4493 }
0x31cc   : > { %4626 = vperm.xlu1 %10618, %v11512_v49  }
0x31d1   : > { %4391 = vmatmul.bf16.gmra.mxu2 %v12725_v21  ;;  %v4450_v9 = vpop.permute.xlu1 %4449 }
0x31d2   : > { %4410 = vmatmul.bf16.gmra.mxu3 %v12726_v18 }
0x31d4   : > { %4630 = vperm.xlu1 %10618, %v11509_v16  }
0x31da   : > { %v4473_v30 = vpop.permute.xlu1 %4472 }
0x31dc   : > { %10621 = vset.pattern.permute.xlu1 %v12714_v40 }
0x31e3   : > { %v4519_v37 = vpop.permute.xlu1 %4518 }
0x31ec   : > { %v4455_v3 = vpop.permute.xlu1 %4454 }
0x31f5   : > { %v4523_v23 = vpop.permute.xlu1 %4522 }
0x31fe   : > { %v4569_v20 = vpop.permute.xlu1 %4568 }
0x3207   : > { %v4481_v15 = vpop.permute.xlu1 %4480 }
0x3210   : > { %v11704_v32 = vpop.permute.xlu1 %4526 }
0x3219   : > { %v4506_v1 = vpop.permute.xlu1 %4505 }
0x3222   : > { %v11708_v54 = vpop.permute.xlu1 %4618 }
0x322b   : > { %v11710_v13 = vpop.permute.xlu1 %4576 }
0x3236   : > { %v11714_v28 = vpop.permute.xlu1 %4622 }
0x323e   : > { %v11724_v39 = vpop.permute.xlu1 %4626 }
0x323f   : > { %v4425_v22 = vpop.f32.mrf.mxu0 }
0x3241   : > { %v4438_v52 = vpop.f32.mrf.mxu1 }
0x3242   : > { %v4439_v45 = vadd.f32 %v4438_v52, %v4425_v22 }
0x3244   : > { %v4462_v44 = vperm.slane %v4439_v45, 0  ;;  %v4483_v34 = vperm.slane %v4439_v45, 1  ;;  %v4508_v36 = vperm.slane %v4439_v45, 2  ;;  %v11716_v62 = vpop.f32.mrf.mxu2  ;;  %v4533_v11 = vperm.slane %v4439_v45, 3 }
0x3245   : > { %v11720_v46 = vpop.f32.mrf.mxu3  ;;  %v4558_v6 = vperm.slane %v4439_v45, 4  ;;  %v4583_v33 = vperm.slane %v4439_v45, 5  ;;  %v4608_v40 = vperm.slane %v4439_v45, 6  ;;  %v4633_v58 = vperm.slane %v4439_v45, 7 }
0x3246   : > { %v4463_v60 = vmul.f32 %v4462_v44, %v4445_v4  ;;  %v4484_v24 = vmul.f32 %v4483_v34, %v4469_v29  ;;  %v4509_v5 = vmul.f32 %v4508_v36, %v4494_v63  ;;  %v4487_v22 = vmul.f32 %v4483_v34, %v4481_v15 }
0x3247   : > { %v4427_v52 = vpop.f32.mrf.mxu0  ;;  %v4466_v59 = vmul.f32 %v4462_v44, %v4460_v42  ;;  %v4534_v55 = vmul.f32 %v4533_v11, %v4519_v37  ;;  %v4512_v50 = vmul.f32 %v4508_v36, %v4506_v1  ;;  %v4464_v8 = vmul.f32 %v4462_v44, %v4450_v9  ;;  %v4581_v9 = vpop.permute.xlu0 %4580 }
0x3248   : > { %v4488_v31 = vadd.f32 %v4484_v24, %v4463_v60  ;;  %v4485_v4 = vmul.f32 %v4483_v34, %v4473_v30  ;;  %v4559_v61 = vmul.f32 %v4558_v6, %v4544_v47  ;;  %v4537_v25 = vmul.f32 %v4533_v11, %v4531_v35 }
0x3249   : > { %v4440_v18 = vpop.f32.mrf.mxu1  ;;  %v4491_v38 = vadd.f32 %v4487_v22, %v4466_v59  ;;  %v4510_v24 = vmul.f32 %v4508_v36, %v4498_v41  ;;  %v4584_v52 = vmul.f32 %v4583_v33, %v4569_v20  ;;  %v4535_v59 = vmul.f32 %v4533_v11, %v4523_v23 }
0x324a   : > { %v4513_v21 = vadd.f32 %v4509_v5, %v4488_v31  ;;  %v4489_v63 = vadd.f32 %v4485_v4, %v4464_v8  ;;  %v4465_v18 = vmul.f32 %v4462_v44, %v4455_v3  ;;  %v4486_v31 = vmul.f32 %v4483_v34, %v4477_v10  ;;  %v4631_v10 = vpop.permute.xlu1 %4630 }
0x324b   : > { %v4516_v53 = vadd.f32 %v4512_v50, %v4491_v38  ;;  %v4562_v5 = vmul.f32 %v4558_v6, %v4556_v56  ;;  %v4511_v47 = vmul.f32 %v4508_v36, %v11700_v2  ;;  %v4587_v50 = vmul.f32 %v4583_v33, %v4581_v9 }
0x324c   : > { %v4538_v29 = vadd.f32 %v4534_v55, %v4513_v21  ;;  %v4389_v60 = vpop.f32.mrf.mxu2  ;;  %v4514_v1 = vadd.f32 %v4510_v24, %v4489_v63  ;;  %v4609_v55 = vmul.f32 %v4608_v40, %v4594_v27  ;;  %v4490_v21 = vadd.f32 %v4486_v31, %v4465_v18 }
0x324d   : > { %v4408_v42 = vpop.f32.mrf.mxu3  ;;  %v4541_v37 = vadd.f32 %v4537_v25, %v4516_v53  ;;  %v4560_v8 = vmul.f32 %v4558_v6, %v11702_v51  ;;  %v4634_v3 = vmul.f32 %v4633_v58, %v11708_v54  ;;  %v4536_v25 = vmul.f32 %v4533_v11, %v11704_v32 }
0x324e   : > { %v4563_v15 = vadd.f32 %v4559_v61, %v4538_v29  ;;  %v4539_v35 = vadd.f32 %v4535_v59, %v4514_v1  ;;  %v4606_v61 = vpop.permute.xlu2 %4605  ;;  %v4515_v53 = vadd.f32 %v4511_v47, %v4490_v21  ;;  %v4585_v27 = vmul.f32 %v4583_v33, %v11706_v7 }
0x324f   : > { %v4566_v38 = vadd.f32 %v4562_v5, %v4541_v37  ;;  %v4612_v20 = vmul.f32 %v4608_v40, %v4606_v61  ;;  %v4561_v44 = vmul.f32 %v4558_v6, %v11712_v19  ;;  %v4637_v36 = vmul.f32 %v4633_v58, %v4631_v10 }
0x3250   : > { %v4588_v30 = vadd.f32 %v4584_v52, %v4563_v15  ;;  %v4564_v56 = vadd.f32 %v4560_v8, %v4539_v35  ;;  %v4540_v2 = vadd.f32 %v4536_v25, %v4515_v53  ;;  %v4610_v22 = vmul.f32 %v4608_v40, %v11718_v26 }
0x3251   : > { %v4591_v23 = vadd.f32 %v4587_v50, %v4566_v38  ;;  %v4586_v32 = vmul.f32 %v4583_v33, %v11710_v13  ;;  %v4635_v15 = vmul.f32 %v4633_v58, %v11714_v28  ;;  %v4611_v52 = vmul.f32 %v4608_v40, %v11722_v43 }
0x3252   : > { %v4613_v41 = vadd.f32 %v4609_v55, %v4588_v30  ;;  %v4589_v51 = vadd.f32 %v4585_v27, %v4564_v56  ;;  %v4565_v63 = vadd.f32 %v4561_v44, %v4540_v2  ;;  %v4407_v6 = vadd.f32 %v11720_v46, %v11716_v62  ;;  %v12734_v44 = vld [vmem:[#allocation10_spill] sm:$0xff] }
0x3253   : > { %v4616_v34 = vadd.f32 %v4612_v20, %v4591_v23  ;;  %v4636_v31 = vmul.f32 %v4633_v58, %v11724_v39  ;;  %v4409_v1 = vadd.f32 %v4408_v42, %v4389_v60  ;;  %v12729_v50 = vmov 5  }
0x3254   : > { %v4638_v45 = vadd.f32 %v4634_v3, %v4613_v41  ;;  %v4392_v4 = vpop.f32.mrf.mxu2  ;;  %v4614_v24 = vadd.f32 %v4610_v22, %v4589_v51  ;;  %v4590_v7 = vadd.f32 %v4586_v32, %v4565_v63  ;;  %v4642_v33 = vmul.f32 %v4407_v6, %v11500_v0 }
0x3255   : > { %v4411_v29 = vpop.f32.mrf.mxu3  ;;  %v4641_v11 = vadd.f32 %v4637_v36, %v4616_v34  ;;  %v4643_v39 = vmul.f32 %v4409_v1, %v11502_v17  ;;  %v12730_v61 = vmov 3   ;;  %v12731_v10 = vmov 7  }
0x3256   : > { %v4646_v54 = vadd.f32 1e-06, %v4638_v45  ;;  %v4639_v18 = vadd.f32 %v4635_v15, %v4614_v24  ;;  %v4615_v26 = vadd.f32 %v4611_v52, %v4590_v7  ;;  %v4412_v62 = vadd.f32 %v4411_v29, %v4392_v4  ;;  %v12733_v45 = vld [vmem:[#allocation9_spill] sm:$0xff] }
0x3257   : > { %v4649_v19 = vadd.f32 1e-06, %v4641_v11  ;;  %v12732_v53 = vmov 0   ;;  %v4773_v2 = vperm.slane %v12733_v45, 1  ;;  %v4774_v34 = vperm.slane %v12734_v44, 1 }
0x3258   : > { %10799 = vrcp.f32 %v4646_v54  ;;  %v4647_v37 = vadd.f32 1e-06, %v4639_v18  ;;  %v4640_v5 = vadd.f32 %v4636_v31, %v4615_v26  ;;  %v4644_v60 = vmul.f32 %v4412_v62, %v11512_v49 }
0x3259   : > { %10801 = vrcp.f32 %v4649_v19  ;;  %v4765_v36 = vperm.slane %v12733_v45, 0  ;;  %v4766_v51 = vperm.slane %v12734_v44, 0  ;;  %v4783_v54 = vperm.slane %v12733_v45, 2 }
0x325a   : > { %10803 = vrcp.f32 %v4647_v37  ;;  %v4648_v59 = vadd.f32 1e-06, %v4640_v5  ;;  %v4784_v29 = vperm.slane %v12734_v44, 2  ;;  %v4793_v63 = vperm.slane %v12733_v45, 3 }
0x325b   : > { %v4794_v32 = vperm.slane %v12734_v44, 3  ;;  %v4803_v52 = vperm.slane %v12733_v45, 4  ;;  %v4804_v6 = vperm.slane %v12734_v44, 4  ;;  %v4813_v37 = vperm.slane %v12733_v45, 5 }
0x325c   : > { %v4394_v13 = vpop.f32.mrf.mxu2  ;;  %10805 = vrcp.f32 %v4648_v59  ;;  %v4814_v5 = vperm.slane %v12734_v44, 5 }
0x325d   : > { %v4413_v9 = vpop.f32.mrf.mxu3 }
0x325e   : > { %v10800_v28 = vpop.eup %10799  ;;  %v4414_v43 = vadd.f32 %v4413_v9, %v4394_v13 }
0x325f   : > { %v11740_v40 = vmul.f32 %v10800_v28, %v4642_v33  ;;  %v10802_v58 = vpop.eup %10801 }
0x3260   : > { %v4645_v46 = vmul.f32 %v4414_v43, %v11509_v16  ;;  %v10804_v30 = vpop.eup %10803 }
0x3261   : > { %4705 = vxpose.xlu2.b32.start [1/4] (short) (narrow) %v11740_v40, 8  ;;  %v11747_v55 = vmul.f32 %v10804_v30, %v4643_v39 }
0x3262   : > { %v11745_v0 = vmul.f32 %v10802_v58, %v4645_v46  ;;  %v10806_v42 = vpop.eup %10805 }
0x3263   : > { %v4658_v21 = vpack.c.bf16 %v11747_v55, %v11740_v40  ;;  %v11753_v47 = vmul.f32 %v10806_v42, %v4644_v60  ;;  %v4823_v60 = vperm.slane %v12733_v45, 6  ;;  %v4824_v42 = vperm.slane %v12734_v44, 6 }
0x3264   : > { %4752 = vmatpush.msra.mxu2 %v11745_v0 }
0x3265   : > { %4660 = vxpose.xlu0.c.b16.start [1/2] (short) (narrow) %v4658_v21, 16  ;;  %v4659_v17 = vpack.c.bf16 %v11745_v0, %v11753_v47 }
0x3266   : > { %4753 = vmatpush.msra.mxu2 %v11753_v47 }
0x3268   : > { %4754 = vmatpush.msra.mxu2 %v11747_v55 }
0x3269   : > { %4706 = vxpose.xlu2.b32.cont [2/4] (short) (narrow) %v11747_v55, 8 }
0x326a   : > { %4755 = vmatpush.msra.mxu2 %v11740_v40 }
0x3271   : > { %4707 = vxpose.xlu2.b32.cont [3/4] (short) (narrow) %v11753_v47, 8 }
0x3275   : > { %4661 = vxpose.xlu0.c.b16.end [2/2] (short) (narrow) %v4659_v17, 16 }
0x3279   : > { %4708 = vxpose.xlu2.b32.end [4/4] (short) (narrow) %v11745_v0, 8 }
0x32db   : > { %10636 = vset.pattern.permute.xlu2 %v12705_v48 }
0x32dc   : > { %10627 = vset.pattern.permute.xlu0 %v12716_v14 }
0x32fa   : > { %v4721_v16 = vpop.trf.xlu2 }
0x32fb   : > { %10324 = vmatmul.msk.f32.vlgmr.msra.gmra.mxu2 %vm315_vm0, %v4721_v16 }
0x3311   : > { %v4668_v49 = vpop.trf.xlu0 }
0x3312   : > { %10322 = vmatmul.msk.bf16.vlgmr.msrb.gmra.mxu0 %vm315_vm0, %v4668_v49  ;;  %10323 = vmatmul.msk.bf16.vlgmr.msra.gmra.mxu1 %vm315_vm0, %v4668_v49 }
0x337e   : > { %v4757_v38 = vpop.f32.mrf.mxu2 }
0x337f   : > { %4762 = vperm.xlu1 %10621, %v4757_v38   ;;  %4820 = vperm.xlu0 %10627, %v4757_v38  }
0x3387   : > { %10622 = vset.pattern.permute.xlu1 %v12705_v48  ;;  %10637 = vset.pattern.permute.xlu0 %v12703_v12 }
0x3388   : > { %4770 = vperm.xlu1 %10622, %v4757_v38   ;;  %5945 = vperm.xlu0 %10637, %v11740_v40  }
0x338f   : > { %v11774_v35 = vpop.f32.mrf.mxu0  ;;  %v11776_v8 = vpop.f32.mrf.mxu1 }
0x3390   : > { %10623 = vset.pattern.permute.xlu1 %v12704_v57  ;;  %10640 = vset.pattern.permute.xlu0 %v12729_v50 }
0x3391   : > { %4780 = vperm.xlu1 %10623, %v4757_v38   ;;  %5970 = vperm.xlu0 %10640, %v11740_v40  }
0x3397   : > { %v4690_v41 = vpop.f32.mrf.mxu0  ;;  %v4703_v3 = vpop.f32.mrf.mxu1 }
0x3398   : > { %v4834_v41 = vperm.slane %v12734_v44, 7 }
0x3399   : > { %10624 = vset.pattern.permute.xlu1 %v12730_v61  ;;  %10641 = vset.pattern.permute.xlu0 %v12730_v61 }
0x339a   : > { %4790 = vperm.xlu1 %10624, %v4757_v38   ;;  %5920 = vperm.xlu0 %10641, %v11740_v40  }
0x33a2   : > { %10625 = vset.pattern.permute.xlu1 %v12703_v12  ;;  %5932 = vperm.xlu0 %10641, %v11745_v0  }
0x33a3   : > { %4800 = vperm.xlu1 %10625, %v4757_v38  }
0x33aa   : > { %10649 = vset.pattern.permute.xlu0 %v12716_v14 }
0x33ab   : > { %10626 = vset.pattern.permute.xlu1 %v12729_v50  ;;  %5995 = vperm.xlu0 %10649, %v11740_v40  }
0x33ac   : > { %4810 = vperm.xlu1 %10626, %v4757_v38  }
0x33b3   : > { %6003 = vperm.xlu0 %10649, %v11753_v47  }
0x33b4   : > { %10628 = vset.pattern.permute.xlu1 %v12731_v10 }
0x33b5   : > { %4830 = vperm.xlu1 %10628, %v4757_v38   ;;  %v4833_v38 = vperm.slane %v12733_v45, 7 }
0x33bd   : > { %10629 = vset.pattern.permute.xlu1 %v12732_v53 }
0x33f1   : > { %v4763_v25 = vpop.permute.xlu1 %4762  ;;  %v4821_v30 = vpop.permute.xlu0 %4820 }
0x33f2   : > { %v4767_v11 = vmul.f32 %v4765_v36, %v4763_v25  ;;  %v4768_v24 = vmul.f32 %v4766_v51, %v4763_v25  ;;  %v4825_v16 = vmul.f32 %v4823_v60, %v4821_v30  ;;  %v4826_v49 = vmul.f32 %v4824_v42, %v4821_v30 }
0x33f3   : > { %v4839_v51 = vmul.f32 %v11774_v35, %v12733_v45 }
0x33fa   : > { %v4771_v23 = vpop.permute.xlu1 %4770 }
0x33fb   : > { %v4775_v22 = vmul.f32 %v4773_v2, %v4771_v23  ;;  %v4776_v4 = vmul.f32 %v4774_v34, %v4771_v23 }
0x33fd   : > { %v4777_v19 = vadd.f32 %v4775_v22, %v4767_v11  ;;  %v4778_v18 = vadd.f32 %v4776_v4, %v4768_v24  ;;  %v4840_v4 = vmul.f32 %v11776_v8, %v12734_v44 }
0x3403   : > { %v4781_v20 = vpop.permute.xlu1 %4780 }
0x3404   : > { %v4785_v15 = vmul.f32 %v4783_v54, %v4781_v20  ;;  %v4786_v7 = vmul.f32 %v4784_v29, %v4781_v20 }
0x3406   : > { %v4787_v33 = vadd.f32 %v4785_v15, %v4777_v19  ;;  %v4788_v13 = vadd.f32 %v4786_v7, %v4778_v18 }
0x340c   : > { %v4791_v56 = vpop.permute.xlu1 %4790 }
0x340d   : > { %v4795_v26 = vmul.f32 %v4793_v63, %v4791_v56  ;;  %v4796_v31 = vmul.f32 %v4794_v32, %v4791_v56  ;;  %v12735_v32 = vmov 1.0  }
0x340f   : > { %v4797_v9 = vadd.f32 %v4795_v26, %v4787_v33  ;;  %v4798_v43 = vadd.f32 %v4796_v31, %v4788_v13 }
0x3415   : > { %v4801_v27 = vpop.permute.xlu1 %4800 }
0x3416   : > { %v4805_v28 = vmul.f32 %v4803_v52, %v4801_v27  ;;  %v4806_v1 = vmul.f32 %v4804_v6, %v4801_v27 }
0x3418   : > { %v4807_v58 = vadd.f32 %v4805_v28, %v4797_v9  ;;  %v4808_v39 = vadd.f32 %v4806_v1, %v4798_v43 }
0x341e   : > { %v4811_v59 = vpop.permute.xlu1 %4810 }
0x341f   : > { %v4815_v62 = vmul.f32 %v4813_v37, %v4811_v59  ;;  %v4816_v46 = vmul.f32 %v4814_v5, %v4811_v59 }
0x3421   : > { %v4817_v21 = vadd.f32 %v4815_v62, %v4807_v58  ;;  %v4818_v17 = vadd.f32 %v4816_v46, %v4808_v39 }
0x3423   : > { %v4827_v25 = vadd.f32 %v4825_v16, %v4817_v21  ;;  %v4828_v23 = vadd.f32 %v4826_v49, %v4818_v17 }
0x3427   : > { %v4831_v3 = vpop.permute.xlu1 %4830 }
0x3428   : > { %v4835_v20 = vmul.f32 %v4833_v38, %v4831_v3  ;;  %v4836_v56 = vmul.f32 %v4834_v41, %v4831_v3 }
0x342a   : > { %v4837_v27 = vadd.f32 %v4835_v20, %v4827_v25  ;;  %v4838_v2 = vadd.f32 %v4836_v56, %v4828_v23 }
0x342c   : > { %v4841_v34 = vadd.f32 1e-06, %v4837_v27  ;;  %v4842_v36 = vadd.f32 1e-06, %v4838_v2  ;;  %v12737_v2 = vld [vmem:[#allocation7_spill] sm:$0xff] }
0x342e   : > { %10807 = vrcp.f32 %v4841_v34 }
0x342f   : > { %10809 = vrcp.f32 %v4842_v36 }
0x3434   : > { %v10808_v22 = vpop.eup %10807 }
0x3435   : > { %v10810_v54 = vpop.eup %10809  ;;  %v11809_v29 = vmul.f32 %v10808_v22, %v4839_v51 }
0x3436   : > { %v11811_v63 = vmul.f32 %v10810_v54, %v4840_v4  ;;  %v12738_v4 = vld [vmem:[#allocation8_spill] sm:$0xff] }
0x3437   : > { %4862 = vmatpush.xpose.msra.mxu3 %v11809_v29 }
0x3438   : > { %4882 = vmatpush.xpose.msra.mxu0 %v11811_v63 }
0x343a   : > { %4863 = vmatmul.f32.vlgmr.msra.gmra.mxu3 %v11809_v29 }
0x343b   : > { %10327 = vmatpush.msk.msrb.mxu3 %vm11135_vm15, %v12735_v32  ;;  %4883 = vmatmul.f32.vlgmr.msra.gmra.mxu0 %v11811_v63 }
0x34b8   : > { %v4884_v35 = vpop.f32.mrf.mxu0 }
0x34bd   : > { %v4864_v45 = vpop.f32.mrf.mxu3 }
0x34be   : > { %v11820_v8 = vadd.f32 %v4884_v35, %v4864_v45 }
0x34c0   : > { %v4887_v44 = vmul.f32 %v11820_v8, %v11820_v8 }
0x34c2   : > { %v4888_v24 = vsel %vm677_vm9, %v4887_v44, 0.0 }
0x34c3   : > { %4889 = vadd.xlane.f32.xlu1 %v4888_v24 }
0x34dc   : > { %5846 = vperm.xlu1 %10629, %v11740_v40  }
0x34e4   : > { %10630 = vset.pattern.permute.xlu1 %v12705_v48 }
0x34e5   : > { %5870 = vperm.xlu1 %10630, %v11740_v40  }
0x34ed   : > { %10631 = vset.pattern.permute.xlu1 %v12704_v57 }
0x34ee   : > { %5895 = vperm.xlu1 %10631, %v11740_v40  }
0x34f6   : > { %10632 = vset.pattern.permute.xlu1 %v12732_v53 }
0x34f7   : > { %5851 = vperm.xlu1 %10632, %v11747_v55  }
0x34ff   : > { %10633 = vset.pattern.permute.xlu1 %v12705_v48 }
0x3500   : > { %5874 = vperm.xlu1 %10633, %v11747_v55  }
0x3508   : > { %10634 = vset.pattern.permute.xlu1 %v12704_v57 }
0x3509   : > { %5899 = vperm.xlu1 %10634, %v11747_v55  }
0x3511   : > { %10635 = vset.pattern.permute.xlu1 %v12732_v53 }
0x3512   : > { %5856 = vperm.xlu1 %10635, %v11753_v47  }
0x351a   : > { %10638 = vset.pattern.permute.xlu1 %v12730_v61 }
0x351b   : > { %5924 = vperm.xlu1 %10638, %v11747_v55  }
0x3523   : > { %10639 = vset.pattern.permute.xlu1 %v12704_v57 }
0x3524   : > { %5903 = vperm.xlu1 %10639, %v11753_v47  }
0x352c   : > { %10642 = vset.pattern.permute.xlu1 %v12732_v53 }
0x352d   : > { %5861 = vperm.xlu1 %10642, %v11745_v0  }
0x3535   : > { %10643 = vset.pattern.permute.xlu1 %v12703_v12 }
0x3536   : > { %5949 = vperm.xlu1 %10643, %v11747_v55   ;;  %v4890_v15 = vpop.xlane.xlu1 %4889 }
0x3537   : > { %v4891_v7 = vrot.slane %v4890_v15, 4 }
0x3539   : > { %v4892_v52 = vadd.f32 %v4891_v7, %v4890_v15 }
0x353b   : > { %v4893_v6 = vrot.slane %v4892_v52, 2 }
0x353d   : > { %v4894_v19 = vadd.f32 %v4893_v6, %v4892_v52 }
0x353e   : > { %10645 = vset.pattern.permute.xlu1 %v12704_v57 }
0x353f   : > { %v4895_v18 = vrot.slane %v4894_v19, 1  ;;  %5907 = vperm.xlu1 %10645, %v11745_v0  }
0x3541   : > { %v4896_v26 = vadd.f32 %v4895_v18, %v4894_v19 }
0x3543   : > { %10811 = vrsqrt.f32 %v4896_v26  ;;  %vm4904_vm7 = vcmp.eq.f32.partialorder %v4896_v26, inf  ;;  %v4907_v59 = vand.u32 2147483648, %v4896_v26  ;;  %vm4906_vm8 = vcmp.eq.f32.partialorder %v4896_v26, 0.0 }
0x3547   : > { %10647 = vset.pattern.permute.xlu1 %v12703_v12 }
0x3548   : > { %5953 = vperm.xlu1 %10647, %v11753_v47  }
0x3549   : > { %v10812_v31 = vpop.eup %10811 }
0x354a   : > { %v4898_v37 = vmul.f32 %v10812_v31, %v4896_v26 }
0x354c   : > { %v4899_v5 = vmul.f32 %v10812_v31, %v4898_v37 }
0x354e   : > { %v4900_v33 = vmul.f32 0.5, %v4899_v5 }
0x3550   : > { %v4901_v13 = vsub.f32 1.5, %v4900_v33  ;;  %10650 = vset.pattern.permute.xlu1 %v12716_v14 }
0x3551   : > { %5999 = vperm.xlu1 %10650, %v11747_v55  }
0x3552   : > { %v4902_v28 = vmul.f32 %v10812_v31, %v4901_v13 }
0x3554   : > { %v4903_v1 = vmul.f32 %v4902_v28, %v4896_v26 }
0x3556   : > { %v4905_v9 = vsel %vm4904_vm7, %v4896_v26, %v4903_v1 }
0x3557   : > { %v4908_v43 = vsel %vm4906_vm8, %v4907_v59, %v4905_v9 }
0x3558   : > { %v4909_v62 = vadd.f32 1e-30, %v4908_v43 }
0x3559   : > { %10652 = vset.pattern.permute.xlu1 %v12703_v12 }
0x355a   : > { %5957 = vperm.xlu1 %10652, %v11745_v0   ;;  %10813 = vrcp.f32 %v4909_v62  ;;  %v4921_v42 = vand.u32 2147483648, %v4909_v62  ;;  %v4919_v16 = vand.u32 2147483647, %v4909_v62  ;;  %vm4915_vm11 = vweird.f32 %v4909_v62 }
0x355b   : > { %10815 = vrsqrt.f32 %v4909_v62  ;;  %vm5758_vm14 = vcmp.eq.f32.partialorder %v4909_v62, inf  ;;  %vm5760_vm1 = vcmp.eq.f32.partialorder %v4909_v62, 0.0 }
0x355c   : > { %v4922_v41 = vor.u32 1.1754944e-38, %v4921_v42  ;;  %vm4920_vm13 = vcmp.eq.f32.partialorder %v4919_v16, 8.507059e+37 }
0x3560   : > { %v10814_v46 = vpop.eup %10813 }
0x3561   : > { %v10816_v58 = vpop.eup %10815  ;;  %v4911_v39 = vmul.f32 %v10814_v46, %v4909_v62  ;;  %vm4916_vm10 = vweird.f32 %v10814_v46 }
0x3562   : > { %10654 = vset.pattern.permute.xlu1 %v12729_v50  ;;  %v5752_v30 = vmul.f32 %v10816_v58, %v4909_v62  ;;  %vm4917_vm12 = vmor %vm4915_vm11, %vm4916_vm10 }
0x3563   : > { %5982 = vperm.xlu1 %10654, %v11745_v0   ;;  %v4912_v60 = vsub.f32 1.0, %v4911_v39 }
0x3564   : > { %v5753_v21 = vmul.f32 %v10816_v58, %v5752_v30 }
0x3565   : > { %v4913_v17 = vmul.f32 %v10814_v46, %v4912_v60 }
0x3566   : > { %v5754_v49 = vmul.f32 0.5, %v5753_v21 }
0x3567   : > { %v4914_v38 = vadd.f32 %v10814_v46, %v4913_v17 }
0x3568   : > { %v5755_v3 = vsub.f32 1.5, %v5754_v49 }
0x3569   : > { %v4918_v25 = vsel %vm4917_vm12, %v10814_v46, %v4914_v38 }
0x356a   : > { %v4923_v23 = vsel %vm4920_vm13, %v4922_v41, %v4918_v25  ;;  %v5756_v20 = vmul.f32 %v10816_v58, %v5755_v3 }
0x356b   : > { %10655 = vset.pattern.permute.xlu1 %v12716_v14  ;;  %v4924_v56 = vmul.f32 %v4923_v23, %v11820_v8 }
0x356c   : > { %6007 = vperm.xlu1 %10655, %v11745_v0   ;;  %v5757_v27 = vmul.f32 %v5756_v20, %v4909_v62 }
0x356d   : > { %4940 = vmatpush.msrb.mxu1 %v4924_v56 }
0x356e   : > { %10325 = vmatmul.msk.f32.vlgmr.msrb.gmra.mxu1 %vm677_vm9, %v12737_v2  ;;  %v5759_v34 = vsel %vm5758_vm14, %v4909_v62, %v5757_v27 }
0x356f   : > { %v11861_v36 = vsel %vm5760_vm1, %v4921_v42, %v5759_v34 }
0x35eb   : > { %v4942_v51 = vpop.f32.mrf.mxu1 }
0x35ec   : > { %v4945_v22 = vmul.f32 0.5, %v4942_v51 }
0x35ee   : > { %v4946_v54 = vsub.f32 %v12738_v4, %v4945_v22 }
0x35f0   : > { %4965 = vmatpush.msrb.mxu2 %v4946_v54  ;;  %10328 = vmatmul.msk.f32.vlgmr.msrb.gmra.mxu3 %vm677_vm9, %v4946_v54 }
0x35f1   : > { %10326 = vmatmul.msk.f32.vlgmr.msrb.gmra.mxu2 %vm677_vm9, %v4924_v56 }
0x3673   : > { %v4990_v35 = vpop.f32.mrf.mxu3 }
0x3674   : > { %v4967_v45 = vpop.f32.mrf.mxu2  ;;  %5059 = vmatpush.msra.mxu2 %v4990_v35 }
0x3675   : > { %5011 = vmatpush.msrb.mxu0 %v4967_v45 }
0x3676   : > { %10329 = vmatmul.msk.f32.vlgmr.msrb.gmra.mxu0 %vm677_vm9, %v4990_v35 }
0x36f3   : > { %v5013_v8 = vpop.f32.mrf.mxu0 }
0x36f4   : > { %v5016_v44 = vmul.f32 0.5, %v5013_v8 }
0x36f6   : > { %v5017_v24 = vsub.f32 %v12738_v4, %v5016_v44 }
0x36f8   : > { %5036 = vmatpush.msra.mxu1 %v5017_v24  ;;  %10331 = vmatmul.msk.f32.vlgmr.msra.gmra.mxu2 %vm677_vm9, %v5017_v24 }
0x36f9   : > { %10330 = vmatmul.msk.f32.vlgmr.msra.gmra.mxu1 %vm677_vm9, %v4967_v45 }
0x3776   : > { %v5038_v15 = vpop.f32.mrf.mxu1 }
0x3777   : > { %5082 = vmatpush.msra.mxu3 %v5038_v15 }
0x377b   : > { %v5061_v7 = vpop.f32.mrf.mxu2 }
0x377c   : > { %10332 = vmatmul.msk.f32.vlgmr.msra.gmra.mxu3 %vm677_vm9, %v5061_v7  ;;  %5130 = vmatpush.msrb.mxu1 %v5061_v7 }
0x37ff   : > { %v5084_v52 = vpop.f32.mrf.mxu3 }
0x3800   : > { %v5087_v6 = vmul.f32 0.5, %v5084_v52 }
0x3802   : > { %v5088_v19 = vsub.f32 %v12738_v4, %v5087_v6 }
0x3804   : > { %5107 = vmatpush.msra.mxu0 %v5088_v19  ;;  %10334 = vmatmul.msk.f32.vlgmr.msrb.gmra.mxu1 %vm677_vm9, %v5088_v19 }
0x3805   : > { %10333 = vmatmul.msk.f32.vlgmr.msra.gmra.mxu0 %vm677_vm9, %v5038_v15 }
0x3881   : > { %v5132_v18 = vpop.f32.mrf.mxu1 }
0x3882   : > { %v5109_v26 = vpop.f32.mrf.mxu0  ;;  %5201 = vmatpush.msrb.mxu0 %v5132_v18 }
0x3883   : > { %5153 = vmatpush.msrb.mxu2 %v5109_v26 }
0x3884   : > { %10335 = vmatmul.msk.f32.vlgmr.msrb.gmra.mxu2 %vm677_vm9, %v5132_v18 }
0x3907   : > { %v5155_v31 = vpop.f32.mrf.mxu2 }
0x3908   : > { %v5158_v37 = vmul.f32 0.5, %v5155_v31 }
0x390a   : > { %v5159_v5 = vsub.f32 %v12738_v4, %v5158_v37 }
0x390c   : > { %5178 = vmatpush.msrb.mxu3 %v5159_v5  ;;  %10337 = vmatmul.msk.f32.vlgmr.msrb.gmra.mxu0 %vm677_vm9, %v5159_v5 }
0x390d   : > { %10336 = vmatmul.msk.f32.vlgmr.msrb.gmra.mxu3 %vm677_vm9, %v5109_v26 }
0x3989   : > { %v5203_v33 = vpop.f32.mrf.mxu0 }
0x398a   : > { %5272 = vmatpush.msra.mxu3 %v5203_v33 }
0x3990   : > { %v5180_v13 = vpop.f32.mrf.mxu3 }
0x3991   : > { %5224 = vmatpush.msra.mxu1 %v5180_v13 }
0x3992   : > { %10338 = vmatmul.msk.f32.vlgmr.msra.gmra.mxu1 %vm677_vm9, %v5203_v33 }
0x3a0f   : > { %v5226_v28 = vpop.f32.mrf.mxu1 }
0x3a10   : > { %v5229_v1 = vmul.f32 0.5, %v5226_v28 }
0x3a12   : > { %v5230_v59 = vsub.f32 %v12738_v4, %v5229_v1 }
0x3a14   : > { %5249 = vmatpush.msra.mxu2 %v5230_v59  ;;  %10340 = vmatmul.msk.f32.vlgmr.msra.gmra.mxu3 %vm677_vm9, %v5230_v59 }
0x3a15   : > { %10339 = vmatmul.msk.f32.vlgmr.msra.gmra.mxu2 %vm677_vm9, %v5180_v13 }
0x3a97   : > { %v5274_v9 = vpop.f32.mrf.mxu3 }
0x3a98   : > { %v5251_v43 = vpop.f32.mrf.mxu2  ;;  %5343 = vmatpush.msrb.mxu2 %v5274_v9 }
0x3a99   : > { %5295 = vmatpush.msra.mxu0 %v5251_v43 }
0x3a9a   : > { %10341 = vmatmul.msk.f32.vlgmr.msra.gmra.mxu0 %vm677_vm9, %v5274_v9 }
0x3b17   : > { %v5297_v62 = vpop.f32.mrf.mxu0 }
0x3b18   : > { %v5300_v46 = vmul.f32 0.5, %v5297_v62 }
0x3b1a   : > { %v5301_v58 = vsub.f32 %v12738_v4, %v5300_v46 }
0x3b1c   : > { %5320 = vmatpush.msrb.mxu1 %v5301_v58  ;;  %10343 = vmatmul.msk.f32.vlgmr.msrb.gmra.mxu2 %vm677_vm9, %v5301_v58 }
0x3b1d   : > { %10342 = vmatmul.msk.f32.vlgmr.msrb.gmra.mxu1 %vm677_vm9, %v5251_v43 }
0x3b9a   : > { %v5322_v39 = vpop.f32.mrf.mxu1 }
0x3b9b   : > { %5366 = vmatpush.msrb.mxu3 %v5322_v39 }
0x3b9f   : > { %v5345_v30 = vpop.f32.mrf.mxu2 }
0x3ba0   : > { %10344 = vmatmul.msk.f32.vlgmr.msrb.gmra.mxu3 %vm677_vm9, %v5345_v30  ;;  %5414 = vmatpush.msra.mxu1 %v5345_v30 }
0x3c23   : > { %v5368_v60 = vpop.f32.mrf.mxu3 }
0x3c24   : > { %v5371_v42 = vmul.f32 0.5, %v5368_v60  ;;  %v12741_v60 = vld [vmem:[#allocation2_spill] sm:$0xff] }
0x3c26   : > { %v5372_v21 = vsub.f32 %v12738_v4, %v5371_v42  ;;  %v12742_v42 = vld [vmem:[#allocation4_spill] sm:$0xff] }
0x3c28   : > { %5391 = vmatpush.msrb.mxu0 %v5372_v21  ;;  %10346 = vmatmul.msk.f32.vlgmr.msra.gmra.mxu1 %vm677_vm9, %v5372_v21  ;;  %v12744_v21 = vld [vmem:[#allocation5_spill] sm:$0xff] }
0x3c29   : > { %10345 = vmatmul.msk.f32.vlgmr.msrb.gmra.mxu0 %vm677_vm9, %v5322_v39 }
0x3ca5   : > { %v5416_v17 = vpop.f32.mrf.mxu1 }
0x3ca6   : > { %v5393_v16 = vpop.f32.mrf.mxu0  ;;  %5485 = vmatpush.msra.mxu0 %v5416_v17 }
0x3ca7   : > { %5437 = vmatpush.msra.mxu2 %v5393_v16 }
0x3ca8   : > { %10347 = vmatmul.msk.f32.vlgmr.msra.gmra.mxu2 %vm677_vm9, %v5416_v17 }
0x3d2b   : > { %v5439_v49 = vpop.f32.mrf.mxu2 }
0x3d2c   : > { %v5442_v38 = vmul.f32 0.5, %v5439_v49 }
0x3d2e   : > { %v5443_v41 = vsub.f32 %v12738_v4, %v5442_v38 }
0x3d30   : > { %5462 = vmatpush.msra.mxu3 %v5443_v41  ;;  %10349 = vmatmul.msk.f32.vlgmr.msra.gmra.mxu0 %vm677_vm9, %v5443_v41 }
0x3d31   : > { %10348 = vmatmul.msk.f32.vlgmr.msra.gmra.mxu3 %vm677_vm9, %v5393_v16 }
0x3dad   : > { %v5487_v3 = vpop.f32.mrf.mxu0 }
0x3dae   : > { %5556 = vmatpush.msrb.mxu3 %v5487_v3 }
0x3db4   : > { %v5464_v25 = vpop.f32.mrf.mxu3 }
0x3db5   : > { %5508 = vmatpush.msrb.mxu1 %v5464_v25 }
0x3db6   : > { %10350 = vmatmul.msk.f32.vlgmr.msrb.gmra.mxu1 %vm677_vm9, %v5487_v3 }
0x3e33   : > { %v5510_v23 = vpop.f32.mrf.mxu1 }
0x3e34   : > { %v5513_v20 = vmul.f32 0.5, %v5510_v23 }
0x3e36   : > { %v5514_v56 = vsub.f32 %v12738_v4, %v5513_v20 }
0x3e38   : > { %5533 = vmatpush.msrb.mxu2 %v5514_v56  ;;  %10352 = vmatmul.msk.f32.vlgmr.msrb.gmra.mxu3 %vm677_vm9, %v5514_v56 }
0x3e39   : > { %10351 = vmatmul.msk.f32.vlgmr.msrb.gmra.mxu2 %vm677_vm9, %v5464_v25 }
0x3ebb   : > { %v5558_v27 = vpop.f32.mrf.mxu3 }
0x3ebc   : > { %v5535_v34 = vpop.f32.mrf.mxu2  ;;  %5627 = vmatpush.msra.mxu2 %v5558_v27 }
0x3ebd   : > { %5579 = vmatpush.msrb.mxu0 %v5535_v34 }
0x3ebe   : > { %10353 = vmatmul.msk.f32.vlgmr.msrb.gmra.mxu0 %vm677_vm9, %v5558_v27 }
0x3f3b   : > { %v5581_v51 = vpop.f32.mrf.mxu0 }
0x3f3c   : > { %v5584_v22 = vmul.f32 0.5, %v5581_v51  ;;  %v5946_v51 = vpop.permute.xlu0 %5945 }
0x3f3e   : > { %v5585_v54 = vsub.f32 %v12738_v4, %v5584_v22 }
0x3f40   : > { %5604 = vmatpush.msra.mxu1 %v5585_v54  ;;  %10355 = vmatmul.msk.f32.vlgmr.msra.gmra.mxu2 %vm677_vm9, %v5585_v54 }
0x3f41   : > { %10354 = vmatmul.msk.f32.vlgmr.msra.gmra.mxu1 %vm677_vm9, %v5535_v34 }
0x3fbe   : > { %v5606_v35 = vpop.f32.mrf.mxu1 }
0x3fbf   : > { %5650 = vmatpush.msra.mxu3 %v5606_v35 }
0x3fc3   : > { %v5629_v45 = vpop.f32.mrf.mxu2 }
0x3fc4   : > { %10356 = vmatmul.msk.f32.vlgmr.msra.gmra.mxu3 %vm677_vm9, %v5629_v45  ;;  %5698 = vmatpush.msrb.mxu1 %v5629_v45 }
0x4047   : > { %v5652_v8 = vpop.f32.mrf.mxu3 }
0x4048   : > { %v5655_v44 = vmul.f32 0.5, %v5652_v8 }
0x404a   : > { %v5656_v24 = vsub.f32 %v12738_v4, %v5655_v44 }
0x404c   : > { %5675 = vmatpush.msra.mxu0 %v5656_v24  ;;  %10358 = vmatmul.msk.f32.vlgmr.msrb.gmra.mxu1 %vm677_vm9, %v5656_v24 }
0x404d   : > { %10357 = vmatmul.msk.f32.vlgmr.msra.gmra.mxu0 %vm677_vm9, %v5606_v35  ;;  %v5971_v35 = vpop.permute.xlu0 %5970 }
0x4055   : > { %v5921_v44 = vpop.permute.xlu0 %5920 }
0x40c9   : > { %v5700_v7 = vpop.f32.mrf.mxu1 }
0x40ca   : > { %v5677_v15 = vpop.f32.mrf.mxu0 }
0x40cb   : > { %5721 = vmatpush.msrb.mxu2 %v5677_v15 }
0x40cc   : > { %10359 = vmatmul.msk.f32.vlgmr.msrb.gmra.mxu2 %vm677_vm9, %v5700_v7  ;;  %v11951_v7 = vpop.permute.xlu0 %5932 }
0x414f   : > { %v5723_v52 = vpop.f32.mrf.mxu2 }
0x4150   : > { %v5726_v6 = vmul.f32 0.5, %v5723_v52 }
0x4152   : > { %v5727_v19 = vsub.f32 %v12738_v4, %v5726_v6 }
0x4154   : > { %5746 = vmatpush.msrb.mxu3 %v5727_v19 }
0x4155   : > { %10360 = vmatmul.msk.f32.vlgmr.msrb.gmra.mxu3 %vm677_vm9, %v5677_v15 }
0x41d8   : > { %v5748_v18 = vpop.f32.mrf.mxu3 }
0x41d9   : > { %v5763_v26 = vmul.f32 %v12737_v2, %v5748_v18 }
0x41db   : > { %v5764_v31 = vsel %vm677_vm9, %v5763_v26, 0.0 }
0x41dc   : > { %5765 = vadd.xlane.f32.xlu2 %v5764_v31 }
0x41f4   : > { %5878 = vperm.xlu2 %10636, %v11753_v47  }
0x41fc   : > { %5882 = vperm.xlu2 %10636, %v11745_v0  }
0x4204   : > { %10644 = vset.pattern.permute.xlu2 %v12730_v61 }
0x4205   : > { %5928 = vperm.xlu2 %10644, %v11753_v47  }
0x420d   : > { %10646 = vset.pattern.permute.xlu2 %v12729_v50 }
0x420e   : > { %5974 = vperm.xlu2 %10646, %v11747_v55  }
0x4216   : > { %10648 = vset.pattern.permute.xlu2 %v12731_v10 }
0x4217   : > { %6020 = vperm.xlu2 %10648, %v11740_v40  }
0x421f   : > { %10651 = vset.pattern.permute.xlu2 %v12729_v50 }
0x4220   : > { %5978 = vperm.xlu2 %10651, %v11753_v47  }
0x4228   : > { %10653 = vset.pattern.permute.xlu2 %v12731_v10 }
0x4229   : > { %6024 = vperm.xlu2 %10653, %v11747_v55  }
0x4231   : > { %6028 = vperm.xlu2 %10653, %v11753_v47  }
0x4239   : > { %6032 = vperm.xlu2 %10653, %v11745_v0  }
0x4241   : > { %10656 = vset.pattern.permute.xlu2 %v12732_v53 }
0x424f   : > { %v5766_v37 = vpop.xlane.xlu2 %5765 }
0x4250   : > { %v5767_v5 = vrot.slane %v5766_v37, 4 }
0x4252   : > { %v5768_v33 = vadd.f32 %v5767_v5, %v5766_v37 }
0x4254   : > { %v5769_v13 = vrot.slane %v5768_v33, 2 }
0x4256   : > { %v5770_v28 = vadd.f32 %v5769_v13, %v5768_v33 }
0x4257   : > { %v5879_v23 = vpop.permute.xlu2 %5878 }
0x4258   : > { %v5771_v1 = vrot.slane %v5770_v28, 1 }
0x425a   : > { %v5772_v59 = vadd.f32 %v5771_v1, %v5770_v28 }
0x425c   : > { %v5773_v9 = vmul.f32 %v5772_v59, %v11861_v36  ;;  %v5847_v36 = vpop.permute.xlu1 %5846 }
0x425e   : > { %v5774_v43 = vadd.f32 1e-06, %v5773_v9 }
0x425f   : > { %v5883_v56 = vpop.permute.xlu2 %5882 }
0x4260   : > { %10817 = vrcp.f32 %v5774_v43 }
0x4266   : > { %v10818_v62 = vpop.eup %10817 }
0x4267   : > { %v11928_v46 = vmul.f32 %v10818_v62, %v11809_v29  ;;  %v11931_v58 = vmul.f32 %v10818_v62, %v11811_v63  ;;  %v12743_v29 = vld [vmem:[#allocation3_spill] sm:$0xff]  ;;  %v5871_v63 = vpop.permute.xlu1 %5870  ;;  %v5929_v34 = vpop.permute.xlu2 %5928 }
0x4269   : > { %12739 = vst [vmem:[#allocation9_spill] sm:$0xff] %v11928_v46  ;;  %v5778_v39 = vpack.c.bf16 %v11928_v46, %v11928_v46  ;;  %v5779_v30 = vpack.c.bf16 %v11931_v58, %v11931_v58 }
0x426a   : > { %12740 = vst [vmem:[#allocation10_spill] sm:$0xff] %v11931_v58 }
0x426b   : > { %5787 = vmatpush.bf16.xpose.msrb.mxu0 %v5778_v39  ;;  %5806 = vmatpush.bf16.xpose.msra.mxu1 %v5779_v30 }
0x426c   : > { %5825 = vmatpush.bf16.xpose.msra.mxu2 %v5778_v39  ;;  %5838 = vmatpush.bf16.xpose.msra.mxu3 %v5779_v30 }
0x426f   : > { %v5896_v17 = vpop.permute.xlu1 %5895  ;;  %v5975_v54 = vpop.permute.xlu2 %5974 }
0x4272   : > { %5788 = vmatmul.bf16.vlgmr.msrb.gmra.mxu0 %v12743_v29  ;;  %5807 = vmatmul.bf16.vlgmr.msra.gmra.mxu1 %v12744_v21 }
0x4273   : > { %5826 = vmatmul.bf16.vlgmr.msra.gmra.mxu2 %v5778_v39  ;;  %5839 = vmatmul.bf16.vlgmr.msra.gmra.mxu3 %v5779_v30 }
0x4274   : > { %6087 = vmatpush.bf16.msrb.mxu2 %v12741_v60  ;;  %6100 = vmatpush.bf16.msrb.mxu3 %v12742_v42 }
0x4277   : > { %v5852_v16 = vpop.permute.xlu1 %5851  ;;  %v11947_v8 = vpop.permute.xlu2 %6020 }
0x4278   : > { %6088 = vmatpush.bf16.msrb.mxu2 %v12743_v29  ;;  %6101 = vmatpush.bf16.msrb.mxu3 %v12744_v21 }
0x427f   : > { %v5875_v49 = vpop.permute.xlu1 %5874  ;;  %v11949_v15 = vpop.permute.xlu2 %5978 }
0x4282   : > { %5793 = vmatmul.bf16.gmra.mxu0 %v12741_v60  ;;  %5812 = vmatmul.bf16.gmra.mxu1 %v12742_v42 }
0x4287   : > { %v5900_v38 = vpop.permute.xlu1 %5899  ;;  %v6025_v28 = vpop.permute.xlu2 %6024 }
0x428f   : > { %v5857_v41 = vpop.permute.xlu1 %5856 }
0x4297   : > { %v5925_v3 = vpop.permute.xlu1 %5924 }
0x429f   : > { %v5904_v25 = vpop.permute.xlu1 %5903 }
0x42a7   : > { %v5862_v20 = vpop.permute.xlu1 %5861 }
0x42af   : > { %v5950_v27 = vpop.permute.xlu1 %5949 }
0x42b7   : > { %v11945_v22 = vpop.permute.xlu1 %5907 }
0x42bf   : > { %v5954_v45 = vpop.permute.xlu1 %5953 }
0x42c7   : > { %v6000_v24 = vpop.permute.xlu1 %5999 }
0x42cf   : > { %v11957_v31 = vpop.permute.xlu1 %5957 }
0x42ef   : > { %v11953_v52 = vpop.f32.mrf.mxu0  ;;  %v11955_v6 = vpop.f32.mrf.mxu1 }
0x42f6   : > { %v5827_v19 = vpop.f32.mrf.mxu2  ;;  %v5840_v18 = vpop.f32.mrf.mxu3 }
0x42f7   : > { %v5841_v26 = vadd.f32 %v5840_v18, %v5827_v19  ;;  %v5996_v19 = vpop.permute.xlu0 %5995  ;;  %v5791_v58 = vpop.f32.mrf.mxu0 }
0x42f8   : > { %v5810_v46 = vpop.f32.mrf.mxu1 }
0x42f9   : > { %v5864_v37 = vperm.slane %v5841_v26, 0  ;;  %v5885_v5 = vperm.slane %v5841_v26, 1  ;;  %v5910_v33 = vperm.slane %v5841_v26, 2  ;;  %v5935_v13 = vperm.slane %v5841_v26, 3 }
0x42fa   : > { %v5960_v62 = vperm.slane %v5841_v26, 4  ;;  %v5985_v42 = vperm.slane %v5841_v26, 5  ;;  %v6010_v53 = vperm.slane %v5841_v26, 6 }
0x42fb   : > { %v5865_v1 = vmul.f32 %v5864_v37, %v5847_v36  ;;  %v5886_v59 = vmul.f32 %v5885_v5, %v5871_v63  ;;  %v5866_v9 = vmul.f32 %v5864_v37, %v5852_v16  ;;  %v5887_v43 = vmul.f32 %v5885_v5, %v5875_v49 }
0x42fc   : > { %v5911_v21 = vmul.f32 %v5910_v33, %v5896_v17  ;;  %v5912_v29 = vmul.f32 %v5910_v33, %v5900_v38  ;;  %v5936_v11 = vmul.f32 %v5935_v13, %v5921_v44  ;;  %v5937_v32 = vmul.f32 %v5935_v13, %v5925_v3 }
0x42fd   : > { %v5890_v39 = vadd.f32 %v5886_v59, %v5865_v1  ;;  %v5891_v30 = vadd.f32 %v5887_v43, %v5866_v9  ;;  %v5867_v36 = vmul.f32 %v5864_v37, %v5857_v41  ;;  %v5888_v63 = vmul.f32 %v5885_v5, %v5879_v23  ;;  %v5983_v9 = vpop.permute.xlu1 %5982 }
0x42fe   : > { %v5829_v60 = vpop.f32.mrf.mxu2  ;;  %v5842_v4 = vpop.f32.mrf.mxu3  ;;  %v5961_v14 = vmul.f32 %v5960_v62, %v5946_v51  ;;  %v5962_v1 = vmul.f32 %v5960_v62, %v5950_v27  ;;  %v6035_v59 = vperm.slane %v5841_v26, 7  ;;  %v5913_v38 = vmul.f32 %v5910_v33, %v5904_v25 }
0x42ff   : > { %v5915_v18 = vadd.f32 %v5911_v21, %v5890_v39  ;;  %v5916_v2 = vadd.f32 %v5912_v29, %v5891_v30  ;;  %v5892_v17 = vadd.f32 %v5888_v63, %v5867_v36  ;;  %v5986_v43 = vmul.f32 %v5985_v42, %v5971_v35  ;;  %v6029_v30 = vpop.permute.xlu2 %6028 }
0x4300   : > { %v5987_v21 = vmul.f32 %v5985_v42, %v5975_v54  ;;  %v5938_v44 = vmul.f32 %v5935_v13, %v5929_v34  ;;  %v5868_v3 = vmul.f32 %v5864_v37, %v5862_v20  ;;  %v5889_v39 = vmul.f32 %v5885_v5, %v5883_v56  ;;  %v6004_v37 = vpop.permute.xlu0 %6003 }
0x4301   : > { %v5940_v16 = vadd.f32 %v5936_v11, %v5915_v18  ;;  %v5941_v49 = vadd.f32 %v5937_v32, %v5916_v2  ;;  %v5917_v29 = vadd.f32 %v5913_v38, %v5892_v17  ;;  %v6011_v23 = vmul.f32 %v6010_v53, %v5996_v19  ;;  %v5813_v18 = vpop.f32.mrf.mxu1 }
0x4302   : > { %v6012_v11 = vmul.f32 %v6010_v53, %v6000_v24  ;;  %v5963_v2 = vmul.f32 %v5960_v62, %v5954_v45  ;;  %v5893_v27 = vadd.f32 %v5889_v39, %v5868_v3  ;;  %v5914_v51 = vmul.f32 %v5910_v33, %v11945_v22  ;;  %v5794_v24 = vpop.f32.mrf.mxu0 }
0x4303   : > { %v5965_v60 = vadd.f32 %v5961_v14, %v5940_v16  ;;  %v5966_v4 = vadd.f32 %v5962_v1, %v5941_v49  ;;  %v5942_v32 = vadd.f32 %v5938_v44, %v5917_v29  ;;  %v6036_v14 = vmul.f32 %v6035_v59, %v11947_v8 }
0x4304   : > { %v6037_v35 = vmul.f32 %v6035_v59, %v6025_v28  ;;  %v5988_v34 = vmul.f32 %v5985_v42, %v11949_v15  ;;  %v5918_v20 = vadd.f32 %v5914_v51, %v5893_v27  ;;  %v5939_v56 = vmul.f32 %v5935_v13, %v11951_v7 }
0x4305   : > { %v5990_v50 = vadd.f32 %v5986_v43, %v5965_v60  ;;  %v5991_v41 = vadd.f32 %v5987_v21, %v5966_v4  ;;  %v5967_v54 = vadd.f32 %v5963_v2, %v5942_v32  ;;  %v6013_v36 = vmul.f32 %v6010_v53, %v6004_v37  ;;  %v6008_v15 = vpop.permute.xlu1 %6007 }
0x4306   : > { %v5943_v63 = vadd.f32 %v5939_v56, %v5918_v20  ;;  %v6038_v28 = vmul.f32 %v6035_v59, %v6029_v30  ;;  %v5989_v49 = vmul.f32 %v5985_v42, %v5983_v9  ;;  %v5809_v7 = vadd.f32 %v11955_v6, %v11953_v52 }
0x4307   : > { %v6015_v25 = vadd.f32 %v6011_v23, %v5990_v50  ;;  %v6016_v26 = vadd.f32 %v6012_v11, %v5991_v41  ;;  %v5992_v45 = vadd.f32 %v5988_v34, %v5967_v54  ;;  %v5964_v50 = vmul.f32 %v5960_v62, %v11957_v31  ;;  %v6033_v38 = vpop.permute.xlu2 %6032 }
0x4308   : > { %v6014_v17 = vmul.f32 %v6010_v53, %v6008_v15  ;;  %v5811_v60 = vadd.f32 %v5810_v46, %v5791_v58  ;;  %v6039_v43 = vmul.f32 %v6035_v59, %v6033_v38  ;;  %v6044_v62 = vmul.f32 %v5809_v7, %v11740_v40 }
0x4309   : > { %v6040_v5 = vadd.f32 %v6036_v14, %v6015_v25  ;;  %v6041_v19 = vadd.f32 %v6037_v35, %v6016_v26  ;;  %v6017_v8 = vadd.f32 %v6013_v36, %v5992_v45  ;;  %v5968_v16 = vadd.f32 %v5964_v50, %v5943_v63  ;;  %v5815_v6 = vpop.f32.mrf.mxu1 }
0x430a   : > { %v6045_v42 = vmul.f32 %v5811_v60, %v11747_v55  ;;  %v5796_v52 = vpop.f32.mrf.mxu0  ;;  %v5814_v46 = vadd.f32 %v5813_v18, %v5794_v24  ;;  %v12745_v26 = vmov 5   ;;  %v12746_v14 = vmov 6   ;;  %v12749_v24 = vld [vmem:[#allocation10_spill] sm:$0xff] }
0x430b   : > { %v6048_v22 = vadd.f32 1e-06, %v6040_v5  ;;  %v6049_v33 = vadd.f32 1e-06, %v6041_v19  ;;  %v6042_v13 = vadd.f32 %v6038_v28, %v6017_v8  ;;  %v5993_v1 = vadd.f32 %v5989_v49, %v5968_v16  ;;  %v12748_v5 = vld [vmem:[#allocation9_spill] sm:$0xff] }
0x430c   : > { %v5816_v53 = vadd.f32 %v5815_v6, %v5796_v52  ;;  %v6046_v30 = vmul.f32 %v5814_v46, %v11753_v47  ;;  %v12747_v35 = vmov 0   ;;  %v6175_v19 = vperm.slane %v12748_v5, 1 }
0x430d   : > { %10819 = vrcp.f32 %v6048_v22  ;;  %v6018_v4 = vadd.f32 %v6014_v17, %v5993_v1  ;;  %v6050_v31 = vadd.f32 1e-06, %v6042_v13  ;;  %v6176_v18 = vperm.slane %v12749_v24, 1 }
0x430e   : > { %10821 = vrcp.f32 %v6049_v33  ;;  %v6047_v55 = vmul.f32 %v5816_v53, %v11745_v0  ;;  %v6167_v45 = vperm.slane %v12748_v5, 0  ;;  %v6168_v36 = vperm.slane %v12749_v24, 0 }
0x430f   : > { %v6043_v21 = vadd.f32 %v6039_v43, %v6018_v4  ;;  %10823 = vrcp.f32 %v6050_v31  ;;  %v6185_v22 = vperm.slane %v12748_v5, 2  ;;  %v6186_v33 = vperm.slane %v12749_v24, 2 }
0x4310   : > { %v6195_v8 = vperm.slane %v12748_v5, 3  ;;  %v6196_v28 = vperm.slane %v12749_v24, 3  ;;  %v6205_v1 = vperm.slane %v12748_v5, 4  ;;  %v6206_v17 = vperm.slane %v12749_v24, 4 }
0x4311   : > { %v6051_v3 = vadd.f32 1e-06, %v6043_v21  ;;  %v6215_v31 = vperm.slane %v12748_v5, 5 }
0x4313   : > { %v10820_v29 = vpop.eup %10819  ;;  %10825 = vrcp.f32 %v6051_v3 }
0x4314   : > { %v10822_v9 = vpop.eup %10821  ;;  %v11968_v44 = vmul.f32 %v10820_v29, %v6044_v62  ;;  %v6216_v62 = vperm.slane %v12749_v24, 5 }
0x4315   : > { %v11970_v39 = vmul.f32 %v10822_v9, %v6045_v42  ;;  %v10824_v58 = vpop.eup %10823 }
0x4316   : > { %6107 = vxpose.xlu0.b32.start [1/4] (short) (narrow) %v11968_v44, 8  ;;  %v11980_v23 = vmul.f32 %v10824_v58, %v6046_v30  ;;  %v6225_v58 = vperm.slane %v12748_v5, 6  ;;  %v6236_v30 = vperm.slane %v12749_v24, 7 }
0x4317   : > { %v6060_v40 = vpack.c.bf16 %v11970_v39, %v11968_v44 }
0x4319   : > { %6062 = vxpose.xlu1.c.b16.start [1/2] (short) (narrow) %v6060_v40, 16  ;;  %v10826_v59 = vpop.eup %10825 }
0x431a   : > { %v11977_v41 = vmul.f32 %v10826_v59, %v6047_v55  ;;  %v6226_v55 = vperm.slane %v12749_v24, 6  ;;  %v6235_v59 = vperm.slane %v12748_v5, 7 }
0x431c   : > { %6154 = vmatpush.msra.mxu0 %v11977_v41  ;;  %v6061_v0 = vpack.c.bf16 %v11977_v41, %v11980_v23 }
0x431e   : > { %6108 = vxpose.xlu0.b32.cont [2/4] (short) (narrow) %v11970_v39, 8  ;;  %6155 = vmatpush.msra.mxu0 %v11980_v23 }
0x4320   : > { %6156 = vmatpush.msra.mxu0 %v11970_v39 }
0x4322   : > { %6157 = vmatpush.msra.mxu0 %v11968_v44 }
0x4326   : > { %6109 = vxpose.xlu0.b32.cont [3/4] (short) (narrow) %v11980_v23, 8 }
0x4329   : > { %6063 = vxpose.xlu1.c.b16.end [2/2] (short) (narrow) %v6061_v0, 16 }
0x432e   : > { %6110 = vxpose.xlu0.b32.end [4/4] (short) (narrow) %v11977_v41, 8 }
0x437c   : > { %10670 = vset.pattern.permute.xlu1 %v12704_v57 }
0x4395   : > { %10663 = vset.pattern.permute.xlu0 %v12731_v10 }
0x43ba   : > { %v6123_v47 = vpop.trf.xlu0 }
0x43bb   : > { %10363 = vmatmul.msk.f32.vlgmr.msra.gmra.mxu0 %vm315_vm0, %v6123_v47 }
0x43c5   : > { %v6070_v11 = vpop.trf.xlu1 }
0x43c6   : > { %10361 = vmatmul.msk.bf16.vlgmr.msrb.gmra.mxu2 %vm315_vm0, %v6070_v11  ;;  %10362 = vmatmul.msk.bf16.vlgmr.msrb.gmra.mxu3 %vm315_vm0, %v6070_v11 }
0x4438   : > { %v6159_v32 = vpop.f32.mrf.mxu0 }
0x4439   : > { %6232 = vperm.xlu0 %10663, %v6159_v32   ;;  %6164 = vperm.xlu2 %10656, %v6159_v32  }
0x4441   : > { %10672 = vset.pattern.permute.xlu0 %v12705_v48  ;;  %10657 = vset.pattern.permute.xlu2 %v12705_v48 }
0x4442   : > { %7280 = vperm.xlu0 %10672, %v11980_v23   ;;  %6172 = vperm.xlu2 %10657, %v6159_v32  }
0x4449   : > { %v11998_v2 = vpop.f32.mrf.mxu2  ;;  %v12000_v27 = vpop.f32.mrf.mxu3 }
0x444a   : > { %10675 = vset.pattern.permute.xlu0 %v12704_v57  ;;  %10658 = vset.pattern.permute.xlu2 %v12704_v57 }
0x444b   : > { %7305 = vperm.xlu0 %10675, %v11980_v23   ;;  %6182 = vperm.xlu2 %10658, %v6159_v32  }
0x4451   : > { %v6092_v51 = vpop.f32.mrf.mxu2  ;;  %v6105_v25 = vpop.f32.mrf.mxu3 }
0x4453   : > { %10680 = vset.pattern.permute.xlu0 %v12730_v61  ;;  %10659 = vset.pattern.permute.xlu2 %v12730_v61 }
0x4454   : > { %7330 = vperm.xlu0 %10680, %v11980_v23   ;;  %6192 = vperm.xlu2 %10659, %v6159_v32  }
0x445c   : > { %10685 = vset.pattern.permute.xlu0 %v12731_v10  ;;  %10660 = vset.pattern.permute.xlu2 %v12703_v12 }
0x445d   : > { %7422 = vperm.xlu0 %10685, %v11968_v44   ;;  %6202 = vperm.xlu2 %10660, %v6159_v32  }
0x4465   : > { %7426 = vperm.xlu0 %10685, %v11970_v39   ;;  %10661 = vset.pattern.permute.xlu2 %v12745_v26 }
0x4466   : > { %6212 = vperm.xlu2 %10661, %v6159_v32  }
0x446d   : > { %7430 = vperm.xlu0 %10685, %v11980_v23  }
0x446e   : > { %10662 = vset.pattern.permute.xlu2 %v12746_v14 }
0x446f   : > { %6222 = vperm.xlu2 %10662, %v6159_v32  }
0x4477   : > { %10664 = vset.pattern.permute.xlu2 %v12747_v35 }
0x4493   : > { %v6165_v54 = vpop.permute.xlu2 %6164 }
0x4494   : > { %v6169_v16 = vmul.f32 %v6167_v45, %v6165_v54  ;;  %v6170_v49 = vmul.f32 %v6168_v36, %v6165_v54  ;;  %v6241_v36 = vmul.f32 %v11998_v2, %v12748_v5 }
0x449c   : > { %v6173_v34 = vpop.permute.xlu2 %6172 }
0x449d   : > { %v6177_v63 = vmul.f32 %v6175_v19, %v6173_v34  ;;  %v6178_v50 = vmul.f32 %v6176_v18, %v6173_v34 }
0x449f   : > { %v6179_v38 = vadd.f32 %v6177_v63, %v6169_v16  ;;  %v6180_v60 = vadd.f32 %v6178_v50, %v6170_v49  ;;  %v6242_v50 = vmul.f32 %v12000_v27, %v12749_v24 }
0x44a5   : > { %v6183_v20 = vpop.permute.xlu2 %6182 }
0x44a6   : > { %v6187_v15 = vmul.f32 %v6185_v22, %v6183_v20  ;;  %v6188_v7 = vmul.f32 %v6186_v33, %v6183_v20 }
0x44a8   : > { %v6189_v21 = vadd.f32 %v6187_v15, %v6179_v38  ;;  %v6190_v29 = vadd.f32 %v6188_v7, %v6180_v60 }
0x44ab   : > { %v6233_v0 = vpop.permute.xlu0 %6232 }
0x44ac   : > { %v6237_v54 = vmul.f32 %v6235_v59, %v6233_v0  ;;  %v6238_v34 = vmul.f32 %v6236_v30, %v6233_v0 }
0x44ae   : > { %v6193_v56 = vpop.permute.xlu2 %6192 }
0x44af   : > { %v6197_v4 = vmul.f32 %v6195_v8, %v6193_v56  ;;  %v6198_v43 = vmul.f32 %v6196_v28, %v6193_v56  ;;  %v12750_v28 = vmov 1.0  }
0x44b1   : > { %v6199_v52 = vadd.f32 %v6197_v4, %v6189_v21  ;;  %v6200_v6 = vadd.f32 %v6198_v43, %v6190_v29 }
0x44b7   : > { %v6203_v37 = vpop.permute.xlu2 %6202 }
0x44b8   : > { %v6207_v42 = vmul.f32 %v6205_v1, %v6203_v37  ;;  %v6208_v9 = vmul.f32 %v6206_v17, %v6203_v37 }
0x44ba   : > { %v6209_v40 = vadd.f32 %v6207_v42, %v6199_v52  ;;  %v6210_v46 = vadd.f32 %v6208_v9, %v6200_v6 }
0x44c0   : > { %v6213_v13 = vpop.permute.xlu2 %6212 }
0x44c1   : > { %v6217_v3 = vmul.f32 %v6215_v31, %v6213_v13  ;;  %v6218_v53 = vmul.f32 %v6216_v62, %v6213_v13 }
0x44c3   : > { %v6219_v11 = vadd.f32 %v6217_v3, %v6209_v40  ;;  %v6220_v32 = vadd.f32 %v6218_v53, %v6210_v46 }
0x44c9   : > { %v6223_v47 = vpop.permute.xlu2 %6222 }
0x44ca   : > { %v6227_v51 = vmul.f32 %v6225_v58, %v6223_v47  ;;  %v6228_v25 = vmul.f32 %v6226_v55, %v6223_v47 }
0x44cc   : > { %v6229_v20 = vadd.f32 %v6227_v51, %v6219_v11  ;;  %v6230_v56 = vadd.f32 %v6228_v25, %v6220_v32 }
0x44ce   : > { %v6239_v37 = vadd.f32 %v6237_v54, %v6229_v20  ;;  %v6240_v19 = vadd.f32 %v6238_v34, %v6230_v56 }
0x44d0   : > { %v6243_v18 = vadd.f32 1e-06, %v6239_v37  ;;  %v6244_v45 = vadd.f32 1e-06, %v6240_v19  ;;  %v12752_v19 = vld [vmem:[#allocation7_spill] sm:$0xff] }
0x44d2   : > { %10827 = vrcp.f32 %v6243_v18 }
0x44d3   : > { %10829 = vrcp.f32 %v6244_v45 }
0x44d8   : > { %v10828_v63 = vpop.eup %10827 }
0x44d9   : > { %v10830_v22 = vpop.eup %10829  ;;  %v12036_v33 = vmul.f32 %v10828_v63, %v6241_v36 }
0x44da   : > { %v12038_v8 = vmul.f32 %v10830_v22, %v6242_v50  ;;  %v12753_v50 = vld [vmem:[#allocation8_spill] sm:$0xff] }
0x44db   : > { %6264 = vmatpush.xpose.msrb.mxu1 %v12036_v33 }
0x44dc   : > { %6284 = vmatpush.xpose.msra.mxu2 %v12038_v8 }
0x44de   : > { %6265 = vmatmul.f32.vlgmr.msrb.gmra.mxu1 %v12036_v33 }
0x44df   : > { %10366 = vmatpush.msk.msra.mxu1 %vm11135_vm15, %v12750_v28  ;;  %6285 = vmatmul.f32.vlgmr.msra.gmra.mxu2 %v12038_v8 }
0x455b   : > { %v6266_v2 = vpop.f32.mrf.mxu1 }
0x4562   : > { %v6286_v5 = vpop.f32.mrf.mxu2 }
0x4563   : > { %v12047_v27 = vadd.f32 %v6286_v5, %v6266_v2 }
0x4565   : > { %v6289_v24 = vmul.f32 %v12047_v27, %v12047_v27 }
0x4567   : > { %v6290_v49 = vsel %vm677_vm9, %v6289_v24, 0.0 }
0x4568   : > { %6291 = vadd.xlane.f32.xlu2 %v6290_v49 }
0x4580   : > { %7248 = vperm.xlu2 %10664, %v11968_v44  }
0x4588   : > { %10665 = vset.pattern.permute.xlu2 %v12705_v48 }
0x4589   : > { %7272 = vperm.xlu2 %10665, %v11968_v44  }
0x4591   : > { %10666 = vset.pattern.permute.xlu2 %v12704_v57 }
0x4592   : > { %7297 = vperm.xlu2 %10666, %v11968_v44  }
0x459a   : > { %10667 = vset.pattern.permute.xlu2 %v12747_v35 }
0x459b   : > { %7253 = vperm.xlu2 %10667, %v11970_v39  }
0x45a3   : > { %10668 = vset.pattern.permute.xlu2 %v12705_v48 }
0x45a4   : > { %7276 = vperm.xlu2 %10668, %v11970_v39  }
0x45ac   : > { %10669 = vset.pattern.permute.xlu2 %v12730_v61 }
0x45ad   : > { %7322 = vperm.xlu2 %10669, %v11968_v44  }
0x45b5   : > { %10671 = vset.pattern.permute.xlu2 %v12747_v35 }
0x45b6   : > { %7258 = vperm.xlu2 %10671, %v11980_v23  }
0x45be   : > { %10673 = vset.pattern.permute.xlu2 %v12703_v12 }
0x45bf   : > { %7347 = vperm.xlu2 %10673, %v11968_v44  }
0x45c7   : > { %10674 = vset.pattern.permute.xlu2 %v12730_v61 }
0x45c8   : > { %7326 = vperm.xlu2 %10674, %v11970_v39  }
0x45d0   : > { %10677 = vset.pattern.permute.xlu2 %v12747_v35 }
0x45d1   : > { %7263 = vperm.xlu2 %10677, %v11977_v41  }
0x45d9   : > { %10679 = vset.pattern.permute.xlu2 %v12703_v12 }
0x45da   : > { %7351 = vperm.xlu2 %10679, %v11970_v39  }
0x45db   : > { %v6292_v15 = vpop.xlane.xlu2 %6291 }
0x45dc   : > { %v6293_v7 = vrot.slane %v6292_v15, 4 }
0x45de   : > { %v6294_v13 = vadd.f32 %v6293_v7, %v6292_v15 }
0x45e0   : > { %v6295_v1 = vrot.slane %v6294_v13, 2 }
0x45e2   : > { %v6296_v17 = vadd.f32 %v6295_v1, %v6294_v13  ;;  %10682 = vset.pattern.permute.xlu2 %v12704_v57 }
0x45e3   : > { %7309 = vperm.xlu2 %10682, %v11977_v41  }
0x45e4   : > { %v6297_v38 = vrot.slane %v6296_v17, 1 }
0x45e6   : > { %v6298_v60 = vadd.f32 %v6297_v38, %v6296_v17 }
0x45e8   : > { %10831 = vrsqrt.f32 %v6298_v60  ;;  %vm6306_vm2 = vcmp.eq.f32.partialorder %v6298_v60, inf  ;;  %v6309_v9 = vand.u32 2147483648, %v6298_v60  ;;  %vm6308_vm3 = vcmp.eq.f32.partialorder %v6298_v60, 0.0 }
0x45eb   : > { %10684 = vset.pattern.permute.xlu2 %v12703_v12 }
0x45ec   : > { %7355 = vperm.xlu2 %10684, %v11980_v23  }
0x45ee   : > { %v10832_v4 = vpop.eup %10831 }
0x45ef   : > { %v6300_v43 = vmul.f32 %v10832_v4, %v6298_v60 }
0x45f1   : > { %v6301_v31 = vmul.f32 %v10832_v4, %v6300_v43 }
0x45f3   : > { %v6302_v62 = vmul.f32 0.5, %v6301_v31 }
0x45f4   : > { %10687 = vset.pattern.permute.xlu2 %v12746_v14 }
0x45f5   : > { %v6303_v21 = vsub.f32 1.5, %v6302_v62  ;;  %7401 = vperm.xlu2 %10687, %v11970_v39  }
0x45f7   : > { %v6304_v29 = vmul.f32 %v10832_v4, %v6303_v21 }
0x45f9   : > { %v6305_v42 = vmul.f32 %v6304_v29, %v6298_v60 }
0x45fb   : > { %v6307_v52 = vsel %vm6306_vm2, %v6298_v60, %v6305_v42 }
0x45fc   : > { %v6310_v6 = vsel %vm6308_vm3, %v6309_v9, %v6307_v52 }
0x45fd   : > { %v6311_v3 = vadd.f32 1e-30, %v6310_v6  ;;  %10689 = vset.pattern.permute.xlu2 %v12703_v12 }
0x45fe   : > { %7359 = vperm.xlu2 %10689, %v11977_v41  }
0x45ff   : > { %10833 = vrcp.f32 %v6311_v3  ;;  %v6323_v59 = vand.u32 2147483648, %v6311_v3  ;;  %v6321_v47 = vand.u32 2147483647, %v6311_v3  ;;  %vm6317_vm5 = vweird.f32 %v6311_v3 }
0x4600   : > { %10835 = vrsqrt.f32 %v6311_v3  ;;  %vm7160_vm8 = vcmp.eq.f32.partialorder %v6311_v3, inf  ;;  %vm7162_vm10 = vcmp.eq.f32.partialorder %v6311_v3, 0.0 }
0x4601   : > { %v6324_v51 = vor.u32 1.1754944e-38, %v6323_v59  ;;  %vm6322_vm7 = vcmp.eq.f32.partialorder %v6321_v47, 8.507059e+37 }
0x4605   : > { %v10834_v53 = vpop.eup %10833 }
0x4606   : > { %v10836_v40 = vpop.eup %10835  ;;  %10691 = vset.pattern.permute.xlu2 %v12745_v26  ;;  %v6313_v46 = vmul.f32 %v10834_v53, %v6311_v3  ;;  %vm6318_vm4 = vweird.f32 %v10834_v53 }
0x4607   : > { %7384 = vperm.xlu2 %10691, %v11977_v41   ;;  %v7154_v58 = vmul.f32 %v10836_v40, %v6311_v3  ;;  %vm6319_vm6 = vmor %vm6317_vm5, %vm6318_vm4 }
0x4608   : > { %v6314_v55 = vsub.f32 1.0, %v6313_v46 }
0x4609   : > { %v7155_v30 = vmul.f32 %v10836_v40, %v7154_v58 }
0x460a   : > { %v6315_v0 = vmul.f32 %v10834_v53, %v6314_v55 }
0x460b   : > { %v7156_v11 = vmul.f32 0.5, %v7155_v30 }
0x460c   : > { %v6316_v32 = vadd.f32 %v10834_v53, %v6315_v0 }
0x460d   : > { %v7157_v25 = vsub.f32 1.5, %v7156_v11 }
0x460e   : > { %v6320_v54 = vsel %vm6319_vm6, %v10834_v53, %v6316_v32 }
0x460f   : > { %10692 = vset.pattern.permute.xlu2 %v12731_v10  ;;  %v6325_v34 = vsel %vm6322_vm7, %v6324_v51, %v6320_v54  ;;  %v7158_v20 = vmul.f32 %v10836_v40, %v7157_v25 }
0x4610   : > { %7434 = vperm.xlu2 %10692, %v11977_v41   ;;  %v6326_v56 = vmul.f32 %v6325_v34, %v12047_v27 }
0x4611   : > { %v7159_v37 = vmul.f32 %v7158_v20, %v6311_v3 }
0x4612   : > { %6342 = vmatpush.msra.mxu3 %v6326_v56 }
0x4613   : > { %10364 = vmatmul.msk.f32.vlgmr.msra.gmra.mxu3 %vm677_vm9, %v12752_v19  ;;  %v7161_v18 = vsel %vm7160_vm8, %v6311_v3, %v7159_v37 }
0x4614   : > { %v12088_v45 = vsel %vm7162_vm10, %v6323_v59, %v7161_v18 }
0x4618   : > { %10693 = vset.pattern.permute.xlu2 %v12747_v35 }
0x4696   : > { %v6344_v36 = vpop.f32.mrf.mxu3 }
0x4697   : > { %v6347_v63 = vmul.f32 0.5, %v6344_v36 }
0x4699   : > { %v6348_v22 = vsub.f32 %v12753_v50, %v6347_v63 }
0x469b   : > { %6367 = vmatpush.msrb.mxu0 %v6348_v22  ;;  %10367 = vmatmul.msk.f32.vlgmr.msra.gmra.mxu1 %vm677_vm9, %v6348_v22 }
0x469c   : > { %10365 = vmatmul.msk.f32.vlgmr.msrb.gmra.mxu0 %vm677_vm9, %v6326_v56 }
0x4718   : > { %v6392_v2 = vpop.f32.mrf.mxu1 }
0x4719   : > { %v6369_v5 = vpop.f32.mrf.mxu0  ;;  %6461 = vmatpush.msra.mxu0 %v6392_v2 }
0x471a   : > { %6413 = vmatpush.msrb.mxu2 %v6369_v5 }
0x471b   : > { %10368 = vmatmul.msk.f32.vlgmr.msrb.gmra.mxu2 %vm677_vm9, %v6392_v2 }
0x479e   : > { %v6415_v27 = vpop.f32.mrf.mxu2 }
0x479f   : > { %v6418_v24 = vmul.f32 0.5, %v6415_v27 }
0x47a1   : > { %v6419_v49 = vsub.f32 %v12753_v50, %v6418_v24 }
0x47a3   : > { %6438 = vmatpush.msrb.mxu3 %v6419_v49  ;;  %10370 = vmatmul.msk.f32.vlgmr.msra.gmra.mxu0 %vm677_vm9, %v6419_v49 }
0x47a4   : > { %10369 = vmatmul.msk.f32.vlgmr.msrb.gmra.mxu3 %vm677_vm9, %v6369_v5 }
0x4820   : > { %v6463_v15 = vpop.f32.mrf.mxu0 }
0x4821   : > { %6532 = vmatpush.msra.mxu3 %v6463_v15 }
0x4827   : > { %v6440_v7 = vpop.f32.mrf.mxu3 }
0x4828   : > { %6484 = vmatpush.msrb.mxu1 %v6440_v7 }
0x4829   : > { %10371 = vmatmul.msk.f32.vlgmr.msrb.gmra.mxu1 %vm677_vm9, %v6463_v15 }
0x48a6   : > { %v6486_v13 = vpop.f32.mrf.mxu1 }
0x48a7   : > { %v6489_v1 = vmul.f32 0.5, %v6486_v13 }
0x48a9   : > { %v6490_v17 = vsub.f32 %v12753_v50, %v6489_v1 }
0x48ab   : > { %6509 = vmatpush.msra.mxu2 %v6490_v17  ;;  %10373 = vmatmul.msk.f32.vlgmr.msra.gmra.mxu3 %vm677_vm9, %v6490_v17 }
0x48ac   : > { %10372 = vmatmul.msk.f32.vlgmr.msra.gmra.mxu2 %vm677_vm9, %v6440_v7 }
0x492e   : > { %v6534_v38 = vpop.f32.mrf.mxu3 }
0x492f   : > { %v6511_v60 = vpop.f32.mrf.mxu2  ;;  %6603 = vmatpush.msrb.mxu2 %v6534_v38 }
0x4930   : > { %6555 = vmatpush.msrb.mxu0 %v6511_v60 }
0x4931   : > { %10374 = vmatmul.msk.f32.vlgmr.msrb.gmra.mxu0 %vm677_vm9, %v6534_v38 }
0x49ae   : > { %v6557_v4 = vpop.f32.mrf.mxu0 }
0x49af   : > { %v6560_v43 = vmul.f32 0.5, %v6557_v4 }
0x49b1   : > { %v6561_v31 = vsub.f32 %v12753_v50, %v6560_v43 }
0x49b3   : > { %6580 = vmatpush.msra.mxu1 %v6561_v31  ;;  %10376 = vmatmul.msk.f32.vlgmr.msrb.gmra.mxu2 %vm677_vm9, %v6561_v31 }
0x49b4   : > { %10375 = vmatmul.msk.f32.vlgmr.msra.gmra.mxu1 %vm677_vm9, %v6511_v60 }
0x4a31   : > { %v6582_v62 = vpop.f32.mrf.mxu1 }
0x4a32   : > { %6626 = vmatpush.msrb.mxu3 %v6582_v62 }
0x4a36   : > { %v6605_v21 = vpop.f32.mrf.mxu2 }
0x4a37   : > { %10377 = vmatmul.msk.f32.vlgmr.msrb.gmra.mxu3 %vm677_vm9, %v6605_v21  ;;  %6674 = vmatpush.msrb.mxu1 %v6605_v21 }
0x4aba   : > { %v6628_v29 = vpop.f32.mrf.mxu3 }
0x4abb   : > { %v6631_v42 = vmul.f32 0.5, %v6628_v29 }
0x4abd   : > { %v6632_v9 = vsub.f32 %v12753_v50, %v6631_v42 }
0x4abf   : > { %6651 = vmatpush.msra.mxu0 %v6632_v9  ;;  %10379 = vmatmul.msk.f32.vlgmr.msrb.gmra.mxu1 %vm677_vm9, %v6632_v9 }
0x4ac0   : > { %10378 = vmatmul.msk.f32.vlgmr.msra.gmra.mxu0 %vm677_vm9, %v6582_v62 }
0x4b3c   : > { %v6676_v52 = vpop.f32.mrf.mxu1 }
0x4b3d   : > { %v6653_v6 = vpop.f32.mrf.mxu0  ;;  %6745 = vmatpush.msrb.mxu0 %v6676_v52 }
0x4b3e   : > { %6697 = vmatpush.msra.mxu2 %v6653_v6 }
0x4b3f   : > { %10380 = vmatmul.msk.f32.vlgmr.msra.gmra.mxu2 %vm677_vm9, %v6676_v52 }
0x4bc2   : > { %v6699_v3 = vpop.f32.mrf.mxu2 }
0x4bc3   : > { %v6702_v53 = vmul.f32 0.5, %v6699_v3 }
0x4bc5   : > { %v6703_v40 = vsub.f32 %v12753_v50, %v6702_v53 }
0x4bc7   : > { %6722 = vmatpush.msra.mxu3 %v6703_v40  ;;  %10382 = vmatmul.msk.f32.vlgmr.msrb.gmra.mxu0 %vm677_vm9, %v6703_v40 }
0x4bc8   : > { %10381 = vmatmul.msk.f32.vlgmr.msra.gmra.mxu3 %vm677_vm9, %v6653_v6 }
0x4c44   : > { %v6747_v46 = vpop.f32.mrf.mxu0 }
0x4c45   : > { %6816 = vmatpush.msrb.mxu3 %v6747_v46 }
0x4c4b   : > { %v6724_v58 = vpop.f32.mrf.mxu3 }
0x4c4c   : > { %6768 = vmatpush.msra.mxu1 %v6724_v58 }
0x4c4d   : > { %10383 = vmatmul.msk.f32.vlgmr.msra.gmra.mxu1 %vm677_vm9, %v6747_v46  ;;  %v7249_v46 = vpop.permute.xlu2 %7248 }
0x4cca   : > { %v6770_v55 = vpop.f32.mrf.mxu1 }
0x4ccb   : > { %v6773_v59 = vmul.f32 0.5, %v6770_v55 }
0x4ccd   : > { %v6774_v30 = vsub.f32 %v12753_v50, %v6773_v59  ;;  %v12757_v59 = vld [vmem:[#allocation4_spill] sm:$0xff] }
0x4ccf   : > { %6793 = vmatpush.msrb.mxu2 %v6774_v30  ;;  %10385 = vmatmul.msk.f32.vlgmr.msrb.gmra.mxu3 %vm677_vm9, %v6774_v30  ;;  %v12759_v30 = vld [vmem:[#allocation5_spill] sm:$0xff] }
0x4cd0   : > { %10384 = vmatmul.msk.f32.vlgmr.msrb.gmra.mxu2 %vm677_vm9, %v6724_v58 }
0x4d52   : > { %v6818_v0 = vpop.f32.mrf.mxu3 }
0x4d53   : > { %v6795_v47 = vpop.f32.mrf.mxu2  ;;  %6887 = vmatpush.msra.mxu2 %v6818_v0 }
0x4d54   : > { %6839 = vmatpush.msra.mxu0 %v6795_v47 }
0x4d55   : > { %10386 = vmatmul.msk.f32.vlgmr.msra.gmra.mxu0 %vm677_vm9, %v6818_v0 }
0x4dd2   : > { %v6841_v11 = vpop.f32.mrf.mxu0 }
0x4dd3   : > { %v6844_v32 = vmul.f32 0.5, %v6841_v11 }
0x4dd5   : > { %v6845_v51 = vsub.f32 %v12753_v50, %v6844_v32 }
0x4dd7   : > { %6864 = vmatpush.msrb.mxu1 %v6845_v51  ;;  %10388 = vmatmul.msk.f32.vlgmr.msra.gmra.mxu2 %vm677_vm9, %v6845_v51 }
0x4dd8   : > { %10387 = vmatmul.msk.f32.vlgmr.msrb.gmra.mxu1 %vm677_vm9, %v6795_v47 }
0x4e55   : > { %v6866_v25 = vpop.f32.mrf.mxu1 }
0x4e56   : > { %6910 = vmatpush.msra.mxu3 %v6866_v25 }
0x4e5a   : > { %v6889_v54 = vpop.f32.mrf.mxu2 }
0x4e5b   : > { %10389 = vmatmul.msk.f32.vlgmr.msra.gmra.mxu3 %vm677_vm9, %v6889_v54  ;;  %6958 = vmatpush.msra.mxu1 %v6889_v54 }
0x4ede   : > { %v6912_v34 = vpop.f32.mrf.mxu3 }
0x4edf   : > { %v6915_v20 = vmul.f32 0.5, %v6912_v34 }
0x4ee1   : > { %v6916_v56 = vsub.f32 %v12753_v50, %v6915_v20 }
0x4ee3   : > { %6935 = vmatpush.msrb.mxu0 %v6916_v56  ;;  %10391 = vmatmul.msk.f32.vlgmr.msra.gmra.mxu1 %vm677_vm9, %v6916_v56 }
0x4ee4   : > { %10390 = vmatmul.msk.f32.vlgmr.msrb.gmra.mxu0 %vm677_vm9, %v6866_v25 }
0x4f60   : > { %v6960_v37 = vpop.f32.mrf.mxu1 }
0x4f61   : > { %v6937_v18 = vpop.f32.mrf.mxu0  ;;  %7029 = vmatpush.msra.mxu0 %v6960_v37 }
0x4f62   : > { %6981 = vmatpush.msrb.mxu2 %v6937_v18 }
0x4f63   : > { %10392 = vmatmul.msk.f32.vlgmr.msrb.gmra.mxu2 %vm677_vm9, %v6960_v37 }
0x4fe6   : > { %v6983_v36 = vpop.f32.mrf.mxu2 }
0x4fe7   : > { %v6986_v63 = vmul.f32 0.5, %v6983_v36  ;;  %v7281_v36 = vpop.permute.xlu0 %7280 }
0x4fe9   : > { %v6987_v22 = vsub.f32 %v12753_v50, %v6986_v63 }
0x4feb   : > { %7006 = vmatpush.msrb.mxu3 %v6987_v22  ;;  %10394 = vmatmul.msk.f32.vlgmr.msra.gmra.mxu0 %vm677_vm9, %v6987_v22 }
0x4fec   : > { %10393 = vmatmul.msk.f32.vlgmr.msrb.gmra.mxu3 %vm677_vm9, %v6937_v18 }
0x5068   : > { %v7031_v2 = vpop.f32.mrf.mxu0 }
0x5069   : > { %7100 = vmatpush.msra.mxu3 %v7031_v2 }
0x506f   : > { %v7008_v5 = vpop.f32.mrf.mxu3 }
0x5070   : > { %7052 = vmatpush.msrb.mxu1 %v7008_v5 }
0x5071   : > { %10395 = vmatmul.msk.f32.vlgmr.msrb.gmra.mxu1 %vm677_vm9, %v7031_v2  ;;  %v7306_v2 = vpop.permute.xlu0 %7305 }
0x50ee   : > { %v7054_v27 = vpop.f32.mrf.mxu1 }
0x50ef   : > { %v7057_v24 = vmul.f32 0.5, %v7054_v27 }
0x50f1   : > { %v7058_v49 = vsub.f32 %v12753_v50, %v7057_v24  ;;  %v7331_v24 = vpop.permute.xlu0 %7330 }
0x50f3   : > { %7077 = vmatpush.msra.mxu2 %v7058_v49  ;;  %10397 = vmatmul.msk.f32.vlgmr.msra.gmra.mxu3 %vm677_vm9, %v7058_v49 }
0x50f4   : > { %10396 = vmatmul.msk.f32.vlgmr.msra.gmra.mxu2 %vm677_vm9, %v7008_v5 }
0x5176   : > { %v7102_v7 = vpop.f32.mrf.mxu3 }
0x5177   : > { %v7079_v15 = vpop.f32.mrf.mxu2 }
0x5178   : > { %7123 = vmatpush.msrb.mxu0 %v7079_v15 }
0x5179   : > { %10398 = vmatmul.msk.f32.vlgmr.msrb.gmra.mxu0 %vm677_vm9, %v7102_v7  ;;  %v7423_v7 = vpop.permute.xlu0 %7422 }
0x51f6   : > { %v7125_v13 = vpop.f32.mrf.mxu0 }
0x51f7   : > { %v7128_v1 = vmul.f32 0.5, %v7125_v13 }
0x51f9   : > { %v7129_v17 = vsub.f32 %v12753_v50, %v7128_v1  ;;  %v7427_v50 = vpop.permute.xlu0 %7426 }
0x51fb   : > { %7148 = vmatpush.msra.mxu1 %v7129_v17 }
0x51fc   : > { %10399 = vmatmul.msk.f32.vlgmr.msra.gmra.mxu1 %vm677_vm9, %v7079_v15 }
0x5279   : > { %v7150_v38 = vpop.f32.mrf.mxu1 }
0x527a   : > { %v7165_v60 = vmul.f32 %v12752_v19, %v7150_v38 }
0x527c   : > { %v7166_v4 = vsel %vm677_vm9, %v7165_v60, 0.0 }
0x527d   : > { %7167 = vadd.xlane.f32.xlu1 %v7166_v4 }
0x5296   : > { %7301 = vperm.xlu1 %10670, %v11970_v39  }
0x529e   : > { %10676 = vset.pattern.permute.xlu1 %v12745_v26 }
0x529f   : > { %7372 = vperm.xlu1 %10676, %v11968_v44  }
0x52a7   : > { %10678 = vset.pattern.permute.xlu1 %v12705_v48 }
0x52a8   : > { %7284 = vperm.xlu1 %10678, %v11977_v41  }
0x52b0   : > { %10681 = vset.pattern.permute.xlu1 %v12746_v14 }
0x52b1   : > { %7397 = vperm.xlu1 %10681, %v11968_v44  }
0x52b9   : > { %10683 = vset.pattern.permute.xlu1 %v12745_v26 }
0x52ba   : > { %7376 = vperm.xlu1 %10683, %v11970_v39  }
0x52c2   : > { %10686 = vset.pattern.permute.xlu1 %v12730_v61 }
0x52c3   : > { %7334 = vperm.xlu1 %10686, %v11977_v41  }
0x52cb   : > { %10688 = vset.pattern.permute.xlu1 %v12745_v26 }
0x52cc   : > { %7380 = vperm.xlu1 %10688, %v11980_v23  }
0x52d4   : > { %10690 = vset.pattern.permute.xlu1 %v12746_v14 }
0x52d5   : > { %7405 = vperm.xlu1 %10690, %v11980_v23  }
0x52dd   : > { %7409 = vperm.xlu1 %10690, %v11977_v41  }
0x52f0   : > { %v7168_v43 = vpop.xlane.xlu1 %7167 }
0x52f1   : > { %v7169_v31 = vrot.slane %v7168_v43, 4 }
0x52f3   : > { %v7170_v62 = vadd.f32 %v7169_v31, %v7168_v43 }
0x52f5   : > { %v7171_v21 = vrot.slane %v7170_v62, 2 }
0x52f7   : > { %v7172_v29 = vadd.f32 %v7171_v21, %v7170_v62 }
0x52f9   : > { %v7173_v42 = vrot.slane %v7172_v29, 1 }
0x52fb   : > { %v7174_v9 = vadd.f32 %v7173_v42, %v7172_v29 }
0x52fd   : > { %v7175_v52 = vmul.f32 %v7174_v9, %v12088_v45  ;;  %v12756_v45 = vld [vmem:[#allocation2_spill] sm:$0xff] }
0x52ff   : > { %v7176_v6 = vadd.f32 1e-06, %v7175_v52 }
0x5301   : > { %10837 = vrcp.f32 %v7176_v6 }
0x5307   : > { %v10838_v3 = vpop.eup %10837 }
0x5308   : > { %v12157_v53 = vmul.f32 %v10838_v3, %v12036_v33  ;;  %v12160_v40 = vmul.f32 %v10838_v3, %v12038_v8  ;;  %v12758_v33 = vld [vmem:[#allocation3_spill] sm:$0xff]  ;;  %v7273_v8 = vpop.permute.xlu2 %7272  ;;  %v7302_v54 = vpop.permute.xlu1 %7301 }
0x530a   : > { %12754 = vst [vmem:[#allocation9_spill] sm:$0xff] %v12157_v53  ;;  %v7180_v58 = vpack.c.bf16 %v12157_v53, %v12157_v53  ;;  %v7181_v55 = vpack.c.bf16 %v12160_v40, %v12160_v40 }
0x530b   : > { %12755 = vst [vmem:[#allocation10_spill] sm:$0xff] %v12160_v40 }
0x530c   : > { %7189 = vmatpush.bf16.xpose.msrb.mxu2 %v7180_v58  ;;  %7208 = vmatpush.bf16.xpose.msrb.mxu3 %v7181_v55 }
0x530d   : > { %7227 = vmatpush.bf16.xpose.msra.mxu0 %v7180_v58  ;;  %7240 = vmatpush.bf16.xpose.msrb.mxu1 %v7181_v55 }
0x5310   : > { %v7298_v0 = vpop.permute.xlu2 %7297 }
0x5311   : > { %v7373_v20 = vpop.permute.xlu1 %7372 }
0x5313   : > { %7190 = vmatmul.bf16.vlgmr.msrb.gmra.mxu2 %v12758_v33  ;;  %7209 = vmatmul.bf16.vlgmr.msrb.gmra.mxu3 %v12759_v30 }
0x5314   : > { %7228 = vmatmul.bf16.vlgmr.msra.gmra.mxu0 %v7180_v58  ;;  %7241 = vmatmul.bf16.vlgmr.msrb.gmra.mxu1 %v7181_v55 }
0x5315   : > { %7489 = vmatpush.bf16.msrb.mxu0 %v12756_v45  ;;  %7502 = vmatpush.bf16.msra.mxu1 %v12757_v59 }
0x5318   : > { %v7254_v47 = vpop.permute.xlu2 %7253 }
0x5319   : > { %7490 = vmatpush.bf16.msrb.mxu0 %v12758_v33  ;;  %7503 = vmatpush.bf16.msra.mxu1 %v12759_v30 }
0x531a   : > { %v7285_v37 = vpop.permute.xlu1 %7284 }
0x5320   : > { %v7277_v11 = vpop.permute.xlu2 %7276 }
0x5323   : > { %7195 = vmatmul.bf16.gmra.mxu2 %v12756_v45  ;;  %7214 = vmatmul.bf16.gmra.mxu3 %v12757_v59  ;;  %v7398_v63 = vpop.permute.xlu1 %7397 }
0x5328   : > { %v7323_v32 = vpop.permute.xlu2 %7322 }
0x532c   : > { %v7377_v5 = vpop.permute.xlu1 %7376 }
0x5330   : > { %v7259_v51 = vpop.permute.xlu2 %7258 }
0x5335   : > { %v12174_v49 = vpop.permute.xlu1 %7334 }
0x5338   : > { %v7348_v25 = vpop.permute.xlu2 %7347 }
0x533e   : > { %v7381_v38 = vpop.permute.xlu1 %7380 }
0x5340   : > { %v7327_v34 = vpop.permute.xlu2 %7326 }
0x5348   : > { %v7264_v56 = vpop.permute.xlu2 %7263 }
0x5350   : > { %v7352_v18 = vpop.permute.xlu2 %7351 }
0x5358   : > { %v7310_v22 = vpop.permute.xlu2 %7309 }
0x5360   : > { %v7356_v27 = vpop.permute.xlu2 %7355 }
0x5368   : > { %v7402_v15 = vpop.permute.xlu2 %7401 }
0x5370   : > { %v7360_v31 = vpop.permute.xlu2 %7359 }
0x5391   : > { %v7229_v13 = vpop.f32.mrf.mxu0  ;;  %v7242_v1 = vpop.f32.mrf.mxu1 }
0x5392   : > { %v7243_v17 = vadd.f32 %v7242_v1, %v7229_v13 }
0x5394   : > { %v7266_v60 = vperm.slane %v7243_v17, 0  ;;  %v7287_v4 = vperm.slane %v7243_v17, 1  ;;  %v7312_v43 = vperm.slane %v7243_v17, 2  ;;  %v7337_v9 = vperm.slane %v7243_v17, 3 }
0x5395   : > { %v7362_v52 = vperm.slane %v7243_v17, 4  ;;  %v7387_v30 = vperm.slane %v7243_v17, 5  ;;  %v7412_v19 = vperm.slane %v7243_v17, 6  ;;  %v12180_v16 = vperm.slane %v7243_v17, 7 }
0x5396   : > { %v12176_v62 = vpop.f32.mrf.mxu2  ;;  %v12178_v21 = vpop.f32.mrf.mxu3  ;;  %v7267_v29 = vmul.f32 %v7266_v60, %v7249_v46  ;;  %v7288_v42 = vmul.f32 %v7287_v4, %v7273_v8  ;;  %v7313_v3 = vmul.f32 %v7312_v43, %v7298_v0  ;;  %v7268_v58 = vmul.f32 %v7266_v60, %v7254_v47 }
0x5397   : > { %v7289_v55 = vmul.f32 %v7287_v4, %v7277_v11  ;;  %v7338_v59 = vmul.f32 %v7337_v9, %v7323_v32  ;;  %v7314_v10 = vmul.f32 %v7312_v43, %v7302_v54  ;;  %v7269_v28 = vmul.f32 %v7266_v60, %v7259_v51  ;;  %v7406_v0 = vpop.permute.xlu1 %7405 }
0x5398   : > { %v7292_v6 = vadd.f32 %v7288_v42, %v7267_v29  ;;  %v7290_v46 = vmul.f32 %v7287_v4, %v7281_v36  ;;  %v7363_v40 = vmul.f32 %v7362_v52, %v7348_v25  ;;  %v7339_v29 = vmul.f32 %v7337_v9, %v7327_v34 }
0x5399   : > { %v7231_v33 = vpop.f32.mrf.mxu0  ;;  %v7244_v13 = vpop.f32.mrf.mxu1  ;;  %v7293_v45 = vadd.f32 %v7289_v55, %v7268_v58  ;;  %v7388_v47 = vmul.f32 %v7387_v30, %v7373_v20  ;;  %v7364_v11 = vmul.f32 %v7362_v52, %v7352_v18  ;;  %v7270_v54 = vmul.f32 %v7266_v60, %v7264_v56 }
0x539a   : > { %v7317_v1 = vadd.f32 %v7313_v3, %v7292_v6  ;;  %v7294_v42 = vadd.f32 %v7290_v46, %v7269_v28  ;;  %v7315_v33 = vmul.f32 %v7312_v43, %v7306_v2  ;;  %v7291_v58 = vmul.f32 %v7287_v4, %v7285_v37  ;;  %v7385_v55 = vpop.permute.xlu2 %7384  ;;  %v7431_v46 = vpop.permute.xlu0 %7430 }
0x539b   : > { %v7318_v53 = vadd.f32 %v7314_v10, %v7293_v45  ;;  %v7413_v17 = vmul.f32 %v7412_v19, %v7398_v63  ;;  %v7389_v35 = vmul.f32 %v7387_v30, %v7377_v5  ;;  %v7340_v36 = vmul.f32 %v7337_v9, %v7331_v24 }
0x539c   : > { %v7342_v8 = vadd.f32 %v7338_v59, %v7317_v1  ;;  %v7319_v51 = vadd.f32 %v7315_v33, %v7294_v42  ;;  %v7295_v10 = vadd.f32 %v7291_v58, %v7270_v54  ;;  %v7316_v45 = vmul.f32 %v7312_v43, %v7310_v22 }
0x539d   : > { %v7343_v3 = vadd.f32 %v7339_v29, %v7318_v53  ;;  %v7438_v34 = vmul.f32 %v12180_v16, %v7423_v7  ;;  %v7414_v20 = vmul.f32 %v7412_v19, %v7402_v15  ;;  %v7365_v18 = vmul.f32 %v7362_v52, %v7356_v27 }
0x539e   : > { %v7367_v13 = vadd.f32 %v7363_v40, %v7342_v8  ;;  %v7193_v6 = vpop.f32.mrf.mxu2  ;;  %v7212_v32 = vpop.f32.mrf.mxu3  ;;  %v7344_v28 = vadd.f32 %v7340_v36, %v7319_v51  ;;  %v7320_v1 = vadd.f32 %v7316_v45, %v7295_v10  ;;  %v7341_v53 = vmul.f32 %v7337_v9, %v12174_v49 }
0x539f   : > { %v7368_v25 = vadd.f32 %v7364_v11, %v7343_v3  ;;  %v7439_v56 = vmul.f32 %v12180_v16, %v7427_v50  ;;  %v7390_v63 = vmul.f32 %v7387_v30, %v7381_v38  ;;  %v7366_v4 = vmul.f32 %v7362_v52, %v7360_v31 }
0x53a0   : > { %v7392_v59 = vadd.f32 %v7388_v47, %v7367_v13  ;;  %v7369_v37 = vadd.f32 %v7365_v18, %v7344_v28  ;;  %v7345_v60 = vadd.f32 %v7341_v53, %v7320_v1  ;;  %v7415_v43 = vmul.f32 %v7412_v19, %v7406_v0  ;;  %v7410_v47 = vpop.permute.xlu1 %7409 }
0x53a1   : > { %v7393_v2 = vadd.f32 %v7389_v35, %v7368_v25  ;;  %v7391_v35 = vmul.f32 %v7387_v30, %v7385_v55  ;;  %v7440_v49 = vmul.f32 %v12180_v16, %v7431_v46  ;;  %v7416_v9 = vmul.f32 %v7412_v19, %v7410_v47 }
0x53a2   : > { %v7417_v40 = vadd.f32 %v7413_v17, %v7392_v59  ;;  %v7394_v22 = vadd.f32 %v7390_v63, %v7369_v37  ;;  %v7370_v29 = vadd.f32 %v7366_v4, %v7345_v60  ;;  %v7435_v42 = vpop.permute.xlu2 %7434  ;;  %v7211_v31 = vadd.f32 %v12178_v21, %v12176_v62  ;;  %v12762_v4 = vld [vmem:[#allocation10_spill] sm:$0xff] }
0x53a3   : > { %v7418_v24 = vadd.f32 %v7414_v20, %v7393_v2  ;;  %v7441_v33 = vmul.f32 %v12180_v16, %v7435_v42  ;;  %v7213_v13 = vadd.f32 %v7212_v32, %v7193_v6  ;;  %v12760_v1 = vmov 0  }
0x53a4   : > { %v7442_v5 = vadd.f32 %v7438_v34, %v7417_v40  ;;  %v7419_v11 = vadd.f32 %v7415_v43, %v7394_v22  ;;  %v7395_v38 = vadd.f32 %v7391_v35, %v7370_v29  ;;  %v7446_v54 = vmul.f32 %v7211_v31, %v11968_v44 }
0x53a5   : > { %v7443_v15 = vadd.f32 %v7439_v56, %v7418_v24  ;;  %v7447_v19 = vmul.f32 %v7213_v13, %v11970_v39  ;;  %v12761_v24 = vld [vmem:[#allocation9_spill] sm:$0xff]  ;;  %v7578_v46 = vperm.slane %v12762_v4, 1  ;;  %v7570_v43 = vperm.slane %v12762_v4, 0 }
0x53a6   : > { %v7450_v7 = vadd.f32 1e-06, %v7442_v5  ;;  %v7196_v8 = vpop.f32.mrf.mxu2  ;;  %v7215_v27 = vpop.f32.mrf.mxu3  ;;  %v7444_v52 = vadd.f32 %v7440_v49, %v7419_v11  ;;  %v7420_v0 = vadd.f32 %v7416_v9, %v7395_v38  ;;  %v7577_v60 = vperm.slane %v12761_v24, 1 }
0x53a7   : > { %v7451_v50 = vadd.f32 1e-06, %v7443_v15  ;;  %v7216_v16 = vadd.f32 %v7215_v27, %v7196_v8  ;;  %v7569_v22 = vperm.slane %v12761_v24, 0  ;;  %v7587_v8 = vperm.slane %v12761_v24, 2 }
0x53a8   : > { %10839 = vrcp.f32 %v7450_v7  ;;  %v7452_v3 = vadd.f32 1e-06, %v7444_v52  ;;  %v7445_v30 = vadd.f32 %v7441_v33, %v7420_v0  ;;  %v7588_v27 = vperm.slane %v12762_v4, 2 }
0x53a9   : > { %10841 = vrcp.f32 %v7451_v50  ;;  %v7448_v10 = vmul.f32 %v7216_v16, %v11980_v23  ;;  %v7597_v29 = vperm.slane %v12761_v24, 3  ;;  %v7598_v35 = vperm.slane %v12762_v4, 3 }
0x53aa   : > { %v7453_v51 = vadd.f32 1e-06, %v7445_v30  ;;  %10843 = vrcp.f32 %v7452_v3  ;;  %v7607_v9 = vperm.slane %v12761_v24, 4  ;;  %v7608_v42 = vperm.slane %v12762_v4, 4 }
0x53ab   : > { %v7617_v13 = vperm.slane %v12761_v24, 5  ;;  %v7618_v3 = vperm.slane %v12762_v4, 5 }
0x53ac   : > { %10845 = vrcp.f32 %v7453_v51 }
0x53ae   : > { %v10840_v58 = vpop.eup %10839  ;;  %v7198_v55 = vpop.f32.mrf.mxu2 }
0x53af   : > { %v7217_v17 = vpop.f32.mrf.mxu3  ;;  %v12190_v36 = vmul.f32 %v10840_v58, %v7446_v54  ;;  %v10842_v21 = vpop.eup %10841 }
0x53b0   : > { %v7218_v62 = vadd.f32 %v7217_v17, %v7198_v55  ;;  %v12193_v59 = vmul.f32 %v10842_v21, %v7447_v19  ;;  %v10844_v32 = vpop.eup %10843 }
0x53b1   : > { %7509 = vxpose.xlu0.b32.start [1/4] (short) (narrow) %v12190_v36, 8  ;;  %v12202_v45 = vmul.f32 %v10844_v32, %v7448_v10  ;;  %v7637_v32 = vperm.slane %v12761_v24, 7 }
0x53b2   : > { %v7449_v6 = vmul.f32 %v7218_v62, %v11977_v41  ;;  %v7462_v44 = vpack.c.bf16 %v12193_v59, %v12190_v36  ;;  %v10846_v25 = vpop.eup %10845 }
0x53b4   : > { %7464 = vxpose.xlu1.c.b16.start [1/2] (short) (narrow) %v7462_v44, 16  ;;  %v12200_v39 = vmul.f32 %v10846_v25, %v7449_v6  ;;  %v7627_v6 = vperm.slane %v12761_v24, 6  ;;  %v7628_v44 = vperm.slane %v12762_v4, 6  ;;  %v7638_v25 = vperm.slane %v12762_v4, 7 }
0x53b6   : > { %7556 = vmatpush.msra.mxu2 %v12200_v39  ;;  %v7463_v41 = vpack.c.bf16 %v12200_v39, %v12202_v45 }
0x53b8   : > { %7557 = vmatpush.msra.mxu2 %v12202_v45 }
0x53b9   : > { %7510 = vxpose.xlu0.b32.cont [2/4] (short) (narrow) %v12193_v59, 8 }
0x53ba   : > { %7558 = vmatpush.msra.mxu2 %v12193_v59 }
0x53bc   : > { %7559 = vmatpush.msra.mxu2 %v12190_v36 }
0x53c1   : > { %7511 = vxpose.xlu0.b32.cont [3/4] (short) (narrow) %v12202_v45, 8 }
0x53c4   : > { %7465 = vxpose.xlu1.c.b16.end [2/2] (short) (narrow) %v7463_v41, 16 }
0x53c9   : > { %7512 = vxpose.xlu0.b32.end [4/4] (short) (narrow) %v12200_v39, 8 }
0x5417   : > { %10708 = vset.pattern.permute.xlu1 %v12705_v48 }
0x5455   : > { %v7525_v23 = vpop.trf.xlu0 }
0x5456   : > { %10402 = vmatmul.msk.f32.vlgmr.msra.gmra.mxu2 %vm315_vm0, %v7525_v23 }
0x5460   : > { %v7472_v34 = vpop.trf.xlu1 }
0x5461   : > { %10400 = vmatmul.msk.bf16.vlgmr.msrb.gmra.mxu0 %vm315_vm0, %v7472_v34  ;;  %10401 = vmatmul.msk.bf16.vlgmr.msra.gmra.mxu1 %vm315_vm0, %v7472_v34 }
0x54d9   : > { %v7561_v20 = vpop.f32.mrf.mxu2 }
0x54da   : > { %7634 = vperm.xlu0 %10685, %v7561_v20   ;;  %7566 = vperm.xlu2 %10693, %v7561_v20  }
0x54de   : > { %v12217_v28 = vpop.f32.mrf.mxu0  ;;  %v12219_v18 = vpop.f32.mrf.mxu1 }
0x54e2   : > { %10706 = vset.pattern.permute.xlu0 %v12704_v57  ;;  %10694 = vset.pattern.permute.xlu2 %v12705_v48 }
0x54e3   : > { %8703 = vperm.xlu0 %10706, %v12193_v59   ;;  %7574 = vperm.xlu2 %10694, %v7561_v20  }
0x54e6   : > { %v7494_v40 = vpop.f32.mrf.mxu0  ;;  %v7507_v2 = vpop.f32.mrf.mxu1 }
0x54eb   : > { %10710 = vset.pattern.permute.xlu0 %v12730_v61  ;;  %10695 = vset.pattern.permute.xlu2 %v12704_v57 }
0x54ec   : > { %8728 = vperm.xlu0 %10710, %v12193_v59   ;;  %7584 = vperm.xlu2 %10695, %v7561_v20  }
0x54f4   : > { %10714 = vset.pattern.permute.xlu0 %v12705_v48  ;;  %10696 = vset.pattern.permute.xlu2 %v12730_v61 }
0x54f5   : > { %8686 = vperm.xlu0 %10714, %v12200_v39   ;;  %7594 = vperm.xlu2 %10696, %v7561_v20  }
0x54fd   : > { %10719 = vset.pattern.permute.xlu0 %v12745_v26  ;;  %10697 = vset.pattern.permute.xlu2 %v12703_v12 }
0x54fe   : > { %8778 = vperm.xlu0 %10719, %v12193_v59   ;;  %7604 = vperm.xlu2 %10697, %v7561_v20  }
0x5506   : > { %8782 = vperm.xlu0 %10719, %v12202_v45   ;;  %10698 = vset.pattern.permute.xlu2 %v12745_v26 }
0x5507   : > { %7614 = vperm.xlu2 %10698, %v7561_v20  }
0x550e   : > { %10726 = vset.pattern.permute.xlu0 %v12746_v14 }
0x550f   : > { %8807 = vperm.xlu0 %10726, %v12202_v45   ;;  %10699 = vset.pattern.permute.xlu2 %v12746_v14 }
0x5510   : > { %7624 = vperm.xlu2 %10699, %v7561_v20  }
0x5518   : > { %10700 = vset.pattern.permute.xlu2 %v12760_v1 }
0x5534   : > { %v7567_v53 = vpop.permute.xlu2 %7566 }
0x5535   : > { %v7571_v47 = vmul.f32 %v7569_v22, %v7567_v53  ;;  %v7572_v11 = vmul.f32 %v7570_v43, %v7567_v53  ;;  %v7643_v22 = vmul.f32 %v12217_v28, %v12761_v24 }
0x553d   : > { %v7575_v56 = vpop.permute.xlu2 %7574 }
0x553e   : > { %v7579_v7 = vmul.f32 %v7577_v60, %v7575_v56  ;;  %v7580_v15 = vmul.f32 %v7578_v46, %v7575_v56 }
0x5540   : > { %v7581_v31 = vadd.f32 %v7579_v7, %v7571_v47  ;;  %v7582_v52 = vadd.f32 %v7580_v15, %v7572_v11  ;;  %v7644_v7 = vmul.f32 %v12219_v18, %v12762_v4 }
0x5546   : > { %v7585_v37 = vpop.permute.xlu2 %7584 }
0x5547   : > { %v7589_v49 = vmul.f32 %v7587_v8, %v7585_v37  ;;  %v7590_v50 = vmul.f32 %v7588_v27, %v7585_v37 }
0x5549   : > { %v7591_v30 = vadd.f32 %v7589_v49, %v7581_v31  ;;  %v7592_v54 = vadd.f32 %v7590_v50, %v7582_v52 }
0x554c   : > { %v7635_v10 = vpop.permute.xlu0 %7634 }
0x554d   : > { %v7639_v2 = vmul.f32 %v7637_v32, %v7635_v10  ;;  %v7640_v53 = vmul.f32 %v7638_v25, %v7635_v10 }
0x554f   : > { %v7595_v63 = vpop.permute.xlu2 %7594 }
0x5550   : > { %v7599_v0 = vmul.f32 %v7597_v29, %v7595_v63  ;;  %v7600_v33 = vmul.f32 %v7598_v35, %v7595_v63  ;;  %v12763_v29 = vmov 1.0  }
0x5552   : > { %v7601_v17 = vadd.f32 %v7599_v0, %v7591_v30  ;;  %v7602_v51 = vadd.f32 %v7600_v33, %v7592_v54 }
0x5558   : > { %v7605_v5 = vpop.permute.xlu2 %7604 }
0x5559   : > { %v7609_v58 = vmul.f32 %v7607_v9, %v7605_v5  ;;  %v7610_v55 = vmul.f32 %v7608_v42, %v7605_v5 }
0x555b   : > { %v7611_v21 = vadd.f32 %v7609_v58, %v7601_v17  ;;  %v7612_v16 = vadd.f32 %v7610_v55, %v7602_v51 }
0x5561   : > { %v7615_v38 = vpop.permute.xlu2 %7614 }
0x5562   : > { %v7619_v19 = vmul.f32 %v7617_v13, %v7615_v38  ;;  %v7620_v62 = vmul.f32 %v7618_v3, %v7615_v38 }
0x5564   : > { %v7621_v23 = vadd.f32 %v7619_v19, %v7611_v21  ;;  %v7622_v34 = vadd.f32 %v7620_v62, %v7612_v16 }
0x556a   : > { %v7625_v41 = vpop.permute.xlu2 %7624 }
0x556b   : > { %v7629_v20 = vmul.f32 %v7627_v6, %v7625_v41  ;;  %v7630_v40 = vmul.f32 %v7628_v44, %v7625_v41 }
0x556d   : > { %v7631_v56 = vadd.f32 %v7629_v20, %v7621_v23  ;;  %v7632_v37 = vadd.f32 %v7630_v40, %v7622_v34 }
0x556f   : > { %v7641_v63 = vadd.f32 %v7639_v2, %v7631_v56  ;;  %v7642_v5 = vadd.f32 %v7640_v53, %v7632_v37 }
0x5571   : > { %v7645_v60 = vadd.f32 1e-06, %v7641_v63  ;;  %v7646_v46 = vadd.f32 1e-06, %v7642_v5  ;;  %v12765_v63 = vld [vmem:[#allocation7_spill] sm:$0xff] }
0x5573   : > { %10847 = vrcp.f32 %v7645_v60 }
0x5574   : > { %10849 = vrcp.f32 %v7646_v46 }
0x5579   : > { %v10848_v43 = vpop.eup %10847 }
0x557a   : > { %v10850_v15 = vpop.eup %10849  ;;  %v12259_v8 = vmul.f32 %v10848_v43, %v7643_v22  ;;  %v12766_v43 = vld [vmem:[#allocation8_spill] sm:$0xff] }
0x557b   : > { %v12261_v27 = vmul.f32 %v10850_v15, %v7644_v7 }
0x557c   : > { %7666 = vmatpush.xpose.msra.mxu3 %v12259_v8 }
0x557d   : > { %7686 = vmatpush.xpose.msra.mxu0 %v12261_v27 }
0x557f   : > { %7667 = vmatmul.f32.vlgmr.msra.gmra.mxu3 %v12259_v8 }
0x5580   : > { %10405 = vmatpush.msk.msrb.mxu3 %vm11135_vm15, %v12763_v29  ;;  %7687 = vmatmul.f32.vlgmr.msra.gmra.mxu0 %v12261_v27 }
0x55fd   : > { %v7688_v28 = vpop.f32.mrf.mxu0 }
0x5602   : > { %v7668_v24 = vpop.f32.mrf.mxu3 }
0x5603   : > { %v12270_v18 = vadd.f32 %v7688_v28, %v7668_v24 }
0x5605   : > { %v7691_v4 = vmul.f32 %v12270_v18, %v12270_v18 }
0x5607   : > { %v7692_v47 = vsel %vm677_vm9, %v7691_v4, 0.0 }
0x5608   : > { %7693 = vadd.xlane.f32.xlu2 %v7692_v47 }
0x5620   : > { %8650 = vperm.xlu2 %10700, %v12190_v36  }
0x5628   : > { %10701 = vset.pattern.permute.xlu2 %v12705_v48 }
0x5629   : > { %8674 = vperm.xlu2 %10701, %v12190_v36  }
0x5631   : > { %10702 = vset.pattern.permute.xlu2 %v12704_v57 }
0x5632   : > { %8699 = vperm.xlu2 %10702, %v12190_v36  }
0x563a   : > { %10703 = vset.pattern.permute.xlu2 %v12760_v1 }
0x563b   : > { %8655 = vperm.xlu2 %10703, %v12193_v59  }
0x5643   : > { %10704 = vset.pattern.permute.xlu2 %v12705_v48 }
0x5644   : > { %8678 = vperm.xlu2 %10704, %v12193_v59  }
0x564c   : > { %10705 = vset.pattern.permute.xlu2 %v12730_v61 }
0x564d   : > { %8724 = vperm.xlu2 %10705, %v12190_v36  }
0x5655   : > { %10707 = vset.pattern.permute.xlu2 %v12760_v1 }
0x5656   : > { %8660 = vperm.xlu2 %10707, %v12202_v45  }
0x565e   : > { %10709 = vset.pattern.permute.xlu2 %v12703_v12 }
0x565f   : > { %8749 = vperm.xlu2 %10709, %v12190_v36  }
0x5667   : > { %10711 = vset.pattern.permute.xlu2 %v12704_v57 }
0x5668   : > { %8707 = vperm.xlu2 %10711, %v12202_v45  }
0x5670   : > { %10712 = vset.pattern.permute.xlu2 %v12745_v26 }
0x5671   : > { %8774 = vperm.xlu2 %10712, %v12190_v36  }
0x5679   : > { %10715 = vset.pattern.permute.xlu2 %v12703_v12 }
0x567a   : > { %8753 = vperm.xlu2 %10715, %v12193_v59  }
0x567b   : > { %v7694_v11 = vpop.xlane.xlu2 %7693 }
0x567c   : > { %v7695_v49 = vrot.slane %v7694_v11, 4 }
0x567e   : > { %v7696_v50 = vadd.f32 %v7695_v49, %v7694_v11 }
0x5680   : > { %v7697_v38 = vrot.slane %v7696_v50, 2 }
0x5682   : > { %v7698_v9 = vadd.f32 %v7697_v38, %v7696_v50  ;;  %10717 = vset.pattern.permute.xlu2 %v12746_v14 }
0x5683   : > { %8799 = vperm.xlu2 %10717, %v12190_v36  }
0x5684   : > { %v7699_v42 = vrot.slane %v7698_v9, 1 }
0x5686   : > { %v7700_v31 = vadd.f32 %v7699_v42, %v7698_v9 }
0x5688   : > { %10851 = vrsqrt.f32 %v7700_v31  ;;  %vm7708_vm11 = vcmp.eq.f32.partialorder %v7700_v31, inf  ;;  %v7711_v58 = vand.u32 2147483648, %v7700_v31  ;;  %vm7710_vm12 = vcmp.eq.f32.partialorder %v7700_v31, 0.0 }
0x568b   : > { %10720 = vset.pattern.permute.xlu2 %v12703_v12 }
0x568c   : > { %8757 = vperm.xlu2 %10720, %v12202_v45  }
0x568e   : > { %v10852_v52 = vpop.eup %10851 }
0x568f   : > { %v7702_v0 = vmul.f32 %v10852_v52, %v7700_v31 }
0x5691   : > { %v7703_v33 = vmul.f32 %v10852_v52, %v7702_v0 }
0x5693   : > { %v7704_v13 = vmul.f32 0.5, %v7703_v33 }
0x5694   : > { %10722 = vset.pattern.permute.xlu2 %v12730_v61 }
0x5695   : > { %v7705_v3 = vsub.f32 1.5, %v7704_v13  ;;  %8736 = vperm.xlu2 %10722, %v12200_v39  }
0x5697   : > { %v7706_v30 = vmul.f32 %v10852_v52, %v7705_v3 }
0x5699   : > { %v7707_v54 = vmul.f32 %v7706_v30, %v7700_v31 }
0x569b   : > { %v7709_v55 = vsel %vm7708_vm11, %v7700_v31, %v7707_v54 }
0x569c   : > { %v7712_v17 = vsel %vm7710_vm12, %v7711_v58, %v7709_v55 }
0x569d   : > { %v7713_v51 = vadd.f32 1e-30, %v7712_v17  ;;  %10724 = vset.pattern.permute.xlu2 %v12703_v12 }
0x569e   : > { %8761 = vperm.xlu2 %10724, %v12200_v39  }
0x569f   : > { %10853 = vrcp.f32 %v7713_v51  ;;  %v7725_v44 = vand.u32 2147483648, %v7713_v51  ;;  %v7723_v10 = vand.u32 2147483647, %v7713_v51  ;;  %vm7719_vm14 = vweird.f32 %v7713_v51 }
0x56a0   : > { %10855 = vrsqrt.f32 %v7713_v51  ;;  %vm8562_vm3 = vcmp.eq.f32.partialorder %v7713_v51, inf  ;;  %vm8564_vm4 = vcmp.eq.f32.partialorder %v7713_v51, 0.0 }
0x56a1   : > { %v7726_v34 = vor.u32 1.1754944e-38, %v7725_v44  ;;  %vm7724_vm2 = vcmp.eq.f32.partialorder %v7723_v10, 8.507059e+37 }
0x56a5   : > { %v10854_v19 = vpop.eup %10853 }
0x56a6   : > { %v10856_v62 = vpop.eup %10855  ;;  %10727 = vset.pattern.permute.xlu2 %v12745_v26  ;;  %v7715_v21 = vmul.f32 %v10854_v19, %v7713_v51  ;;  %vm7720_vm13 = vweird.f32 %v10854_v19 }
0x56a7   : > { %8786 = vperm.xlu2 %10727, %v12200_v39   ;;  %v8556_v16 = vmul.f32 %v10856_v62, %v7713_v51  ;;  %vm7721_vm1 = vmor %vm7719_vm14, %vm7720_vm13 }
0x56a8   : > { %v7716_v6 = vsub.f32 1.0, %v7715_v21 }
0x56a9   : > { %v8557_v32 = vmul.f32 %v10856_v62, %v8556_v16 }
0x56aa   : > { %v7717_v25 = vmul.f32 %v10854_v19, %v7716_v6 }
0x56ab   : > { %v8558_v41 = vmul.f32 0.5, %v8557_v32 }
0x56ac   : > { %v7718_v23 = vadd.f32 %v10854_v19, %v7717_v25 }
0x56ad   : > { %v8559_v20 = vsub.f32 1.5, %v8558_v41 }
0x56ae   : > { %v7722_v40 = vsel %vm7721_vm1, %v10854_v19, %v7718_v23 }
0x56af   : > { %10728 = vset.pattern.permute.xlu2 %v12746_v14  ;;  %v7727_v2 = vsel %vm7724_vm2, %v7726_v34, %v7722_v40  ;;  %v8560_v53 = vmul.f32 %v10856_v62, %v8559_v20 }
0x56b0   : > { %8811 = vperm.xlu2 %10728, %v12200_v39   ;;  %v7728_v56 = vmul.f32 %v7727_v2, %v12270_v18 }
0x56b1   : > { %v8561_v37 = vmul.f32 %v8560_v53, %v7713_v51 }
0x56b2   : > { %7744 = vmatpush.msrb.mxu1 %v7728_v56 }
0x56b3   : > { %10403 = vmatmul.msk.f32.vlgmr.msrb.gmra.mxu1 %vm677_vm9, %v12765_v63  ;;  %v8563_v5 = vsel %vm8562_vm3, %v7713_v51, %v8561_v37 }
0x56b4   : > { %v12311_v60 = vsel %vm8564_vm4, %v7725_v44, %v8563_v5 }
0x5730   : > { %v7746_v46 = vpop.f32.mrf.mxu1 }
0x5731   : > { %v7749_v22 = vmul.f32 0.5, %v7746_v46 }
0x5733   : > { %v7750_v7 = vsub.f32 %v12766_v43, %v7749_v22 }
0x5735   : > { %7769 = vmatpush.msrb.mxu2 %v7750_v7  ;;  %10406 = vmatmul.msk.f32.vlgmr.msrb.gmra.mxu3 %vm677_vm9, %v7750_v7 }
0x5736   : > { %10404 = vmatmul.msk.f32.vlgmr.msrb.gmra.mxu2 %vm677_vm9, %v7728_v56 }
0x57b8   : > { %v7794_v15 = vpop.f32.mrf.mxu3 }
0x57b9   : > { %v7771_v28 = vpop.f32.mrf.mxu2  ;;  %7863 = vmatpush.msra.mxu2 %v7794_v15 }
0x57ba   : > { %7815 = vmatpush.msrb.mxu0 %v7771_v28 }
0x57bb   : > { %10407 = vmatmul.msk.f32.vlgmr.msrb.gmra.mxu0 %vm677_vm9, %v7794_v15 }
0x5838   : > { %v7817_v24 = vpop.f32.mrf.mxu0 }
0x5839   : > { %v7820_v18 = vmul.f32 0.5, %v7817_v24 }
0x583b   : > { %v7821_v4 = vsub.f32 %v12766_v43, %v7820_v18 }
0x583d   : > { %7840 = vmatpush.msra.mxu1 %v7821_v4  ;;  %10409 = vmatmul.msk.f32.vlgmr.msra.gmra.mxu2 %vm677_vm9, %v7821_v4 }
0x583e   : > { %10408 = vmatmul.msk.f32.vlgmr.msra.gmra.mxu1 %vm677_vm9, %v7771_v28 }
0x58bb   : > { %v7842_v47 = vpop.f32.mrf.mxu1 }
0x58bc   : > { %7886 = vmatpush.msra.mxu3 %v7842_v47 }
0x58c0   : > { %v7865_v11 = vpop.f32.mrf.mxu2 }
0x58c1   : > { %10410 = vmatmul.msk.f32.vlgmr.msra.gmra.mxu3 %vm677_vm9, %v7865_v11  ;;  %7934 = vmatpush.msrb.mxu1 %v7865_v11 }
0x5944   : > { %v7888_v49 = vpop.f32.mrf.mxu3 }
0x5945   : > { %v7891_v50 = vmul.f32 0.5, %v7888_v49 }
0x5947   : > { %v7892_v38 = vsub.f32 %v12766_v43, %v7891_v50 }
0x5949   : > { %7911 = vmatpush.msra.mxu0 %v7892_v38  ;;  %10412 = vmatmul.msk.f32.vlgmr.msrb.gmra.mxu1 %vm677_vm9, %v7892_v38 }
0x594a   : > { %10411 = vmatmul.msk.f32.vlgmr.msra.gmra.mxu0 %vm677_vm9, %v7842_v47 }
0x59c6   : > { %v7936_v9 = vpop.f32.mrf.mxu1 }
0x59c7   : > { %v7913_v42 = vpop.f32.mrf.mxu0  ;;  %8005 = vmatpush.msrb.mxu0 %v7936_v9 }
0x59c8   : > { %7957 = vmatpush.msrb.mxu2 %v7913_v42 }
0x59c9   : > { %10413 = vmatmul.msk.f32.vlgmr.msrb.gmra.mxu2 %vm677_vm9, %v7936_v9 }
0x5a4c   : > { %v7959_v31 = vpop.f32.mrf.mxu2 }
0x5a4d   : > { %v7962_v52 = vmul.f32 0.5, %v7959_v31  ;;  %v12767_v31 = vmov 7  }
0x5a4f   : > { %v7963_v0 = vsub.f32 %v12766_v43, %v7962_v52 }
0x5a51   : > { %7982 = vmatpush.msrb.mxu3 %v7963_v0  ;;  %10415 = vmatmul.msk.f32.vlgmr.msrb.gmra.mxu0 %vm677_vm9, %v7963_v0 }
0x5a52   : > { %10414 = vmatmul.msk.f32.vlgmr.msrb.gmra.mxu3 %vm677_vm9, %v7913_v42 }
0x5ace   : > { %v8007_v33 = vpop.f32.mrf.mxu0 }
0x5acf   : > { %8076 = vmatpush.msra.mxu3 %v8007_v33 }
0x5ad5   : > { %v7984_v13 = vpop.f32.mrf.mxu3 }
0x5ad6   : > { %8028 = vmatpush.msra.mxu1 %v7984_v13 }
0x5ad7   : > { %10416 = vmatmul.msk.f32.vlgmr.msra.gmra.mxu1 %vm677_vm9, %v8007_v33 }
0x5b54   : > { %v8030_v3 = vpop.f32.mrf.mxu1 }
0x5b55   : > { %v8033_v30 = vmul.f32 0.5, %v8030_v3 }
0x5b57   : > { %v8034_v54 = vsub.f32 %v12766_v43, %v8033_v30 }
0x5b59   : > { %8053 = vmatpush.msra.mxu2 %v8034_v54  ;;  %10418 = vmatmul.msk.f32.vlgmr.msra.gmra.mxu3 %vm677_vm9, %v8034_v54 }
0x5b5a   : > { %10417 = vmatmul.msk.f32.vlgmr.msra.gmra.mxu2 %vm677_vm9, %v7984_v13 }
0x5bdc   : > { %v8078_v58 = vpop.f32.mrf.mxu3 }
0x5bdd   : > { %v8055_v55 = vpop.f32.mrf.mxu2  ;;  %8147 = vmatpush.msrb.mxu2 %v8078_v58 }
0x5bde   : > { %8099 = vmatpush.msra.mxu0 %v8055_v55 }
0x5bdf   : > { %10419 = vmatmul.msk.f32.vlgmr.msra.gmra.mxu0 %vm677_vm9, %v8078_v58 }
0x5c5c   : > { %v8101_v17 = vpop.f32.mrf.mxu0 }
0x5c5d   : > { %v8104_v51 = vmul.f32 0.5, %v8101_v17 }
0x5c5f   : > { %v8105_v19 = vsub.f32 %v12766_v43, %v8104_v51 }
0x5c61   : > { %8124 = vmatpush.msrb.mxu1 %v8105_v19  ;;  %10421 = vmatmul.msk.f32.vlgmr.msrb.gmra.mxu2 %vm677_vm9, %v8105_v19 }
0x5c62   : > { %10420 = vmatmul.msk.f32.vlgmr.msrb.gmra.mxu1 %vm677_vm9, %v8055_v55 }
0x5cdf   : > { %v8126_v62 = vpop.f32.mrf.mxu1 }
0x5ce0   : > { %8170 = vmatpush.msrb.mxu3 %v8126_v62 }
0x5ce4   : > { %v8149_v21 = vpop.f32.mrf.mxu2 }
0x5ce5   : > { %10422 = vmatmul.msk.f32.vlgmr.msrb.gmra.mxu3 %vm677_vm9, %v8149_v21  ;;  %8218 = vmatpush.msra.mxu1 %v8149_v21 }
0x5d68   : > { %v8172_v16 = vpop.f32.mrf.mxu3 }
0x5d69   : > { %v8175_v6 = vmul.f32 0.5, %v8172_v16 }
0x5d6b   : > { %v8176_v44 = vsub.f32 %v12766_v43, %v8175_v6  ;;  %v12771_v6 = vld [vmem:[#allocation4_spill] sm:$0xff] }
0x5d6d   : > { %8195 = vmatpush.msrb.mxu0 %v8176_v44  ;;  %10424 = vmatmul.msk.f32.vlgmr.msra.gmra.mxu1 %vm677_vm9, %v8176_v44  ;;  %v12773_v44 = vld [vmem:[#allocation5_spill] sm:$0xff] }
0x5d6e   : > { %10423 = vmatmul.msk.f32.vlgmr.msrb.gmra.mxu0 %vm677_vm9, %v8126_v62  ;;  %v8651_v62 = vpop.permute.xlu2 %8650 }
0x5dea   : > { %v8220_v32 = vpop.f32.mrf.mxu1 }
0x5deb   : > { %v8197_v25 = vpop.f32.mrf.mxu0  ;;  %8289 = vmatpush.msra.mxu0 %v8220_v32 }
0x5dec   : > { %8241 = vmatpush.msra.mxu2 %v8197_v25 }
0x5ded   : > { %10425 = vmatmul.msk.f32.vlgmr.msra.gmra.mxu2 %vm677_vm9, %v8220_v32 }
0x5e70   : > { %v8243_v10 = vpop.f32.mrf.mxu2 }
0x5e71   : > { %v8246_v41 = vmul.f32 0.5, %v8243_v10 }
0x5e73   : > { %v8247_v23 = vsub.f32 %v12766_v43, %v8246_v41 }
0x5e75   : > { %8266 = vmatpush.msra.mxu3 %v8247_v23  ;;  %10427 = vmatmul.msk.f32.vlgmr.msra.gmra.mxu0 %vm677_vm9, %v8247_v23 }
0x5e76   : > { %10426 = vmatmul.msk.f32.vlgmr.msra.gmra.mxu3 %vm677_vm9, %v8197_v25 }
0x5ef2   : > { %v8291_v34 = vpop.f32.mrf.mxu0 }
0x5ef3   : > { %8360 = vmatpush.msrb.mxu3 %v8291_v34 }
0x5ef9   : > { %v8268_v20 = vpop.f32.mrf.mxu3 }
0x5efa   : > { %8312 = vmatpush.msrb.mxu1 %v8268_v20 }
0x5efb   : > { %10428 = vmatmul.msk.f32.vlgmr.msrb.gmra.mxu1 %vm677_vm9, %v8291_v34 }
0x5f78   : > { %v8314_v40 = vpop.f32.mrf.mxu1 }
0x5f79   : > { %v8317_v2 = vmul.f32 0.5, %v8314_v40 }
0x5f7b   : > { %v8318_v53 = vsub.f32 %v12766_v43, %v8317_v2 }
0x5f7d   : > { %8337 = vmatpush.msrb.mxu2 %v8318_v53  ;;  %10430 = vmatmul.msk.f32.vlgmr.msrb.gmra.mxu3 %vm677_vm9, %v8318_v53 }
0x5f7e   : > { %10429 = vmatmul.msk.f32.vlgmr.msrb.gmra.mxu2 %vm677_vm9, %v8268_v20 }
0x6000   : > { %v8362_v56 = vpop.f32.mrf.mxu3 }
0x6001   : > { %v8339_v37 = vpop.f32.mrf.mxu2  ;;  %8431 = vmatpush.msra.mxu2 %v8362_v56 }
0x6002   : > { %8383 = vmatpush.msrb.mxu0 %v8339_v37 }
0x6003   : > { %10431 = vmatmul.msk.f32.vlgmr.msrb.gmra.mxu0 %vm677_vm9, %v8362_v56 }
0x6080   : > { %v8385_v5 = vpop.f32.mrf.mxu0 }
0x6081   : > { %v8388_v46 = vmul.f32 0.5, %v8385_v5 }
0x6083   : > { %v8389_v22 = vsub.f32 %v12766_v43, %v8388_v46 }
0x6085   : > { %8408 = vmatpush.msra.mxu1 %v8389_v22  ;;  %10433 = vmatmul.msk.f32.vlgmr.msra.gmra.mxu2 %vm677_vm9, %v8389_v22  ;;  %v8704_v22 = vpop.permute.xlu0 %8703 }
0x6086   : > { %10432 = vmatmul.msk.f32.vlgmr.msra.gmra.mxu1 %vm677_vm9, %v8339_v37 }
0x6103   : > { %v8410_v7 = vpop.f32.mrf.mxu1 }
0x6104   : > { %8454 = vmatpush.msra.mxu3 %v8410_v7 }
0x6108   : > { %v8433_v15 = vpop.f32.mrf.mxu2 }
0x6109   : > { %10434 = vmatmul.msk.f32.vlgmr.msra.gmra.mxu3 %vm677_vm9, %v8433_v15  ;;  %8502 = vmatpush.msrb.mxu1 %v8433_v15 }
0x618c   : > { %v8456_v28 = vpop.f32.mrf.mxu3 }
0x618d   : > { %v8459_v24 = vmul.f32 0.5, %v8456_v28  ;;  %v8729_v28 = vpop.permute.xlu0 %8728 }
0x618f   : > { %v8460_v18 = vsub.f32 %v12766_v43, %v8459_v24 }
0x6191   : > { %8479 = vmatpush.msra.mxu0 %v8460_v18  ;;  %10436 = vmatmul.msk.f32.vlgmr.msrb.gmra.mxu1 %vm677_vm9, %v8460_v18 }
0x6192   : > { %10435 = vmatmul.msk.f32.vlgmr.msra.gmra.mxu0 %vm677_vm9, %v8410_v7 }
0x620e   : > { %v8504_v47 = vpop.f32.mrf.mxu1 }
0x620f   : > { %v8481_v4 = vpop.f32.mrf.mxu0 }
0x6210   : > { %8525 = vmatpush.msrb.mxu2 %v8481_v4 }
0x6211   : > { %10437 = vmatmul.msk.f32.vlgmr.msrb.gmra.mxu2 %vm677_vm9, %v8504_v47 }
0x6294   : > { %v8527_v11 = vpop.f32.mrf.mxu2 }
0x6295   : > { %v8530_v49 = vmul.f32 0.5, %v8527_v11 }
0x6297   : > { %v8531_v50 = vsub.f32 %v12766_v43, %v8530_v49 }
0x6299   : > { %8550 = vmatpush.msrb.mxu3 %v8531_v50 }
0x629a   : > { %10438 = vmatmul.msk.f32.vlgmr.msrb.gmra.mxu3 %vm677_vm9, %v8481_v4  ;;  %v8687_v4 = vpop.permute.xlu0 %8686 }
0x631d   : > { %v8552_v38 = vpop.f32.mrf.mxu3 }
0x631e   : > { %v8567_v9 = vmul.f32 %v12765_v63, %v8552_v38 }
0x6320   : > { %v8568_v42 = vsel %vm677_vm9, %v8567_v9, 0.0 }
0x6321   : > { %8569 = vadd.xlane.f32.xlu1 %v8568_v42 }
0x633a   : > { %8682 = vperm.xlu1 %10708, %v12202_v45  }
0x6342   : > { %10713 = vset.pattern.permute.xlu1 %v12760_v1 }
0x6343   : > { %8665 = vperm.xlu1 %10713, %v12200_v39  }
0x634b   : > { %10716 = vset.pattern.permute.xlu1 %v12730_v61 }
0x634c   : > { %8732 = vperm.xlu1 %10716, %v12202_v45  }
0x6354   : > { %10718 = vset.pattern.permute.xlu1 %v12704_v57 }
0x6355   : > { %8711 = vperm.xlu1 %10718, %v12200_v39  }
0x635d   : > { %10721 = vset.pattern.permute.xlu1 %v12767_v31 }
0x635e   : > { %8824 = vperm.xlu1 %10721, %v12190_v36  }
0x6366   : > { %10723 = vset.pattern.permute.xlu1 %v12746_v14 }
0x6367   : > { %8803 = vperm.xlu1 %10723, %v12193_v59  }
0x636f   : > { %10725 = vset.pattern.permute.xlu1 %v12767_v31 }
0x6370   : > { %8828 = vperm.xlu1 %10725, %v12193_v59  }
0x6378   : > { %8832 = vperm.xlu1 %10725, %v12202_v45  }
0x6380   : > { %8836 = vperm.xlu1 %10725, %v12200_v39  }
0x6388   : > { %10729 = vset.pattern.permute.xlu1 %v12760_v1 }
0x6394   : > { %v8570_v52 = vpop.xlane.xlu1 %8569 }
0x6395   : > { %v8571_v0 = vrot.slane %v8570_v52, 4 }
0x6397   : > { %v8572_v33 = vadd.f32 %v8571_v0, %v8570_v52  ;;  %v8779_v52 = vpop.permute.xlu0 %8778 }
0x6399   : > { %v8573_v13 = vrot.slane %v8572_v33, 2 }
0x639b   : > { %v8574_v3 = vadd.f32 %v8573_v13, %v8572_v33 }
0x639d   : > { %v8575_v30 = vrot.slane %v8574_v3, 1 }
0x639f   : > { %v8576_v54 = vadd.f32 %v8575_v30, %v8574_v3 }
0x63a1   : > { %v8577_v58 = vmul.f32 %v8576_v54, %v12311_v60  ;;  %v12770_v60 = vld [vmem:[#allocation2_spill] sm:$0xff] }
0x63a3   : > { %v8578_v55 = vadd.f32 1e-06, %v8577_v58 }
0x63a5   : > { %10857 = vrcp.f32 %v8578_v55 }
0x63ab   : > { %v10858_v17 = vpop.eup %10857 }
0x63ac   : > { %v12379_v51 = vmul.f32 %v10858_v17, %v12259_v8  ;;  %v12382_v19 = vmul.f32 %v10858_v17, %v12261_v27  ;;  %v12772_v8 = vld [vmem:[#allocation3_spill] sm:$0xff]  ;;  %v8675_v27 = vpop.permute.xlu2 %8674  ;;  %v12400_v40 = vpop.permute.xlu1 %8682 }
0x63ae   : > { %12768 = vst [vmem:[#allocation9_spill] sm:$0xff] %v12379_v51  ;;  %v8582_v21 = vpack.c.bf16 %v12379_v51, %v12379_v51  ;;  %v8583_v16 = vpack.c.bf16 %v12382_v19, %v12382_v19 }
0x63af   : > { %12769 = vst [vmem:[#allocation10_spill] sm:$0xff] %v12382_v19 }
0x63b0   : > { %8591 = vmatpush.bf16.xpose.msrb.mxu0 %v8582_v21  ;;  %8610 = vmatpush.bf16.xpose.msra.mxu1 %v8583_v16 }
0x63b1   : > { %8629 = vmatpush.bf16.xpose.msra.mxu2 %v8582_v21  ;;  %8642 = vmatpush.bf16.xpose.msra.mxu3 %v8583_v16 }
0x63b4   : > { %v8700_v32 = vpop.permute.xlu2 %8699 }
0x63b5   : > { %v8666_v53 = vpop.permute.xlu1 %8665 }
0x63b7   : > { %8592 = vmatmul.bf16.vlgmr.msrb.gmra.mxu0 %v12772_v8  ;;  %8611 = vmatmul.bf16.vlgmr.msra.gmra.mxu1 %v12773_v44 }
0x63b8   : > { %8630 = vmatmul.bf16.vlgmr.msra.gmra.mxu2 %v8582_v21  ;;  %8643 = vmatmul.bf16.vlgmr.msra.gmra.mxu3 %v8583_v16 }
0x63b9   : > { %8891 = vmatpush.bf16.msrb.mxu2 %v12770_v60  ;;  %8904 = vmatpush.bf16.msrb.mxu3 %v12771_v6 }
0x63bc   : > { %v8656_v25 = vpop.permute.xlu2 %8655 }
0x63bd   : > { %8892 = vmatpush.bf16.msrb.mxu2 %v12772_v8  ;;  %8905 = vmatpush.bf16.msrb.mxu3 %v12773_v44 }
0x63be   : > { %v12402_v37 = vpop.permute.xlu1 %8732 }
0x63c4   : > { %v8679_v10 = vpop.permute.xlu2 %8678 }
0x63c7   : > { %8597 = vmatmul.bf16.gmra.mxu0 %v12770_v60  ;;  %8616 = vmatmul.bf16.gmra.mxu1 %v12771_v6  ;;  %v8712_v46 = vpop.permute.xlu1 %8711 }
0x63cc   : > { %v8725_v41 = vpop.permute.xlu2 %8724 }
0x63d0   : > { %v12406_v15 = vpop.permute.xlu1 %8824 }
0x63d4   : > { %v12396_v23 = vpop.permute.xlu2 %8660 }
0x63d9   : > { %v8804_v18 = vpop.permute.xlu1 %8803 }
0x63dc   : > { %v8750_v34 = vpop.permute.xlu2 %8749 }
0x63e2   : > { %v8829_v9 = vpop.permute.xlu1 %8828 }
0x63e4   : > { %v12398_v20 = vpop.permute.xlu2 %8707 }
0x63ea   : > { %v8833_v51 = vpop.permute.xlu1 %8832 }
0x63ec   : > { %v8775_v2 = vpop.permute.xlu2 %8774 }
0x63f4   : > { %v8754_v56 = vpop.permute.xlu2 %8753 }
0x63fc   : > { %v8800_v5 = vpop.permute.xlu2 %8799 }
0x6404   : > { %v12404_v7 = vpop.permute.xlu2 %8757 }
0x640c   : > { %v8737_v24 = vpop.permute.xlu2 %8736 }
0x6414   : > { %v8762_v49 = vpop.permute.xlu2 %8761 }
0x641c   : > { %v8787_v63 = vpop.permute.xlu2 %8786 }
0x6434   : > { %v12408_v47 = vpop.f32.mrf.mxu0  ;;  %v12410_v11 = vpop.f32.mrf.mxu1 }
0x643b   : > { %v8631_v50 = vpop.f32.mrf.mxu2  ;;  %v8644_v38 = vpop.f32.mrf.mxu3 }
0x643c   : > { %v8645_v42 = vadd.f32 %v8644_v38, %v8631_v50  ;;  %v12412_v17 = vpop.f32.mrf.mxu0  ;;  %v12414_v21 = vpop.f32.mrf.mxu1 }
0x643e   : > { %v8668_v0 = vperm.slane %v8645_v42, 0  ;;  %v8689_v33 = vperm.slane %v8645_v42, 1  ;;  %v8714_v13 = vperm.slane %v8645_v42, 2  ;;  %v8739_v3 = vperm.slane %v8645_v42, 3 }
0x643f   : > { %v8764_v16 = vperm.slane %v8645_v42, 4  ;;  %v8789_v43 = vperm.slane %v8645_v42, 5 }
0x6440   : > { %v8669_v30 = vmul.f32 %v8668_v0, %v8651_v62  ;;  %v8670_v54 = vmul.f32 %v8668_v0, %v8656_v25  ;;  %v8690_v58 = vmul.f32 %v8689_v33, %v8675_v27  ;;  %v8691_v55 = vmul.f32 %v8689_v33, %v8679_v10 }
0x6441   : > { %v8715_v8 = vmul.f32 %v8714_v13, %v8700_v32  ;;  %v8716_v44 = vmul.f32 %v8714_v13, %v8704_v22  ;;  %v8740_v19 = vmul.f32 %v8739_v3, %v8725_v41  ;;  %v8741_v62 = vmul.f32 %v8739_v3, %v8729_v28  ;;  %v8783_v22 = vpop.permute.xlu0 %8782 }
0x6442   : > { %v8694_v60 = vadd.f32 %v8690_v58, %v8669_v30  ;;  %v8695_v6 = vadd.f32 %v8691_v55, %v8670_v54  ;;  %v8814_v25 = vperm.slane %v8645_v42, 6  ;;  %v8672_v27 = vmul.f32 %v8668_v0, %v8666_v53 }
0x6443   : > { %v8633_v50 = vpop.f32.mrf.mxu2  ;;  %v8646_v38 = vpop.f32.mrf.mxu3  ;;  %v8693_v10 = vmul.f32 %v8689_v33, %v8687_v4  ;;  %v8765_v12 = vmul.f32 %v8764_v16, %v8750_v34  ;;  %v8766_v61 = vmul.f32 %v8764_v16, %v8754_v56  ;;  %v8839_v30 = vperm.slane %v8645_v42, 7 }
0x6444   : > { %v8719_v35 = vadd.f32 %v8715_v8, %v8694_v60  ;;  %v8720_v29 = vadd.f32 %v8716_v44, %v8695_v6  ;;  %v8718_v32 = vmul.f32 %v8714_v13, %v8712_v46  ;;  %v8790_v50 = vmul.f32 %v8789_v43, %v8775_v2  ;;  %v8617_v34 = vpop.f32.mrf.mxu1 }
0x6445   : > { %v8697_v54 = vadd.f32 %v8693_v10, %v8672_v27  ;;  %v8791_v38 = vmul.f32 %v8789_v43, %v8779_v52  ;;  %v8743_v6 = vmul.f32 %v8739_v3, %v8737_v24  ;;  %v8671_v41 = vmul.f32 %v8668_v0, %v12396_v23  ;;  %v8812_v0 = vpop.permute.xlu2 %8811 }
0x6446   : > { %v8744_v14 = vadd.f32 %v8740_v19, %v8719_v35  ;;  %v8745_v26 = vadd.f32 %v8741_v62, %v8720_v29  ;;  %v8692_v53 = vmul.f32 %v8689_v33, %v12400_v40  ;;  %v8815_v35 = vmul.f32 %v8814_v25, %v8800_v5  ;;  %v8598_v19 = vpop.f32.mrf.mxu0  ;;  %v8837_v62 = vpop.permute.xlu1 %8836 }
0x6447   : > { %v8722_v60 = vadd.f32 %v8718_v32, %v8697_v54  ;;  %v8816_v29 = vmul.f32 %v8814_v25, %v8804_v18  ;;  %v8768_v42 = vmul.f32 %v8764_v16, %v8762_v49  ;;  %v8841_v2 = vmul.f32 %v8839_v30, %v8829_v9 }
0x6448   : > { %v8769_v58 = vadd.f32 %v8765_v12, %v8744_v14  ;;  %v8770_v55 = vadd.f32 %v8766_v61, %v8745_v26  ;;  %v8696_v46 = vadd.f32 %v8692_v53, %v8671_v41  ;;  %v8717_v12 = vmul.f32 %v8714_v13, %v12398_v20 }
0x6449   : > { %v8747_v56 = vadd.f32 %v8743_v6, %v8722_v60  ;;  %v8840_v14 = vmul.f32 %v8839_v30, %v12406_v15  ;;  %v8793_v23 = vmul.f32 %v8789_v43, %v8787_v63  ;;  %v8742_v40 = vmul.f32 %v8739_v3, %v12402_v37  ;;  %v8808_v54 = vpop.permute.xlu0 %8807 }
0x644a   : > { %v8794_v28 = vadd.f32 %v8790_v50, %v8769_v58  ;;  %v8795_v4 = vadd.f32 %v8791_v38, %v8770_v55  ;;  %v8721_v52 = vadd.f32 %v8717_v12, %v8696_v46  ;;  %v8818_v8 = vmul.f32 %v8814_v25, %v8812_v0 }
0x644b   : > { %v8772_v24 = vadd.f32 %v8768_v42, %v8747_v56  ;;  %v8767_v49 = vmul.f32 %v8764_v16, %v12404_v7  ;;  %v8843_v10 = vmul.f32 %v8839_v30, %v8837_v62  ;;  %v8792_v9 = vmul.f32 %v8789_v43, %v8783_v22 }
0x644c   : > { %v8819_v61 = vadd.f32 %v8815_v35, %v8794_v28  ;;  %v8820_v26 = vadd.f32 %v8816_v29, %v8795_v4  ;;  %v8746_v44 = vadd.f32 %v8742_v40, %v8721_v52  ;;  %v8613_v63 = vadd.f32 %v12410_v11, %v12408_v47  ;;  %v8619_v16 = vpop.f32.mrf.mxu1  ;;  %v12779_v52 = vld [vmem:[#allocation10_spill] sm:$0xff] }
0x644d   : > { %v8797_v33 = vadd.f32 %v8793_v23, %v8772_v24  ;;  %v8817_v32 = vmul.f32 %v8814_v25, %v8808_v54  ;;  %v8615_v58 = vadd.f32 %v12414_v21, %v12412_v17  ;;  %v8842_v38 = vmul.f32 %v8839_v30, %v8833_v51  ;;  %v12778_v24 = vld [vmem:[#allocation9_spill] sm:$0xff] }
0x644e   : > { %v8844_v5 = vadd.f32 %v8840_v14, %v8819_v61  ;;  %v8845_v18 = vadd.f32 %v8841_v2, %v8820_v26  ;;  %v8771_v15 = vadd.f32 %v8767_v49, %v8746_v44  ;;  %v8600_v7 = vpop.f32.mrf.mxu0  ;;  %v8848_v60 = vmul.f32 %v8613_v63, %v12190_v36 }
0x644f   : > { %v8822_v27 = vadd.f32 %v8818_v8, %v8797_v33  ;;  %v8849_v47 = vmul.f32 %v8615_v58, %v12193_v59  ;;  %v8620_v11 = vadd.f32 %v8619_v16, %v8600_v7  ;;  %v8618_v21 = vadd.f32 %v8617_v34, %v8598_v19 }
0x6450   : > { %v8852_v20 = vadd.f32 1e-06, %v8844_v5  ;;  %v8853_v13 = vadd.f32 1e-06, %v8845_v18  ;;  %v8796_v3 = vadd.f32 %v8792_v9, %v8771_v15  ;;  %v12774_v42 = vmov 3  }
0x6451   : > { %v8847_v37 = vadd.f32 %v8843_v10, %v8822_v27  ;;  %v8851_v28 = vmul.f32 %v8620_v11, %v12200_v39  ;;  %v8850_v36 = vmul.f32 %v8618_v21, %v12202_v45  ;;  %v12775_v46 = vmov 4  }
0x6452   : > { %10859 = vrcp.f32 %v8852_v20  ;;  %v8821_v50 = vadd.f32 %v8817_v32, %v8796_v3  ;;  %v12776_v12 = vmov 5   ;;  %v12777_v61 = vmov 6  }
0x6453   : > { %10861 = vrcp.f32 %v8853_v13  ;;  %v8855_v55 = vadd.f32 1e-06, %v8847_v37  ;;  %v8979_v23 = vperm.slane %v12778_v24, 1  ;;  %v8980_v40 = vperm.slane %v12779_v52, 1 }
0x6454   : > { %v8846_v43 = vadd.f32 %v8842_v38, %v8821_v50  ;;  %v8971_v0 = vperm.slane %v12778_v24, 0  ;;  %v8972_v5 = vperm.slane %v12779_v52, 0  ;;  %v8989_v8 = vperm.slane %v12778_v24, 2 }
0x6455   : > { %10863 = vrcp.f32 %v8855_v55  ;;  %v8990_v44 = vperm.slane %v12779_v52, 2  ;;  %v9000_v49 = vperm.slane %v12779_v52, 3  ;;  %v9009_v15 = vperm.slane %v12778_v24, 4 }
0x6456   : > { %v8854_v53 = vadd.f32 1e-06, %v8846_v43  ;;  %v9010_v9 = vperm.slane %v12779_v52, 4  ;;  %v9019_v32 = vperm.slane %v12778_v24, 5  ;;  %v9020_v58 = vperm.slane %v12779_v52, 5 }
0x6458   : > { %v10860_v22 = vpop.eup %10859  ;;  %10865 = vrcp.f32 %v8854_v53  ;;  %v9039_v53 = vperm.slane %v12778_v24, 7 }
0x6459   : > { %v10862_v6 = vpop.eup %10861  ;;  %v8860_v41 = vmul.f32 %v10860_v22, %v8848_v60 }
0x645a   : > { %v8861_v25 = vmul.f32 %v10862_v6, %v8849_v47  ;;  %v9029_v6 = vperm.slane %v12778_v24, 6 }
0x645b   : > { %8911 = vxpose.xlu0.b32.start [1/4] (short) (narrow) %v8860_v41, 8  ;;  %v10864_v51 = vpop.eup %10863 }
0x645c   : > { %v12428_v17 = vpack.c.bf16 %v8861_v25, %v8860_v41  ;;  %v8863_v30 = vmul.f32 %v10864_v51, %v8851_v28 }
0x645e   : > { %8866 = vxpose.xlu2.c.b16.start [1/2] (short) (narrow) %v12428_v17, 16  ;;  %8958 = vmatpush.msra.mxu0 %v8863_v30  ;;  %v10866_v59 = vpop.eup %10865 }
0x645f   : > { %v8862_v4 = vmul.f32 %v10866_v59, %v8850_v36 }
0x6461   : > { %8959 = vmatpush.msra.mxu0 %v8862_v4  ;;  %v12433_v35 = vpack.c.bf16 %v8863_v30, %v8862_v4 }
0x6463   : > { %8912 = vxpose.xlu0.b32.cont [2/4] (short) (narrow) %v8861_v25, 8  ;;  %8960 = vmatpush.msra.mxu0 %v8861_v25  ;;  %v9040_v25 = vperm.slane %v12779_v52, 7 }
0x6465   : > { %8961 = vmatpush.msra.mxu0 %v8860_v41  ;;  %v9030_v41 = vperm.slane %v12779_v52, 6 }
0x646b   : > { %8913 = vxpose.xlu0.b32.cont [3/4] (short) (narrow) %v8862_v4, 8 }
0x646e   : > { %8867 = vxpose.xlu2.c.b16.end [2/2] (short) (narrow) %v12433_v35, 16 }
0x6473   : > { %8914 = vxpose.xlu0.b32.end [4/4] (short) (narrow) %v8863_v30, 8 }
0x64d0   : > { %10736 = vset.pattern.permute.xlu2 %v12767_v31 }
0x64da   : > { %10738 = vset.pattern.permute.xlu0 %v12760_v1 }
0x64ff   : > { %v8874_v39 = vpop.trf.xlu2  ;;  %v8927_v29 = vpop.trf.xlu0 }
0x6500   : > { %10439 = vmatmul.msk.bf16.vlgmr.msrb.gmra.mxu2 %vm315_vm0, %v8874_v39  ;;  %10440 = vmatmul.msk.bf16.vlgmr.msrb.gmra.mxu3 %vm315_vm0, %v8874_v39 }
0x6501   : > { %10441 = vmatmul.msk.f32.vlgmr.msra.gmra.mxu0 %vm315_vm0, %v8927_v29 }
0x657e   : > { %v8963_v45 = vpop.f32.mrf.mxu0 }
0x657f   : > { %8968 = vperm.xlu1 %10729, %v8963_v45   ;;  %9036 = vperm.xlu2 %10736, %v8963_v45  }
0x6583   : > { %v12441_v19 = vpop.f32.mrf.mxu2  ;;  %v12443_v34 = vpop.f32.mrf.mxu3 }
0x6587   : > { %10730 = vset.pattern.permute.xlu1 %v12705_v48 }
0x6588   : > { %8976 = vperm.xlu1 %10730, %v8963_v45  }
0x658b   : > { %v8896_v31 = vpop.f32.mrf.mxu2  ;;  %v8909_v56 = vpop.f32.mrf.mxu3 }
0x6590   : > { %10731 = vset.pattern.permute.xlu1 %v12704_v57 }
0x6591   : > { %8986 = vperm.xlu1 %10731, %v8963_v45  }
0x6599   : > { %10732 = vset.pattern.permute.xlu1 %v12774_v42 }
0x659a   : > { %8996 = vperm.xlu1 %10732, %v8963_v45  }
0x65a2   : > { %10733 = vset.pattern.permute.xlu1 %v12775_v46 }
0x65a3   : > { %9006 = vperm.xlu1 %10733, %v8963_v45  }
0x65ab   : > { %10734 = vset.pattern.permute.xlu1 %v12776_v12  ;;  %v9045_v12 = vmul.f32 %v12441_v19, %v12778_v24 }
0x65ac   : > { %9016 = vperm.xlu1 %10734, %v8963_v45  }
0x65b4   : > { %10735 = vset.pattern.permute.xlu1 %v12777_v61 }
0x65b5   : > { %9026 = vperm.xlu1 %10735, %v8963_v45  }
0x65bd   : > { %10737 = vset.pattern.permute.xlu1 %v12760_v1  ;;  %v8999_v1 = vperm.slane %v12778_v24, 3 }
0x65d9   : > { %v9037_v21 = vpop.permute.xlu2 %9036 }
0x65da   : > { %v9041_v4 = vmul.f32 %v9039_v53, %v9037_v21  ;;  %v9042_v39 = vmul.f32 %v9040_v25, %v9037_v21 }
0x65f1   : > { %v8969_v48 = vpop.permute.xlu1 %8968 }
0x65f2   : > { %v8973_v62 = vmul.f32 %v8971_v0, %v8969_v48  ;;  %v8974_v20 = vmul.f32 %v8972_v5, %v8969_v48  ;;  %v9046_v48 = vmul.f32 %v12443_v34, %v12779_v52 }
0x65fa   : > { %v8977_v26 = vpop.permute.xlu1 %8976 }
0x65fb   : > { %v8981_v18 = vmul.f32 %v8979_v23, %v8977_v26  ;;  %v8982_v33 = vmul.f32 %v8980_v40, %v8977_v26 }
0x65fd   : > { %v8983_v54 = vadd.f32 %v8981_v18, %v8973_v62  ;;  %v8984_v63 = vadd.f32 %v8982_v33, %v8974_v20 }
0x6603   : > { %v8987_v14 = vpop.permute.xlu1 %8986 }
0x6604   : > { %v8991_v13 = vmul.f32 %v8989_v8, %v8987_v14  ;;  %v8992_v27 = vmul.f32 %v8990_v44, %v8987_v14 }
0x6606   : > { %v8993_v7 = vadd.f32 %v8991_v13, %v8983_v54  ;;  %v8994_v16 = vadd.f32 %v8992_v27, %v8984_v63 }
0x660c   : > { %v8997_v2 = vpop.permute.xlu1 %8996 }
0x660d   : > { %v9001_v37 = vmul.f32 %v8999_v1, %v8997_v2  ;;  %v9002_v3 = vmul.f32 %v9000_v49, %v8997_v2 }
0x660f   : > { %v9003_v38 = vadd.f32 %v9001_v37, %v8993_v7  ;;  %v9004_v60 = vadd.f32 %v9002_v3, %v8994_v16 }
0x6615   : > { %v9007_v57 = vpop.permute.xlu1 %9006 }
0x6616   : > { %v9011_v55 = vmul.f32 %v9009_v15, %v9007_v57  ;;  %v9012_v50 = vmul.f32 %v9010_v9, %v9007_v57  ;;  %v12780_v57 = vmov 1.0  }
0x6618   : > { %v9013_v47 = vadd.f32 %v9011_v55, %v9003_v38  ;;  %v9014_v11 = vadd.f32 %v9012_v50, %v9004_v60 }
0x661e   : > { %v9017_v10 = vpop.permute.xlu1 %9016 }
0x661f   : > { %v9021_v43 = vmul.f32 %v9019_v32, %v9017_v10  ;;  %v9022_v22 = vmul.f32 %v9020_v58, %v9017_v10 }
0x6621   : > { %v9023_v51 = vadd.f32 %v9021_v43, %v9013_v47  ;;  %v9024_v30 = vadd.f32 %v9022_v22, %v9014_v11 }
0x6627   : > { %v9027_v28 = vpop.permute.xlu1 %9026 }
0x6628   : > { %v9031_v36 = vmul.f32 %v9029_v6, %v9027_v28  ;;  %v9032_v59 = vmul.f32 %v9030_v41, %v9027_v28  ;;  %v12782_v28 = vld [vmem:[#allocation7_spill] sm:$0xff] }
0x662a   : > { %v9033_v29 = vadd.f32 %v9031_v36, %v9023_v51  ;;  %v9034_v45 = vadd.f32 %v9032_v59, %v9024_v30 }
0x662c   : > { %v9043_v31 = vadd.f32 %v9041_v4, %v9033_v29  ;;  %v9044_v56 = vadd.f32 %v9042_v39, %v9034_v45  ;;  %v12783_v4 = vld [vmem:[#allocation8_spill] sm:$0xff] }
0x662e   : > { %v9047_v42 = vadd.f32 1e-06, %v9043_v31  ;;  %v9048_v46 = vadd.f32 1e-06, %v9044_v56 }
0x6630   : > { %10867 = vrcp.f32 %v9047_v42 }
0x6631   : > { %10869 = vrcp.f32 %v9048_v46 }
0x6636   : > { %v10868_v61 = vpop.eup %10867 }
0x6637   : > { %v10870_v26 = vpop.eup %10869  ;;  %v12472_v14 = vmul.f32 %v10868_v61, %v9045_v12 }
0x6638   : > { %v12474_v2 = vmul.f32 %v10870_v26, %v9046_v48 }
0x6639   : > { %9068 = vmatpush.xpose.msrb.mxu1 %v12472_v14 }
0x663a   : > { %9088 = vmatpush.xpose.msra.mxu2 %v12474_v2 }
0x663c   : > { %9069 = vmatmul.f32.vlgmr.msrb.gmra.mxu1 %v12472_v14 }
0x663d   : > { %10444 = vmatpush.msk.msra.mxu1 %vm11135_vm15, %v12780_v57  ;;  %9089 = vmatmul.f32.vlgmr.msra.gmra.mxu2 %v12474_v2 }
0x66b9   : > { %v9070_v19 = vpop.f32.mrf.mxu1 }
0x66c0   : > { %v9090_v24 = vpop.f32.mrf.mxu2 }
0x66c1   : > { %v9091_v34 = vadd.f32 %v9090_v24, %v9070_v19 }
0x66c3   : > { %v9093_v52 = vmul.f32 %v9091_v34, %v9091_v34 }
0x66c5   : > { %v9094_v40 = vsel %vm677_vm9, %v9093_v52, 0.0 }
0x66c6   : > { %9095 = vadd.xlane.f32.xlu0 %v9094_v40 }
0x6739   : > { %v9096_v0 = vpop.xlane.xlu0 %9095 }
0x673a   : > { %v9097_v5 = vrot.slane %v9096_v0, 4 }
0x673c   : > { %v9098_v18 = vadd.f32 %v9097_v5, %v9096_v0 }
0x673e   : > { %v9099_v33 = vrot.slane %v9098_v18, 2 }
0x6740   : > { %v9100_v8 = vadd.f32 %v9099_v33, %v9098_v18 }
0x6742   : > { %v9101_v44 = vrot.slane %v9100_v8, 1 }
0x6744   : > { %v9102_v1 = vadd.f32 %v9101_v44, %v9100_v8 }
0x6746   : > { %10871 = vrsqrt.f32 %v9102_v1  ;;  %vm9110_vm15 = vcmp.eq.f32.partialorder %v9102_v1, inf  ;;  %v9113_v9 = vand.u32 2147483648, %v9102_v1  ;;  %vm9112_vm5 = vcmp.eq.f32.partialorder %v9102_v1, 0.0 }
0x674c   : > { %v10872_v49 = vpop.eup %10871 }
0x674d   : > { %v9104_v62 = vmul.f32 %v10872_v49, %v9102_v1 }
0x674f   : > { %v9105_v20 = vmul.f32 %v10872_v49, %v9104_v62 }
0x6751   : > { %v9106_v13 = vmul.f32 0.5, %v9105_v20 }
0x6753   : > { %v9107_v27 = vsub.f32 1.5, %v9106_v13 }
0x6755   : > { %v9108_v10 = vmul.f32 %v10872_v49, %v9107_v27 }
0x6757   : > { %v9109_v15 = vmul.f32 %v9108_v10, %v9102_v1 }
0x6759   : > { %v9111_v54 = vsel %vm9110_vm15, %v9102_v1, %v9109_v15 }
0x675a   : > { %v9114_v63 = vsel %vm9112_vm5, %v9113_v9, %v9111_v54 }
0x675b   : > { %v9115_v37 = vadd.f32 1e-30, %v9114_v63 }
0x675d   : > { %10873 = vrcp.f32 %v9115_v37  ;;  %v9127_v55 = vand.u32 2147483648, %v9115_v37  ;;  %v9125_v60 = vand.u32 2147483647, %v9115_v37  ;;  %vm9121_vm7 = vweird.f32 %v9115_v37 }
0x675e   : > { %10875 = vrsqrt.f32 %v9115_v37  ;;  %vm9964_vm11 = vcmp.eq.f32.partialorder %v9115_v37, inf  ;;  %vm9966_vm12 = vcmp.eq.f32.partialorder %v9115_v37, 0.0 }
0x675f   : > { %v9128_v47 = vor.u32 1.1754944e-38, %v9127_v55  ;;  %vm9126_vm10 = vcmp.eq.f32.partialorder %v9125_v60, 8.507059e+37 }
0x6763   : > { %v10874_v3 = vpop.eup %10873 }
0x6764   : > { %v10876_v32 = vpop.eup %10875  ;;  %v9117_v58 = vmul.f32 %v10874_v3, %v9115_v37  ;;  %vm9122_vm6 = vweird.f32 %v10874_v3 }
0x6765   : > { %v9958_v7 = vmul.f32 %v10876_v32, %v9115_v37  ;;  %vm9123_vm8 = vmor %vm9121_vm7, %vm9122_vm6 }
0x6766   : > { %v9118_v16 = vsub.f32 1.0, %v9117_v58 }
0x6767   : > { %v9959_v50 = vmul.f32 %v10876_v32, %v9958_v7 }
0x6768   : > { %v9119_v38 = vmul.f32 %v10874_v3, %v9118_v16 }
0x6769   : > { %v9960_v43 = vmul.f32 0.5, %v9959_v50 }
0x676a   : > { %v9120_v22 = vadd.f32 %v10874_v3, %v9119_v38 }
0x676b   : > { %v9961_v11 = vsub.f32 1.5, %v9960_v43 }
0x676c   : > { %v9124_v6 = vsel %vm9123_vm8, %v10874_v3, %v9120_v22 }
0x676d   : > { %v9129_v41 = vsel %vm9126_vm10, %v9128_v47, %v9124_v6  ;;  %v9962_v53 = vmul.f32 %v10876_v32, %v9961_v11 }
0x676e   : > { %v9130_v25 = vmul.f32 %v9129_v41, %v9091_v34 }
0x676f   : > { %v9963_v21 = vmul.f32 %v9962_v53, %v9115_v37 }
0x6770   : > { %9146 = vmatpush.msra.mxu3 %v9130_v25 }
0x6771   : > { %10442 = vmatmul.msk.f32.vlgmr.msra.gmra.mxu3 %vm677_vm9, %v12782_v28  ;;  %v9965_v51 = vsel %vm9964_vm11, %v9115_v37, %v9963_v21 }
0x6772   : > { %v12486_v30 = vsel %vm9966_vm12, %v9127_v55, %v9965_v51 }
0x67f4   : > { %v9148_v36 = vpop.f32.mrf.mxu3 }
0x67f5   : > { %v9151_v59 = vmul.f32 0.5, %v9148_v36 }
0x67f7   : > { %v9152_v39 = vsub.f32 %v12783_v4, %v9151_v59  ;;  %v379_v59 = vld [vmem:[%s12600_s3] sm:$0xff] }
0x67f9   : > { %9171 = vmatpush.msrb.mxu0 %v9152_v39  ;;  %10445 = vmatmul.msk.f32.vlgmr.msra.gmra.mxu1 %vm677_vm9, %v9152_v39  ;;  %v381_v39 = vld [vmem:[%s12600_s3 + $0x10] sm:$0xff] }
0x67fa   : > { %10443 = vmatmul.msk.f32.vlgmr.msrb.gmra.mxu0 %vm677_vm9, %v9130_v25 }
0x6876   : > { %v9196_v29 = vpop.f32.mrf.mxu1 }
0x6877   : > { %v9173_v45 = vpop.f32.mrf.mxu0  ;;  %9265 = vmatpush.msra.mxu0 %v9196_v29 }
0x6878   : > { %9217 = vmatpush.msrb.mxu2 %v9173_v45 }
0x6879   : > { %10446 = vmatmul.msk.f32.vlgmr.msrb.gmra.mxu2 %vm677_vm9, %v9196_v29 }
0x68fc   : > { %v9219_v31 = vpop.f32.mrf.mxu2 }
0x68fd   : > { %v9222_v56 = vmul.f32 0.5, %v9219_v31 }
0x68ff   : > { %v9223_v42 = vsub.f32 %v12783_v4, %v9222_v56 }
0x6901   : > { %9242 = vmatpush.msrb.mxu3 %v9223_v42  ;;  %10448 = vmatmul.msk.f32.vlgmr.msra.gmra.mxu0 %vm677_vm9, %v9223_v42 }
0x6902   : > { %10447 = vmatmul.msk.f32.vlgmr.msrb.gmra.mxu3 %vm677_vm9, %v9173_v45 }
0x697e   : > { %v9267_v46 = vpop.f32.mrf.mxu0 }
0x697f   : > { %9336 = vmatpush.msra.mxu3 %v9267_v46 }
0x6985   : > { %v9244_v12 = vpop.f32.mrf.mxu3 }
0x6986   : > { %9288 = vmatpush.msrb.mxu1 %v9244_v12 }
0x6987   : > { %10449 = vmatmul.msk.f32.vlgmr.msrb.gmra.mxu1 %vm677_vm9, %v9267_v46 }
0x6a04   : > { %v9290_v61 = vpop.f32.mrf.mxu1 }
0x6a05   : > { %v9293_v48 = vmul.f32 0.5, %v9290_v61  ;;  %v10074_v61 = vld [vmem:[%s12601_s4] sm:$0xff] }
0x6a07   : > { %v9294_v26 = vsub.f32 %v12783_v4, %v9293_v48 }
0x6a09   : > { %9313 = vmatpush.msra.mxu2 %v9294_v26  ;;  %10451 = vmatmul.msk.f32.vlgmr.msra.gmra.mxu3 %vm677_vm9, %v9294_v26 }
0x6a0a   : > { %10450 = vmatmul.msk.f32.vlgmr.msra.gmra.mxu2 %vm677_vm9, %v9244_v12 }
0x6a8c   : > { %v9338_v57 = vpop.f32.mrf.mxu3 }
0x6a8d   : > { %v9315_v23 = vpop.f32.mrf.mxu2  ;;  %9407 = vmatpush.msrb.mxu2 %v9338_v57 }
0x6a8e   : > { %9359 = vmatpush.msrb.mxu0 %v9315_v23 }
0x6a8f   : > { %10452 = vmatmul.msk.f32.vlgmr.msrb.gmra.mxu0 %vm677_vm9, %v9338_v57 }
0x6b0c   : > { %v9361_v19 = vpop.f32.mrf.mxu0 }
0x6b0d   : > { %v9364_v24 = vmul.f32 0.5, %v9361_v19  ;;  %v10075_v19 = vld [vmem:[%s12601_s4 + $0x8] sm:$0xff] }
0x6b0f   : > { %v9365_v34 = vsub.f32 %v12783_v4, %v9364_v24 }
0x6b11   : > { %9384 = vmatpush.msra.mxu1 %v9365_v34  ;;  %10454 = vmatmul.msk.f32.vlgmr.msrb.gmra.mxu2 %vm677_vm9, %v9365_v34 }
0x6b12   : > { %10453 = vmatmul.msk.f32.vlgmr.msra.gmra.mxu1 %vm677_vm9, %v9315_v23 }
0x6b8f   : > { %v9386_v52 = vpop.f32.mrf.mxu1 }
0x6b90   : > { %9430 = vmatpush.msrb.mxu3 %v9386_v52 }
0x6b94   : > { %v9409_v40 = vpop.f32.mrf.mxu2 }
0x6b95   : > { %10455 = vmatmul.msk.f32.vlgmr.msrb.gmra.mxu3 %vm677_vm9, %v9409_v40  ;;  %9478 = vmatpush.msrb.mxu1 %v9409_v40 }
0x6c18   : > { %v9432_v0 = vpop.f32.mrf.mxu3 }
0x6c19   : > { %v9435_v5 = vmul.f32 0.5, %v9432_v0 }
0x6c1b   : > { %v9436_v18 = vsub.f32 %v12783_v4, %v9435_v5 }
0x6c1d   : > { %9455 = vmatpush.msra.mxu0 %v9436_v18  ;;  %10457 = vmatmul.msk.f32.vlgmr.msrb.gmra.mxu1 %vm677_vm9, %v9436_v18 }
0x6c1e   : > { %10456 = vmatmul.msk.f32.vlgmr.msra.gmra.mxu0 %vm677_vm9, %v9386_v52  ;;  %v10076_v52 = vld [vmem:[%s12601_s4 + $0x10] sm:$0xff] }
0x6c9a   : > { %v9480_v33 = vpop.f32.mrf.mxu1 }
0x6c9b   : > { %v9457_v8 = vpop.f32.mrf.mxu0  ;;  %9549 = vmatpush.msrb.mxu0 %v9480_v33 }
0x6c9c   : > { %9501 = vmatpush.msra.mxu2 %v9457_v8 }
0x6c9d   : > { %10458 = vmatmul.msk.f32.vlgmr.msra.gmra.mxu2 %vm677_vm9, %v9480_v33 }
0x6d20   : > { %v9503_v44 = vpop.f32.mrf.mxu2 }
0x6d21   : > { %v9506_v1 = vmul.f32 0.5, %v9503_v44 }
0x6d23   : > { %v9507_v49 = vsub.f32 %v12783_v4, %v9506_v1 }
0x6d25   : > { %9526 = vmatpush.msra.mxu3 %v9507_v49  ;;  %10460 = vmatmul.msk.f32.vlgmr.msrb.gmra.mxu0 %vm677_vm9, %v9507_v49 }
0x6d26   : > { %10459 = vmatmul.msk.f32.vlgmr.msra.gmra.mxu3 %vm677_vm9, %v9457_v8 }
0x6da2   : > { %v9551_v62 = vpop.f32.mrf.mxu0 }
0x6da3   : > { %9620 = vmatpush.msrb.mxu3 %v9551_v62 }
0x6da9   : > { %v9528_v20 = vpop.f32.mrf.mxu3 }
0x6daa   : > { %9572 = vmatpush.msra.mxu1 %v9528_v20 }
0x6dab   : > { %10461 = vmatmul.msk.f32.vlgmr.msra.gmra.mxu1 %vm677_vm9, %v9551_v62 }
0x6e28   : > { %v9574_v13 = vpop.f32.mrf.mxu1 }
0x6e29   : > { %v9577_v27 = vmul.f32 0.5, %v9574_v13 }
0x6e2b   : > { %v9578_v10 = vsub.f32 %v12783_v4, %v9577_v27  ;;  %v10883_v27 = vld [vmem:[%s10974_s10 + $0x8] sm:$0xff] }
0x6e2d   : > { %9597 = vmatpush.msrb.mxu2 %v9578_v10  ;;  %10463 = vmatmul.msk.f32.vlgmr.msrb.gmra.mxu3 %vm677_vm9, %v9578_v10 }
0x6e2e   : > { %10462 = vmatmul.msk.f32.vlgmr.msrb.gmra.mxu2 %vm677_vm9, %v9528_v20 }
0x6eb0   : > { %v9622_v15 = vpop.f32.mrf.mxu3 }
0x6eb1   : > { %v9599_v9 = vpop.f32.mrf.mxu2  ;;  %9691 = vmatpush.msra.mxu2 %v9622_v15 }
0x6eb2   : > { %9643 = vmatpush.msra.mxu0 %v9599_v9 }
0x6eb3   : > { %10464 = vmatmul.msk.f32.vlgmr.msra.gmra.mxu0 %vm677_vm9, %v9622_v15 }
0x6f30   : > { %v9645_v54 = vpop.f32.mrf.mxu0 }
0x6f31   : > { %v9648_v63 = vmul.f32 0.5, %v9645_v54 }
0x6f33   : > { %v9649_v37 = vsub.f32 %v12783_v4, %v9648_v63 }
0x6f35   : > { %9668 = vmatpush.msrb.mxu1 %v9649_v37  ;;  %10466 = vmatmul.msk.f32.vlgmr.msra.gmra.mxu2 %vm677_vm9, %v9649_v37  ;;  %v10884_v37 = vld [vmem:[%s10974_s10] sm:$0xff] }
0x6f36   : > { %10465 = vmatmul.msk.f32.vlgmr.msrb.gmra.mxu1 %vm677_vm9, %v9599_v9 }
0x6fb3   : > { %v9670_v3 = vpop.f32.mrf.mxu1 }
0x6fb4   : > { %9714 = vmatpush.msra.mxu3 %v9670_v3 }
0x6fb8   : > { %v9693_v32 = vpop.f32.mrf.mxu2 }
0x6fb9   : > { %10467 = vmatmul.msk.f32.vlgmr.msra.gmra.mxu3 %vm677_vm9, %v9693_v32  ;;  %9762 = vmatpush.msra.mxu1 %v9693_v32 }
0x703c   : > { %v9716_v58 = vpop.f32.mrf.mxu3 }
0x703d   : > { %v9719_v7 = vmul.f32 0.5, %v9716_v58 }
0x703f   : > { %v9720_v16 = vsub.f32 %v12783_v4, %v9719_v7  ;;  %v10885_v7 = vld [vmem:[%s10974_s10 + $0x18] sm:$0xff] }
0x7041   : > { %9739 = vmatpush.msrb.mxu0 %v9720_v16  ;;  %10469 = vmatmul.msk.f32.vlgmr.msra.gmra.mxu1 %vm677_vm9, %v9720_v16 }
0x7042   : > { %10468 = vmatmul.msk.f32.vlgmr.msrb.gmra.mxu0 %vm677_vm9, %v9670_v3 }
0x70be   : > { %v9764_v55 = vpop.f32.mrf.mxu1 }
0x70bf   : > { %v9741_v50 = vpop.f32.mrf.mxu0  ;;  %9833 = vmatpush.msra.mxu0 %v9764_v55 }
0x70c0   : > { %9785 = vmatpush.msrb.mxu2 %v9741_v50 }
0x70c1   : > { %10470 = vmatmul.msk.f32.vlgmr.msrb.gmra.mxu2 %vm677_vm9, %v9764_v55 }
0x7144   : > { %v9787_v38 = vpop.f32.mrf.mxu2 }
0x7145   : > { %v9790_v60 = vmul.f32 0.5, %v9787_v38 }
0x7147   : > { %v9791_v43 = vsub.f32 %v12783_v4, %v9790_v60 }
0x7149   : > { %9810 = vmatpush.msrb.mxu3 %v9791_v43  ;;  %10472 = vmatmul.msk.f32.vlgmr.msra.gmra.mxu0 %vm677_vm9, %v9791_v43  ;;  %v10886_v43 = vld [vmem:[%s10974_s10 + $0x10] sm:$0xff] }
0x714a   : > { %10471 = vmatmul.msk.f32.vlgmr.msrb.gmra.mxu3 %vm677_vm9, %v9741_v50 }
0x71c6   : > { %v9835_v22 = vpop.f32.mrf.mxu0 }
0x71c7   : > { %9904 = vmatpush.msra.mxu3 %v9835_v22 }
0x71cd   : > { %v9812_v47 = vpop.f32.mrf.mxu3 }
0x71ce   : > { %9856 = vmatpush.msrb.mxu1 %v9812_v47 }
0x71cf   : > { %10473 = vmatmul.msk.f32.vlgmr.msrb.gmra.mxu1 %vm677_vm9, %v9835_v22 }
0x724c   : > { %v9858_v11 = vpop.f32.mrf.mxu1 }
0x724d   : > { %v9861_v6 = vmul.f32 0.5, %v9858_v11 }
0x724f   : > { %v9862_v41 = vsub.f32 %v12783_v4, %v9861_v6 }
0x7251   : > { %9881 = vmatpush.msra.mxu2 %v9862_v41  ;;  %10475 = vmatmul.msk.f32.vlgmr.msra.gmra.mxu3 %vm677_vm9, %v9862_v41  ;;  %v10887_v41 = vld [vmem:[%s10974_s10 + $0x28] sm:$0xff] }
0x7252   : > { %10474 = vmatmul.msk.f32.vlgmr.msra.gmra.mxu2 %vm677_vm9, %v9812_v47 }
0x7253   : > { %9998 = vmatpush.bf16.msrb.mxu2 %v12433_v35 }
0x7257   : > { %9999 = vmatpush.bf16.msrb.mxu2 %v12428_v17  ;;  %v380_v17 = vld [vmem:[%s12600_s3 + $0x8] sm:$0xff] }
0x7258   : > { %v9984_v35 = vpack.c.bf16 %v380_v17, %v379_v59  ;;  %v10888_v59 = vld [vmem:[%s10974_s10 + $0x20] sm:$0xff] }
0x725a   : > { %10478 = vmatmul.msk.bf16.vlgmr.msrb.gmra.mxu2 %vm315_vm0, %v9984_v35 }
0x72d4   : > { %v9906_v25 = vpop.f32.mrf.mxu3 }
0x72d5   : > { %v9883_v53 = vpop.f32.mrf.mxu2 }
0x72d6   : > { %9927 = vmatpush.msrb.mxu0 %v9883_v53 }
0x72d7   : > { %10476 = vmatmul.msk.f32.vlgmr.msrb.gmra.mxu0 %vm677_vm9, %v9906_v25 }
0x72dd   : > { %v10001_v24 = vpop.f32.mrf.mxu2 }
0x72e5   : > { %v10003_v0 = vpop.f32.mrf.mxu2 }
0x72e6   : > { %v10011_v49 = vpack.c.bf16 %v10003_v0, %v10001_v24 }
0x7354   : > { %v9929_v21 = vpop.f32.mrf.mxu0 }
0x7355   : > { %v9932_v51 = vmul.f32 0.5, %v9929_v21 }
0x7357   : > { %v9933_v36 = vsub.f32 %v12783_v4, %v9932_v51  ;;  %v382_v4 = vld [vmem:[%s12600_s3 + $0x18] sm:$0xff] }
0x7358   : > { %v9985_v29 = vpack.c.bf16 %v382_v4, %v381_v39  ;;  %v10889_v4 = vld [vmem:[%s10974_s10 + $0x38] sm:$0xff] }
0x7359   : > { %9952 = vmatpush.msra.mxu1 %v9933_v36 }
0x735a   : > { %10477 = vmatmul.msk.f32.vlgmr.msra.gmra.mxu1 %vm677_vm9, %v9883_v53  ;;  %10479 = vmatmul.msk.bf16.gmra.mxu2 %vm315_vm0, %v9985_v29  ;;  %vm10021_vm0 = vcmask 1043456  }
0x73d7   : > { %v9954_v45 = vpop.f32.mrf.mxu1 }
0x73d8   : > { %v9969_v31 = vmul.f32 %v12782_v28, %v9954_v45 }
0x73da   : > { %v9970_v56 = vsel %vm677_vm9, %v9969_v31, 0.0 }
0x73db   : > { %9971 = vadd.xlane.f32.xlu1 %v9970_v56 }
0x73f4   : > { %10080 = vperm.xlu1 %10737, %v10074_v61  }
0x73fc   : > { %10085 = vperm.xlu1 %10737, %v10075_v19  }
0x7404   : > { %10090 = vperm.xlu1 %10737, %v10076_v52  }
0x744e   : > { %v9972_v42 = vpop.xlane.xlu1 %9971 }
0x744f   : > { %v9973_v46 = vrot.slane %v9972_v42, 4 }
0x7451   : > { %v9974_v12 = vadd.f32 %v9973_v46, %v9972_v42 }
0x7453   : > { %v9975_v48 = vrot.slane %v9974_v12, 2 }
0x7455   : > { %v9976_v26 = vadd.f32 %v9975_v48, %v9974_v12  ;;  %v10890_v12 = vld [vmem:[%s10974_s10 + $0x30] sm:$0xff] }
0x7457   : > { %v9977_v57 = vrot.slane %v9976_v26, 1 }
0x7459   : > { %v9978_v23 = vadd.f32 %v9977_v57, %v9976_v26 }
0x745b   : > { %v9979_v28 = vmul.f32 %v9978_v23, %v12486_v30  ;;  %v10077_v30 = vld [vmem:[%s12601_s4 + $0x18] sm:$0xff] }
0x745c   : > { %10095 = vperm.xlu1 %10737, %v10077_v30  }
0x745d   : > { %v9980_v34 = vadd.f32 1e-06, %v9979_v28 }
0x745f   : > { %10877 = vrcp.f32 %v9980_v34 }
0x7465   : > { %v10878_v40 = vpop.eup %10877 }
0x7466   : > { %v9982_v5 = vmul.f32 %v10878_v40, %v12472_v14  ;;  %v9983_v18 = vmul.f32 %v10878_v40, %v12474_v2  ;;  %v10006_v14 = vpop.f32.mrf.mxu2  ;;  %v10081_v20 = vpop.permute.xlu1 %10080 }
0x7468   : > { %v10013_v33 = vpack.c.bf16 %v9982_v5, %v9982_v5  ;;  %v10014_v8 = vpack.c.bf16 %v9983_v18, %v9983_v18 }
0x746a   : > { %v10023_v44 = vsel %vm10021_vm0, %v10013_v33, 0  ;;  %v10026_v1 = vsel %vm10021_vm0, %v10014_v8, 0 }
0x746b   : > { %10035 = vmatpush.bf16.msrb.mxu3 %v10023_v44  ;;  %10054 = vmatpush.bf16.msra.mxu0 %v10026_v1 }
0x746e   : > { %10480 = vmatmul.msk.bf16.vlgmr.msrb.gmra.mxu3 %vm677_vm9, %v10011_v49  ;;  %10482 = vmatmul.msk.bf16.vlgmr.msra.gmra.mxu0 %vm677_vm9, %v10011_v49  ;;  %v10008_v2 = vpop.f32.mrf.mxu2  ;;  %v10086_v63 = vpop.permute.xlu1 %10085 }
0x746f   : > { %v10012_v62 = vpack.c.bf16 %v10008_v2, %v10006_v14 }
0x7476   : > { %v10091_v11 = vpop.permute.xlu1 %10090 }
0x747e   : > { %10481 = vmatmul.msk.bf16.gmra.mxu3 %vm677_vm9, %v10012_v62  ;;  %10483 = vmatmul.msk.bf16.gmra.mxu0 %vm677_vm9, %v10012_v62 }
0x74ce   : > { %v10096_v45 = vpop.permute.xlu1 %10095 }
0x74eb   : > { %v10056_v13 = vpop.f32.mrf.mxu0 }
0x74ec   : > { %v10067_v10 = vadd.f32 %v10883_v27, %v10056_v13 }
0x74ee   : > { %v10099_v15 = vadd.f32 %v10081_v20, %v10067_v10 }
0x74f0   : > { %v10107_v9 = vmax.f32 %v10099_v15, 0.0 }
0x74f1   : > { %v10037_v54 = vpop.f32.mrf.mxu3 }
0x74f2   : > { %v10066_v3 = vadd.f32 %v10884_v37, %v10037_v54  ;;  %10115 = vst [vmem:[%s12577_s23 + $0x8] sm:$0xff] %v10107_v9 }
0x74f3   : > { %v10058_v32 = vpop.f32.mrf.mxu0 }
0x74f4   : > { %v10098_v58 = vadd.f32 %v10081_v20, %v10066_v3  ;;  %v10069_v16 = vadd.f32 %v10885_v7, %v10058_v32 }
0x74f6   : > { %v10106_v55 = vmax.f32 %v10098_v58, 0.0  ;;  %v10101_v50 = vadd.f32 %v10086_v63, %v10069_v16 }
0x74f8   : > { %10114 = vst [vmem:[%s12577_s23] sm:$0xff] %v10106_v55  ;;  %v10109_v38 = vmax.f32 %v10101_v50, 0.0 }
0x74f9   : > { %v10039_v60 = vpop.f32.mrf.mxu3 }
0x74fa   : > { %v10068_v22 = vadd.f32 %v10886_v43, %v10039_v60  ;;  %10117 = vst [vmem:[%s12577_s23 + $0x18] sm:$0xff] %v10109_v38 }
0x74fb   : > { %v10061_v47 = vpop.f32.mrf.mxu0 }
0x74fc   : > { %v10100_v6 = vadd.f32 %v10086_v63, %v10068_v22  ;;  %v10071_v53 = vadd.f32 %v10887_v41, %v10061_v47 }
0x74fe   : > { %v10108_v25 = vmax.f32 %v10100_v6, 0.0  ;;  %v10103_v21 = vadd.f32 %v10091_v11, %v10071_v53 }
0x7500   : > { %10116 = vst [vmem:[%s12577_s23 + $0x10] sm:$0xff] %v10108_v25  ;;  %v10111_v51 = vmax.f32 %v10103_v21, 0.0 }
0x7501   : > { %v10042_v36 = vpop.f32.mrf.mxu3 }
0x7502   : > { %v10070_v17 = vadd.f32 %v10888_v59, %v10042_v36  ;;  %10119 = vst [vmem:[%s12577_s23 + $0x28] sm:$0xff] %v10111_v51 }
0x7503   : > { %v10063_v35 = vpop.f32.mrf.mxu0 }
0x7504   : > { %v10102_v39 = vadd.f32 %v10091_v11, %v10070_v17  ;;  %v10073_v29 = vadd.f32 %v10889_v4, %v10063_v35 }
0x7506   : > { %v10110_v31 = vmax.f32 %v10102_v39, 0.0  ;;  %v10105_v56 = vadd.f32 %v10096_v45, %v10073_v29 }
0x7508   : > { %10118 = vst [vmem:[%s12577_s23 + $0x20] sm:$0xff] %v10110_v31  ;;  %v10113_v42 = vmax.f32 %v10105_v56, 0.0 }
0x7509   : > { %v10044_v46 = vpop.f32.mrf.mxu3 }
0x750a   : > { %v10072_v61 = vadd.f32 %v10890_v12, %v10044_v46  ;;  %10121 = vst [vmem:[%s12577_s23 + $0x38] sm:$0xff] %v10113_v42 }
0x750c   : > { %v10104_v48 = vadd.f32 %v10096_v45, %v10072_v61 }
0x750e   : > { %v10112_v26 = vmax.f32 %v10104_v48, 0.0 }
0x7510   : > { %10120 = vst [vmem:[%s12577_s23 + $0x30] sm:$0xff] %v10112_v26 }
0x7511 PF: > { %s16_s21 = sadd.s32 1, %s10897_s21  }
0x7512   : > { %p13_p4 = scmp.ge.s32.totalorder %s16_s21, 4  }
0x7514   :  { %15 = sbr.rel (!%p13_p4) target bundleno = 1 (0x1), region = 77 }

</bundles_post_ra>
